<compile_context>
chip_gen: v5e
topology: v5e:2x2
jax: 0.10.0
libtpu: 0.0.40
codegen_flags: <defaults>
</compile_context>

<pallas_src>
import math

import numpy as np
import jax
import jax.numpy as jnp
from jax.experimental import pallas as pl
from jax.experimental.pallas import tpu as pltpu


def _nerf_pe_kernel(x_ref, coef_ref, phase_ref, o_ref):
    """x_ref: (tile, D); coef/phase: (1, out_dim); o_ref: (tile, out_dim)."""
    x = x_ref[...].astype(jnp.float32)                 # f32 compute, cast at store
    n_rep = o_ref.shape[-1] // x_ref.shape[-1]         # 2 * depth (static)
    # Lane-replicate x so x_wide[m, k*D + d] == x[m, d] (k-major, d-minor),
    # matching the torch concat order.  Minor-dim concat of identical pieces
    # is a cheap, well-supported lowering (same op the old kernel used).
    x_wide = jnp.concatenate([x] * n_rep, axis=-1)     # (tile, out_dim)
    # Phase trick: sin half has phase 0, cos half has phase pi/2.
    theta = x_wide * coef_ref[...] + phase_ref[...]
    o_ref[...] = jnp.sin(theta).astype(o_ref.dtype)
    # TODO(synk): torch.isnan(out).any() runtime assert has no cheap in-kernel
    # equivalent; NaN check is done host-side in the demo only.


def nerf_positional_encoding(inputs, *, depth=10, sine_type="lin_sine",
                             avoid_aliasing=False, max_spatial_resolution=None,
                             tile_m=4096, out_dtype=None):
    if sine_type == "lin_sine":
        bases = np.arange(1, depth + 1, dtype=np.float64)
    elif sine_type == "exp_sine":
        # NOTE: for large depth, b*pi*x exceeds f32 argument-reduction accuracy;
        # this matches the torch module's f32 behavior.
        bases = 2.0 ** np.arange(depth, dtype=np.float64)
    else:
        raise ValueError(sine_type)

    if avoid_aliasing and max_spatial_resolution is None:
        raise ValueError("Please specify the maxima spatial resolution")
    factor = (max_spatial_resolution / depth) if avoid_aliasing else 1.0

    orig_shape = inputs.shape
    in_dim = orig_shape[-1]
    n_rep = 2 * depth
    out_dim = in_dim * n_rep
    out_dtype = jnp.dtype(inputs.dtype) if out_dtype is None else jnp.dtype(out_dtype)

    # coef[k] = bases[k % depth] * factor * pi ; phase[k] = 0 (sin half) / pi/2 (cos half)
    coef = np.concatenate([bases, bases]) * factor * math.pi          # (2*depth,)
    phase = np.concatenate([np.zeros(depth), np.full(depth, math.pi / 2.0)])
    # Widen to out_dim (k-major, d-minor) so the kernel does one fused FMA + sin.
    coef_w = np.repeat(coef, in_dim).astype(np.float32).reshape(1, out_dim)
    phase_w = np.repeat(phase, in_dim).astype(np.float32).reshape(1, out_dim)

    x2d = inputs.reshape(-1, in_dim)        # contiguous reshape, no copy
    M = x2d.shape[0]

    # Big row tiles; clamp to M (full-dim block) for small inputs.
    tile_m = max(8, (int(tile_m) // 8) * 8)
    tile = M if M <= tile_m else tile_m
    grid = (pl.cdiv(M, tile),)

    out2d = pl.pallas_call(
        _nerf_pe_kernel,
        out_shape=jax.ShapeDtypeStruct((M, out_dim), out_dtype),
        grid_spec=pltpu.PrefetchScalarGridSpec(
            num_scalar_prefetch=0,
            grid=grid,
            in_specs=[
                pl.BlockSpec((tile, in_dim), lambda i: (i, 0)),
                pl.BlockSpec((1, out_dim), lambda i: (0, 0)),
                pl.BlockSpec((1, out_dim), lambda i: (0, 0)),
            ],
            out_specs=pl.BlockSpec((tile, out_dim), lambda i: (i, 0)),
        ),
        compiler_params=pltpu.CompilerParams(
            dimension_semantics=("parallel",),
            vmem_limit_bytes=32 * 1024 * 1024,
        ),
    )(x2d, coef_w, phase_w)

    return out2d.reshape(*orig_shape[:-1], out_dim)


def _reference(inputs, *, depth=10, factor=1.0, sine_type="lin_sine"):
    if sine_type == "lin_sine":
        bases = [i + 1 for i in range(depth)]
    else:
        bases = [2 ** i for i in range(depth)]
    outs = [jnp.sin(b * factor * math.pi * inputs) for b in bases] + \
           [jnp.cos(b * factor * math.pi * inputs) for b in bases]
    return jnp.concatenate(outs, axis=-1)


if __name__ == "__main__":
    key = jax.random.PRNGKey(0)
    # Typical usage: normalized (x, y) coordinates per query, e.g. (B, N, 2).
    B, N, D = 2, 128, 2
    x = jax.random.uniform(key, (B, N, D), dtype=jnp.float32)

    ref = _reference(x, depth=10, factor=1.0, sine_type="lin_sine")

    # Single-block path (tile clamped to M).
    out = nerf_positional_encoding(x, depth=10, sine_type="lin_sine")
    out = jax.block_until_ready(out)
    assert out.shape == (B, N, D * 10 * 2), out.shape
    assert not bool(jnp.isnan(out).any())
    assert jnp.allclose(out, ref, atol=1e-5, rtol=1e-5)

    # Multi-block path (grid of 4 tiles, exact division).
    out2 = nerf_positional_encoding(x, depth=10, sine_type="lin_sine", tile_m=64)
    out2 = jax.block_until_ready(out2)
    assert jnp.allclose(out2, ref, atol=1e-5, rtol=1e-5)

    print("KERNEL_OK")
</pallas_src>

<mosaic_0001>
module attributes {stable_mosaic.version = 11 : i64} {
  func.func @_nerf_pe_kernel(%arg0: i32, %arg1: memref<256x2xf32, #tpu.memory_space<vmem>>, %arg2: memref<1x40xf32, #tpu.memory_space<vmem>>, %arg3: memref<1x40xf32, #tpu.memory_space<vmem>>, %arg4: memref<256x40xf32, #tpu.memory_space<vmem>>) attributes {dimension_semantics = [#tpu.dimension_semantics<parallel>], iteration_bounds = array<i64: 1>, scalar_prefetch = 0 : i64, scratch_operands = 0 : i64, tpu.core_type = #tpu.core_type<tc>, window_params = [{transform_indices = @transform_0, window_bounds = array<i64: 256, 2>}, {pipeline_mode = #tpu.pipeline_mode<synchronous>, transform_indices = @transform_1, window_bounds = array<i64: 1, 40>}, {pipeline_mode = #tpu.pipeline_mode<synchronous>, transform_indices = @transform_2, window_bounds = array<i64: 1, 40>}, {transform_indices = @transform_3, window_bounds = array<i64: 256, 40>}]} {
    %c0 = arith.constant 0 : index
    %c0_0 = arith.constant 0 : index
    %0 = vector.load %arg1[%c0, %c0_0] : memref<256x2xf32, #tpu.memory_space<vmem>>, vector<256x2xf32>
    %1 = tpu.concatenate %0, %0, %0, %0, %0, %0, %0, %0, %0, %0, %0, %0, %0, %0, %0, %0 in 1 : vector<256x2xf32>, vector<256x2xf32>, vector<256x2xf32>, vector<256x2xf32>, vector<256x2xf32>, vector<256x2xf32>, vector<256x2xf32>, vector<256x2xf32>, vector<256x2xf32>, vector<256x2xf32>, vector<256x2xf32>, vector<256x2xf32>, vector<256x2xf32>, vector<256x2xf32>, vector<256x2xf32>, vector<256x2xf32> -> vector<256x32xf32>
    %2 = tpu.concatenate %0, %0, %0, %0 in 1 : vector<256x2xf32>, vector<256x2xf32>, vector<256x2xf32>, vector<256x2xf32> -> vector<256x8xf32>
    %3 = tpu.concatenate %1, %2 in 1 : vector<256x32xf32>, vector<256x8xf32> -> vector<256x40xf32>
    %c0_1 = arith.constant 0 : index
    %c0_2 = arith.constant 0 : index
    %4 = vector.load %arg2[%c0_1, %c0_2] : memref<1x40xf32, #tpu.memory_space<vmem>>, vector<1x40xf32>
    %5 = vector.broadcast %4 : vector<1x40xf32> to vector<256x40xf32>
    %6 = arith.mulf %3, %5 : vector<256x40xf32>
    %c0_3 = arith.constant 0 : index
    %c0_4 = arith.constant 0 : index
    %7 = vector.load %arg3[%c0_3, %c0_4] : memref<1x40xf32, #tpu.memory_space<vmem>>, vector<1x40xf32>
    %8 = vector.broadcast %7 : vector<1x40xf32> to vector<256x40xf32>
    %9 = arith.addf %6, %8 : vector<256x40xf32>
    %10 = math.sin %9 : vector<256x40xf32>
    %c0_5 = arith.constant 0 : index
    %c0_6 = arith.constant 0 : index
    %11 = vector.load %arg4[%c0_5, %c0_6] : memref<256x40xf32, #tpu.memory_space<vmem>>, vector<256x40xf32>
    tpu.vector_store %arg4[%c0_5, %c0_6], %10 {strides = array<i32>} : memref<256x40xf32, #tpu.memory_space<vmem>>, vector<256x40xf32>,
    return
  }
  func.func @transform_0(%arg0: i32) -> (i32, i32) {
    %c0_i32 = arith.constant 0 : i32
    %c0_i32_0 = arith.constant 0 : i32
    return %arg0, %c0_i32 : i32, i32
  }
  func.func @transform_1(%arg0: i32) -> (i32, i32) {
    %c0_i32 = arith.constant 0 : i32
    %c0_i32_0 = arith.constant 0 : i32
    %c0_i32_1 = arith.constant 0 : i32
    return %c0_i32, %c0_i32_0 : i32, i32
  }
  func.func @transform_2(%arg0: i32) -> (i32, i32) {
    %c0_i32 = arith.constant 0 : i32
    %c0_i32_0 = arith.constant 0 : i32
    %c0_i32_1 = arith.constant 0 : i32
    return %c0_i32, %c0_i32_0 : i32, i32
  }
  func.func @transform_3(%arg0: i32) -> (i32, i32) {
    %c0_i32 = arith.constant 0 : i32
    %c0_i32_0 = arith.constant 0 : i32
    return %arg0, %c0_i32 : i32, i32
  }
}

</mosaic_0001>

<bundles_post_ra>
// kernel: tpu_custom_call.1
= control target key start
LH: loop header
LB: loop body
LE: loop exit
PB: predicated region body
PF: predicated region fallthrough
CT: control target
= control target key end

     0   :  { %s7442_s18 = smov 2   ;;  %s7443_s25 = smov 4   ;;  %vm1518_vm0 = vcmask 15360   ;;  %vm1551_vm1 = vcmask 31744   ;;  %vm1584_vm2 = vcmask 48128   ;;  %vm1617_vm3 = vcmask 64512   ;;  %s14701_s0 = inlined_call_operand.vmem [shape: f32[256,2], index: 0, kind: input, shape index: {}]   ;;  %s14702_s1 = inlined_call_operand.vmem [shape: f32[1,40], index: 1, kind: input, shape index: {}]   ;;  %s14703_s2 = inlined_call_operand.vmem [shape: f32[1,40], index: 2, kind: input, shape index: {}]   ;;  %s14704_s3 = inlined_call_operand.vmem [shape: f32[256,40], index: 3, kind: output, shape index: {}]  }
   0x1   :  { %v7488_v0 = vld [vmem:[%s14701_s0 + $0x20] sm:$0xff]  ;;  %v7493_v1 = vld [vmem:[%s14701_s0 + $0x10] sm:$0xff]  ;;  %v7509_v3 = vld [vmem:[%s14701_s0 + $0x28] sm:$0xff]  ;;  %s7445_s26 = smov 8   ;;  %s7446_s27 = smov 10   ;;  %vm1650_vm4 = vcmask 80896  }
   0x2   :  { %v7498_v2 = vld [vmem:[%s14701_s0] sm:$0xff]  ;;  %86 = vrot.lane.b32.xlu2 %v7488_v0, %s7442_s18  ;;  %82 = vrot.lane.b32.xlu1 %v7493_v1, %s7442_s18  ;;  %v7514_v4 = vld [vmem:[%s14701_s0 + $0x18] sm:$0xff]  ;;  %s7447_s28 = smov 12   ;;  %s7448_s29 = smov 14   ;;  %vm1683_vm5 = vcmask 97280   ;;  %vm1716_vm6 = vcmask 113664  }
   0x3   :  { %78 = vrot.lane.b32.xlu0 %v7498_v2, %s7442_s18  ;;  %v7519_v5 = vld [vmem:[%s14701_s0 + $0x8] sm:$0xff]  ;;  %v7530_v6 = vld [vmem:[%s14701_s0 + $0x40] sm:$0xff]  ;;  %v7535_v7 = vld [vmem:[%s14701_s0 + $0x38] sm:$0xff]  ;;  %s7449_s30 = smov 16   ;;  %s7450_s4 = smov 18   ;;  %vm1749_vm7 = vcmask 130048  }
   0x4   :  { %v7540_v8 = vld [vmem:[%s14701_s0 + $0x30] sm:$0xff]  ;;  %v7551_v9 = vld [vmem:[%s14701_s0 + $0x58] sm:$0xff]  ;;  %v7561_v11 = vld [vmem:[%s14701_s0 + $0x48] sm:$0xff]  ;;  %s7451_s5 = smov 20   ;;  %s7452_s15 = smov 22   ;;  %vm1782_vm8 = vcmask 146432  }
   0x5   :  { %v7556_v10 = vld [vmem:[%s14701_s0 + $0x50] sm:$0xff]  ;;  %v7577_v13 = vld [vmem:[%s14701_s0 + $0x68] sm:$0xff]  ;;  %v7582_v14 = vld [vmem:[%s14701_s0 + $0x60] sm:$0xff]  ;;  %s7454_s19 = smov 26   ;;  %s7455_s20 = smov 28   ;;  %vm1815_vm9 = vcmask 162816  }
   0x6   :  { %v7572_v12 = vld [vmem:[%s14701_s0 + $0x70] sm:$0xff]  ;;  %v7593_v15 = vld [vmem:[%s14701_s0 + $0x88] sm:$0xff]  ;;  %v7598_v16 = vld [vmem:[%s14701_s0 + $0x80] sm:$0xff]  ;;  %vm1848_vm10 = vcmask 179200   ;;  %vm1881_vm11 = vcmask 195584   ;;  %vm1914_vm12 = vcmask 211968  }
   0x7   :  { %v7603_v17 = vld [vmem:[%s14701_s0 + $0x78] sm:$0xff]  ;;  %v7614_v18 = vld [vmem:[%s14701_s0 + $0xa0] sm:$0xff]  ;;  %v7624_v20 = vld [vmem:[%s14701_s0 + $0x90] sm:$0xff]  ;;  %vm1947_vm13 = vcmask 228352   ;;  %vm1980_vm14 = vcmask 244736   ;;  %vm2141_vm15 = vcmask 261120  }
   0x8   :  { %v7619_v19 = vld [vmem:[%s14701_s0 + $0x98] sm:$0xff]  ;;  %v7640_v22 = vld [vmem:[%s14701_s0 + $0xb0] sm:$0xff]  ;;  %v7645_v23 = vld [vmem:[%s14701_s0 + $0xa8] sm:$0xff] }
   0x9   :  { %v7635_v21 = vld [vmem:[%s14701_s0 + $0xb8] sm:$0xff]  ;;  %v7656_v24 = vld [vmem:[%s14701_s0 + $0xd0] sm:$0xff]  ;;  %v7661_v25 = vld [vmem:[%s14701_s0 + $0xc8] sm:$0xff] }
   0xa   :  { %88 = vrot.lane.b32.xlu2 %v7509_v3, %s7442_s18  ;;  %84 = vrot.lane.b32.xlu1 %v7514_v4, %s7442_s18  ;;  %v7666_v26 = vld [vmem:[%s14701_s0 + $0xc0] sm:$0xff]  ;;  %v7677_v27 = vld [vmem:[%s14701_s0 + $0xe8] sm:$0xff] }
   0xb   :  { %80 = vrot.lane.b32.xlu0 %v7519_v5, %s7442_s18  ;;  %v7682_v28 = vld [vmem:[%s14701_s0 + $0xe0] sm:$0xff]  ;;  %v7687_v29 = vld [vmem:[%s14701_s0 + $0xd8] sm:$0xff]  ;;  %v7703_v31 = vld [vmem:[%s14701_s0 + $0xf0] sm:$0xff] }
   0xc   :  { %v7698_v30 = vld [vmem:[%s14701_s0 + $0xf8] sm:$0xff] }
  0x12   :  { %94 = vrot.lane.b32.xlu2 %v7530_v6, %s7442_s18  ;;  %92 = vrot.lane.b32.xlu1 %v7535_v7, %s7442_s18 }
  0x13   :  { %90 = vrot.lane.b32.xlu0 %v7540_v8, %s7442_s18 }
  0x1a   :  { %100 = vrot.lane.b32.xlu2 %v7551_v9, %s7442_s18  ;;  %98 = vrot.lane.b32.xlu1 %v7556_v10, %s7442_s18 }
  0x1b   :  { %96 = vrot.lane.b32.xlu0 %v7561_v11, %s7442_s18 }
  0x22   :  { %106 = vrot.lane.b32.xlu2 %v7572_v12, %s7442_s18  ;;  %104 = vrot.lane.b32.xlu1 %v7577_v13, %s7442_s18 }
  0x23   :  { %102 = vrot.lane.b32.xlu0 %v7582_v14, %s7442_s18 }
  0x2a   :  { %112 = vrot.lane.b32.xlu2 %v7593_v15, %s7442_s18  ;;  %110 = vrot.lane.b32.xlu1 %v7598_v16, %s7442_s18 }
  0x2b   :  { %108 = vrot.lane.b32.xlu0 %v7603_v17, %s7442_s18 }
  0x32   :  { %118 = vrot.lane.b32.xlu2 %v7614_v18, %s7442_s18  ;;  %116 = vrot.lane.b32.xlu1 %v7619_v19, %s7442_s18 }
  0x33   :  { %114 = vrot.lane.b32.xlu0 %v7624_v20, %s7442_s18 }
  0x3a   :  { %124 = vrot.lane.b32.xlu2 %v7635_v21, %s7442_s18  ;;  %122 = vrot.lane.b32.xlu1 %v7640_v22, %s7442_s18 }
  0x3b   :  { %120 = vrot.lane.b32.xlu0 %v7645_v23, %s7442_s18 }
  0x42   :  { %130 = vrot.lane.b32.xlu2 %v7656_v24, %s7442_s18  ;;  %128 = vrot.lane.b32.xlu1 %v7661_v25, %s7442_s18 }
  0x43   :  { %126 = vrot.lane.b32.xlu0 %v7666_v26, %s7442_s18 }
  0x4a   :  { %136 = vrot.lane.b32.xlu2 %v7677_v27, %s7442_s18  ;;  %134 = vrot.lane.b32.xlu1 %v7682_v28, %s7442_s18 }
  0x4b   :  { %132 = vrot.lane.b32.xlu0 %v7687_v29, %s7442_s18 }
  0x52   :  { %140 = vrot.lane.b32.xlu1 %v7698_v30, %s7442_s18  ;;  %174 = vrot.lane.b32.xlu2 %v7498_v2, %s7443_s25 }
  0x53   :  { %138 = vrot.lane.b32.xlu0 %v7703_v31, %s7442_s18  ;;  %s7444_s18 = smov 6  }
  0x5a   :  { %178 = vrot.lane.b32.xlu1 %v7493_v1, %s7443_s25  ;;  %180 = vrot.lane.b32.xlu2 %v7514_v4, %s7443_s25 }
  0x5b   :  { %176 = vrot.lane.b32.xlu0 %v7519_v5, %s7443_s25 }
  0x5c   :  { %v7717_v32 = vpop.permute.xlu2 %86 }
  0x62   :  { %184 = vrot.lane.b32.xlu1 %v7509_v3, %s7443_s25  ;;  %186 = vrot.lane.b32.xlu2 %v7540_v8, %s7443_s25 }
  0x63   :  { %182 = vrot.lane.b32.xlu0 %v7488_v0, %s7443_s25 }
  0x64   :  { %v7725_v33 = vpop.permute.xlu2 %88 }
  0x6a   :  { %190 = vrot.lane.b32.xlu1 %v7530_v6, %s7443_s25  ;;  %192 = vrot.lane.b32.xlu2 %v7561_v11, %s7443_s25 }
  0x6b   :  { %188 = vrot.lane.b32.xlu0 %v7535_v7, %s7443_s25 }
  0x6c   :  { %v7733_v34 = vpop.permute.xlu2 %94 }
  0x6d   :  { %14740 = vst [vmem:[#allocation2_spill] sm:$0xff] %v7733_v34 }
  0x72   :  { %196 = vrot.lane.b32.xlu1 %v7551_v9, %s7443_s25  ;;  %198 = vrot.lane.b32.xlu2 %v7582_v14, %s7443_s25 }
  0x73   :  { %194 = vrot.lane.b32.xlu0 %v7556_v10, %s7443_s25 }
  0x74   :  { %v7741_v35 = vpop.permute.xlu2 %100  ;;  %v7743_v36 = vpop.permute.xlu1 %82 }
  0x75   :  { %14741 = vst [vmem:[#allocation3_spill] sm:$0xff] %v7741_v35  ;;  %v7745_v37 = vpop.permute.xlu0 %78 }
  0x7a   :  { %202 = vrot.lane.b32.xlu1 %v7572_v12, %s7443_s25  ;;  %204 = vrot.lane.b32.xlu2 %v7603_v17, %s7443_s25 }
  0x7b   :  { %200 = vrot.lane.b32.xlu0 %v7577_v13, %s7443_s25 }
  0x7c   :  { %v7753_v38 = vpop.permute.xlu2 %106  ;;  %v7755_v39 = vpop.permute.xlu1 %84 }
  0x7d   :  { %v7757_v40 = vpop.permute.xlu0 %80 }
  0x82   :  { %208 = vrot.lane.b32.xlu1 %v7593_v15, %s7443_s25  ;;  %210 = vrot.lane.b32.xlu2 %v7624_v20, %s7443_s25 }
  0x83   :  { %206 = vrot.lane.b32.xlu0 %v7598_v16, %s7443_s25 }
  0x84   :  { %v7765_v41 = vpop.permute.xlu2 %112  ;;  %v7767_v42 = vpop.permute.xlu1 %92 }
  0x85   :  { %14742 = vst [vmem:[#allocation4_spill] sm:$0xff] %v7767_v42  ;;  %v7769_v43 = vpop.permute.xlu0 %90 }
  0x8a   :  { %214 = vrot.lane.b32.xlu1 %v7614_v18, %s7443_s25  ;;  %216 = vrot.lane.b32.xlu2 %v7645_v23, %s7443_s25 }
  0x8b   :  { %212 = vrot.lane.b32.xlu0 %v7619_v19, %s7443_s25 }
  0x8c   :  { %v7777_v44 = vpop.permute.xlu2 %118  ;;  %v7779_v45 = vpop.permute.xlu1 %98 }
  0x8d   :  { %14743 = vst [vmem:[#allocation5_spill] sm:$0xff] %v7779_v45  ;;  %v7781_v46 = vpop.permute.xlu0 %96 }
  0x92   :  { %220 = vrot.lane.b32.xlu1 %v7635_v21, %s7443_s25  ;;  %222 = vrot.lane.b32.xlu2 %v7666_v26, %s7443_s25 }
  0x93   :  { %218 = vrot.lane.b32.xlu0 %v7640_v22, %s7443_s25 }
  0x94   :  { %v7789_v47 = vpop.permute.xlu2 %124  ;;  %v7791_v48 = vpop.permute.xlu1 %104 }
  0x95   :  { %v7793_v49 = vpop.permute.xlu0 %102 }
  0x9a   :  { %226 = vrot.lane.b32.xlu1 %v7656_v24, %s7443_s25  ;;  %228 = vrot.lane.b32.xlu2 %v7687_v29, %s7443_s25 }
  0x9b   :  { %224 = vrot.lane.b32.xlu0 %v7661_v25, %s7443_s25 }
  0x9c   :  { %v7801_v50 = vpop.permute.xlu2 %130  ;;  %v7803_v51 = vpop.permute.xlu1 %110 }
  0x9d   :  { %v7805_v52 = vpop.permute.xlu0 %108 }
  0xa2   :  { %232 = vrot.lane.b32.xlu1 %v7677_v27, %s7443_s25  ;;  %234 = vrot.lane.b32.xlu2 %v7703_v31, %s7443_s25 }
  0xa3   :  { %230 = vrot.lane.b32.xlu0 %v7682_v28, %s7443_s25 }
  0xa4   :  { %v7813_v53 = vpop.permute.xlu2 %136  ;;  %v7815_v54 = vpop.permute.xlu1 %116 }
  0xa5   :  { %v7817_v55 = vpop.permute.xlu0 %114 }
  0xaa   :  { %270 = vrot.lane.b32.xlu1 %v7498_v2, %s7444_s18  ;;  %272 = vrot.lane.b32.xlu2 %v7519_v5, %s7444_s18 }
  0xab   :  { %236 = vrot.lane.b32.xlu0 %v7698_v30, %s7443_s25  ;;  %s7456_s25 = smov 30  }
  0xac   :  { %v7825_v56 = vpop.permute.xlu1 %122  ;;  %v7827_v57 = vpop.permute.xlu2 %174 }
  0xad   :  { %14744 = vst [vmem:[#allocation6_spill] sm:$0xff] %v7825_v56  ;;  %v7829_v58 = vpop.permute.xlu0 %120 }
  0xae   :  { %14745 = vst [vmem:[#allocation7_spill] sm:$0xff] %v7827_v57 }
  0xaf   :  { %14746 = vst [vmem:[#allocation8_spill] sm:$0xff] %v7829_v58 }
  0xb2   :  { %276 = vrot.lane.b32.xlu1 %v7514_v4, %s7444_s18  ;;  %278 = vrot.lane.b32.xlu2 %v7488_v0, %s7444_s18 }
  0xb3   :  { %274 = vrot.lane.b32.xlu0 %v7493_v1, %s7444_s18 }
  0xb4   :  { %v7837_v59 = vpop.permute.xlu1 %128  ;;  %v7839_v60 = vpop.permute.xlu2 %180 }
  0xb5   :  { %14747 = vst [vmem:[#allocation9_spill] sm:$0xff] %v7837_v59  ;;  %v7841_v61 = vpop.permute.xlu0 %126 }
  0xb6   :  { %14748 = vst [vmem:[#allocation10_spill] sm:$0xff] %v7839_v60 }
  0xb7   :  { %14749 = vst [vmem:[#allocation11_spill] sm:$0xff] %v7841_v61 }
  0xba   :  { %282 = vrot.lane.b32.xlu1 %v7540_v8, %s7444_s18  ;;  %284 = vrot.lane.b32.xlu2 %v7535_v7, %s7444_s18 }
  0xbb   :  { %280 = vrot.lane.b32.xlu0 %v7509_v3, %s7444_s18 }
  0xbc   :  { %v7849_v62 = vpop.permute.xlu1 %134  ;;  %v7851_v63 = vpop.permute.xlu2 %186 }
  0xbd   :  { %14750 = vst [vmem:[#allocation12_spill] sm:$0xff] %v7849_v62  ;;  %v7853_v35 = vpop.permute.xlu0 %132 }
  0xbe   :  { %14751 = vst [vmem:[#allocation13_spill] sm:$0xff] %v7851_v63 }
  0xbf   :  { %14752 = vst [vmem:[#allocation14_spill] sm:$0xff] %v7853_v35 }
  0xc2   :  { %288 = vrot.lane.b32.xlu1 %v7561_v11, %s7444_s18  ;;  %290 = vrot.lane.b32.xlu2 %v7556_v10, %s7444_s18 }
  0xc3   :  { %286 = vrot.lane.b32.xlu0 %v7530_v6, %s7444_s18 }
  0xc4   :  { %v7861_v45 = vpop.permute.xlu1 %140  ;;  %v7863_v34 = vpop.permute.xlu2 %192 }
  0xc5   :  { %14753 = vst [vmem:[#allocation15_spill] sm:$0xff] %v7861_v45  ;;  %v7865_v42 = vpop.permute.xlu0 %138 }
  0xc6   :  { %14754 = vst [vmem:[#allocation16_spill] sm:$0xff] %v7863_v34 }
  0xc7   :  { %14755 = vst [vmem:[#allocation17_spill] sm:$0xff] %v7865_v42 }
  0xca   :  { %294 = vrot.lane.b32.xlu1 %v7582_v14, %s7444_s18  ;;  %296 = vrot.lane.b32.xlu2 %v7577_v13, %s7444_s18 }
  0xcb   :  { %292 = vrot.lane.b32.xlu0 %v7551_v9, %s7444_s18 }
  0xcc   :  { %v7873_v35 = vpop.permute.xlu1 %178  ;;  %v7875_v63 = vpop.permute.xlu2 %198 }
  0xcd   :  { %14756 = vst [vmem:[#allocation18_spill] sm:$0xff] %v7873_v35  ;;  %v7877_v62 = vpop.permute.xlu0 %176 }
  0xce   :  { %14757 = vst [vmem:[#allocation19_spill] sm:$0xff] %v7875_v63 }
  0xcf   :  { %14758 = vst [vmem:[#allocation20_spill] sm:$0xff] %v7877_v62 }
  0xd2   :  { %300 = vrot.lane.b32.xlu1 %v7603_v17, %s7444_s18  ;;  %302 = vrot.lane.b32.xlu2 %v7598_v16, %s7444_s18 }
  0xd3   :  { %298 = vrot.lane.b32.xlu0 %v7572_v12, %s7444_s18 }
  0xd4   :  { %v7885_v42 = vpop.permute.xlu1 %184  ;;  %v7887_v34 = vpop.permute.xlu2 %204 }
  0xd5   :  { %14759 = vst [vmem:[#allocation21_spill] sm:$0xff] %v7885_v42  ;;  %v7889_v45 = vpop.permute.xlu0 %182 }
  0xd6   :  { %14760 = vst [vmem:[#allocation22_spill] sm:$0xff] %v7887_v34 }
  0xd7   :  { %14761 = vst [vmem:[#allocation23_spill] sm:$0xff] %v7889_v45 }
  0xda   :  { %306 = vrot.lane.b32.xlu1 %v7624_v20, %s7444_s18  ;;  %308 = vrot.lane.b32.xlu2 %v7619_v19, %s7444_s18 }
  0xdb   :  { %304 = vrot.lane.b32.xlu0 %v7593_v15, %s7444_s18 }
  0xdc   :  { %v7897_v62 = vpop.permute.xlu1 %190  ;;  %v7899_v63 = vpop.permute.xlu2 %210 }
  0xdd   :  { %14762 = vst [vmem:[#allocation24_spill] sm:$0xff] %v7897_v62  ;;  %v7901_v35 = vpop.permute.xlu0 %188 }
  0xde   :  { %14763 = vst [vmem:[#allocation25_spill] sm:$0xff] %v7899_v63 }
  0xdf   :  { %14764 = vst [vmem:[#allocation26_spill] sm:$0xff] %v7901_v35 }
  0xe2   :  { %312 = vrot.lane.b32.xlu1 %v7645_v23, %s7444_s18  ;;  %314 = vrot.lane.b32.xlu2 %v7640_v22, %s7444_s18 }
  0xe3   :  { %310 = vrot.lane.b32.xlu0 %v7614_v18, %s7444_s18 }
  0xe4   :  { %v7909_v45 = vpop.permute.xlu1 %196  ;;  %v7911_v34 = vpop.permute.xlu2 %216 }
  0xe5   :  { %14765 = vst [vmem:[#allocation27_spill] sm:$0xff] %v7909_v45  ;;  %v7913_v42 = vpop.permute.xlu0 %194 }
  0xe6   :  { %14766 = vst [vmem:[#allocation28_spill] sm:$0xff] %v7911_v34 }
  0xe7   :  { %14767 = vst [vmem:[#allocation29_spill] sm:$0xff] %v7913_v42 }
  0xea   :  { %318 = vrot.lane.b32.xlu1 %v7666_v26, %s7444_s18  ;;  %320 = vrot.lane.b32.xlu2 %v7661_v25, %s7444_s18 }
  0xeb   :  { %316 = vrot.lane.b32.xlu0 %v7635_v21, %s7444_s18 }
  0xec   :  { %v7921_v62 = vpop.permute.xlu1 %202  ;;  %v7923_v35 = vpop.permute.xlu2 %222 }
  0xed   :  { %14768 = vst [vmem:[#allocation30_spill] sm:$0xff] %v7923_v35  ;;  %v7925_v63 = vpop.permute.xlu0 %200 }
  0xee   :  { %14769 = vst [vmem:[#allocation31_spill] sm:$0xff] %v7925_v63 }
  0xf2   :  { %324 = vrot.lane.b32.xlu1 %v7687_v29, %s7444_s18  ;;  %326 = vrot.lane.b32.xlu2 %v7682_v28, %s7444_s18 }
  0xf3   :  { %322 = vrot.lane.b32.xlu0 %v7656_v24, %s7444_s18 }
  0xf4   :  { %v7933_v45 = vpop.permute.xlu1 %208  ;;  %v7935_v42 = vpop.permute.xlu2 %228 }
  0xf5   :  { %14770 = vst [vmem:[#allocation32_spill] sm:$0xff] %v7933_v45  ;;  %v7937_v34 = vpop.permute.xlu0 %206 }
  0xf6   :  { %14771 = vst [vmem:[#allocation33_spill] sm:$0xff] %v7935_v42 }
  0xf7   :  { %14772 = vst [vmem:[#allocation34_spill] sm:$0xff] %v7937_v34 }
  0xfa   :  { %330 = vrot.lane.b32.xlu1 %v7703_v31, %s7444_s18  ;;  %332 = vrot.lane.b32.xlu2 %v7698_v30, %s7444_s18 }
  0xfb   :  { %328 = vrot.lane.b32.xlu0 %v7677_v27, %s7444_s18 }
  0xfc   :  { %v7945_v63 = vpop.permute.xlu1 %214  ;;  %v7947_v35 = vpop.permute.xlu2 %234 }
  0xfd   :  { %14773 = vst [vmem:[#allocation35_spill] sm:$0xff] %v7945_v63  ;;  %v7949_v61 = vpop.permute.xlu0 %212 }
  0xfe   :  { %14774 = vst [vmem:[#allocation36_spill] sm:$0xff] %v7947_v35 }
  0xff   :  { %14775 = vst [vmem:[#allocation37_spill] sm:$0xff] %v7949_v61 }
 0x102   :  { %368 = vrot.lane.b32.xlu1 %v7519_v5, %s7445_s26  ;;  %370 = vrot.lane.b32.xlu2 %v7493_v1, %s7445_s26 }
 0x103   :  { %366 = vrot.lane.b32.xlu0 %v7498_v2, %s7445_s26 }
 0x104   :  { %v7957_v34 = vpop.permute.xlu1 %220  ;;  %v7959_v42 = vpop.permute.xlu2 %272 }
 0x105   :  { %14776 = vst [vmem:[#allocation38_spill] sm:$0xff] %v7957_v34  ;;  %v7961_v45 = vpop.permute.xlu0 %218 }
 0x106   :  { %14777 = vst [vmem:[#allocation39_spill] sm:$0xff] %v7959_v42 }
 0x107   :  { %14778 = vst [vmem:[#allocation40_spill] sm:$0xff] %v7961_v45 }
 0x10a   :  { %374 = vrot.lane.b32.xlu1 %v7488_v0, %s7445_s26  ;;  %376 = vrot.lane.b32.xlu2 %v7509_v3, %s7445_s26 }
 0x10b   :  { %372 = vrot.lane.b32.xlu0 %v7514_v4, %s7445_s26 }
 0x10c   :  { %v7969_v61 = vpop.permute.xlu1 %226  ;;  %v7971_v35 = vpop.permute.xlu2 %278 }
 0x10d   :  { %14779 = vst [vmem:[#allocation41_spill] sm:$0xff] %v7969_v61  ;;  %v7973_v63 = vpop.permute.xlu0 %224 }
 0x10e   :  { %14780 = vst [vmem:[#allocation42_spill] sm:$0xff] %v7971_v35 }
 0x10f   :  { %14781 = vst [vmem:[#allocation43_spill] sm:$0xff] %v7973_v63 }
 0x112   :  { %380 = vrot.lane.b32.xlu1 %v7535_v7, %s7445_s26  ;;  %382 = vrot.lane.b32.xlu2 %v7530_v6, %s7445_s26 }
 0x113   :  { %378 = vrot.lane.b32.xlu0 %v7540_v8, %s7445_s26 }
 0x114   :  { %v7981_v45 = vpop.permute.xlu1 %232  ;;  %v7983_v42 = vpop.permute.xlu2 %284 }
 0x115   :  { %14782 = vst [vmem:[#allocation44_spill] sm:$0xff] %v7981_v45  ;;  %v7985_v34 = vpop.permute.xlu0 %230 }
 0x116   :  { %14783 = vst [vmem:[#allocation45_spill] sm:$0xff] %v7983_v42 }
 0x117   :  { %14784 = vst [vmem:[#allocation46_spill] sm:$0xff] %v7985_v34 }
 0x11a   :  { %386 = vrot.lane.b32.xlu1 %v7556_v10, %s7445_s26  ;;  %388 = vrot.lane.b32.xlu2 %v7551_v9, %s7445_s26 }
 0x11b   :  { %384 = vrot.lane.b32.xlu0 %v7561_v11, %s7445_s26 }
 0x11c   :  { %v7993_v63 = vpop.permute.xlu1 %270  ;;  %v7995_v35 = vpop.permute.xlu2 %290 }
 0x11d   :  { %14785 = vst [vmem:[#allocation47_spill] sm:$0xff] %v7993_v63  ;;  %v7997_v61 = vpop.permute.xlu0 %236 }
 0x11e   :  { %14786 = vst [vmem:[#allocation48_spill] sm:$0xff] %v7995_v35 }
 0x11f   :  { %14787 = vst [vmem:[#allocation49_spill] sm:$0xff] %v7997_v61 }
 0x122   :  { %392 = vrot.lane.b32.xlu1 %v7577_v13, %s7445_s26  ;;  %394 = vrot.lane.b32.xlu2 %v7572_v12, %s7445_s26 }
 0x123   :  { %390 = vrot.lane.b32.xlu0 %v7582_v14, %s7445_s26 }
 0x124   :  { %v8005_v42 = vpop.permute.xlu1 %276  ;;  %v8007_v34 = vpop.permute.xlu2 %296 }
 0x125   :  { %14788 = vst [vmem:[#allocation50_spill] sm:$0xff] %v8005_v42  ;;  %v8009_v45 = vpop.permute.xlu0 %274 }
 0x126   :  { %14789 = vst [vmem:[#allocation51_spill] sm:$0xff] %v8007_v34 }
 0x127   :  { %14790 = vst [vmem:[#allocation52_spill] sm:$0xff] %v8009_v45 }
 0x12a   :  { %398 = vrot.lane.b32.xlu1 %v7598_v16, %s7445_s26  ;;  %400 = vrot.lane.b32.xlu2 %v7593_v15, %s7445_s26 }
 0x12b   :  { %396 = vrot.lane.b32.xlu0 %v7603_v17, %s7445_s26 }
 0x12c   :  { %v8017_v35 = vpop.permute.xlu1 %282  ;;  %v8019_v61 = vpop.permute.xlu2 %302 }
 0x12d   :  { %14791 = vst [vmem:[#allocation53_spill] sm:$0xff] %v8017_v35  ;;  %v8021_v63 = vpop.permute.xlu0 %280 }
 0x12e   :  { %14792 = vst [vmem:[#allocation54_spill] sm:$0xff] %v8019_v61 }
 0x12f   :  { %14793 = vst [vmem:[#allocation55_spill] sm:$0xff] %v8021_v63 }
 0x132   :  { %404 = vrot.lane.b32.xlu1 %v7619_v19, %s7445_s26  ;;  %406 = vrot.lane.b32.xlu2 %v7614_v18, %s7445_s26 }
 0x133   :  { %402 = vrot.lane.b32.xlu0 %v7624_v20, %s7445_s26 }
 0x134   :  { %v8029_v45 = vpop.permute.xlu1 %288  ;;  %v8031_v34 = vpop.permute.xlu2 %308 }
 0x135   :  { %14794 = vst [vmem:[#allocation56_spill] sm:$0xff] %v8029_v45  ;;  %v8033_v42 = vpop.permute.xlu0 %286 }
 0x136   :  { %14795 = vst [vmem:[#allocation57_spill] sm:$0xff] %v8031_v34 }
 0x137   :  { %14796 = vst [vmem:[#allocation58_spill] sm:$0xff] %v8033_v42 }
 0x13a   :  { %410 = vrot.lane.b32.xlu1 %v7640_v22, %s7445_s26  ;;  %412 = vrot.lane.b32.xlu2 %v7635_v21, %s7445_s26 }
 0x13b   :  { %408 = vrot.lane.b32.xlu0 %v7645_v23, %s7445_s26 }
 0x13c   :  { %v8041_v63 = vpop.permute.xlu1 %294  ;;  %v8043_v61 = vpop.permute.xlu2 %314 }
 0x13d   :  { %14797 = vst [vmem:[#allocation59_spill] sm:$0xff] %v8041_v63  ;;  %v8045_v35 = vpop.permute.xlu0 %292 }
 0x13e   :  { %14798 = vst [vmem:[#allocation60_spill] sm:$0xff] %v8043_v61 }
 0x13f   :  { %14799 = vst [vmem:[#allocation61_spill] sm:$0xff] %v8045_v35 }
 0x142   :  { %416 = vrot.lane.b32.xlu1 %v7661_v25, %s7445_s26  ;;  %418 = vrot.lane.b32.xlu2 %v7656_v24, %s7445_s26 }
 0x143   :  { %414 = vrot.lane.b32.xlu0 %v7666_v26, %s7445_s26 }
 0x144   :  { %v8053_v42 = vpop.permute.xlu1 %300  ;;  %v8055_v34 = vpop.permute.xlu2 %320 }
 0x145   :  { %14800 = vst [vmem:[#allocation62_spill] sm:$0xff] %v8053_v42  ;;  %v8057_v45 = vpop.permute.xlu0 %298 }
 0x146   :  { %14801 = vst [vmem:[#allocation63_spill] sm:$0xff] %v8055_v34 }
 0x14a   :  { %422 = vrot.lane.b32.xlu1 %v7682_v28, %s7445_s26  ;;  %424 = vrot.lane.b32.xlu2 %v7677_v27, %s7445_s26 }
 0x14b   :  { %420 = vrot.lane.b32.xlu0 %v7687_v29, %s7445_s26 }
 0x14c   :  { %v8065_v35 = vpop.permute.xlu1 %306  ;;  %v8067_v61 = vpop.permute.xlu2 %326 }
 0x14d   :  { %14802 = vst [vmem:[#allocation64_spill] sm:$0xff] %v8065_v35  ;;  %v8069_v63 = vpop.permute.xlu0 %304 }
 0x14e   :  { %14803 = vst [vmem:[#allocation65_spill] sm:$0xff] %v8067_v61 }
 0x14f   :  { %14804 = vst [vmem:[#allocation66_spill] sm:$0xff] %v8069_v63 }
 0x152   :  { %428 = vrot.lane.b32.xlu1 %v7698_v30, %s7445_s26  ;;  %462 = vrot.lane.b32.xlu2 %v7498_v2, %s7446_s27 }
 0x153   :  { %426 = vrot.lane.b32.xlu0 %v7703_v31, %s7445_s26 }
 0x154   :  { %v8077_v34 = vpop.permute.xlu1 %312  ;;  %v8079_v42 = vpop.permute.xlu2 %332 }
 0x155   :  { %14805 = vst [vmem:[#allocation67_spill] sm:$0xff] %v8077_v34  ;;  %v8081_v60 = vpop.permute.xlu0 %310 }
 0x156   :  { %14806 = vst [vmem:[#allocation68_spill] sm:$0xff] %v8079_v42 }
 0x157   :  { %14807 = vst [vmem:[#allocation69_spill] sm:$0xff] %v8081_v60 }
 0x15a   :  { %466 = vrot.lane.b32.xlu1 %v7493_v1, %s7446_s27  ;;  %468 = vrot.lane.b32.xlu2 %v7514_v4, %s7446_s27 }
 0x15b   :  { %464 = vrot.lane.b32.xlu0 %v7519_v5, %s7446_s27 }
 0x15c   :  { %v8089_v61 = vpop.permute.xlu1 %318  ;;  %v8091_v35 = vpop.permute.xlu2 %370 }
 0x15d   :  { %14808 = vst [vmem:[#allocation70_spill] sm:$0xff] %v8089_v61  ;;  %v8093_v63 = vpop.permute.xlu0 %316 }
 0x15e   :  { %14809 = vst [vmem:[#allocation71_spill] sm:$0xff] %v8091_v35 }
 0x15f   :  { %14810 = vst [vmem:[#allocation72_spill] sm:$0xff] %v8093_v63 }
 0x162   :  { %472 = vrot.lane.b32.xlu1 %v7509_v3, %s7446_s27  ;;  %474 = vrot.lane.b32.xlu2 %v7540_v8, %s7446_s27 }
 0x163   :  { %470 = vrot.lane.b32.xlu0 %v7488_v0, %s7446_s27 }
 0x164   :  { %v8101_v42 = vpop.permute.xlu1 %324  ;;  %v8103_v34 = vpop.permute.xlu2 %376 }
 0x165   :  { %14811 = vst [vmem:[#allocation73_spill] sm:$0xff] %v8101_v42  ;;  %v8105_v60 = vpop.permute.xlu0 %322 }
 0x166   :  { %14812 = vst [vmem:[#allocation74_spill] sm:$0xff] %v8103_v34 }
 0x167   :  { %14813 = vst [vmem:[#allocation75_spill] sm:$0xff] %v8105_v60 }
 0x16a   :  { %478 = vrot.lane.b32.xlu1 %v7530_v6, %s7446_s27  ;;  %480 = vrot.lane.b32.xlu2 %v7561_v11, %s7446_s27 }
 0x16b   :  { %476 = vrot.lane.b32.xlu0 %v7535_v7, %s7446_s27 }
 0x16c   :  { %v8113_v35 = vpop.permute.xlu1 %330  ;;  %v8115_v61 = vpop.permute.xlu2 %382 }
 0x16d   :  { %14814 = vst [vmem:[#allocation76_spill] sm:$0xff] %v8113_v35  ;;  %v8117_v63 = vpop.permute.xlu0 %328 }
 0x16e   :  { %14815 = vst [vmem:[#allocation77_spill] sm:$0xff] %v8115_v61 }
 0x16f   :  { %14816 = vst [vmem:[#allocation78_spill] sm:$0xff] %v8117_v63 }
 0x172   :  { %484 = vrot.lane.b32.xlu1 %v7551_v9, %s7446_s27  ;;  %486 = vrot.lane.b32.xlu2 %v7582_v14, %s7446_s27 }
 0x173   :  { %482 = vrot.lane.b32.xlu0 %v7556_v10, %s7446_s27 }
 0x174   :  { %v8125_v34 = vpop.permute.xlu1 %368  ;;  %v8127_v60 = vpop.permute.xlu2 %388 }
 0x175   :  { %14817 = vst [vmem:[#allocation79_spill] sm:$0xff] %v8125_v34  ;;  %v8129_v42 = vpop.permute.xlu0 %366 }
 0x176   :  { %14818 = vst [vmem:[#allocation80_spill] sm:$0xff] %v8127_v60 }
 0x177   :  { %14819 = vst [vmem:[#allocation81_spill] sm:$0xff] %v8129_v42 }
 0x17a   :  { %490 = vrot.lane.b32.xlu1 %v7572_v12, %s7446_s27  ;;  %492 = vrot.lane.b32.xlu2 %v7603_v17, %s7446_s27 }
 0x17b   :  { %488 = vrot.lane.b32.xlu0 %v7577_v13, %s7446_s27 }
 0x17c   :  { %v8137_v61 = vpop.permute.xlu1 %374  ;;  %v8139_v63 = vpop.permute.xlu2 %394 }
 0x17d   :  { %14820 = vst [vmem:[#allocation82_spill] sm:$0xff] %v8137_v61  ;;  %v8141_v35 = vpop.permute.xlu0 %372 }
 0x17e   :  { %14821 = vst [vmem:[#allocation83_spill] sm:$0xff] %v8141_v35 }
 0x182   :  { %496 = vrot.lane.b32.xlu1 %v7593_v15, %s7446_s27  ;;  %498 = vrot.lane.b32.xlu2 %v7624_v20, %s7446_s27 }
 0x183   :  { %494 = vrot.lane.b32.xlu0 %v7598_v16, %s7446_s27 }
 0x184   :  { %v8149_v60 = vpop.permute.xlu1 %380  ;;  %v8151_v42 = vpop.permute.xlu2 %400 }
 0x185   :  { %14822 = vst [vmem:[#allocation84_spill] sm:$0xff] %v8149_v60  ;;  %v8153_v34 = vpop.permute.xlu0 %378 }
 0x186   :  { %14823 = vst [vmem:[#allocation85_spill] sm:$0xff] %v8151_v42 }
 0x187   :  { %14824 = vst [vmem:[#allocation86_spill] sm:$0xff] %v8153_v34 }
 0x18a   :  { %502 = vrot.lane.b32.xlu1 %v7614_v18, %s7446_s27  ;;  %504 = vrot.lane.b32.xlu2 %v7645_v23, %s7446_s27 }
 0x18b   :  { %500 = vrot.lane.b32.xlu0 %v7619_v19, %s7446_s27 }
 0x18c   :  { %v8161_v61 = vpop.permute.xlu1 %386  ;;  %v8163_v35 = vpop.permute.xlu2 %406 }
 0x18d   :  { %14825 = vst [vmem:[#allocation87_spill] sm:$0xff] %v8161_v61  ;;  %v8165_v59 = vpop.permute.xlu0 %384 }
 0x18e   :  { %14826 = vst [vmem:[#allocation88_spill] sm:$0xff] %v8163_v35 }
 0x18f   :  { %14827 = vst [vmem:[#allocation89_spill] sm:$0xff] %v8165_v59 }
 0x192   :  { %508 = vrot.lane.b32.xlu1 %v7635_v21, %s7446_s27  ;;  %510 = vrot.lane.b32.xlu2 %v7666_v26, %s7446_s27 }
 0x193   :  { %506 = vrot.lane.b32.xlu0 %v7640_v22, %s7446_s27 }
 0x194   :  { %v8173_v60 = vpop.permute.xlu1 %392  ;;  %v8175_v34 = vpop.permute.xlu2 %412 }
 0x195   :  { %14828 = vst [vmem:[#allocation90_spill] sm:$0xff] %v8173_v60  ;;  %v8177_v42 = vpop.permute.xlu0 %390 }
 0x196   :  { %14829 = vst [vmem:[#allocation91_spill] sm:$0xff] %v8175_v34 }
 0x197   :  { %14830 = vst [vmem:[#allocation92_spill] sm:$0xff] %v8177_v42 }
 0x19a   :  { %514 = vrot.lane.b32.xlu1 %v7656_v24, %s7446_s27  ;;  %516 = vrot.lane.b32.xlu2 %v7687_v29, %s7446_s27 }
 0x19b   :  { %512 = vrot.lane.b32.xlu0 %v7661_v25, %s7446_s27 }
 0x19c   :  { %v8185_v61 = vpop.permute.xlu1 %398  ;;  %v8187_v59 = vpop.permute.xlu2 %418 }
 0x19d   :  { %14831 = vst [vmem:[#allocation93_spill] sm:$0xff] %v8185_v61  ;;  %v8189_v35 = vpop.permute.xlu0 %396 }
 0x19e   :  { %14832 = vst [vmem:[#allocation94_spill] sm:$0xff] %v8187_v59 }
 0x19f   :  { %14833 = vst [vmem:[#allocation95_spill] sm:$0xff] %v8189_v35 }
 0x1a2   :  { %520 = vrot.lane.b32.xlu1 %v7677_v27, %s7446_s27  ;;  %522 = vrot.lane.b32.xlu2 %v7703_v31, %s7446_s27 }
 0x1a3   :  { %518 = vrot.lane.b32.xlu0 %v7682_v28, %s7446_s27 }
 0x1a4   :  { %v8197_v42 = vpop.permute.xlu1 %404  ;;  %v8199_v34 = vpop.permute.xlu2 %424 }
 0x1a5   :  { %14834 = vst [vmem:[#allocation96_spill] sm:$0xff] %v8197_v42  ;;  %v8201_v60 = vpop.permute.xlu0 %402 }
 0x1a6   :  { %14835 = vst [vmem:[#allocation97_spill] sm:$0xff] %v8199_v34 }
 0x1a7   :  { %14836 = vst [vmem:[#allocation98_spill] sm:$0xff] %v8201_v60 }
 0x1aa   :  { %558 = vrot.lane.b32.xlu1 %v7498_v2, %s7447_s28  ;;  %560 = vrot.lane.b32.xlu2 %v7519_v5, %s7447_s28 }
 0x1ab   :  { %524 = vrot.lane.b32.xlu0 %v7698_v30, %s7446_s27 }
 0x1ac   :  { %v8209_v35 = vpop.permute.xlu1 %410  ;;  %v8211_v59 = vpop.permute.xlu2 %462 }
 0x1ad   :  { %14837 = vst [vmem:[#allocation99_spill] sm:$0xff] %v8209_v35  ;;  %v8213_v61 = vpop.permute.xlu0 %408 }
 0x1ae   :  { %14838 = vst [vmem:[#allocation100_spill] sm:$0xff] %v8211_v59 }
 0x1af   :  { %14839 = vst [vmem:[#allocation101_spill] sm:$0xff] %v8213_v61 }
 0x1b2   :  { %564 = vrot.lane.b32.xlu1 %v7514_v4, %s7447_s28  ;;  %566 = vrot.lane.b32.xlu2 %v7488_v0, %s7447_s28 }
 0x1b3   :  { %562 = vrot.lane.b32.xlu0 %v7493_v1, %s7447_s28 }
 0x1b4   :  { %v8221_v60 = vpop.permute.xlu1 %416  ;;  %v8223_v34 = vpop.permute.xlu2 %468 }
 0x1b5   :  { %14840 = vst [vmem:[#allocation102_spill] sm:$0xff] %v8221_v60  ;;  %v8225_v42 = vpop.permute.xlu0 %414 }
 0x1b6   :  { %14841 = vst [vmem:[#allocation103_spill] sm:$0xff] %v8223_v34 }
 0x1b7   :  { %14842 = vst [vmem:[#allocation104_spill] sm:$0xff] %v8225_v42 }
 0x1ba   :  { %570 = vrot.lane.b32.xlu1 %v7540_v8, %s7447_s28  ;;  %572 = vrot.lane.b32.xlu2 %v7535_v7, %s7447_s28 }
 0x1bb   :  { %568 = vrot.lane.b32.xlu0 %v7509_v3, %s7447_s28 }
 0x1bc   :  { %v8233_v61 = vpop.permute.xlu1 %422  ;;  %v8235_v59 = vpop.permute.xlu2 %474 }
 0x1bd   :  { %14843 = vst [vmem:[#allocation105_spill] sm:$0xff] %v8233_v61  ;;  %v8237_v35 = vpop.permute.xlu0 %420 }
 0x1be   :  { %14844 = vst [vmem:[#allocation106_spill] sm:$0xff] %v8235_v59 }
 0x1bf   :  { %14845 = vst [vmem:[#allocation107_spill] sm:$0xff] %v8237_v35 }
 0x1c2   :  { %576 = vrot.lane.b32.xlu1 %v7561_v11, %s7447_s28  ;;  %578 = vrot.lane.b32.xlu2 %v7556_v10, %s7447_s28 }
 0x1c3   :  { %574 = vrot.lane.b32.xlu0 %v7530_v6, %s7447_s28 }
 0x1c4   :  { %v8245_v42 = vpop.permute.xlu1 %428  ;;  %v8247_v34 = vpop.permute.xlu2 %480 }
 0x1c5   :  { %14846 = vst [vmem:[#allocation108_spill] sm:$0xff] %v8245_v42  ;;  %v8249_v60 = vpop.permute.xlu0 %426 }
 0x1c6   :  { %14847 = vst [vmem:[#allocation109_spill] sm:$0xff] %v8247_v34 }
 0x1c7   :  { %14848 = vst [vmem:[#allocation110_spill] sm:$0xff] %v8249_v60 }
 0x1ca   :  { %582 = vrot.lane.b32.xlu1 %v7582_v14, %s7447_s28  ;;  %584 = vrot.lane.b32.xlu2 %v7577_v13, %s7447_s28 }
 0x1cb   :  { %580 = vrot.lane.b32.xlu0 %v7551_v9, %s7447_s28 }
 0x1cc   :  { %v8257_v35 = vpop.permute.xlu1 %466  ;;  %v8259_v59 = vpop.permute.xlu2 %486 }
 0x1cd   :  { %14849 = vst [vmem:[#allocation111_spill] sm:$0xff] %v8257_v35  ;;  %v8261_v61 = vpop.permute.xlu0 %464 }
 0x1ce   :  { %14850 = vst [vmem:[#allocation112_spill] sm:$0xff] %v8259_v59 }
 0x1cf   :  { %14851 = vst [vmem:[#allocation113_spill] sm:$0xff] %v8261_v61 }
 0x1d2   :  { %588 = vrot.lane.b32.xlu1 %v7603_v17, %s7447_s28  ;;  %590 = vrot.lane.b32.xlu2 %v7598_v16, %s7447_s28 }
 0x1d3   :  { %586 = vrot.lane.b32.xlu0 %v7572_v12, %s7447_s28 }
 0x1d4   :  { %v8269_v60 = vpop.permute.xlu1 %472  ;;  %v8271_v34 = vpop.permute.xlu2 %492 }
 0x1d5   :  { %14852 = vst [vmem:[#allocation114_spill] sm:$0xff] %v8269_v60  ;;  %v8273_v42 = vpop.permute.xlu0 %470 }
 0x1d6   :  { %14853 = vst [vmem:[#allocation115_spill] sm:$0xff] %v8271_v34 }
 0x1d7   :  { %14854 = vst [vmem:[#allocation116_spill] sm:$0xff] %v8273_v42 }
 0x1da   :  { %594 = vrot.lane.b32.xlu1 %v7624_v20, %s7447_s28  ;;  %596 = vrot.lane.b32.xlu2 %v7619_v19, %s7447_s28 }
 0x1db   :  { %592 = vrot.lane.b32.xlu0 %v7593_v15, %s7447_s28 }
 0x1dc   :  { %v8281_v61 = vpop.permute.xlu1 %478  ;;  %v8283_v59 = vpop.permute.xlu2 %498 }
 0x1dd   :  { %14855 = vst [vmem:[#allocation117_spill] sm:$0xff] %v8281_v61  ;;  %v8285_v35 = vpop.permute.xlu0 %476 }
 0x1de   :  { %14856 = vst [vmem:[#allocation118_spill] sm:$0xff] %v8283_v59 }
 0x1df   :  { %14857 = vst [vmem:[#allocation119_spill] sm:$0xff] %v8285_v35 }
 0x1e2   :  { %600 = vrot.lane.b32.xlu1 %v7645_v23, %s7447_s28  ;;  %602 = vrot.lane.b32.xlu2 %v7640_v22, %s7447_s28 }
 0x1e3   :  { %598 = vrot.lane.b32.xlu0 %v7614_v18, %s7447_s28 }
 0x1e4   :  { %v8293_v42 = vpop.permute.xlu1 %484  ;;  %v8295_v60 = vpop.permute.xlu2 %504 }
 0x1e5   :  { %14858 = vst [vmem:[#allocation120_spill] sm:$0xff] %v8293_v42  ;;  %v8297_v34 = vpop.permute.xlu0 %482 }
 0x1e6   :  { %14859 = vst [vmem:[#allocation121_spill] sm:$0xff] %v8295_v60 }
 0x1e7   :  { %14860 = vst [vmem:[#allocation122_spill] sm:$0xff] %v8297_v34 }
 0x1ea   :  { %606 = vrot.lane.b32.xlu1 %v7666_v26, %s7447_s28  ;;  %608 = vrot.lane.b32.xlu2 %v7661_v25, %s7447_s28 }
 0x1eb   :  { %604 = vrot.lane.b32.xlu0 %v7635_v21, %s7447_s28 }
 0x1ec   :  { %v8305_v35 = vpop.permute.xlu1 %490  ;;  %v8307_v61 = vpop.permute.xlu2 %510 }
 0x1ed   :  { %14861 = vst [vmem:[#allocation123_spill] sm:$0xff] %v8307_v61  ;;  %v8309_v59 = vpop.permute.xlu0 %488 }
 0x1ee   :  { %14862 = vst [vmem:[#allocation124_spill] sm:$0xff] %v8309_v59 }
 0x1f2   :  { %612 = vrot.lane.b32.xlu1 %v7687_v29, %s7447_s28  ;;  %614 = vrot.lane.b32.xlu2 %v7682_v28, %s7447_s28 }
 0x1f3   :  { %610 = vrot.lane.b32.xlu0 %v7656_v24, %s7447_s28 }
 0x1f4   :  { %v8317_v34 = vpop.permute.xlu1 %496  ;;  %v8319_v42 = vpop.permute.xlu2 %516 }
 0x1f5   :  { %14863 = vst [vmem:[#allocation125_spill] sm:$0xff] %v8317_v34  ;;  %v8321_v60 = vpop.permute.xlu0 %494 }
 0x1f6   :  { %14864 = vst [vmem:[#allocation126_spill] sm:$0xff] %v8319_v42 }
 0x1f7   :  { %14865 = vst [vmem:[#allocation127_spill] sm:$0xff] %v8321_v60 }
 0x1fa   :  { %618 = vrot.lane.b32.xlu1 %v7703_v31, %s7447_s28  ;;  %620 = vrot.lane.b32.xlu2 %v7698_v30, %s7447_s28 }
 0x1fb   :  { %616 = vrot.lane.b32.xlu0 %v7677_v27, %s7447_s28 }
 0x1fc   :  { %v8329_v61 = vpop.permute.xlu1 %502  ;;  %v8331_v59 = vpop.permute.xlu2 %522 }
 0x1fd   :  { %14866 = vst [vmem:[#allocation128_spill] sm:$0xff] %v8329_v61  ;;  %v8333_v58 = vpop.permute.xlu0 %500 }
 0x1fe   :  { %14867 = vst [vmem:[#allocation129_spill] sm:$0xff] %v8331_v59 }
 0x1ff   :  { %14868 = vst [vmem:[#allocation130_spill] sm:$0xff] %v8333_v58 }
 0x202   :  { %656 = vrot.lane.b32.xlu1 %v7519_v5, %s7448_s29  ;;  %658 = vrot.lane.b32.xlu2 %v7493_v1, %s7448_s29 }
 0x203   :  { %654 = vrot.lane.b32.xlu0 %v7498_v2, %s7448_s29 }
 0x204   :  { %v8341_v42 = vpop.permute.xlu1 %508  ;;  %v8343_v60 = vpop.permute.xlu2 %560 }
 0x205   :  { %14869 = vst [vmem:[#allocation131_spill] sm:$0xff] %v8341_v42  ;;  %v8345_v34 = vpop.permute.xlu0 %506 }
 0x206   :  { %14870 = vst [vmem:[#allocation132_spill] sm:$0xff] %v8343_v60 }
 0x207   :  { %14871 = vst [vmem:[#allocation133_spill] sm:$0xff] %v8345_v34 }
 0x20a   :  { %662 = vrot.lane.b32.xlu1 %v7488_v0, %s7448_s29  ;;  %664 = vrot.lane.b32.xlu2 %v7509_v3, %s7448_s29 }
 0x20b   :  { %660 = vrot.lane.b32.xlu0 %v7514_v4, %s7448_s29 }
 0x20c   :  { %v8353_v59 = vpop.permute.xlu1 %514  ;;  %v8355_v58 = vpop.permute.xlu2 %566 }
 0x20d   :  { %14872 = vst [vmem:[#allocation134_spill] sm:$0xff] %v8353_v59  ;;  %v8357_v61 = vpop.permute.xlu0 %512 }
 0x20e   :  { %14873 = vst [vmem:[#allocation135_spill] sm:$0xff] %v8355_v58 }
 0x20f   :  { %14874 = vst [vmem:[#allocation136_spill] sm:$0xff] %v8357_v61 }
 0x212   :  { %668 = vrot.lane.b32.xlu1 %v7535_v7, %s7448_s29  ;;  %670 = vrot.lane.b32.xlu2 %v7530_v6, %s7448_s29 }
 0x213   :  { %666 = vrot.lane.b32.xlu0 %v7540_v8, %s7448_s29 }
 0x214   :  { %v8365_v60 = vpop.permute.xlu1 %520  ;;  %v8367_v34 = vpop.permute.xlu2 %572 }
 0x215   :  { %14875 = vst [vmem:[#allocation137_spill] sm:$0xff] %v8365_v60  ;;  %v8369_v42 = vpop.permute.xlu0 %518 }
 0x216   :  { %14876 = vst [vmem:[#allocation138_spill] sm:$0xff] %v8367_v34 }
 0x217   :  { %14877 = vst [vmem:[#allocation139_spill] sm:$0xff] %v8369_v42 }
 0x21a   :  { %674 = vrot.lane.b32.xlu1 %v7556_v10, %s7448_s29  ;;  %676 = vrot.lane.b32.xlu2 %v7551_v9, %s7448_s29 }
 0x21b   :  { %672 = vrot.lane.b32.xlu0 %v7561_v11, %s7448_s29 }
 0x21c   :  { %v8377_v58 = vpop.permute.xlu1 %558  ;;  %v8379_v61 = vpop.permute.xlu2 %578 }
 0x21d   :  { %14878 = vst [vmem:[#allocation140_spill] sm:$0xff] %v8377_v58  ;;  %v8381_v59 = vpop.permute.xlu0 %524 }
 0x21e   :  { %14879 = vst [vmem:[#allocation141_spill] sm:$0xff] %v8379_v61 }
 0x21f   :  { %14880 = vst [vmem:[#allocation142_spill] sm:$0xff] %v8381_v59 }
 0x222   :  { %680 = vrot.lane.b32.xlu1 %v7577_v13, %s7448_s29  ;;  %682 = vrot.lane.b32.xlu2 %v7572_v12, %s7448_s29 }
 0x223   :  { %678 = vrot.lane.b32.xlu0 %v7582_v14, %s7448_s29 }
 0x224   :  { %v8389_v34 = vpop.permute.xlu1 %564  ;;  %v8391_v42 = vpop.permute.xlu2 %584 }
 0x225   :  { %14881 = vst [vmem:[#allocation143_spill] sm:$0xff] %v8389_v34  ;;  %v8393_v60 = vpop.permute.xlu0 %562 }
 0x226   :  { %14882 = vst [vmem:[#allocation144_spill] sm:$0xff] %v8391_v42 }
 0x227   :  { %14883 = vst [vmem:[#allocation145_spill] sm:$0xff] %v8393_v60 }
 0x22a   :  { %686 = vrot.lane.b32.xlu1 %v7598_v16, %s7448_s29  ;;  %688 = vrot.lane.b32.xlu2 %v7593_v15, %s7448_s29 }
 0x22b   :  { %684 = vrot.lane.b32.xlu0 %v7603_v17, %s7448_s29 }
 0x22c   :  { %v8401_v61 = vpop.permute.xlu1 %570  ;;  %v8403_v59 = vpop.permute.xlu2 %590 }
 0x22d   :  { %14884 = vst [vmem:[#allocation146_spill] sm:$0xff] %v8401_v61  ;;  %v8405_v58 = vpop.permute.xlu0 %568 }
 0x22e   :  { %14885 = vst [vmem:[#allocation147_spill] sm:$0xff] %v8403_v59 }
 0x22f   :  { %14886 = vst [vmem:[#allocation148_spill] sm:$0xff] %v8405_v58 }
 0x232   :  { %692 = vrot.lane.b32.xlu1 %v7619_v19, %s7448_s29  ;;  %694 = vrot.lane.b32.xlu2 %v7614_v18, %s7448_s29 }
 0x233   :  { %690 = vrot.lane.b32.xlu0 %v7624_v20, %s7448_s29 }
 0x234   :  { %v8413_v60 = vpop.permute.xlu1 %576  ;;  %v8415_v34 = vpop.permute.xlu2 %596 }
 0x235   :  { %14887 = vst [vmem:[#allocation149_spill] sm:$0xff] %v8413_v60  ;;  %v8417_v42 = vpop.permute.xlu0 %574 }
 0x236   :  { %14888 = vst [vmem:[#allocation150_spill] sm:$0xff] %v8415_v34 }
 0x237   :  { %14889 = vst [vmem:[#allocation151_spill] sm:$0xff] %v8417_v42 }
 0x23a   :  { %698 = vrot.lane.b32.xlu1 %v7640_v22, %s7448_s29  ;;  %700 = vrot.lane.b32.xlu2 %v7635_v21, %s7448_s29 }
 0x23b   :  { %696 = vrot.lane.b32.xlu0 %v7645_v23, %s7448_s29 }
 0x23c   :  { %v8425_v58 = vpop.permute.xlu1 %582  ;;  %v8427_v61 = vpop.permute.xlu2 %602 }
 0x23d   :  { %14890 = vst [vmem:[#allocation152_spill] sm:$0xff] %v8425_v58  ;;  %v8429_v59 = vpop.permute.xlu0 %580 }
 0x23e   :  { %14891 = vst [vmem:[#allocation153_spill] sm:$0xff] %v8427_v61 }
 0x23f   :  { %14892 = vst [vmem:[#allocation154_spill] sm:$0xff] %v8429_v59 }
 0x242   :  { %704 = vrot.lane.b32.xlu1 %v7661_v25, %s7448_s29  ;;  %706 = vrot.lane.b32.xlu2 %v7656_v24, %s7448_s29 }
 0x243   :  { %702 = vrot.lane.b32.xlu0 %v7666_v26, %s7448_s29 }
 0x244   :  { %v8437_v42 = vpop.permute.xlu1 %588  ;;  %v8439_v60 = vpop.permute.xlu2 %608 }
 0x245   :  { %14893 = vst [vmem:[#allocation155_spill] sm:$0xff] %v8437_v42  ;;  %v8441_v34 = vpop.permute.xlu0 %586 }
 0x246   :  { %14894 = vst [vmem:[#allocation156_spill] sm:$0xff] %v8439_v60 }
 0x24a   :  { %710 = vrot.lane.b32.xlu1 %v7682_v28, %s7448_s29  ;;  %712 = vrot.lane.b32.xlu2 %v7677_v27, %s7448_s29 }
 0x24b   :  { %708 = vrot.lane.b32.xlu0 %v7687_v29, %s7448_s29 }
 0x24c   :  { %v8449_v59 = vpop.permute.xlu1 %594  ;;  %v8451_v58 = vpop.permute.xlu2 %614 }
 0x24d   :  { %14895 = vst [vmem:[#allocation157_spill] sm:$0xff] %v8449_v59  ;;  %v8453_v61 = vpop.permute.xlu0 %592 }
 0x24e   :  { %14896 = vst [vmem:[#allocation158_spill] sm:$0xff] %v8451_v58 }
 0x24f   :  { %14897 = vst [vmem:[#allocation159_spill] sm:$0xff] %v8453_v61 }
 0x252   :  { %716 = vrot.lane.b32.xlu1 %v7698_v30, %s7448_s29  ;;  %750 = vrot.lane.b32.xlu2 %v7498_v2, %s7449_s30 }
 0x253   :  { %714 = vrot.lane.b32.xlu0 %v7703_v31, %s7448_s29 }
 0x254   :  { %v8461_v60 = vpop.permute.xlu1 %600  ;;  %v8463_v42 = vpop.permute.xlu2 %620 }
 0x255   :  { %14898 = vst [vmem:[#allocation160_spill] sm:$0xff] %v8461_v60  ;;  %v8465_v57 = vpop.permute.xlu0 %598 }
 0x256   :  { %14899 = vst [vmem:[#allocation161_spill] sm:$0xff] %v8463_v42 }
 0x257   :  { %14900 = vst [vmem:[#allocation162_spill] sm:$0xff] %v8465_v57  ;;  %v8984_v57 = vld [vmem:[%s14701_s0 + $0xd8] sm:$0xff] }
 0x258   :  { %14990 = vst [vmem:[#allocation252_spill] sm:$0xff] %v8984_v57 }
 0x25a   :  { %754 = vrot.lane.b32.xlu1 %v7493_v1, %s7449_s30  ;;  %756 = vrot.lane.b32.xlu2 %v7514_v4, %s7449_s30 }
 0x25b   :  { %752 = vrot.lane.b32.xlu0 %v7519_v5, %s7449_s30 }
 0x25c   :  { %v8473_v58 = vpop.permute.xlu1 %606  ;;  %v8475_v59 = vpop.permute.xlu2 %658 }
 0x25d   :  { %14901 = vst [vmem:[#allocation163_spill] sm:$0xff] %v8473_v58  ;;  %v8477_v61 = vpop.permute.xlu0 %604 }
 0x25e   :  { %14902 = vst [vmem:[#allocation164_spill] sm:$0xff] %v8475_v59 }
 0x25f   :  { %14903 = vst [vmem:[#allocation165_spill] sm:$0xff] %v8477_v61  ;;  %v8953_v61 = vld [vmem:[%s14701_s0 + $0xc8] sm:$0xff] }
 0x262   :  { %760 = vrot.lane.b32.xlu1 %v7509_v3, %s7449_s30  ;;  %762 = vrot.lane.b32.xlu2 %v7540_v8, %s7449_s30 }
 0x263   :  { %758 = vrot.lane.b32.xlu0 %v7488_v0, %s7449_s30 }
 0x264   :  { %v8485_v1 = vpop.permute.xlu1 %612  ;;  %v8487_v42 = vpop.permute.xlu2 %664 }
 0x265   :  { %14904 = vst [vmem:[#allocation166_spill] sm:$0xff] %v8485_v1  ;;  %v8489_v60 = vpop.permute.xlu0 %610 }
 0x266   :  { %14905 = vst [vmem:[#allocation167_spill] sm:$0xff] %v8487_v42 }
 0x267   :  { %14906 = vst [vmem:[#allocation168_spill] sm:$0xff] %v8489_v60  ;;  %v8896_v60 = vld [vmem:[%s14701_s0 + $0x78] sm:$0xff] }
 0x26a   :  { %766 = vrot.lane.b32.xlu1 %v7530_v6, %s7449_s30  ;;  %768 = vrot.lane.b32.xlu2 %v7561_v11, %s7449_s30 }
 0x26b   :  { %764 = vrot.lane.b32.xlu0 %v7535_v7, %s7449_s30 }
 0x26c   :  { %v8497_v3 = vpop.permute.xlu1 %618  ;;  %v8499_v59 = vpop.permute.xlu2 %670 }
 0x26d   :  { %14907 = vst [vmem:[#allocation169_spill] sm:$0xff] %v8497_v3  ;;  %v8501_v0 = vpop.permute.xlu0 %616 }
 0x26e   :  { %14908 = vst [vmem:[#allocation170_spill] sm:$0xff] %v8499_v59 }
 0x26f   :  { %14909 = vst [vmem:[#allocation171_spill] sm:$0xff] %v8501_v0 }
 0x272   :  { %772 = vrot.lane.b32.xlu1 %v7551_v9, %s7449_s30  ;;  %774 = vrot.lane.b32.xlu2 %v7582_v14, %s7449_s30 }
 0x273   :  { %770 = vrot.lane.b32.xlu0 %v7556_v10, %s7449_s30 }
 0x274   :  { %v8509_v6 = vpop.permute.xlu1 %656  ;;  %v8511_v42 = vpop.permute.xlu2 %676 }
 0x275   :  { %14910 = vst [vmem:[#allocation172_spill] sm:$0xff] %v8509_v6  ;;  %v8513_v1 = vpop.permute.xlu0 %654 }
 0x276   :  { %14911 = vst [vmem:[#allocation173_spill] sm:$0xff] %v8511_v42 }
 0x277   :  { %14912 = vst [vmem:[#allocation174_spill] sm:$0xff] %v8513_v1 }
 0x27a   :  { %778 = vrot.lane.b32.xlu1 %v7572_v12, %s7449_s30  ;;  %780 = vrot.lane.b32.xlu2 %v7603_v17, %s7449_s30 }
 0x27b   :  { %776 = vrot.lane.b32.xlu0 %v7577_v13, %s7449_s30 }
 0x27c   :  { %v8521_v9 = vpop.permute.xlu1 %662  ;;  %v8523_v59 = vpop.permute.xlu2 %682 }
 0x27d   :  { %14913 = vst [vmem:[#allocation175_spill] sm:$0xff] %v8521_v9  ;;  %v8525_v3 = vpop.permute.xlu0 %660 }
 0x27e   :  { %14914 = vst [vmem:[#allocation176_spill] sm:$0xff] %v8525_v3 }
 0x282   :  { %784 = vrot.lane.b32.xlu1 %v7593_v15, %s7449_s30  ;;  %786 = vrot.lane.b32.xlu2 %v7624_v20, %s7449_s30 }
 0x283   :  { %782 = vrot.lane.b32.xlu0 %v7598_v16, %s7449_s30 }
 0x284   :  { %v8533_v12 = vpop.permute.xlu1 %668  ;;  %v8535_v42 = vpop.permute.xlu2 %688 }
 0x285   :  { %14915 = vst [vmem:[#allocation177_spill] sm:$0xff] %v8533_v12  ;;  %v8537_v6 = vpop.permute.xlu0 %666 }
 0x286   :  { %14916 = vst [vmem:[#allocation178_spill] sm:$0xff] %v8535_v42  ;;  %v9001_v42 = vld [vmem:[%s14701_s0 + $0xf0] sm:$0xff] }
 0x287   :  { %14917 = vst [vmem:[#allocation179_spill] sm:$0xff] %v8537_v6 }
 0x28a   :  { %790 = vrot.lane.b32.xlu1 %v7614_v18, %s7449_s30  ;;  %792 = vrot.lane.b32.xlu2 %v7645_v23, %s7449_s30 }
 0x28b   :  { %788 = vrot.lane.b32.xlu0 %v7619_v19, %s7449_s30 }
 0x28c   :  { %v8545_v15 = vpop.permute.xlu1 %674  ;;  %v8547_v9 = vpop.permute.xlu2 %694 }
 0x28d   :  { %14918 = vst [vmem:[#allocation180_spill] sm:$0xff] %v8545_v15  ;;  %v8549_v58 = vpop.permute.xlu0 %672 }
 0x28e   :  { %14919 = vst [vmem:[#allocation181_spill] sm:$0xff] %v8547_v9  ;;  %v8975_v9 = vld [vmem:[%s14701_s0 + $0xe0] sm:$0xff] }
 0x28f   :  { %14920 = vst [vmem:[#allocation182_spill] sm:$0xff] %v8549_v58 }
 0x292   :  { %796 = vrot.lane.b32.xlu1 %v7635_v21, %s7449_s30  ;;  %798 = vrot.lane.b32.xlu2 %v7666_v26, %s7449_s30 }
 0x293   :  { %794 = vrot.lane.b32.xlu0 %v7640_v22, %s7449_s30 }
 0x294   :  { %v8557_v18 = vpop.permute.xlu1 %680  ;;  %v8559_v12 = vpop.permute.xlu2 %700 }
 0x295   :  { %14921 = vst [vmem:[#allocation183_spill] sm:$0xff] %v8557_v18  ;;  %v8561_v6 = vpop.permute.xlu0 %678  ;;  %v8940_v18 = vld [vmem:[%s14701_s0 + $0xa8] sm:$0xff] }
 0x296   :  { %14922 = vst [vmem:[#allocation184_spill] sm:$0xff] %v8559_v12  ;;  %v8931_v12 = vld [vmem:[%s14701_s0 + $0xb0] sm:$0xff] }
 0x297   :  { %14923 = vst [vmem:[#allocation185_spill] sm:$0xff] %v8561_v6 }
 0x29a   :  { %802 = vrot.lane.b32.xlu1 %v7656_v24, %s7449_s30  ;;  %804 = vrot.lane.b32.xlu2 %v7687_v29, %s7449_s30 }
 0x29b   :  { %800 = vrot.lane.b32.xlu0 %v7661_v25, %s7449_s30 }
 0x29c   :  { %v8569_v21 = vpop.permute.xlu1 %686  ;;  %v8571_v15 = vpop.permute.xlu2 %706 }
 0x29d   :  { %14924 = vst [vmem:[#allocation186_spill] sm:$0xff] %v8569_v21  ;;  %v8573_v58 = vpop.permute.xlu0 %684  ;;  %v8887_v21 = vld [vmem:[%s14701_s0 + $0x80] sm:$0xff] }
 0x29e   :  { %14925 = vst [vmem:[#allocation187_spill] sm:$0xff] %v8571_v15  ;;  %v8874_v15 = vld [vmem:[%s14701_s0 + $0x60] sm:$0xff] }
 0x29f   :  { %14926 = vst [vmem:[#allocation188_spill] sm:$0xff] %v8573_v58  ;;  %v8865_v58 = vld [vmem:[%s14701_s0 + $0x68] sm:$0xff] }
 0x2a2   :  { %808 = vrot.lane.b32.xlu1 %v7677_v27, %s7449_s30  ;;  %810 = vrot.lane.b32.xlu2 %v7703_v31, %s7449_s30 }
 0x2a3   :  { %806 = vrot.lane.b32.xlu0 %v7682_v28, %s7449_s30 }
 0x2a4   :  { %v8581_v24 = vpop.permute.xlu1 %692  ;;  %v8583_v6 = vpop.permute.xlu2 %712 }
 0x2a5   :  { %14927 = vst [vmem:[#allocation189_spill] sm:$0xff] %v8581_v24  ;;  %v8585_v3 = vpop.permute.xlu0 %690  ;;  %v8830_v24 = vld [vmem:[%s14701_s0 + $0x30] sm:$0xff] }
 0x2a6   :  { %14928 = vst [vmem:[#allocation190_spill] sm:$0xff] %v8583_v6 }
 0x2a7   :  { %14929 = vst [vmem:[#allocation191_spill] sm:$0xff] %v8585_v3  ;;  %v8604_v3 = vld [vmem:[%s14701_s0 + $0x20] sm:$0xff] }
 0x2aa   :  { %846 = vrot.lane.b32.xlu1 %v7498_v2, %s7450_s4  ;;  %848 = vrot.lane.b32.xlu2 %v7519_v5, %s7450_s4  ;;  %v8611_v2 = vld [vmem:[%s14701_s0 + $0x10] sm:$0xff] }
 0x2ab   :  { %812 = vrot.lane.b32.xlu0 %v7698_v30, %s7449_s30 }
 0x2ac   :  { %v8593_v27 = vpop.permute.xlu1 %698  ;;  %v8595_v1 = vpop.permute.xlu2 %750 }
 0x2ad   :  { %14930 = vst [vmem:[#allocation192_spill] sm:$0xff] %v8593_v27  ;;  %v8597_v0 = vpop.permute.xlu0 %696 }
 0x2ae   :  { %14931 = vst [vmem:[#allocation193_spill] sm:$0xff] %v8595_v1 }
 0x2af   :  { %14932 = vst [vmem:[#allocation194_spill] sm:$0xff] %v8597_v0  ;;  %v8628_v0 = vld [vmem:[%s14701_s0 + $0x28] sm:$0xff] }
 0x2b2   :  { %852 = vrot.lane.b32.xlu1 %v7514_v4, %s7450_s4  ;;  %854 = vrot.lane.b32.xlu2 %v8604_v3, %s7450_s4 }
 0x2b3   :  { %850 = vrot.lane.b32.xlu0 %v8611_v2, %s7450_s4 }
 0x2b4   :  { %v8615_v5 = vpop.permute.xlu1 %704  ;;  %v8617_v30 = vpop.permute.xlu2 %756 }
 0x2b5   :  { %14933 = vst [vmem:[#allocation195_spill] sm:$0xff] %v8615_v5  ;;  %v8619_v4 = vpop.permute.xlu0 %702 }
 0x2b6   :  { %14934 = vst [vmem:[#allocation196_spill] sm:$0xff] %v8617_v30 }
 0x2b7   :  { %14935 = vst [vmem:[#allocation197_spill] sm:$0xff] %v8619_v4  ;;  %v8791_v4 = vld [vmem:[%s14701_s0] sm:$0xff] }
 0x2ba   :  { %858 = vrot.lane.b32.xlu1 %v7540_v8, %s7450_s4  ;;  %860 = vrot.lane.b32.xlu2 %v7535_v7, %s7450_s4  ;;  %v8645_v7 = vld [vmem:[%s14701_s0 + $0x40] sm:$0xff] }
 0x2bb   :  { %856 = vrot.lane.b32.xlu0 %v8628_v0, %s7450_s4 }
 0x2bc   :  { %v8632_v1 = vpop.permute.xlu1 %710  ;;  %v8634_v5 = vpop.permute.xlu2 %762 }
 0x2bd   :  { %14936 = vst [vmem:[#allocation198_spill] sm:$0xff] %v8632_v1  ;;  %v8636_v30 = vpop.permute.xlu0 %708 }
 0x2be   :  { %14937 = vst [vmem:[#allocation199_spill] sm:$0xff] %v8634_v5 }
 0x2bf   :  { %14938 = vst [vmem:[#allocation200_spill] sm:$0xff] %v8636_v30 }
 0x2c2   :  { %864 = vrot.lane.b32.xlu1 %v7561_v11, %s7450_s4  ;;  %866 = vrot.lane.b32.xlu2 %v7556_v10, %s7450_s4  ;;  %v8662_v10 = vld [vmem:[%s14701_s0 + $0x58] sm:$0xff] }
 0x2c3   :  { %862 = vrot.lane.b32.xlu0 %v8645_v7, %s7450_s4 }
 0x2c4   :  { %v8649_v8 = vpop.permute.xlu1 %716  ;;  %v8651_v1 = vpop.permute.xlu2 %768 }
 0x2c5   :  { %14939 = vst [vmem:[#allocation201_spill] sm:$0xff] %v8649_v8  ;;  %v8653_v5 = vpop.permute.xlu0 %714 }
 0x2c6   :  { %14940 = vst [vmem:[#allocation202_spill] sm:$0xff] %v8651_v1 }
 0x2c7   :  { %14941 = vst [vmem:[#allocation203_spill] sm:$0xff] %v8653_v5 }
 0x2ca   :  { %870 = vrot.lane.b32.xlu1 %v7582_v14, %s7450_s4  ;;  %872 = vrot.lane.b32.xlu2 %v7577_v13, %s7450_s4  ;;  %v8679_v13 = vld [vmem:[%s14701_s0 + $0x70] sm:$0xff] }
 0x2cb   :  { %868 = vrot.lane.b32.xlu0 %v8662_v10, %s7450_s4 }
 0x2cc   :  { %v8666_v11 = vpop.permute.xlu1 %754  ;;  %v8668_v8 = vpop.permute.xlu2 %774 }
 0x2cd   :  { %14942 = vst [vmem:[#allocation204_spill] sm:$0xff] %v8666_v11  ;;  %v8670_v1 = vpop.permute.xlu0 %752 }
 0x2ce   :  { %14943 = vst [vmem:[#allocation205_spill] sm:$0xff] %v8668_v8 }
 0x2cf   :  { %14944 = vst [vmem:[#allocation206_spill] sm:$0xff] %v8670_v1 }
 0x2d2   :  { %876 = vrot.lane.b32.xlu1 %v7603_v17, %s7450_s4  ;;  %878 = vrot.lane.b32.xlu2 %v7598_v16, %s7450_s4  ;;  %v8696_v16 = vld [vmem:[%s14701_s0 + $0x88] sm:$0xff] }
 0x2d3   :  { %874 = vrot.lane.b32.xlu0 %v8679_v13, %s7450_s4 }
 0x2d4   :  { %v8683_v14 = vpop.permute.xlu1 %760  ;;  %v8685_v11 = vpop.permute.xlu2 %780 }
 0x2d5   :  { %14945 = vst [vmem:[#allocation207_spill] sm:$0xff] %v8683_v14  ;;  %v8687_v8 = vpop.permute.xlu0 %758 }
 0x2d6   :  { %14946 = vst [vmem:[#allocation208_spill] sm:$0xff] %v8685_v11 }
 0x2d7   :  { %14947 = vst [vmem:[#allocation209_spill] sm:$0xff] %v8687_v8 }
 0x2da   :  { %882 = vrot.lane.b32.xlu1 %v7624_v20, %s7450_s4  ;;  %884 = vrot.lane.b32.xlu2 %v7619_v19, %s7450_s4  ;;  %v8713_v19 = vld [vmem:[%s14701_s0 + $0xa0] sm:$0xff] }
 0x2db   :  { %880 = vrot.lane.b32.xlu0 %v8696_v16, %s7450_s4 }
 0x2dc   :  { %v8700_v17 = vpop.permute.xlu1 %766  ;;  %v8702_v14 = vpop.permute.xlu2 %786 }
 0x2dd   :  { %14948 = vst [vmem:[#allocation210_spill] sm:$0xff] %v8700_v17  ;;  %v8704_v1 = vpop.permute.xlu0 %764 }
 0x2de   :  { %14949 = vst [vmem:[#allocation211_spill] sm:$0xff] %v8702_v14  ;;  %v8808_v14 = vld [vmem:[%s14701_s0 + $0x18] sm:$0xff] }
 0x2df   :  { %14950 = vst [vmem:[#allocation212_spill] sm:$0xff] %v8704_v1 }
 0x2e2   :  { %888 = vrot.lane.b32.xlu1 %v7645_v23, %s7450_s4  ;;  %890 = vrot.lane.b32.xlu2 %v7640_v22, %s7450_s4  ;;  %v8730_v22 = vld [vmem:[%s14701_s0 + $0xb8] sm:$0xff] }
 0x2e3   :  { %886 = vrot.lane.b32.xlu0 %v8713_v19, %s7450_s4 }
 0x2e4   :  { %v8717_v20 = vpop.permute.xlu1 %772  ;;  %v8719_v17 = vpop.permute.xlu2 %792 }
 0x2e5   :  { %14951 = vst [vmem:[#allocation213_spill] sm:$0xff] %v8717_v20  ;;  %v8721_v8 = vpop.permute.xlu0 %770 }
 0x2e6   :  { %14952 = vst [vmem:[#allocation214_spill] sm:$0xff] %v8719_v17 }
 0x2e7   :  { %14953 = vst [vmem:[#allocation215_spill] sm:$0xff] %v8721_v8 }
 0x2ea   :  { %894 = vrot.lane.b32.xlu1 %v7666_v26, %s7450_s4  ;;  %896 = vrot.lane.b32.xlu2 %v7661_v25, %s7450_s4  ;;  %v8747_v25 = vld [vmem:[%s14701_s0 + $0xd0] sm:$0xff] }
 0x2eb   :  { %892 = vrot.lane.b32.xlu0 %v8730_v22, %s7450_s4 }
 0x2ec   :  { %v8734_v23 = vpop.permute.xlu1 %778  ;;  %v8736_v20 = vpop.permute.xlu2 %798 }
 0x2ed   :  { %14954 = vst [vmem:[#allocation216_spill] sm:$0xff] %v8734_v23  ;;  %v8738_v1 = vpop.permute.xlu0 %776 }
 0x2ee   :  { %14955 = vst [vmem:[#allocation217_spill] sm:$0xff] %v8736_v20  ;;  %v8782_v20 = vld [vmem:[%s14701_s0 + $0x8] sm:$0xff] }
 0x2ef   :  { %14956 = vst [vmem:[#allocation218_spill] sm:$0xff] %v8738_v1  ;;  %v8918_v1 = vld [vmem:[%s14701_s0 + $0x90] sm:$0xff] }
 0x2f2   :  { %900 = vrot.lane.b32.xlu1 %v7687_v29, %s7450_s4  ;;  %902 = vrot.lane.b32.xlu2 %v7682_v28, %s7450_s4  ;;  %v8762_v28 = vld [vmem:[%s14701_s0 + $0xf8] sm:$0xff]  ;;  %v8769_v29 = vld [vmem:[%s14701_s0 + $0xe8] sm:$0xff] }
 0x2f3   :  { %898 = vrot.lane.b32.xlu0 %v8747_v25, %s7450_s4 }
 0x2f4   :  { %v8751_v26 = vpop.permute.xlu1 %784  ;;  %v8753_v8 = vpop.permute.xlu2 %804 }
 0x2f5   :  { %14957 = vst [vmem:[#allocation219_spill] sm:$0xff] %v8751_v26  ;;  %v8755_v5 = vpop.permute.xlu0 %782 }
 0x2f6   :  { %14958 = vst [vmem:[#allocation220_spill] sm:$0xff] %v8753_v8 }
 0x2f7   :  { %14959 = vst [vmem:[#allocation221_spill] sm:$0xff] %v8755_v5  ;;  %v8852_v5 = vld [vmem:[%s14701_s0 + $0x48] sm:$0xff] }
 0x2fa   :  { %906 = vrot.lane.b32.xlu1 %v7703_v31, %s7450_s4  ;;  %908 = vrot.lane.b32.xlu2 %v8762_v28, %s7450_s4 }
 0x2fb   :  { %904 = vrot.lane.b32.xlu0 %v8769_v29, %s7450_s4 }
 0x2fc   :  { %v8773_v8 = vpop.permute.xlu1 %790  ;;  %v8775_v30 = vpop.permute.xlu2 %810 }
 0x2fd   :  { %14960 = vst [vmem:[#allocation222_spill] sm:$0xff] %v8773_v8  ;;  %v8777_v31 = vpop.permute.xlu0 %788  ;;  %v8962_v8 = vld [vmem:[%s14701_s0 + $0xc0] sm:$0xff] }
 0x2fe   :  { %14961 = vst [vmem:[#allocation223_spill] sm:$0xff] %v8775_v30 }
 0x2ff   :  { %14962 = vst [vmem:[#allocation224_spill] sm:$0xff] %v8777_v31 }
 0x302   :  { %944 = vrot.lane.b32.xlu1 %v8782_v20, %s7451_s5  ;;  %946 = vrot.lane.b32.xlu2 %v8611_v2, %s7451_s5 }
 0x303   :  { %942 = vrot.lane.b32.xlu0 %v8791_v4, %s7451_s5 }
 0x304   :  { %v8795_v30 = vpop.permute.xlu1 %796  ;;  %v8797_v17 = vpop.permute.xlu2 %848 }
 0x305   :  { %14963 = vst [vmem:[#allocation225_spill] sm:$0xff] %v8795_v30  ;;  %v8799_v27 = vpop.permute.xlu0 %794  ;;  %v8909_v30 = vld [vmem:[%s14701_s0 + $0x98] sm:$0xff] }
 0x306   :  { %14964 = vst [vmem:[#allocation226_spill] sm:$0xff] %v8797_v17 }
 0x307   :  { %14965 = vst [vmem:[#allocation227_spill] sm:$0xff] %v8799_v27  ;;  %v8821_v27 = vld [vmem:[%s14701_s0 + $0x38] sm:$0xff] }
 0x30a   :  { %950 = vrot.lane.b32.xlu1 %v8604_v3, %s7451_s5  ;;  %952 = vrot.lane.b32.xlu2 %v8628_v0, %s7451_s5 }
 0x30b   :  { %948 = vrot.lane.b32.xlu0 %v8808_v14, %s7451_s5 }
 0x30c   :  { %v8812_v31 = vpop.permute.xlu1 %802  ;;  %v8814_v6 = vpop.permute.xlu2 %854 }
 0x30d   :  { %14966 = vst [vmem:[#allocation228_spill] sm:$0xff] %v8812_v31  ;;  %v8816_v17 = vpop.permute.xlu0 %800  ;;  %v8843_v31 = vld [vmem:[%s14701_s0 + $0x50] sm:$0xff] }
 0x30e   :  { %14967 = vst [vmem:[#allocation229_spill] sm:$0xff] %v8814_v6 }
 0x30f   :  { %14968 = vst [vmem:[#allocation230_spill] sm:$0xff] %v8816_v17 }
 0x312   :  { %956 = vrot.lane.b32.xlu1 %v8821_v27, %s7451_s5  ;;  %958 = vrot.lane.b32.xlu2 %v8645_v7, %s7451_s5 }
 0x313   :  { %954 = vrot.lane.b32.xlu0 %v8830_v24, %s7451_s5 }
 0x314   :  { %v8834_v6 = vpop.permute.xlu1 %808  ;;  %v8836_v17 = vpop.permute.xlu2 %860 }
 0x315   :  { %14969 = vst [vmem:[#allocation231_spill] sm:$0xff] %v8834_v6  ;;  %v8838_v11 = vpop.permute.xlu0 %806 }
 0x316   :  { %14970 = vst [vmem:[#allocation232_spill] sm:$0xff] %v8836_v17 }
 0x317   :  { %14971 = vst [vmem:[#allocation233_spill] sm:$0xff] %v8838_v11 }
 0x31a   :  { %962 = vrot.lane.b32.xlu1 %v8843_v31, %s7451_s5  ;;  %964 = vrot.lane.b32.xlu2 %v8662_v10, %s7451_s5 }
 0x31b   :  { %960 = vrot.lane.b32.xlu0 %v8852_v5, %s7451_s5 }
 0x31c   :  { %v8856_v17 = vpop.permute.xlu1 %846  ;;  %v8858_v11 = vpop.permute.xlu2 %866 }
 0x31d   :  { %14972 = vst [vmem:[#allocation234_spill] sm:$0xff] %v8856_v17  ;;  %v8860_v6 = vpop.permute.xlu0 %812 }
 0x31e   :  { %14973 = vst [vmem:[#allocation235_spill] sm:$0xff] %v8858_v11 }
 0x31f   :  { %14974 = vst [vmem:[#allocation236_spill] sm:$0xff] %v8860_v6 }
 0x322   :  { %968 = vrot.lane.b32.xlu1 %v8865_v58, %s7451_s5  ;;  %970 = vrot.lane.b32.xlu2 %v8679_v13, %s7451_s5 }
 0x323   :  { %966 = vrot.lane.b32.xlu0 %v8874_v15, %s7451_s5 }
 0x324   :  { %v8878_v11 = vpop.permute.xlu1 %852  ;;  %v8880_v6 = vpop.permute.xlu2 %872 }
 0x325   :  { %14975 = vst [vmem:[#allocation237_spill] sm:$0xff] %v8878_v11  ;;  %v8882_v17 = vpop.permute.xlu0 %850 }
 0x326   :  { %14976 = vst [vmem:[#allocation238_spill] sm:$0xff] %v8880_v6 }
 0x327   :  { %14977 = vst [vmem:[#allocation239_spill] sm:$0xff] %v8882_v17 }
 0x32a   :  { %974 = vrot.lane.b32.xlu1 %v8887_v21, %s7451_s5  ;;  %976 = vrot.lane.b32.xlu2 %v8696_v16, %s7451_s5 }
 0x32b   :  { %972 = vrot.lane.b32.xlu0 %v8896_v60, %s7451_s5 }
 0x32c   :  { %v8900_v17 = vpop.permute.xlu1 %858  ;;  %v8902_v11 = vpop.permute.xlu2 %878 }
 0x32d   :  { %14978 = vst [vmem:[#allocation240_spill] sm:$0xff] %v8900_v17  ;;  %v8904_v6 = vpop.permute.xlu0 %856 }
 0x32e   :  { %14979 = vst [vmem:[#allocation241_spill] sm:$0xff] %v8902_v11 }
 0x32f   :  { %14980 = vst [vmem:[#allocation242_spill] sm:$0xff] %v8904_v6 }
 0x332   :  { %980 = vrot.lane.b32.xlu1 %v8909_v30, %s7451_s5  ;;  %982 = vrot.lane.b32.xlu2 %v8713_v19, %s7451_s5 }
 0x333   :  { %978 = vrot.lane.b32.xlu0 %v8918_v1, %s7451_s5 }
 0x334   :  { %v8922_v6 = vpop.permute.xlu1 %864  ;;  %v8924_v17 = vpop.permute.xlu2 %884 }
 0x335   :  { %14981 = vst [vmem:[#allocation243_spill] sm:$0xff] %v8922_v6  ;;  %v8926_v11 = vpop.permute.xlu0 %862 }
 0x336   :  { %14982 = vst [vmem:[#allocation244_spill] sm:$0xff] %v8924_v17 }
 0x337   :  { %14983 = vst [vmem:[#allocation245_spill] sm:$0xff] %v8926_v11 }
 0x33a   :  { %986 = vrot.lane.b32.xlu1 %v8931_v12, %s7451_s5  ;;  %988 = vrot.lane.b32.xlu2 %v8730_v22, %s7451_s5 }
 0x33b   :  { %984 = vrot.lane.b32.xlu0 %v8940_v18, %s7451_s5 }
 0x33c   :  { %v8944_v11 = vpop.permute.xlu1 %870  ;;  %v8946_v6 = vpop.permute.xlu2 %890 }
 0x33d   :  { %14984 = vst [vmem:[#allocation246_spill] sm:$0xff] %v8944_v11  ;;  %v8948_v17 = vpop.permute.xlu0 %868 }
 0x33e   :  { %14985 = vst [vmem:[#allocation247_spill] sm:$0xff] %v8946_v6 }
 0x33f   :  { %14986 = vst [vmem:[#allocation248_spill] sm:$0xff] %v8948_v17 }
 0x342   :  { %992 = vrot.lane.b32.xlu1 %v8953_v61, %s7451_s5  ;;  %994 = vrot.lane.b32.xlu2 %v8747_v25, %s7451_s5 }
 0x343   :  { %990 = vrot.lane.b32.xlu0 %v8962_v8, %s7451_s5 }
 0x344   :  { %v8966_v17 = vpop.permute.xlu1 %876  ;;  %v8968_v11 = vpop.permute.xlu2 %896 }
 0x345   :  { %14987 = vst [vmem:[#allocation249_spill] sm:$0xff] %v8966_v17  ;;  %v8970_v6 = vpop.permute.xlu0 %874 }
 0x346   :  { %14988 = vst [vmem:[#allocation250_spill] sm:$0xff] %v8968_v11 }
 0x347   :  { %14989 = vst [vmem:[#allocation251_spill] sm:$0xff] %v8970_v6 }
 0x34a   :  { %998 = vrot.lane.b32.xlu1 %v8975_v9, %s7451_s5  ;;  %1000 = vrot.lane.b32.xlu2 %v8769_v29, %s7451_s5 }
 0x34b   :  { %996 = vrot.lane.b32.xlu0 %v8984_v57, %s7451_s5 }
 0x34c   :  { %v8988_v11 = vpop.permute.xlu1 %882  ;;  %v8990_v17 = vpop.permute.xlu2 %902 }
 0x34d   :  { %14991 = vst [vmem:[#allocation253_spill] sm:$0xff] %v8988_v11  ;;  %v8992_v26 = vpop.permute.xlu0 %880 }
 0x34e   :  { %14992 = vst [vmem:[#allocation254_spill] sm:$0xff] %v8990_v17 }
 0x34f   :  { %14993 = vst [vmem:[#allocation255_spill] sm:$0xff] %v8992_v26 }
 0x352   :  { %1004 = vrot.lane.b32.xlu1 %v8762_v28, %s7451_s5  ;;  %1038 = vrot.lane.b32.xlu2 %v8791_v4, %s7452_s15 }
 0x353   :  { %1002 = vrot.lane.b32.xlu0 %v9001_v42, %s7451_s5  ;;  %s7453_s5 = smov 24  }
 0x354   :  { %v9005_v11 = vpop.permute.xlu1 %888  ;;  %v9007_v17 = vpop.permute.xlu2 %908 }
 0x355   :  { %14994 = vst [vmem:[#allocation256_spill] sm:$0xff] %v9005_v11  ;;  %v9009_v26 = vpop.permute.xlu0 %886 }
 0x356   :  { %14995 = vst [vmem:[#allocation257_spill] sm:$0xff] %v9007_v17 }
 0x357   :  { %14996 = vst [vmem:[#allocation258_spill] sm:$0xff] %v9009_v26 }
 0x35a   :  { %1042 = vrot.lane.b32.xlu1 %v8611_v2, %s7452_s15  ;;  %1044 = vrot.lane.b32.xlu2 %v8808_v14, %s7452_s15 }
 0x35b   :  { %1040 = vrot.lane.b32.xlu0 %v8782_v20, %s7452_s15 }
 0x35c   :  { %v9017_v6 = vpop.permute.xlu1 %894  ;;  %v9019_v23 = vpop.permute.xlu2 %946 }
 0x35d   :  { %14997 = vst [vmem:[#allocation259_spill] sm:$0xff] %v9017_v6  ;;  %v9021_v56 = vpop.permute.xlu0 %892 }
 0x35e   :  { %14998 = vst [vmem:[#allocation260_spill] sm:$0xff] %v9019_v23 }
 0x35f   :  { %14999 = vst [vmem:[#allocation261_spill] sm:$0xff] %v9021_v56 }
 0x362   :  { %1048 = vrot.lane.b32.xlu1 %v8628_v0, %s7452_s15  ;;  %1050 = vrot.lane.b32.xlu2 %v8830_v24, %s7452_s15 }
 0x363   :  { %1046 = vrot.lane.b32.xlu0 %v8604_v3, %s7452_s15 }
 0x364   :  { %v9029_v17 = vpop.permute.xlu1 %900  ;;  %v9031_v11 = vpop.permute.xlu2 %952 }
 0x365   :  { %15000 = vst [vmem:[#allocation262_spill] sm:$0xff] %v9029_v17  ;;  %v9033_v26 = vpop.permute.xlu0 %898 }
 0x366   :  { %15001 = vst [vmem:[#allocation263_spill] sm:$0xff] %v9031_v11 }
 0x367   :  { %15002 = vst [vmem:[#allocation264_spill] sm:$0xff] %v9033_v26 }
 0x36a   :  { %1054 = vrot.lane.b32.xlu1 %v8645_v7, %s7452_s15  ;;  %1056 = vrot.lane.b32.xlu2 %v8852_v5, %s7452_s15 }
 0x36b   :  { %1052 = vrot.lane.b32.xlu0 %v8821_v27, %s7452_s15 }
 0x36c   :  { %v9041_v23 = vpop.permute.xlu1 %906  ;;  %v9043_v6 = vpop.permute.xlu2 %958 }
 0x36d   :  { %15003 = vst [vmem:[#allocation265_spill] sm:$0xff] %v9041_v23  ;;  %v9045_v56 = vpop.permute.xlu0 %904 }
 0x36e   :  { %15004 = vst [vmem:[#allocation266_spill] sm:$0xff] %v9043_v6 }
 0x36f   :  { %15005 = vst [vmem:[#allocation267_spill] sm:$0xff] %v9045_v56 }
 0x372   :  { %1060 = vrot.lane.b32.xlu1 %v8662_v10, %s7452_s15  ;;  %1062 = vrot.lane.b32.xlu2 %v8874_v15, %s7452_s15 }
 0x373   :  { %1058 = vrot.lane.b32.xlu0 %v8843_v31, %s7452_s15 }
 0x374   :  { %v9053_v11 = vpop.permute.xlu1 %944  ;;  %v9055_v17 = vpop.permute.xlu2 %964 }
 0x375   :  { %15006 = vst [vmem:[#allocation268_spill] sm:$0xff] %v9053_v11  ;;  %v9057_v26 = vpop.permute.xlu0 %942 }
 0x376   :  { %15007 = vst [vmem:[#allocation269_spill] sm:$0xff] %v9055_v17 }
 0x377   :  { %15008 = vst [vmem:[#allocation270_spill] sm:$0xff] %v9057_v26 }
 0x37a   :  { %1066 = vrot.lane.b32.xlu1 %v8679_v13, %s7452_s15  ;;  %1068 = vrot.lane.b32.xlu2 %v8896_v60, %s7452_s15 }
 0x37b   :  { %1064 = vrot.lane.b32.xlu0 %v8865_v58, %s7452_s15 }
 0x37c   :  { %v9065_v6 = vpop.permute.xlu1 %950  ;;  %v9067_v23 = vpop.permute.xlu2 %970 }
 0x37d   :  { %15009 = vst [vmem:[#allocation271_spill] sm:$0xff] %v9065_v6  ;;  %v9069_v56 = vpop.permute.xlu0 %948 }
 0x37e   :  { %15010 = vst [vmem:[#allocation272_spill] sm:$0xff] %v9067_v23 }
 0x37f   :  { %15011 = vst [vmem:[#allocation273_spill] sm:$0xff] %v9069_v56 }
 0x382   :  { %1072 = vrot.lane.b32.xlu1 %v8696_v16, %s7452_s15  ;;  %1074 = vrot.lane.b32.xlu2 %v8918_v1, %s7452_s15 }
 0x383   :  { %1070 = vrot.lane.b32.xlu0 %v8887_v21, %s7452_s15 }
 0x384   :  { %v9077_v17 = vpop.permute.xlu1 %956  ;;  %v9079_v11 = vpop.permute.xlu2 %976 }
 0x385   :  { %15012 = vst [vmem:[#allocation274_spill] sm:$0xff] %v9077_v17  ;;  %v9081_v26 = vpop.permute.xlu0 %954 }
 0x386   :  { %15013 = vst [vmem:[#allocation275_spill] sm:$0xff] %v9079_v11 }
 0x387   :  { %15014 = vst [vmem:[#allocation276_spill] sm:$0xff] %v9081_v26 }
 0x38a   :  { %1078 = vrot.lane.b32.xlu1 %v8713_v19, %s7452_s15  ;;  %1080 = vrot.lane.b32.xlu2 %v8940_v18, %s7452_s15 }
 0x38b   :  { %1076 = vrot.lane.b32.xlu0 %v8909_v30, %s7452_s15 }
 0x38c   :  { %v9089_v6 = vpop.permute.xlu1 %962  ;;  %v9091_v56 = vpop.permute.xlu2 %982 }
 0x38d   :  { %15015 = vst [vmem:[#allocation277_spill] sm:$0xff] %v9089_v6  ;;  %v9093_v23 = vpop.permute.xlu0 %960 }
 0x38e   :  { %15016 = vst [vmem:[#allocation278_spill] sm:$0xff] %v9091_v56 }
 0x38f   :  { %15017 = vst [vmem:[#allocation279_spill] sm:$0xff] %v9093_v23 }
 0x392   :  { %1084 = vrot.lane.b32.xlu1 %v8730_v22, %s7452_s15  ;;  %1086 = vrot.lane.b32.xlu2 %v8962_v8, %s7452_s15 }
 0x393   :  { %1082 = vrot.lane.b32.xlu0 %v8931_v12, %s7452_s15 }
 0x394   :  { %v9101_v17 = vpop.permute.xlu1 %968  ;;  %v9103_v26 = vpop.permute.xlu2 %988 }
 0x395   :  { %15018 = vst [vmem:[#allocation280_spill] sm:$0xff] %v9101_v17  ;;  %v9105_v11 = vpop.permute.xlu0 %966 }
 0x396   :  { %15019 = vst [vmem:[#allocation281_spill] sm:$0xff] %v9103_v26 }
 0x397   :  { %15020 = vst [vmem:[#allocation282_spill] sm:$0xff] %v9105_v11 }
 0x39a   :  { %1090 = vrot.lane.b32.xlu1 %v8747_v25, %s7452_s15  ;;  %1092 = vrot.lane.b32.xlu2 %v8984_v57, %s7452_s15 }
 0x39b   :  { %1088 = vrot.lane.b32.xlu0 %v8953_v61, %s7452_s15 }
 0x39c   :  { %v9113_v6 = vpop.permute.xlu1 %974  ;;  %v9115_v23 = vpop.permute.xlu2 %994 }
 0x39d   :  { %15021 = vst [vmem:[#allocation283_spill] sm:$0xff] %v9113_v6  ;;  %v9117_v56 = vpop.permute.xlu0 %972 }
 0x39e   :  { %15022 = vst [vmem:[#allocation284_spill] sm:$0xff] %v9115_v23 }
 0x39f   :  { %15023 = vst [vmem:[#allocation285_spill] sm:$0xff] %v9117_v56 }
 0x3a2   :  { %1096 = vrot.lane.b32.xlu1 %v8769_v29, %s7452_s15  ;;  %1098 = vrot.lane.b32.xlu2 %v9001_v42, %s7452_s15 }
 0x3a3   :  { %1094 = vrot.lane.b32.xlu0 %v8975_v9, %s7452_s15 }
 0x3a4   :  { %v9125_v11 = vpop.permute.xlu1 %980  ;;  %v9127_v26 = vpop.permute.xlu2 %1000 }
 0x3a5   :  { %15024 = vst [vmem:[#allocation286_spill] sm:$0xff] %v9125_v11  ;;  %v9129_v17 = vpop.permute.xlu0 %978 }
 0x3a6   :  { %15025 = vst [vmem:[#allocation287_spill] sm:$0xff] %v9127_v26 }
 0x3a7   :  { %15026 = vst [vmem:[#allocation288_spill] sm:$0xff] %v9129_v17 }
 0x3aa   :  { %1134 = vrot.lane.b32.xlu1 %v8791_v4, %s7453_s5  ;;  %1136 = vrot.lane.b32.xlu2 %v8782_v20, %s7453_s5 }
 0x3ab   :  { %1100 = vrot.lane.b32.xlu0 %v8762_v28, %s7452_s15 }
 0x3ac   :  { %v9137_v56 = vpop.permute.xlu1 %986  ;;  %v9139_v23 = vpop.permute.xlu2 %1038 }
 0x3ad   :  { %15027 = vst [vmem:[#allocation289_spill] sm:$0xff] %v9137_v56  ;;  %v9141_v6 = vpop.permute.xlu0 %984 }
 0x3ae   :  { %15028 = vst [vmem:[#allocation290_spill] sm:$0xff] %v9139_v23 }
 0x3af   :  { %15029 = vst [vmem:[#allocation291_spill] sm:$0xff] %v9141_v6 }
 0x3b2   :  { %1140 = vrot.lane.b32.xlu1 %v8808_v14, %s7453_s5  ;;  %1142 = vrot.lane.b32.xlu2 %v8604_v3, %s7453_s5 }
 0x3b3   :  { %1138 = vrot.lane.b32.xlu0 %v8611_v2, %s7453_s5 }
 0x3b4   :  { %v9149_v17 = vpop.permute.xlu1 %992  ;;  %v9151_v26 = vpop.permute.xlu2 %1044 }
 0x3b5   :  { %15030 = vst [vmem:[#allocation292_spill] sm:$0xff] %v9149_v17  ;;  %v9153_v11 = vpop.permute.xlu0 %990 }
 0x3b6   :  { %15031 = vst [vmem:[#allocation293_spill] sm:$0xff] %v9151_v26 }
 0x3b7   :  { %15032 = vst [vmem:[#allocation294_spill] sm:$0xff] %v9153_v11 }
 0x3ba   :  { %1146 = vrot.lane.b32.xlu1 %v8830_v24, %s7453_s5  ;;  %1148 = vrot.lane.b32.xlu2 %v8821_v27, %s7453_s5 }
 0x3bb   :  { %1144 = vrot.lane.b32.xlu0 %v8628_v0, %s7453_s5 }
 0x3bc   :  { %v9161_v6 = vpop.permute.xlu1 %998  ;;  %v9163_v23 = vpop.permute.xlu2 %1050 }
 0x3bd   :  { %15033 = vst [vmem:[#allocation295_spill] sm:$0xff] %v9161_v6  ;;  %v9165_v56 = vpop.permute.xlu0 %996 }
 0x3be   :  { %15034 = vst [vmem:[#allocation296_spill] sm:$0xff] %v9163_v23 }
 0x3bf   :  { %15035 = vst [vmem:[#allocation297_spill] sm:$0xff] %v9165_v56 }
 0x3c2   :  { %1152 = vrot.lane.b32.xlu1 %v8852_v5, %s7453_s5  ;;  %1154 = vrot.lane.b32.xlu2 %v8843_v31, %s7453_s5 }
 0x3c3   :  { %1150 = vrot.lane.b32.xlu0 %v8645_v7, %s7453_s5 }
 0x3c4   :  { %v9173_v11 = vpop.permute.xlu1 %1004  ;;  %v9175_v26 = vpop.permute.xlu2 %1056 }
 0x3c5   :  { %15036 = vst [vmem:[#allocation298_spill] sm:$0xff] %v9173_v11  ;;  %v9177_v17 = vpop.permute.xlu0 %1002 }
 0x3c6   :  { %15037 = vst [vmem:[#allocation299_spill] sm:$0xff] %v9175_v26 }
 0x3c7   :  { %15038 = vst [vmem:[#allocation300_spill] sm:$0xff] %v9177_v17 }
 0x3ca   :  { %1158 = vrot.lane.b32.xlu1 %v8874_v15, %s7453_s5  ;;  %1160 = vrot.lane.b32.xlu2 %v8865_v58, %s7453_s5 }
 0x3cb   :  { %1156 = vrot.lane.b32.xlu0 %v8662_v10, %s7453_s5 }
 0x3cc   :  { %v9185_v56 = vpop.permute.xlu1 %1042  ;;  %v9187_v23 = vpop.permute.xlu2 %1062 }
 0x3cd   :  { %15039 = vst [vmem:[#allocation301_spill] sm:$0xff] %v9185_v56  ;;  %v9189_v6 = vpop.permute.xlu0 %1040 }
 0x3ce   :  { %15040 = vst [vmem:[#allocation302_spill] sm:$0xff] %v9187_v23 }
 0x3cf   :  { %15041 = vst [vmem:[#allocation303_spill] sm:$0xff] %v9189_v6 }
 0x3d2   :  { %1164 = vrot.lane.b32.xlu1 %v8896_v60, %s7453_s5  ;;  %1166 = vrot.lane.b32.xlu2 %v8887_v21, %s7453_s5 }
 0x3d3   :  { %1162 = vrot.lane.b32.xlu0 %v8679_v13, %s7453_s5 }
 0x3d4   :  { %v9197_v17 = vpop.permute.xlu1 %1048  ;;  %v9199_v26 = vpop.permute.xlu2 %1068 }
 0x3d5   :  { %15042 = vst [vmem:[#allocation304_spill] sm:$0xff] %v9197_v17  ;;  %v9201_v11 = vpop.permute.xlu0 %1046 }
 0x3d6   :  { %15043 = vst [vmem:[#allocation305_spill] sm:$0xff] %v9199_v26 }
 0x3d7   :  { %15044 = vst [vmem:[#allocation306_spill] sm:$0xff] %v9201_v11 }
 0x3da   :  { %1170 = vrot.lane.b32.xlu1 %v8918_v1, %s7453_s5  ;;  %1172 = vrot.lane.b32.xlu2 %v8909_v30, %s7453_s5 }
 0x3db   :  { %1168 = vrot.lane.b32.xlu0 %v8696_v16, %s7453_s5 }
 0x3dc   :  { %v9209_v6 = vpop.permute.xlu1 %1054  ;;  %v9211_v23 = vpop.permute.xlu2 %1074 }
 0x3dd   :  { %15045 = vst [vmem:[#allocation307_spill] sm:$0xff] %v9209_v6  ;;  %v9213_v56 = vpop.permute.xlu0 %1052 }
 0x3de   :  { %15046 = vst [vmem:[#allocation308_spill] sm:$0xff] %v9211_v23 }
 0x3df   :  { %15047 = vst [vmem:[#allocation309_spill] sm:$0xff] %v9213_v56 }
 0x3e2   :  { %1176 = vrot.lane.b32.xlu1 %v8940_v18, %s7453_s5  ;;  %1178 = vrot.lane.b32.xlu2 %v8931_v12, %s7453_s5 }
 0x3e3   :  { %1174 = vrot.lane.b32.xlu0 %v8713_v19, %s7453_s5 }
 0x3e4   :  { %v9221_v11 = vpop.permute.xlu1 %1060  ;;  %v9223_v17 = vpop.permute.xlu2 %1080 }
 0x3e5   :  { %15048 = vst [vmem:[#allocation310_spill] sm:$0xff] %v9221_v11  ;;  %v9225_v26 = vpop.permute.xlu0 %1058 }
 0x3e6   :  { %15049 = vst [vmem:[#allocation311_spill] sm:$0xff] %v9223_v17 }
 0x3e7   :  { %15050 = vst [vmem:[#allocation312_spill] sm:$0xff] %v9225_v26 }
 0x3ea   :  { %1182 = vrot.lane.b32.xlu1 %v8962_v8, %s7453_s5  ;;  %1184 = vrot.lane.b32.xlu2 %v8953_v61, %s7453_s5 }
 0x3eb   :  { %1180 = vrot.lane.b32.xlu0 %v8730_v22, %s7453_s5 }
 0x3ec   :  { %v9233_v56 = vpop.permute.xlu1 %1066  ;;  %v9235_v6 = vpop.permute.xlu2 %1086 }
 0x3ed   :  { %15051 = vst [vmem:[#allocation313_spill] sm:$0xff] %v9233_v56  ;;  %v9237_v23 = vpop.permute.xlu0 %1064 }
 0x3ee   :  { %15052 = vst [vmem:[#allocation314_spill] sm:$0xff] %v9235_v6 }
 0x3ef   :  { %15053 = vst [vmem:[#allocation315_spill] sm:$0xff] %v9237_v23 }
 0x3f2   :  { %1188 = vrot.lane.b32.xlu1 %v8984_v57, %s7453_s5  ;;  %1190 = vrot.lane.b32.xlu2 %v8975_v9, %s7453_s5 }
 0x3f3   :  { %1186 = vrot.lane.b32.xlu0 %v8747_v25, %s7453_s5 }
 0x3f4   :  { %v9245_v26 = vpop.permute.xlu1 %1072  ;;  %v9247_v11 = vpop.permute.xlu2 %1092 }
 0x3f5   :  { %15054 = vst [vmem:[#allocation316_spill] sm:$0xff] %v9245_v26  ;;  %v9249_v17 = vpop.permute.xlu0 %1070 }
 0x3f6   :  { %15055 = vst [vmem:[#allocation317_spill] sm:$0xff] %v9247_v11 }
 0x3f7   :  { %15056 = vst [vmem:[#allocation318_spill] sm:$0xff] %v9249_v17 }
 0x3fa   :  { %1194 = vrot.lane.b32.xlu1 %v9001_v42, %s7453_s5  ;;  %1196 = vrot.lane.b32.xlu2 %v8762_v28, %s7453_s5 }
 0x3fb   :  { %1192 = vrot.lane.b32.xlu0 %v8769_v29, %s7453_s5 }
 0x3fc   :  { %v9257_v6 = vpop.permute.xlu1 %1078  ;;  %v9259_v23 = vpop.permute.xlu2 %1098 }
 0x3fd   :  { %15057 = vst [vmem:[#allocation319_spill] sm:$0xff] %v9257_v6  ;;  %v9261_v56 = vpop.permute.xlu0 %1076 }
 0x3fe   :  { %15058 = vst [vmem:[#allocation320_spill] sm:$0xff] %v9259_v23 }
 0x3ff   :  { %15059 = vst [vmem:[#allocation321_spill] sm:$0xff] %v9261_v56 }
 0x402   :  { %1232 = vrot.lane.b32.xlu1 %v8782_v20, %s7454_s19  ;;  %1234 = vrot.lane.b32.xlu2 %v8611_v2, %s7454_s19 }
 0x403   :  { %1230 = vrot.lane.b32.xlu0 %v8791_v4, %s7454_s19 }
 0x404   :  { %v9269_v11 = vpop.permute.xlu1 %1084  ;;  %v9271_v17 = vpop.permute.xlu2 %1136 }
 0x405   :  { %15060 = vst [vmem:[#allocation322_spill] sm:$0xff] %v9269_v11  ;;  %v9273_v26 = vpop.permute.xlu0 %1082 }
 0x406   :  { %15061 = vst [vmem:[#allocation323_spill] sm:$0xff] %v9271_v17 }
 0x407   :  { %15062 = vst [vmem:[#allocation324_spill] sm:$0xff] %v9273_v26 }
 0x40a   :  { %1238 = vrot.lane.b32.xlu1 %v8604_v3, %s7454_s19  ;;  %1240 = vrot.lane.b32.xlu2 %v8628_v0, %s7454_s19 }
 0x40b   :  { %1236 = vrot.lane.b32.xlu0 %v8808_v14, %s7454_s19 }
 0x40c   :  { %v9281_v23 = vpop.permute.xlu1 %1090  ;;  %v9283_v56 = vpop.permute.xlu2 %1142 }
 0x40d   :  { %15063 = vst [vmem:[#allocation325_spill] sm:$0xff] %v9281_v23  ;;  %v9285_v6 = vpop.permute.xlu0 %1088 }
 0x40e   :  { %15064 = vst [vmem:[#allocation326_spill] sm:$0xff] %v9283_v56 }
 0x40f   :  { %15065 = vst [vmem:[#allocation327_spill] sm:$0xff] %v9285_v6 }
 0x412   :  { %1244 = vrot.lane.b32.xlu1 %v8821_v27, %s7454_s19  ;;  %1246 = vrot.lane.b32.xlu2 %v8645_v7, %s7454_s19 }
 0x413   :  { %1242 = vrot.lane.b32.xlu0 %v8830_v24, %s7454_s19 }
 0x414   :  { %v9293_v17 = vpop.permute.xlu1 %1096  ;;  %v9295_v26 = vpop.permute.xlu2 %1148 }
 0x415   :  { %15066 = vst [vmem:[#allocation328_spill] sm:$0xff] %v9293_v17  ;;  %v9297_v11 = vpop.permute.xlu0 %1094 }
 0x416   :  { %15067 = vst [vmem:[#allocation329_spill] sm:$0xff] %v9295_v26 }
 0x417   :  { %15068 = vst [vmem:[#allocation330_spill] sm:$0xff] %v9297_v11 }
 0x41a   :  { %1250 = vrot.lane.b32.xlu1 %v8843_v31, %s7454_s19  ;;  %1252 = vrot.lane.b32.xlu2 %v8662_v10, %s7454_s19 }
 0x41b   :  { %1248 = vrot.lane.b32.xlu0 %v8852_v5, %s7454_s19 }
 0x41c   :  { %v9305_v56 = vpop.permute.xlu1 %1134  ;;  %v9307_v6 = vpop.permute.xlu2 %1154 }
 0x41d   :  { %15069 = vst [vmem:[#allocation331_spill] sm:$0xff] %v9305_v56  ;;  %v9309_v23 = vpop.permute.xlu0 %1100 }
 0x41e   :  { %15070 = vst [vmem:[#allocation332_spill] sm:$0xff] %v9307_v6 }
 0x41f   :  { %15071 = vst [vmem:[#allocation333_spill] sm:$0xff] %v9309_v23 }
 0x422   :  { %1256 = vrot.lane.b32.xlu1 %v8865_v58, %s7454_s19  ;;  %1258 = vrot.lane.b32.xlu2 %v8679_v13, %s7454_s19 }
 0x423   :  { %1254 = vrot.lane.b32.xlu0 %v8874_v15, %s7454_s19 }
 0x424   :  { %v9317_v26 = vpop.permute.xlu1 %1140  ;;  %v9319_v11 = vpop.permute.xlu2 %1160 }
 0x425   :  { %15072 = vst [vmem:[#allocation334_spill] sm:$0xff] %v9317_v26  ;;  %v9321_v17 = vpop.permute.xlu0 %1138 }
 0x426   :  { %15073 = vst [vmem:[#allocation335_spill] sm:$0xff] %v9319_v11 }
 0x427   :  { %15074 = vst [vmem:[#allocation336_spill] sm:$0xff] %v9321_v17 }
 0x42a   :  { %1262 = vrot.lane.b32.xlu1 %v8887_v21, %s7454_s19  ;;  %1264 = vrot.lane.b32.xlu2 %v8696_v16, %s7454_s19 }
 0x42b   :  { %1260 = vrot.lane.b32.xlu0 %v8896_v60, %s7454_s19 }
 0x42c   :  { %v9329_v6 = vpop.permute.xlu1 %1146  ;;  %v9331_v23 = vpop.permute.xlu2 %1166 }
 0x42d   :  { %15075 = vst [vmem:[#allocation337_spill] sm:$0xff] %v9329_v6  ;;  %v9333_v56 = vpop.permute.xlu0 %1144 }
 0x42e   :  { %15076 = vst [vmem:[#allocation338_spill] sm:$0xff] %v9331_v23 }
 0x42f   :  { %15077 = vst [vmem:[#allocation339_spill] sm:$0xff] %v9333_v56 }
 0x432   :  { %1268 = vrot.lane.b32.xlu1 %v8909_v30, %s7454_s19  ;;  %1270 = vrot.lane.b32.xlu2 %v8713_v19, %s7454_s19 }
 0x433   :  { %1266 = vrot.lane.b32.xlu0 %v8918_v1, %s7454_s19 }
 0x434   :  { %v9341_v17 = vpop.permute.xlu1 %1152  ;;  %v9343_v26 = vpop.permute.xlu2 %1172 }
 0x435   :  { %15078 = vst [vmem:[#allocation340_spill] sm:$0xff] %v9341_v17  ;;  %v9345_v11 = vpop.permute.xlu0 %1150 }
 0x436   :  { %15079 = vst [vmem:[#allocation341_spill] sm:$0xff] %v9343_v26 }
 0x437   :  { %15080 = vst [vmem:[#allocation342_spill] sm:$0xff] %v9345_v11 }
 0x43a   :  { %1274 = vrot.lane.b32.xlu1 %v8931_v12, %s7454_s19  ;;  %1276 = vrot.lane.b32.xlu2 %v8730_v22, %s7454_s19 }
 0x43b   :  { %1272 = vrot.lane.b32.xlu0 %v8940_v18, %s7454_s19 }
 0x43c   :  { %v9353_v56 = vpop.permute.xlu1 %1158  ;;  %v9355_v6 = vpop.permute.xlu2 %1178 }
 0x43d   :  { %15081 = vst [vmem:[#allocation343_spill] sm:$0xff] %v9353_v56  ;;  %v9357_v23 = vpop.permute.xlu0 %1156 }
 0x43e   :  { %15082 = vst [vmem:[#allocation344_spill] sm:$0xff] %v9355_v6 }
 0x43f   :  { %15083 = vst [vmem:[#allocation345_spill] sm:$0xff] %v9357_v23 }
 0x442   :  { %1280 = vrot.lane.b32.xlu1 %v8953_v61, %s7454_s19  ;;  %1282 = vrot.lane.b32.xlu2 %v8747_v25, %s7454_s19 }
 0x443   :  { %1278 = vrot.lane.b32.xlu0 %v8962_v8, %s7454_s19 }
 0x444   :  { %v9365_v11 = vpop.permute.xlu1 %1164  ;;  %v9367_v17 = vpop.permute.xlu2 %1184 }
 0x445   :  { %15084 = vst [vmem:[#allocation346_spill] sm:$0xff] %v9365_v11  ;;  %v9369_v26 = vpop.permute.xlu0 %1162 }
 0x446   :  { %15085 = vst [vmem:[#allocation347_spill] sm:$0xff] %v9367_v17 }
 0x44a   :  { %1286 = vrot.lane.b32.xlu1 %v8975_v9, %s7454_s19  ;;  %1288 = vrot.lane.b32.xlu2 %v8769_v29, %s7454_s19 }
 0x44b   :  { %1284 = vrot.lane.b32.xlu0 %v8984_v57, %s7454_s19 }
 0x44c   :  { %v9377_v23 = vpop.permute.xlu1 %1170  ;;  %v9379_v56 = vpop.permute.xlu2 %1190 }
 0x44d   :  { %15086 = vst [vmem:[#allocation348_spill] sm:$0xff] %v9377_v23  ;;  %v9381_v6 = vpop.permute.xlu0 %1168 }
 0x44e   :  { %15087 = vst [vmem:[#allocation349_spill] sm:$0xff] %v9379_v56 }
 0x44f   :  { %15088 = vst [vmem:[#allocation350_spill] sm:$0xff] %v9381_v6 }
 0x452   :  { %1292 = vrot.lane.b32.xlu1 %v8762_v28, %s7454_s19  ;;  %1326 = vrot.lane.b32.xlu2 %v8791_v4, %s7455_s20 }
 0x453   :  { %1290 = vrot.lane.b32.xlu0 %v9001_v42, %s7454_s19 }
 0x454   :  { %v9389_v17 = vpop.permute.xlu1 %1176  ;;  %v9391_v11 = vpop.permute.xlu2 %1196 }
 0x455   :  { %15089 = vst [vmem:[#allocation351_spill] sm:$0xff] %v9389_v17  ;;  %v9393_v57 = vpop.permute.xlu0 %1174 }
 0x456   :  { %15090 = vst [vmem:[#allocation352_spill] sm:$0xff] %v9391_v11 }
 0x457   :  { %15091 = vst [vmem:[#allocation353_spill] sm:$0xff] %v9393_v57 }
 0x45a   :  { %1330 = vrot.lane.b32.xlu1 %v8611_v2, %s7455_s20  ;;  %1332 = vrot.lane.b32.xlu2 %v8808_v14, %s7455_s20 }
 0x45b   :  { %1328 = vrot.lane.b32.xlu0 %v8782_v20, %s7455_s20 }
 0x45c   :  { %v9401_v56 = vpop.permute.xlu1 %1182  ;;  %v9403_v23 = vpop.permute.xlu2 %1234 }
 0x45d   :  { %15092 = vst [vmem:[#allocation354_spill] sm:$0xff] %v9401_v56  ;;  %v9405_v6 = vpop.permute.xlu0 %1180 }
 0x45e   :  { %15093 = vst [vmem:[#allocation355_spill] sm:$0xff] %v9403_v23 }
 0x45f   :  { %15094 = vst [vmem:[#allocation356_spill] sm:$0xff] %v9405_v6 }
 0x462   :  { %1336 = vrot.lane.b32.xlu1 %v8628_v0, %s7455_s20  ;;  %1338 = vrot.lane.b32.xlu2 %v8830_v24, %s7455_s20 }
 0x463   :  { %1334 = vrot.lane.b32.xlu0 %v8604_v3, %s7455_s20 }
 0x464   :  { %v9413_v11 = vpop.permute.xlu1 %1188  ;;  %v9415_v17 = vpop.permute.xlu2 %1240 }
 0x465   :  { %15095 = vst [vmem:[#allocation357_spill] sm:$0xff] %v9415_v17  ;;  %v9417_v57 = vpop.permute.xlu0 %1186  ;;  %v9434_v17 = vsel %vm1518_vm0, %v8604_v3, %v7717_v32  ;;  %v1522_v32 = vsel %vm1518_vm0, %v8808_v14, %v7755_v39  ;;  %v9509_v3 = vsel %vm1518_vm0, %v8747_v25, %v7801_v50  ;;  %v9526_v50 = vsel %vm1518_vm0, %v8769_v29, %v7813_v53  ;;  %v15103_v14 = vld [vmem:[#allocation251_spill] sm:$0xff]  ;;  %v15105_v29 = vld [vmem:[#allocation32_spill] sm:$0xff] }
 0x46a   :  { %1342 = vrot.lane.b32.xlu1 %v8645_v7, %s7455_s20  ;;  %1344 = vrot.lane.b32.xlu2 %v8852_v5, %s7455_s20  ;;  %v9439_v7 = vsel %vm1518_vm0, %v8628_v0, %v7725_v33  ;;  %v9458_v33 = vsel %vm1518_vm0, %v8782_v20, %v7757_v40  ;;  %v1528_v40 = vsel %vm1518_vm0, %v8852_v5, %v7781_v46  ;;  %v15100_v5 = vld [vmem:[#allocation216_spill] sm:$0xff] }
 0x46b   :  { %1340 = vrot.lane.b32.xlu0 %v8821_v27, %s7455_s20  ;;  %v9444_v27 = vsel %vm1518_vm0, %v8611_v2, %v7743_v36  ;;  %v1536_v36 = vsel %vm1518_vm0, %v8696_v16, %v7765_v41  ;;  %v9483_v41 = vsel %vm1518_vm0, %v8730_v22, %v7789_v47  ;;  %v1531_v46 = vsel %vm1518_vm0, %v8874_v15, %v7793_v49  ;;  %v15099_v2 = vld [vmem:[#allocation7_spill] sm:$0xff] }
 0x46c   :  { %v9425_v23 = vpop.permute.xlu1 %1194  ;;  %v9427_v56 = vpop.permute.xlu2 %1246  ;;  %v1534_v0 = vsel %vm1518_vm0, %v8896_v60, %v7805_v52 }
 0x46d   :  { %15096 = vst [vmem:[#allocation358_spill] sm:$0xff] %v9425_v23  ;;  %v9429_v6 = vpop.permute.xlu0 %1192  ;;  %v1533_v23 = vsel %vm1518_vm0, %v8679_v13, %v7753_v38  ;;  %v9469_v38 = vsel %vm1518_vm0, %v8713_v19, %v7777_v44  ;;  %v9494_v44 = vsel %vm1518_vm0, %v8865_v58, %v7791_v48  ;;  %v9514_v48 = vsel %vm1518_vm0, %v8887_v21, %v7803_v51 }
 0x46e   :  { %15097 = vst [vmem:[#allocation359_spill] sm:$0xff] %v9427_v56  ;;  %v1519_v56 = vsel %vm1518_vm0, %v8791_v4, %v7745_v37  ;;  %v1525_v37 = vsel %vm1518_vm0, %v8830_v24, %v7769_v43  ;;  %v1566_v39 = vsel %vm1551_vm1, %v1533_v23, %v7921_v62  ;;  %v1537_v51 = vsel %vm1518_vm0, %v8918_v1, %v7817_v55  ;;  %v15098_v24 = vld [vmem:[#allocation6_spill] sm:$0xff]  ;;  %v15101_v4 = vld [vmem:[#allocation8_spill] sm:$0xff] }
 0x46f   :  { %v9487_v43 = vsel %vm1584_vm2, %v1566_v39, %v8057_v45  ;;  %v9541_v53 = vsel %vm1518_vm0, %v8931_v12, %v15098_v24  ;;  %v1540_v55 = vsel %vm1518_vm0, %v8940_v18, %v15101_v4  ;;  %v15104_v23 = vld [vmem:[#allocation10_spill] sm:$0xff]  ;;  %v15106_v39 = vld [vmem:[#allocation272_spill] sm:$0xff]  ;;  %v15110_v24 = vld [vmem:[#allocation313_spill] sm:$0xff] }
 0x470   :  { %v1632_v47 = vsel %vm1617_vm3, %v9487_v43, %v8139_v63 }
 0x471   :  { %v1665_v49 = vsel %vm1650_vm4, %v1632_v47, %v8305_v35  ;;  %v1538_v35 = vsel %vm1518_vm0, %v8909_v30, %v7815_v54 }
 0x472   :  { %1348 = vrot.lane.b32.xlu1 %v8662_v10, %s7455_s20  ;;  %1350 = vrot.lane.b32.xlu2 %v8874_v15, %s7455_s20  ;;  %v1698_v15 = vsel %vm1683_vm5, %v1665_v49, %v8441_v34  ;;  %v9545_v34 = vsel %vm1551_vm1, %v1519_v56, %v15099_v2  ;;  %v15102_v10 = vld [vmem:[#allocation9_spill] sm:$0xff]  ;;  %v9561_v56 = vsel %vm1551_vm1, %v1522_v32, %v15104_v23  ;;  %v15107_v49 = vld [vmem:[#allocation11_spill] sm:$0xff]  ;;  %v15111_v2 = vld [vmem:[#allocation12_spill] sm:$0xff] }
 0x473   :  { %1346 = vrot.lane.b32.xlu0 %v8843_v31, %s7455_s20  ;;  %v1731_v52 = vsel %vm1716_vm6, %v1698_v15, %v8523_v59  ;;  %v9555_v59 = vsel %vm1518_vm0, %v8953_v61, %v15102_v10  ;;  %v1569_v31 = vsel %vm1551_vm1, %v1536_v36, %v15105_v29  ;;  %v1543_v15 = vsel %vm1518_vm0, %v8962_v8, %v15107_v49  ;;  %v15114_v23 = vld [vmem:[#allocation14_spill] sm:$0xff] }
 0x474   :  { %v9502_v45 = vpop.permute.xlu1 %1232  ;;  %v9504_v62 = vpop.permute.xlu2 %1252  ;;  %v1764_v54 = vsel %vm1749_vm7, %v1731_v52, %v15100_v5  ;;  %v15108_v52 = vld [vmem:[#allocation66_spill] sm:$0xff] }
 0x475   :  { %v9518_v63 = vpop.permute.xlu0 %1230  ;;  %v1797_v20 = vsel %vm1782_vm8, %v1764_v54, %v15103_v14  ;;  %v9576_v32 = vsel %vm1584_vm2, %v1569_v31, %v15108_v52  ;;  %v15113_v14 = vld [vmem:[#allocation13_spill] sm:$0xff] }
 0x476   :  { %v1830_v47 = vsel %vm1815_vm9, %v1797_v20, %v15106_v39  ;;  %15109 = vst [vmem:[#allocation6_spill] sm:$0xff] %v9576_v32  ;;  %v1558_v20 = vsel %vm1551_vm1, %v1525_v37, %v15113_v14  ;;  %v15116_v31 = vld [vmem:[#allocation125_spill] sm:$0xff] }
 0x477   :  { %v1863_v36 = vsel %vm1848_vm10, %v1830_v47, %v15110_v24  ;;  %v15118_v24 = vld [vmem:[#allocation16_spill] sm:$0xff]  ;;  %v15119_v37 = vld [vmem:[#allocation17_spill] sm:$0xff] }
 0x478   :  { %v1896_v54 = vsel %vm1881_vm11, %v1863_v36, %v9369_v26  ;;  %v15117_v26 = vld [vmem:[#allocation15_spill] sm:$0xff]  ;;  %v1561_v36 = vsel %vm1551_vm1, %v1528_v40, %v15118_v24  ;;  %v15125_v24 = vld [vmem:[#allocation21_spill] sm:$0xff] }
 0x479   :  { %v1550_v52 = vsel %vm1518_vm0, %v8762_v28, %v15117_v26  ;;  %v15124_v26 = vld [vmem:[#allocation178_spill] sm:$0xff] }
 0x47a   :  { %1354 = vrot.lane.b32.xlu1 %v8679_v13, %s7455_s20  ;;  %1356 = vrot.lane.b32.xlu2 %v8896_v60, %s7455_s20  ;;  %v1547_v13 = vsel %vm1518_vm0, %v8975_v9, %v15111_v2  ;;  %v15112_v60 = vld [vmem:[#allocation85_spill] sm:$0xff]  ;;  %v1549_v2 = vsel %vm1518_vm0, %v9001_v42, %v15119_v37  ;;  %v9627_v37 = vsel %vm1551_vm1, %v9439_v7, %v15125_v24  ;;  %v15131_v7 = vld [vmem:[#allocation30_spill] sm:$0xff] }
 0x47b   :  { %1352 = vrot.lane.b32.xlu0 %v8865_v58, %s7455_s20  ;;  %v1635_v5 = vsel %vm1617_vm3, %v9576_v32, %v15112_v60  ;;  %v15115_v58 = vld [vmem:[#allocation252_spill] sm:$0xff]  ;;  %v15120_v60 = vld [vmem:[#allocation159_spill] sm:$0xff] }
 0x47c   :  { %v9590_v4 = vpop.permute.xlu1 %1238  ;;  %v1259_v10 = vpop.permute.xlu2 %1258  ;;  %v1546_v29 = vsel %vm1518_vm0, %v15115_v58, %v15114_v23  ;;  %v1668_v39 = vsel %vm1650_vm4, %v1635_v5, %v15116_v31  ;;  %v15121_v5 = vld [vmem:[#allocation18_spill] sm:$0xff]  ;;  %v15123_v31 = vld [vmem:[#allocation20_spill] sm:$0xff]  ;;  %v15127_v32 = vld [vmem:[#allocation23_spill] sm:$0xff] }
 0x47d   :  { %v9600_v47 = vsel %vm1914_vm12, %v1896_v54, %v1259_v10  ;;  %v9602_v49 = vpop.permute.xlu0 %1236  ;;  %v1701_v14 = vsel %vm1683_vm5, %v1668_v39, %v15120_v60  ;;  %v1554_v54 = vsel %vm1551_vm1, %v9444_v27, %v15121_v5  ;;  %v15122_v10 = vld [vmem:[#allocation19_spill] sm:$0xff]  ;;  %v1553_v28 = vsel %vm1551_vm1, %v9458_v33, %v15123_v31  ;;  %v15126_v39 = vld [vmem:[#allocation22_spill] sm:$0xff] }
 0x47e   :  { %v1564_v23 = vsel %vm1551_vm1, %v1531_v46, %v15122_v10  ;;  %v1734_v40 = vsel %vm1716_vm6, %v1701_v14, %v15124_v26  ;;  %v1567_v60 = vsel %vm1551_vm1, %v1534_v0, %v15126_v39  ;;  %v1556_v27 = vsel %vm1551_vm1, %v9434_v17, %v15127_v32  ;;  %v15128_v46 = vld [vmem:[#allocation219_spill] sm:$0xff]  ;;  %v15129_v10 = vld [vmem:[#allocation25_spill] sm:$0xff]  ;;  %v15130_v14 = vld [vmem:[#allocation28_spill] sm:$0xff] }
 0x47f   :  { %v1767_v5 = vsel %vm1749_vm7, %v1734_v40, %v15128_v46  ;;  %v9638_v33 = vsel %vm1551_vm1, %v1537_v51, %v15129_v10  ;;  %v9642_v31 = vsel %vm1551_vm1, %v1540_v55, %v15130_v14  ;;  %v9646_v26 = vsel %vm1551_vm1, %v1543_v15, %v15131_v7  ;;  %v15132_v0 = vld [vmem:[#allocation255_spill] sm:$0xff]  ;;  %v15136_v55 = vld [vmem:[#allocation33_spill] sm:$0xff]  ;;  %v15140_v14 = vld [vmem:[#allocation316_spill] sm:$0xff] }
 0x480   :  { %v1800_v24 = vsel %vm1782_vm8, %v1767_v5, %v15132_v0  ;;  %v15133_v39 = vld [vmem:[#allocation31_spill] sm:$0xff]  ;;  %v9664_v15 = vsel %vm1551_vm1, %v1546_v29, %v15136_v55  ;;  %v15137_v5 = vld [vmem:[#allocation34_spill] sm:$0xff]  ;;  %v15138_v10 = vld [vmem:[#allocation69_spill] sm:$0xff] }
 0x481   :  { %v1565_v17 = vsel %vm1551_vm1, %v9494_v44, %v15133_v39  ;;  %v15134_v32 = vld [vmem:[#allocation35_spill] sm:$0xff]  ;;  %v1568_v44 = vsel %vm1551_vm1, %v9514_v48, %v15137_v5  ;;  %v15142_v29 = vld [vmem:[#allocation37_spill] sm:$0xff]  ;;  %v15144_v39 = vld [vmem:[#allocation350_spill] sm:$0xff] }
 0x482   :  { %v1572_v51 = vsel %vm1551_vm1, %v9469_v38, %v15134_v32  ;;  %v15135_v40 = vld [vmem:[#allocation275_spill] sm:$0xff]  ;;  %1360 = vrot.lane.b32.xlu1 %v8696_v16, %s7455_s20  ;;  %1362 = vrot.lane.b32.xlu2 %v8918_v1, %s7455_s20  ;;  %v15141_v16 = vld [vmem:[#allocation36_spill] sm:$0xff]  ;;  %v1571_v0 = vsel %vm1551_vm1, %v1538_v35, %v15142_v29  ;;  %v15149_v29 = vld [vmem:[#allocation41_spill] sm:$0xff] }
 0x483   :  { %v1833_v46 = vsel %vm1815_vm9, %v1800_v24, %v15135_v40  ;;  %v9671_v38 = vsel %vm1584_vm2, %v1572_v51, %v15138_v10  ;;  %1358 = vrot.lane.b32.xlu0 %v8887_v21, %s7455_s20  ;;  %v9679_v1 = vsel %vm1551_vm1, %v1549_v2, %v15141_v16  ;;  %v15143_v24 = vld [vmem:[#allocation88_spill] sm:$0xff]  ;;  %v15146_v55 = vld [vmem:[#allocation39_spill] sm:$0xff] }
 0x484   :  { %15139 = vst [vmem:[#allocation7_spill] sm:$0xff] %v9671_v38  ;;  %v1866_v7 = vsel %vm1848_vm10, %v1833_v46, %v15140_v14  ;;  %v1638_v48 = vsel %vm1617_vm3, %v9671_v38, %v15143_v24  ;;  %v9688_v51 = vpop.permute.xlu1 %1244  ;;  %v1265_v40 = vpop.permute.xlu2 %1264  ;;  %v15145_v46 = vld [vmem:[#allocation38_spill] sm:$0xff]  ;;  %v9695_v2 = vsel %vm1584_vm2, %v1553_v28, %v15146_v55  ;;  %v15147_v5 = vld [vmem:[#allocation128_spill] sm:$0xff] }
 0x485   :  { %v1899_v32 = vsel %vm1881_vm11, %v1866_v7, %v15144_v39  ;;  %v1575_v21 = vsel %vm1551_vm1, %v9483_v41, %v15145_v46  ;;  %v1671_v35 = vsel %vm1650_vm4, %v1638_v48, %v15147_v5  ;;  %v9702_v14 = vpop.permute.xlu0 %1242  ;;  %v15148_v7 = vld [vmem:[#allocation40_spill] sm:$0xff]  ;;  %v1578_v41 = vsel %vm1551_vm1, %v9509_v3, %v15149_v29  ;;  %v15150_v24 = vld [vmem:[#allocation42_spill] sm:$0xff]  ;;  %v15152_v46 = vld [vmem:[#allocation43_spill] sm:$0xff] }
 0x486   :  { %v9700_v10 = vsel %vm1914_vm12, %v1899_v32, %v1265_v40  ;;  %v1574_v16 = vsel %vm1551_vm1, %v9541_v53, %v15148_v7  ;;  %v9712_v28 = vsel %vm1584_vm2, %v1556_v27, %v15150_v24  ;;  %v15151_v39 = vld [vmem:[#allocation162_spill] sm:$0xff]  ;;  %v1577_v32 = vsel %vm1551_vm1, %v9555_v59, %v15152_v46  ;;  %v15153_v40 = vld [vmem:[#allocation44_spill] sm:$0xff]  ;;  %v15155_v3 = vld [vmem:[#allocation181_spill] sm:$0xff] }
 0x487   :  { %v1704_v48 = vsel %vm1683_vm5, %v1671_v35, %v15151_v39  ;;  %v9722_v55 = vsel %vm1551_vm1, %v9526_v50, %v15153_v40  ;;  %v15154_v53 = vld [vmem:[#allocation46_spill] sm:$0xff]  ;;  %v15156_v27 = vld [vmem:[#allocation47_spill] sm:$0xff]  ;;  %v15157_v35 = vld [vmem:[#allocation49_spill] sm:$0xff] }
 0x488   :  { %v1580_v5 = vsel %vm1551_vm1, %v1547_v13, %v15154_v53  ;;  %v1737_v7 = vsel %vm1716_vm6, %v1704_v48, %v15155_v3  ;;  %v9731_v29 = vsel %vm1584_vm2, %v9545_v34, %v15156_v27  ;;  %v1583_v24 = vsel %vm1551_vm1, %v1550_v52, %v15157_v35  ;;  %v15158_v59 = vld [vmem:[#allocation50_spill] sm:$0xff]  ;;  %v15160_v13 = vld [vmem:[#allocation51_spill] sm:$0xff]  ;;  %v15161_v48 = vld [vmem:[#allocation52_spill] sm:$0xff] }
 0x489   :  { %v9738_v39 = vsel %vm1584_vm2, %v9561_v56, %v15158_v59  ;;  %v15159_v50 = vld [vmem:[#allocation222_spill] sm:$0xff]  ;;  %v9744_v40 = vsel %vm1584_vm2, %v1565_v17, %v15160_v13  ;;  %v9748_v53 = vsel %vm1584_vm2, %v1554_v54, %v15161_v48  ;;  %v15162_v34 = vld [vmem:[#allocation53_spill] sm:$0xff]  ;;  %v15171_v13 = vld [vmem:[#allocation72_spill] sm:$0xff] }
 0x48a   :  { %v1770_v46 = vsel %vm1749_vm7, %v1737_v7, %v15159_v50  ;;  %v9752_v3 = vsel %vm1584_vm2, %v1558_v20, %v15162_v34  ;;  %v15163_v52 = vld [vmem:[#allocation258_spill] sm:$0xff]  ;;  %v15166_v7 = vld [vmem:[#allocation56_spill] sm:$0xff]  ;;  %1366 = vrot.lane.b32.xlu1 %v8713_v19, %s7455_s20  ;;  %1368 = vrot.lane.b32.xlu2 %v8940_v18, %s7455_s20  ;;  %v15168_v20 = vld [vmem:[#allocation57_spill] sm:$0xff] }
 0x48b   :  { %v1803_v27 = vsel %vm1782_vm8, %v1770_v46, %v15163_v52  ;;  %v15164_v56 = vld [vmem:[#allocation54_spill] sm:$0xff]  ;;  %v9762_v59 = vsel %vm1584_vm2, %v1561_v36, %v15166_v7  ;;  %v9772_v54 = vsel %vm1584_vm2, %v1571_v0, %v15168_v20  ;;  %v15170_v46 = vld [vmem:[#allocation59_spill] sm:$0xff]  ;;  %v9780_v36 = vsel %vm1584_vm2, %v1575_v21, %v15171_v13  ;;  %1364 = vrot.lane.b32.xlu0 %v8909_v30, %s7455_s20  ;;  %v15174_v19 = vld [vmem:[#allocation60_spill] sm:$0xff] }
 0x48c   :  { %v9758_v35 = vsel %vm1584_vm2, %v1568_v44, %v15164_v56  ;;  %v15167_v17 = vld [vmem:[#allocation278_spill] sm:$0xff]  ;;  %15169 = vst [vmem:[#allocation8_spill] sm:$0xff] %v9772_v54  ;;  %v9776_v44 = vsel %vm1584_vm2, %v1564_v23, %v15170_v46  ;;  %v15173_v48 = vld [vmem:[#allocation319_spill] sm:$0xff]  ;;  %v9788_v18 = vsel %vm1584_vm2, %v1574_v16, %v15174_v19  ;;  %v15178_v21 = vld [vmem:[#allocation353_spill] sm:$0xff]  ;;  %v9798_v7 = vpop.permute.xlu1 %1250 }
 0x48d   :  { %15165 = vst [vmem:[#allocation216_spill] sm:$0xff] %v9758_v35  ;;  %v1836_v50 = vsel %vm1815_vm9, %v1803_v27, %v15167_v17  ;;  %v15176_v0 = vld [vmem:[#allocation90_spill] sm:$0xff]  ;;  %v15177_v23 = vld [vmem:[#allocation91_spill] sm:$0xff]  ;;  %v1271_v17 = vpop.permute.xlu2 %1270  ;;  %v15181_v16 = vld [vmem:[#allocation124_spill] sm:$0xff]  ;;  %v9811_v19 = vpop.permute.xlu0 %1248 }
 0x48e   :  { %15172 = vst [vmem:[#allocation9_spill] sm:$0xff] %v9780_v36  ;;  %v1869_v34 = vsel %vm1848_vm10, %v1836_v50, %v15173_v48  ;;  %v1631_v52 = vsel %vm1617_vm3, %v9744_v40, %v15176_v0  ;;  %v1641_v27 = vsel %vm1617_vm3, %v9780_v36, %v15177_v23  ;;  %v15179_v50 = vld [vmem:[#allocation62_spill] sm:$0xff]  ;;  %v15182_v46 = vld [vmem:[#allocation131_spill] sm:$0xff]  ;;  %v15185_v23 = vld [vmem:[#allocation64_spill] sm:$0xff] }
 0x48f   :  { %15175 = vst [vmem:[#allocation251_spill] sm:$0xff] %v9788_v18  ;;  %v1902_v56 = vsel %vm1881_vm11, %v1869_v34, %v15178_v21  ;;  %v9802_v30 = vsel %vm1584_vm2, %v1567_v60, %v15179_v50  ;;  %v1664_v20 = vsel %vm1650_vm4, %v1631_v52, %v15181_v16  ;;  %v1674_v13 = vsel %vm1650_vm4, %v1641_v27, %v15182_v46  ;;  %v15183_v0 = vld [vmem:[#allocation63_spill] sm:$0xff]  ;;  %v15186_v21 = vld [vmem:[#allocation144_spill] sm:$0xff]  ;;  %v15187_v50 = vld [vmem:[#allocation165_spill] sm:$0xff] }
 0x490   :  { %15180 = vst [vmem:[#allocation10_spill] sm:$0xff] %v9802_v30  ;;  %v9809_v48 = vsel %vm1914_vm12, %v1902_v56, %v1271_v17  ;;  %v9815_v34 = vsel %vm1584_vm2, %v1577_v32, %v15183_v0  ;;  %v9820_v60 = vsel %vm1584_vm2, %v9638_v33, %v15185_v23  ;;  %v1697_v52 = vsel %vm1683_vm5, %v1664_v20, %v15186_v21  ;;  %v15188_v16 = vld [vmem:[#allocation65_spill] sm:$0xff]  ;;  %v15190_v17 = vld [vmem:[#allocation67_spill] sm:$0xff]  ;;  %v15193_v33 = vld [vmem:[#allocation184_spill] sm:$0xff] }
 0x491   :  { %15184 = vst [vmem:[#allocation32_spill] sm:$0xff] %v9815_v34  ;;  %v1707_v27 = vsel %vm1683_vm5, %v1674_v13, %v15187_v50  ;;  %v9828_v56 = vsel %vm1584_vm2, %v1580_v5, %v15188_v16  ;;  %v9833_v32 = vsel %vm1584_vm2, %v9642_v31, %v15190_v17  ;;  %v15192_v46 = vld [vmem:[#allocation183_spill] sm:$0xff]  ;;  %v15194_v36 = vld [vmem:[#allocation68_spill] sm:$0xff]  ;;  %v15196_v13 = vld [vmem:[#allocation70_spill] sm:$0xff] }
 0x492   :  { %15189 = vst [vmem:[#allocation272_spill] sm:$0xff] %v9828_v56  ;;  %v1730_v0 = vsel %vm1716_vm6, %v1697_v52, %v15192_v46  ;;  %v1740_v23 = vsel %vm1716_vm6, %v1707_v27, %v15193_v33  ;;  %v9841_v20 = vsel %vm1584_vm2, %v1583_v24, %v15194_v36  ;;  %v9846_v5 = vsel %vm1584_vm2, %v9646_v26, %v15196_v13  ;;  %v15198_v21 = vld [vmem:[#allocation218_spill] sm:$0xff]  ;;  %v15199_v31 = vld [vmem:[#allocation225_spill] sm:$0xff]  ;;  %v15200_v17 = vld [vmem:[#allocation71_spill] sm:$0xff] }
 0x493   :  { %15191 = vst [vmem:[#allocation11_spill] sm:$0xff] %v9833_v32  ;;  %v1763_v50 = vsel %vm1749_vm7, %v1730_v0, %v15198_v21  ;;  %v1773_v16 = vsel %vm1749_vm7, %v1740_v23, %v15199_v31  ;;  %v9855_v52 = vsel %vm1617_vm3, %v9748_v53, %v15200_v17  ;;  %v15201_v27 = vld [vmem:[#allocation73_spill] sm:$0xff]  ;;  %v15203_v36 = vld [vmem:[#allocation238_spill] sm:$0xff]  ;;  %v15205_v0 = vld [vmem:[#allocation75_spill] sm:$0xff]  ;;  %1372 = vrot.lane.b32.xlu1 %v8730_v22, %s7455_s20 }
 0x494   :  { %15195 = vst [vmem:[#allocation66_spill] sm:$0xff] %v9841_v20  ;;  %v9860_v24 = vsel %vm1584_vm2, %v9664_v15, %v15201_v27  ;;  %v1796_v26 = vsel %vm1782_vm8, %v1763_v50, %v15203_v36  ;;  %v15204_v46 = vld [vmem:[#allocation261_spill] sm:$0xff]  ;;  %v9868_v13 = vsel %vm1584_vm2, %v1578_v41, %v15205_v0  ;;  %v15207_v23 = vld [vmem:[#allocation280_spill] sm:$0xff]  ;;  %1374 = vrot.lane.b32.xlu2 %v8962_v8, %s7455_s20  ;;  %v15212_v27 = vld [vmem:[#allocation315_spill] sm:$0xff] }
 0x495   :  { %15197 = vst [vmem:[#allocation313_spill] sm:$0xff] %v9846_v5  ;;  %v1806_v33 = vsel %vm1782_vm8, %v1773_v16, %v15204_v46  ;;  %v1829_v21 = vsel %vm1815_vm9, %v1796_v26, %v15207_v23  ;;  %v15208_v31 = vld [vmem:[#allocation281_spill] sm:$0xff]  ;;  %v15209_v15 = vld [vmem:[#allocation76_spill] sm:$0xff]  ;;  %v15213_v26 = vld [vmem:[#allocation322_spill] sm:$0xff]  ;;  %1370 = vrot.lane.b32.xlu0 %v8931_v12, %s7455_s20 }
 0x496   :  { %15202 = vst [vmem:[#allocation12_spill] sm:$0xff] %v9860_v24  ;;  %v1839_v17 = vsel %vm1815_vm9, %v1806_v33, %v15208_v31  ;;  %v9881_v50 = vsel %vm1584_vm2, %v9679_v1, %v15209_v15  ;;  %v15211_v16 = vld [vmem:[#allocation93_spill] sm:$0xff]  ;;  %v1862_v36 = vsel %vm1848_vm10, %v1829_v21, %v15212_v27  ;;  %v15214_v22 = vld [vmem:[#allocation94_spill] sm:$0xff]  ;;  %v15215_v33 = vld [vmem:[#allocation95_spill] sm:$0xff]  ;;  %v1257_v15 = vpop.permute.xlu1 %1256 }
 0x497   :  { %15206 = vst [vmem:[#allocation85_spill] sm:$0xff] %v9868_v13  ;;  %v1634_v41 = vsel %vm1617_vm3, %v9758_v35, %v15211_v16  ;;  %v1872_v46 = vsel %vm1848_vm10, %v1839_v17, %v15213_v26  ;;  %v1644_v8 = vsel %vm1617_vm3, %v9868_v13, %v15214_v22  ;;  %v1633_v1 = vsel %vm1617_vm3, %v9802_v30, %v15215_v33  ;;  %v15216_v0 = vld [vmem:[#allocation335_spill] sm:$0xff]  ;;  %v15217_v31 = vld [vmem:[#allocation356_spill] sm:$0xff]  ;;  %v1277_v16 = vpop.permute.xlu2 %1276  ;;  %v15219_v12 = vld [vmem:[#allocation134_spill] sm:$0xff]  ;;  %v9912_v33 = vpop.permute.xlu0 %1254 }
 0x498   :  { %15210 = vst [vmem:[#allocation13_spill] sm:$0xff] %v9881_v50  ;;  %v1895_v23 = vsel %vm1881_vm11, %v1862_v36, %v15216_v0  ;;  %v1905_v21 = vsel %vm1881_vm11, %v1872_v46, %v15217_v31  ;;  %v15218_v17 = vld [vmem:[#allocation127_spill] sm:$0xff]  ;;  %v1677_v26 = vsel %vm1650_vm4, %v1644_v8, %v15219_v12  ;;  %v15220_v36 = vld [vmem:[#allocation78_spill] sm:$0xff]  ;;  %v15224_v8 = vld [vmem:[#allocation168_spill] sm:$0xff] }
 0x499   :  { %v1667_v27 = vsel %vm1650_vm4, %v1634_v41, %v15218_v17  ;;  %v9907_v22 = vsel %vm1914_vm12, %v1895_v23, %v1257_v15  ;;  %v9910_v13 = vsel %vm1914_vm12, %v1905_v21, %v1277_v16  ;;  %v9917_v46 = vsel %vm1584_vm2, %v9722_v55, %v15220_v36  ;;  %v15222_v0 = vld [vmem:[#allocation115_spill] sm:$0xff]  ;;  %v15227_v38 = vld [vmem:[#allocation186_spill] sm:$0xff]  ;;  %v15232_v30 = vld [vmem:[#allocation228_spill] sm:$0xff] }
 0x49a   :  { %15221 = vst [vmem:[#allocation14_spill] sm:$0xff] %v9917_v46  ;;  %v1666_v31 = vsel %vm1650_vm4, %v1633_v1, %v15222_v0  ;;  %v15223_v41 = vld [vmem:[#allocation147_spill] sm:$0xff]  ;;  %v1710_v23 = vsel %vm1683_vm5, %v1677_v26, %v15224_v8  ;;  %v15229_v0 = vld [vmem:[#allocation96_spill] sm:$0xff]  ;;  %v15231_v8 = vld [vmem:[#allocation221_spill] sm:$0xff] }
 0x49b   :  { %v1700_v17 = vsel %vm1683_vm5, %v1667_v27, %v15223_v41  ;;  %v15225_v15 = vld [vmem:[#allocation79_spill] sm:$0xff]  ;;  %v1637_v27 = vsel %vm1617_vm3, %v9772_v54, %v15229_v0  ;;  %v15230_v41 = vld [vmem:[#allocation188_spill] sm:$0xff]  ;;  %1378 = vrot.lane.b32.xlu1 %v8747_v25, %s7455_s20  ;;  %v15244_v25 = vld [vmem:[#allocation130_spill] sm:$0xff] }
 0x49c   :  { %v9928_v21 = vsel %vm1617_vm3, %v9695_v2, %v15225_v15  ;;  %v15226_v16 = vld [vmem:[#allocation155_spill] sm:$0xff]  ;;  %v1733_v55 = vsel %vm1716_vm6, %v1700_v17, %v15227_v38  ;;  %v15234_v17 = vld [vmem:[#allocation208_spill] sm:$0xff]  ;;  %1380 = vrot.lane.b32.xlu2 %v15115_v58, %s7455_s20  ;;  %v15245_v58 = vld [vmem:[#allocation305_spill] sm:$0xff] }
 0x49d   :  { %v1699_v12 = vsel %vm1683_vm5, %v1666_v31, %v15226_v16  ;;  %v15228_v36 = vld [vmem:[#allocation187_spill] sm:$0xff]  ;;  %v1766_v15 = vsel %vm1749_vm7, %v1733_v55, %v15231_v8  ;;  %v15233_v31 = vld [vmem:[#allocation97_spill] sm:$0xff]  ;;  %v15236_v0 = vld [vmem:[#allocation264_spill] sm:$0xff]  ;;  %1376 = vrot.lane.b32.xlu0 %v8953_v61, %s7455_s20 }
 0x49e   :  { %v1743_v1 = vsel %vm1716_vm6, %v1710_v23, %v15228_v36  ;;  %v1732_v26 = vsel %vm1716_vm6, %v1699_v12, %v15230_v41  ;;  %v1647_v38 = vsel %vm1617_vm3, %v9917_v46, %v15233_v31  ;;  %v15235_v16 = vld [vmem:[#allocation241_spill] sm:$0xff]  ;;  %v15238_v55 = vld [vmem:[#allocation283_spill] sm:$0xff] }
 0x49f   :  { %v1776_v35 = vsel %vm1749_vm7, %v1743_v1, %v15232_v30  ;;  %v1765_v23 = vsel %vm1749_vm7, %v1732_v26, %v15234_v17  ;;  %v1799_v36 = vsel %vm1782_vm8, %v1766_v15, %v15235_v16  ;;  %v15237_v12 = vld [vmem:[#allocation249_spill] sm:$0xff]  ;;  %v15239_v30 = vld [vmem:[#allocation284_spill] sm:$0xff]  ;;  %v15240_v26 = vld [vmem:[#allocation98_spill] sm:$0xff] }
 0x4a0   :  { %v1809_v54 = vsel %vm1782_vm8, %v1776_v35, %v15236_v0  ;;  %v1798_v41 = vsel %vm1782_vm8, %v1765_v23, %v15237_v12  ;;  %v1832_v8 = vsel %vm1815_vm9, %v1799_v36, %v15238_v55  ;;  %v1636_v15 = vsel %vm1617_vm3, %v9820_v60, %v15240_v26  ;;  %v15241_v35 = vld [vmem:[#allocation285_spill] sm:$0xff]  ;;  %v15242_v17 = vld [vmem:[#allocation318_spill] sm:$0xff] }
 0x4a1   :  { %v1842_v1 = vsel %vm1815_vm9, %v1809_v54, %v15239_v30  ;;  %v1831_v31 = vsel %vm1815_vm9, %v1798_v41, %v15241_v35  ;;  %v1865_v23 = vsel %vm1848_vm10, %v1832_v8, %v15242_v17  ;;  %v15243_v16 = vld [vmem:[#allocation325_spill] sm:$0xff]  ;;  %v1670_v54 = vsel %vm1650_vm4, %v1637_v27, %v15244_v25  ;;  %v15246_v12 = vld [vmem:[#allocation338_spill] sm:$0xff]  ;;  %v1263_v30 = vpop.permute.xlu1 %1262  ;;  %v1283_v8 = vpop.permute.xlu2 %1282 }
 0x4a2   :  { %v1875_v36 = vsel %vm1848_vm10, %v1842_v1, %v15243_v16  ;;  %v1864_v0 = vsel %vm1848_vm10, %v1831_v31, %v15245_v58  ;;  %v1898_v55 = vsel %vm1881_vm11, %v1865_v23, %v15246_v12  ;;  %v15247_v26 = vld [vmem:[#allocation137_spill] sm:$0xff]  ;;  %v15248_v35 = vld [vmem:[#allocation346_spill] sm:$0xff]  ;;  %v1261_v31 = vpop.permute.xlu0 %1260 }
 0x4a3   :  { %v1908_v41 = vsel %vm1881_vm11, %v1875_v36, %v9417_v57  ;;  %v1680_v1 = vsel %vm1650_vm4, %v1647_v38, %v15247_v26  ;;  %v1897_v61 = vsel %vm1881_vm11, %v1864_v0, %v15248_v35  ;;  %v9988_v17 = vsel %vm1914_vm12, %v1898_v55, %v1263_v30  ;;  %v15249_v16 = vld [vmem:[#allocation118_spill] sm:$0xff]  ;;  %v15251_v36 = vld [vmem:[#allocation171_spill] sm:$0xff]  ;;  %v15252_v0 = vld [vmem:[#allocation81_spill] sm:$0xff] }
 0x4a4   :  { %v9991_v27 = vsel %vm1914_vm12, %v1908_v41, %v1283_v8  ;;  %v1669_v23 = vsel %vm1650_vm4, %v1636_v15, %v15249_v16  ;;  %v15250_v25 = vld [vmem:[#allocation150_spill] sm:$0xff]  ;;  %v1713_v58 = vsel %vm1683_vm5, %v1680_v1, %v15251_v36  ;;  %v10000_v38 = vsel %vm1914_vm12, %v1897_v61, %v1261_v31  ;;  %v15253_v55 = vld [vmem:[#allocation157_spill] sm:$0xff]  ;;  %v15257_v35 = vld [vmem:[#allocation191_spill] sm:$0xff]  ;;  %1386 = vrot.lane.b32.xlu2 %v9001_v42, %s7455_s20 }
 0x4a5   :  { %v1703_v57 = vsel %vm1683_vm5, %v1670_v54, %v15250_v25  ;;  %v1618_v12 = vsel %vm1617_vm3, %v9731_v29, %v15252_v0  ;;  %v1702_v41 = vsel %vm1683_vm5, %v1669_v23, %v15253_v55  ;;  %v15254_v30 = vld [vmem:[#allocation189_spill] sm:$0xff]  ;;  %v15255_v15 = vld [vmem:[#allocation190_spill] sm:$0xff]  ;;  %v15256_v54 = vld [vmem:[#allocation99_spill] sm:$0xff]  ;;  %1382 = vrot.lane.b32.xlu0 %v8975_v9, %s7455_s20 }
 0x4a6   :  { %v1736_v8 = vsel %vm1716_vm6, %v1703_v57, %v15254_v30  ;;  %v1746_v26 = vsel %vm1716_vm6, %v1713_v58, %v15255_v15  ;;  %v1640_v1 = vsel %vm1617_vm3, %v9788_v18, %v15256_v54  ;;  %v1735_v61 = vsel %vm1716_vm6, %v1702_v41, %v15257_v35  ;;  %v15258_v31 = vld [vmem:[#allocation224_spill] sm:$0xff]  ;;  %v15259_v25 = vld [vmem:[#allocation231_spill] sm:$0xff]  ;;  %v15264_v46 = vld [vmem:[#allocation253_spill] sm:$0xff] }
 0x4a7   :  { %v1769_v16 = vsel %vm1749_vm7, %v1736_v8, %v15258_v31  ;;  %v1779_v36 = vsel %vm1749_vm7, %v1746_v26, %v15259_v25  ;;  %v15260_v23 = vld [vmem:[#allocation100_spill] sm:$0xff]  ;;  %v15261_v57 = vld [vmem:[#allocation211_spill] sm:$0xff]  ;;  %v15265_v35 = vld [vmem:[#allocation286_spill] sm:$0xff] }
 0x4a8   :  { %v1651_v0 = vsel %vm1650_vm4, %v1618_v12, %v15260_v23  ;;  %v1768_v55 = vsel %vm1749_vm7, %v1735_v61, %v15261_v57  ;;  %v15262_v58 = vld [vmem:[#allocation244_spill] sm:$0xff]  ;;  %v15263_v15 = vld [vmem:[#allocation267_spill] sm:$0xff]  ;;  %v15267_v61 = vld [vmem:[#allocation101_spill] sm:$0xff] }
 0x4a9   :  { %v1802_v30 = vsel %vm1782_vm8, %v1769_v16, %v15262_v58  ;;  %v1812_v54 = vsel %vm1782_vm8, %v1779_v36, %v15263_v15  ;;  %v1801_v41 = vsel %vm1782_vm8, %v1768_v55, %v15264_v46  ;;  %v15266_v31 = vld [vmem:[#allocation287_spill] sm:$0xff]  ;;  %v1639_v46 = vsel %vm1617_vm3, %v9833_v32, %v15267_v61  ;;  %v15268_v16 = vld [vmem:[#allocation288_spill] sm:$0xff]  ;;  %v15269_v36 = vld [vmem:[#allocation321_spill] sm:$0xff] }
 0x4aa   :  { %v1835_v8 = vsel %vm1815_vm9, %v1802_v30, %v15265_v35  ;;  %v1845_v26 = vsel %vm1815_vm9, %v1812_v54, %v15266_v31  ;;  %v10037_v12 = vld [vmem:[%s14701_s0 + $0xe8] sm:$0xff]  ;;  %v1834_v25 = vsel %vm1815_vm9, %v1801_v41, %v15268_v16  ;;  %v15270_v57 = vld [vmem:[#allocation328_spill] sm:$0xff]  ;;  %v15271_v58 = vld [vmem:[#allocation133_spill] sm:$0xff]  ;;  %v1269_v31 = vpop.permute.xlu1 %1268 }
 0x4ab   :  { %1384 = vrot.lane.b32.xlu1 %v10037_v12, %s7455_s20  ;;  %v1868_v23 = vsel %vm1848_vm10, %v1835_v8, %v15269_v36  ;;  %v1878_v55 = vsel %vm1848_vm10, %v1845_v26, %v15270_v57  ;;  %v1673_v30 = vsel %vm1650_vm4, %v1640_v1, %v15271_v58  ;;  %v15272_v42 = vld [vmem:[#allocation308_spill] sm:$0xff]  ;;  %v15273_v54 = vld [vmem:[#allocation341_spill] sm:$0xff]  ;;  %v1289_v8 = vpop.permute.xlu2 %1288 }
 0x4ac   :  { %v1867_v15 = vsel %vm1848_vm10, %v1834_v25, %v15272_v42  ;;  %v1901_v35 = vsel %vm1881_vm11, %v1868_v23, %v15273_v54  ;;  %v1911_v41 = vsel %vm1881_vm11, %v1878_v55, %v9429_v6  ;;  %v15274_v61 = vld [vmem:[#allocation140_spill] sm:$0xff]  ;;  %v1267_v25 = vpop.permute.xlu0 %1266  ;;  %v15276_v57 = vld [vmem:[#allocation121_spill] sm:$0xff]  ;;  %v15278_v55 = vld [vmem:[#allocation174_spill] sm:$0xff] }
 0x4ad   :  { %v1684_v26 = vsel %vm1683_vm5, %v1651_v0, %v15274_v61  ;;  %v15275_v16 = vld [vmem:[#allocation348_spill] sm:$0xff]  ;;  %v10067_v36 = vsel %vm1914_vm12, %v1901_v35, %v1269_v31  ;;  %v10070_v1 = vsel %vm1914_vm12, %v1911_v41, %v1289_v8  ;;  %v1672_v23 = vsel %vm1650_vm4, %v1639_v46, %v15276_v57  ;;  %v15277_v58 = vld [vmem:[#allocation153_spill] sm:$0xff] }
 0x4ae   :  { %v1900_v9 = vsel %vm1881_vm11, %v1867_v15, %v15275_v16  ;;  %v1706_v6 = vsel %vm1683_vm5, %v1673_v30, %v15277_v58  ;;  %v1717_v42 = vsel %vm1716_vm6, %v1684_v26, %v15278_v55  ;;  %v15279_v15 = vld [vmem:[#allocation83_spill] sm:$0xff]  ;;  %v15280_v35 = vld [vmem:[#allocation160_spill] sm:$0xff]  ;;  %v15282_v46 = vld [vmem:[#allocation193_spill] sm:$0xff] }
 0x4af   :  { %v10079_v0 = vsel %vm1914_vm12, %v1900_v9, %v1267_v25  ;;  %v1621_v54 = vsel %vm1617_vm3, %v9738_v39, %v15279_v15  ;;  %v1705_v41 = vsel %vm1683_vm5, %v1672_v23, %v15280_v35  ;;  %v15281_v31 = vld [vmem:[#allocation192_spill] sm:$0xff]  ;;  %v1750_v61 = vsel %vm1749_vm7, %v1717_v42, %v15282_v46  ;;  %v15283_v30 = vld [vmem:[#allocation102_spill] sm:$0xff]  ;;  %v15285_v25 = vld [vmem:[#allocation227_spill] sm:$0xff] }
 0x4b0   :  { %v1739_v8 = vsel %vm1716_vm6, %v1706_v6, %v15281_v31  ;;  %v1643_v26 = vsel %vm1617_vm3, %v9815_v34, %v15283_v30  ;;  %v15284_v16 = vld [vmem:[#allocation194_spill] sm:$0xff]  ;;  %v15287_v23 = vld [vmem:[#allocation103_spill] sm:$0xff]  ;;  %v15291_v34 = vld [vmem:[#allocation256_spill] sm:$0xff] }
 0x4b1   :  { %v1738_v9 = vsel %vm1716_vm6, %v1705_v41, %v15284_v16  ;;  %v1772_v57 = vsel %vm1749_vm7, %v1739_v8, %v15285_v25  ;;  %v15286_v58 = vld [vmem:[#allocation234_spill] sm:$0xff]  ;;  %v1654_v15 = vsel %vm1650_vm4, %v1621_v54, %v15287_v23  ;;  %v15289_v42 = vld [vmem:[#allocation247_spill] sm:$0xff]  ;;  %v15292_v16 = vld [vmem:[#allocation289_spill] sm:$0xff] }
 0x4b2   :  { %v1783_v55 = vsel %vm1782_vm8, %v1750_v61, %v15286_v58  ;;  %v15288_v6 = vld [vmem:[#allocation214_spill] sm:$0xff]  ;;  %v1805_v31 = vsel %vm1782_vm8, %v1772_v57, %v15289_v42  ;;  %v15295_v58 = vld [vmem:[#allocation291_spill] sm:$0xff]  ;;  %v15296_v23 = vld [vmem:[#allocation324_spill] sm:$0xff] }
 0x4b3   :  { %v1771_v35 = vsel %vm1749_vm7, %v1738_v9, %v15288_v6  ;;  %v15290_v46 = vld [vmem:[#allocation270_spill] sm:$0xff]  ;;  %v1838_v8 = vsel %vm1815_vm9, %v1805_v31, %v15292_v16  ;;  %v7398_v9 = vld [vmem:[%s14701_s0 + $0x8] sm:$0xff]  ;;  %v10133_v31 = vld [vmem:[%s14701_s0 + $0xf8] sm:$0xff] }
 0x4b4   :  { %v1816_v30 = vsel %vm1815_vm9, %v1783_v55, %v15290_v46  ;;  %v1804_v41 = vsel %vm1782_vm8, %v1771_v35, %v15291_v34  ;;  %v15293_v25 = vld [vmem:[#allocation290_spill] sm:$0xff]  ;;  %1424 = vrot.lane.b32.xlu2 %v7398_v9, %s7456_s25  ;;  %v15294_v34 = vld [vmem:[#allocation104_spill] sm:$0xff]  ;;  %v1871_v6 = vsel %vm1848_vm10, %v1838_v8, %v15296_v23  ;;  %v15297_v35 = vld [vmem:[#allocation331_spill] sm:$0xff]  ;;  %1388 = vrot.lane.b32.xlu0 %v10133_v31, %s7455_s20  ;;  %v1327_v9 = vpop.permute.xlu2 %1326 }
 0x4b5   :  { %v1849_v61 = vsel %vm1848_vm10, %v1816_v30, %v15293_v25  ;;  %v7397_v54 = vld [vmem:[%s14701_s0] sm:$0xff]  ;;  %v1642_v57 = vsel %vm1617_vm3, %v9846_v5, %v15294_v34  ;;  %v1837_v55 = vsel %vm1815_vm9, %v1804_v41, %v15295_v58  ;;  %v15298_v46 = vld [vmem:[#allocation136_spill] sm:$0xff]  ;;  %v15299_v16 = vld [vmem:[#allocation311_spill] sm:$0xff] }
 0x4b6   :  { %1422 = vrot.lane.b32.xlu1 %v7397_v54, %s7456_s25  ;;  %v1882_v42 = vsel %vm1881_vm11, %v1849_v61, %v15297_v35  ;;  %v1676_v30 = vsel %vm1650_vm4, %v1643_v26, %v15298_v46  ;;  %v1870_v41 = vsel %vm1848_vm10, %v1837_v55, %v15299_v16  ;;  %v15300_v25 = vld [vmem:[#allocation344_spill] sm:$0xff]  ;;  %v1275_v54 = vpop.permute.xlu1 %1274  ;;  %v15301_v34 = vld [vmem:[#allocation143_spill] sm:$0xff]  ;;  %v1273_v55 = vpop.permute.xlu0 %1272  ;;  %v15317_v32 = vld [vmem:[#allocation273_spill] sm:$0xff] }
 0x4b7   :  { %v1904_v8 = vsel %vm1881_vm11, %v1871_v6, %v15300_v25  ;;  %v1915_v61 = vsel %vm1914_vm12, %v1882_v42, %v9518_v63  ;;  %v1687_v58 = vsel %vm1683_vm5, %v1654_v15, %v15301_v34  ;;  %v15302_v23 = vld [vmem:[#allocation351_spill] sm:$0xff]  ;;  %v15304_v16 = vld [vmem:[#allocation156_spill] sm:$0xff] }
 0x4b8   :  { %v1903_v35 = vsel %vm1881_vm11, %v1870_v41, %v15302_v23  ;;  %v10150_v5 = vsel %vm1914_vm12, %v1904_v8, %v1275_v54  ;;  %v10153_v26 = vsel %vm1947_vm13, %v1915_v61, %v1327_v9  ;;  %v15303_v46 = vld [vmem:[#allocation123_spill] sm:$0xff]  ;;  %v1709_v63 = vsel %vm1683_vm5, %v1676_v30, %v15304_v16  ;;  %v15305_v42 = vld [vmem:[#allocation176_spill] sm:$0xff]  ;;  %v15306_v41 = vld [vmem:[#allocation86_spill] sm:$0xff] }
 0x4b9   :  { %v1675_v6 = vsel %vm1650_vm4, %v1642_v57, %v15303_v46  ;;  %v1720_v25 = vsel %vm1716_vm6, %v1687_v58, %v15305_v42  ;;  %v10162_v15 = vsel %vm1914_vm12, %v1903_v35, %v1273_v55  ;;  %v1624_v8 = vsel %vm1617_vm3, %v9752_v3, %v15306_v41  ;;  %v15307_v54 = vld [vmem:[#allocation163_spill] sm:$0xff]  ;;  %v15309_v57 = vld [vmem:[#allocation196_spill] sm:$0xff]  ;;  %v15310_v30 = vld [vmem:[#allocation105_spill] sm:$0xff] }
 0x4ba   :  { %v1708_v61 = vsel %vm1683_vm5, %v1675_v6, %v15307_v54  ;;  %v15308_v9 = vld [vmem:[#allocation195_spill] sm:$0xff]  ;;  %v1753_v23 = vsel %vm1749_vm7, %v1720_v25, %v15309_v57  ;;  %v1646_v58 = vsel %vm1617_vm3, %v9828_v56, %v15310_v30  ;;  %v15311_v46 = vld [vmem:[#allocation197_spill] sm:$0xff]  ;;  %v15312_v55 = vld [vmem:[#allocation230_spill] sm:$0xff] }
 0x4bb   :  { %v1742_v34 = vsel %vm1716_vm6, %v1709_v63, %v15308_v9  ;;  %v1741_v35 = vsel %vm1716_vm6, %v1708_v61, %v15311_v46  ;;  %v15313_v42 = vld [vmem:[#allocation237_spill] sm:$0xff]  ;;  %v15314_v6 = vld [vmem:[#allocation106_spill] sm:$0xff]  ;;  %v15318_v56 = vld [vmem:[#allocation259_spill] sm:$0xff] }
 0x4bc   :  { %v1775_v16 = vsel %vm1749_vm7, %v1742_v34, %v15312_v55  ;;  %v1786_v41 = vsel %vm1782_vm8, %v1753_v23, %v15313_v42  ;;  %v1657_v54 = vsel %vm1650_vm4, %v1624_v8, %v15314_v6  ;;  %v15315_v63 = vld [vmem:[#allocation217_spill] sm:$0xff]  ;;  %v15316_v25 = vld [vmem:[#allocation250_spill] sm:$0xff]  ;;  %v15319_v46 = vld [vmem:[#allocation292_spill] sm:$0xff] }
 0x4bd   :  { %v1774_v9 = vsel %vm1749_vm7, %v1741_v35, %v15315_v63  ;;  %v1808_v57 = vsel %vm1782_vm8, %v1775_v16, %v15316_v25  ;;  %v1819_v30 = vsel %vm1815_vm9, %v1786_v41, %v15317_v32  ;;  %v15320_v55 = vld [vmem:[#allocation293_spill] sm:$0xff]  ;;  %v7401_v35 = vld [vmem:[%s14701_s0 + $0x20] sm:$0xff]  ;;  %v15321_v32 = vld [vmem:[#allocation107_spill] sm:$0xff] }
 0x4be   :  { %v1807_v61 = vsel %vm1782_vm8, %v1774_v9, %v15318_v56  ;;  %v1841_v34 = vsel %vm1815_vm9, %v1808_v57, %v15319_v46  ;;  %v1852_v23 = vsel %vm1848_vm10, %v1819_v30, %v15320_v55  ;;  %v7400_v8 = vld [vmem:[%s14701_s0 + $0x18] sm:$0xff]  ;;  %1430 = vrot.lane.b32.xlu2 %v7401_v35, %s7456_s25  ;;  %v1645_v56 = vsel %vm1617_vm3, %v9860_v24, %v15321_v32  ;;  %v15322_v16 = vld [vmem:[#allocation294_spill] sm:$0xff]  ;;  %v15323_v41 = vld [vmem:[#allocation327_spill] sm:$0xff]  ;;  %v1281_v35 = vpop.permute.xlu1 %1280 }
 0x4bf   :  { %1428 = vrot.lane.b32.xlu1 %v7400_v8, %s7456_s25  ;;  %v1840_v42 = vsel %vm1815_vm9, %v1807_v61, %v15322_v16  ;;  %v1874_v6 = vsel %vm1848_vm10, %v1841_v34, %v15323_v41  ;;  %v15324_v63 = vld [vmem:[#allocation334_spill] sm:$0xff]  ;;  %v7402_v25 = vld [vmem:[%s14701_s0 + $0x10] sm:$0xff]  ;;  %v15325_v57 = vld [vmem:[#allocation139_spill] sm:$0xff] }
 0x4c0   :  { %v1885_v9 = vsel %vm1881_vm11, %v1852_v23, %v15324_v63  ;;  %1426 = vrot.lane.b32.xlu0 %v7402_v25, %s7456_s25  ;;  %v1679_v30 = vsel %vm1650_vm4, %v1646_v58, %v15325_v57  ;;  %v15326_v46 = vld [vmem:[#allocation314_spill] sm:$0xff]  ;;  %v15327_v8 = vld [vmem:[#allocation347_spill] sm:$0xff]  ;;  %v1333_v23 = vpop.permute.xlu2 %1332  ;;  %v15344_v24 = vld [vmem:[#allocation276_spill] sm:$0xff] }
 0x4c1   :  { %v1873_v55 = vsel %vm1848_vm10, %v1840_v42, %v15326_v46  ;;  %v1907_v61 = vsel %vm1881_vm11, %v1874_v6, %v15327_v8  ;;  %v1918_v34 = vsel %vm1914_vm12, %v1885_v9, %v9602_v49  ;;  %v15328_v32 = vld [vmem:[#allocation146_spill] sm:$0xff]  ;;  %v1279_v42 = vpop.permute.xlu0 %1278  ;;  %v15332_v9 = vld [vmem:[#allocation179_spill] sm:$0xff] }
 0x4c2   :  { %v1690_v16 = vsel %vm1683_vm5, %v1657_v54, %v15328_v32  ;;  %v15329_v41 = vld [vmem:[#allocation354_spill] sm:$0xff]  ;;  %v10230_v25 = vsel %vm1914_vm12, %v1907_v61, %v1281_v35  ;;  %v10233_v58 = vsel %vm1947_vm13, %v1918_v34, %v1333_v23 }
 0x4c3   :  { %v1906_v63 = vsel %vm1881_vm11, %v1873_v55, %v15329_v41  ;;  %v15330_v57 = vld [vmem:[#allocation126_spill] sm:$0xff]  ;;  %v1723_v8 = vsel %vm1716_vm6, %v1690_v16, %v15332_v9  ;;  %v15333_v55 = vld [vmem:[#allocation89_spill] sm:$0xff]  ;;  %v15340_v9 = vld [vmem:[#allocation240_spill] sm:$0xff] }
 0x4c4   :  { %v1678_v6 = vsel %vm1650_vm4, %v1645_v56, %v15330_v57  ;;  %v15331_v46 = vld [vmem:[#allocation158_spill] sm:$0xff]  ;;  %v10242_v54 = vsel %vm1914_vm12, %v1906_v63, %v1279_v42  ;;  %v1627_v61 = vsel %vm1617_vm3, %v9762_v59, %v15333_v55  ;;  %v15336_v56 = vld [vmem:[#allocation199_spill] sm:$0xff]  ;;  %v15338_v57 = vld [vmem:[#allocation200_spill] sm:$0xff] }
 0x4c5   :  { %v1712_v49 = vsel %vm1683_vm5, %v1679_v30, %v15331_v46  ;;  %v15334_v35 = vld [vmem:[#allocation166_spill] sm:$0xff]  ;;  %v1756_v41 = vsel %vm1749_vm7, %v1723_v8, %v15336_v56  ;;  %v15337_v30 = vld [vmem:[#allocation108_spill] sm:$0xff]  ;;  %v15339_v42 = vld [vmem:[#allocation233_spill] sm:$0xff] }
 0x4c6   :  { %v1711_v34 = vsel %vm1683_vm5, %v1678_v6, %v15334_v35  ;;  %v15335_v23 = vld [vmem:[#allocation198_spill] sm:$0xff]  ;;  %v1649_v16 = vsel %vm1617_vm3, %v9841_v20, %v15337_v30  ;;  %v1789_v55 = vsel %vm1782_vm8, %v1756_v41, %v15340_v9  ;;  %v15341_v6 = vld [vmem:[#allocation109_spill] sm:$0xff] }
 0x4c7   :  { %v1745_v32 = vsel %vm1716_vm6, %v1712_v49, %v15335_v23  ;;  %v1744_v63 = vsel %vm1716_vm6, %v1711_v34, %v15338_v57  ;;  %v1660_v35 = vsel %vm1650_vm4, %v1627_v61, %v15341_v6  ;;  %v15342_v49 = vld [vmem:[#allocation220_spill] sm:$0xff]  ;;  %v15343_v8 = vld [vmem:[#allocation254_spill] sm:$0xff]  ;;  %v1822_v30 = vsel %vm1815_vm9, %v1789_v55, %v15344_v24  ;;  %v15346_v57 = vld [vmem:[#allocation295_spill] sm:$0xff] }
 0x4c8   :  { %v1778_v46 = vsel %vm1749_vm7, %v1745_v32, %v15339_v42  ;;  %v1777_v23 = vsel %vm1749_vm7, %v1744_v63, %v15342_v49  ;;  %v15345_v20 = vld [vmem:[#allocation262_spill] sm:$0xff]  ;;  %v15347_v42 = vld [vmem:[#allocation296_spill] sm:$0xff]  ;;  %v10283_v63 = vld [vmem:[%s14701_s0 + $0x38] sm:$0xff] }
 0x4c9   :  { %v1811_v56 = vsel %vm1782_vm8, %v1778_v46, %v15343_v8  ;;  %v1810_v34 = vsel %vm1782_vm8, %v1777_v23, %v15345_v20  ;;  %v1855_v41 = vsel %vm1848_vm10, %v1822_v30, %v15347_v42  ;;  %v7403_v61 = vld [vmem:[%s14701_s0 + $0x30] sm:$0xff]  ;;  %1436 = vrot.lane.b32.xlu2 %v10283_v63, %s7456_s25  ;;  %v15348_v20 = vld [vmem:[#allocation110_spill] sm:$0xff]  ;;  %v15349_v46 = vld [vmem:[#allocation297_spill] sm:$0xff] }
 0x4ca   :  { %v1844_v32 = vsel %vm1815_vm9, %v1811_v56, %v15346_v57  ;;  %1434 = vrot.lane.b32.xlu1 %v7403_v61, %s7456_s25  ;;  %v1648_v24 = vsel %vm1617_vm3, %v9881_v50, %v15348_v20  ;;  %v1843_v9 = vsel %vm1815_vm9, %v1810_v34, %v15349_v46  ;;  %v15350_v55 = vld [vmem:[#allocation330_spill] sm:$0xff]  ;;  %v15351_v49 = vld [vmem:[#allocation337_spill] sm:$0xff]  ;;  %v7405_v8 = vld [vmem:[%s14701_s0 + $0x28] sm:$0xff]  ;;  %v1287_v20 = vpop.permute.xlu1 %1286 }
 0x4cb   :  { %v1877_v6 = vsel %vm1848_vm10, %v1844_v32, %v15350_v55  ;;  %v1888_v23 = vsel %vm1881_vm11, %v1855_v41, %v15351_v49  ;;  %1432 = vrot.lane.b32.xlu0 %v7405_v8, %s7456_s25  ;;  %v15352_v56 = vld [vmem:[#allocation142_spill] sm:$0xff]  ;;  %v15353_v57 = vld [vmem:[#allocation317_spill] sm:$0xff]  ;;  %v1339_v41 = vpop.permute.xlu2 %1338  ;;  %v15370_v50 = vld [vmem:[#allocation279_spill] sm:$0xff] }
 0x4cc   :  { %v1682_v30 = vsel %vm1650_vm4, %v1649_v16, %v15352_v56  ;;  %v1876_v42 = vsel %vm1848_vm10, %v1843_v9, %v15353_v57  ;;  %v15354_v61 = vld [vmem:[#allocation349_spill] sm:$0xff]  ;;  %v1921_v32 = vsel %vm1914_vm12, %v1888_v23, %v9702_v14  ;;  %v1285_v9 = vpop.permute.xlu0 %1284  ;;  %v15358_v23 = vld [vmem:[#allocation182_spill] sm:$0xff] }
 0x4cd   :  { %v1910_v34 = vsel %vm1881_vm11, %v1877_v6, %v15354_v61  ;;  %v15355_v46 = vld [vmem:[#allocation149_spill] sm:$0xff]  ;;  %v1909_v49 = vsel %vm1881_vm11, %v1876_v42, %v9413_v11  ;;  %v10316_v16 = vsel %vm1947_vm13, %v1921_v32, %v1339_v41  ;;  %v15359_v11 = vld [vmem:[#allocation92_spill] sm:$0xff] }
 0x4ce   :  { %v1693_v55 = vsel %vm1683_vm5, %v1660_v35, %v15355_v46  ;;  %v10313_v8 = vsel %vm1914_vm12, %v1910_v34, %v1287_v20  ;;  %v15356_v56 = vld [vmem:[#allocation129_spill] sm:$0xff]  ;;  %v10325_v35 = vsel %vm1914_vm12, %v1909_v49, %v1285_v9  ;;  %v1630_v42 = vsel %vm1617_vm3, %v9776_v44, %v15359_v11  ;;  %v15365_v9 = vld [vmem:[#allocation236_spill] sm:$0xff] }
 0x4cf   :  { %v1681_v6 = vsel %vm1650_vm4, %v1648_v24, %v15356_v56  ;;  %v15357_v57 = vld [vmem:[#allocation161_spill] sm:$0xff]  ;;  %v1726_v61 = vsel %vm1716_vm6, %v1693_v55, %v15358_v23  ;;  %v15362_v24 = vld [vmem:[#allocation202_spill] sm:$0xff]  ;;  %v15364_v56 = vld [vmem:[#allocation203_spill] sm:$0xff] }
 0x4d0   :  { %v1715_v14 = vsel %vm1683_vm5, %v1682_v30, %v15357_v57  ;;  %v15360_v34 = vld [vmem:[#allocation169_spill] sm:$0xff]  ;;  %v1759_v46 = vsel %vm1749_vm7, %v1726_v61, %v15362_v24  ;;  %v15363_v30 = vld [vmem:[#allocation111_spill] sm:$0xff] }
 0x4d1   :  { %v1714_v32 = vsel %vm1683_vm5, %v1681_v6, %v15360_v34  ;;  %v15361_v20 = vld [vmem:[#allocation201_spill] sm:$0xff]  ;;  %v1653_v55 = vsel %vm1650_vm4, %v9855_v52, %v15363_v30  ;;  %v15366_v23 = vld [vmem:[#allocation243_spill] sm:$0xff]  ;;  %v15367_v6 = vld [vmem:[#allocation112_spill] sm:$0xff] }
 0x4d2   :  { %v1748_v41 = vsel %vm1716_vm6, %v1715_v14, %v15361_v20  ;;  %v1747_v49 = vsel %vm1716_vm6, %v1714_v32, %v15364_v56  ;;  %v1792_v11 = vsel %vm1782_vm8, %v1759_v46, %v15366_v23  ;;  %v1663_v34 = vsel %vm1650_vm4, %v1630_v42, %v15367_v6  ;;  %v15368_v14 = vld [vmem:[#allocation223_spill] sm:$0xff]  ;;  %v15369_v61 = vld [vmem:[#allocation257_spill] sm:$0xff]  ;;  %v15372_v56 = vld [vmem:[#allocation298_spill] sm:$0xff] }
 0x4d3   :  { %v1781_v57 = vsel %vm1749_vm7, %v1748_v41, %v15365_v9  ;;  %v1780_v20 = vsel %vm1749_vm7, %v1747_v49, %v15368_v14  ;;  %v1825_v52 = vsel %vm1815_vm9, %v1792_v11, %v15370_v50  ;;  %v15371_v30 = vld [vmem:[#allocation265_spill] sm:$0xff]  ;;  %v15373_v9 = vld [vmem:[#allocation299_spill] sm:$0xff]  ;;  %v10366_v49 = vld [vmem:[%s14701_s0 + $0x50] sm:$0xff] }
 0x4d4   :  { %v1814_v24 = vsel %vm1782_vm8, %v1781_v57, %v15369_v61  ;;  %v1813_v32 = vsel %vm1782_vm8, %v1780_v20, %v15371_v30  ;;  %v1858_v46 = vsel %vm1848_vm10, %v1825_v52, %v15373_v9  ;;  %v7406_v42 = vld [vmem:[%s14701_s0 + $0x48] sm:$0xff]  ;;  %1442 = vrot.lane.b32.xlu2 %v10366_v49, %s7456_s25  ;;  %v15374_v50 = vld [vmem:[#allocation113_spill] sm:$0xff]  ;;  %v15375_v23 = vld [vmem:[#allocation300_spill] sm:$0xff] }
 0x4d5   :  { %v1847_v41 = vsel %vm1815_vm9, %v1814_v24, %v15372_v56  ;;  %1440 = vrot.lane.b32.xlu1 %v7406_v42, %s7456_s25  ;;  %v1652_v57 = vsel %vm1650_vm4, %v9928_v21, %v15374_v50  ;;  %v1846_v11 = vsel %vm1815_vm9, %v1813_v32, %v15375_v23  ;;  %v15376_v6 = vld [vmem:[#allocation333_spill] sm:$0xff]  ;;  %v15377_v20 = vld [vmem:[#allocation340_spill] sm:$0xff]  ;;  %v7408_v24 = vld [vmem:[%s14701_s0 + $0x40] sm:$0xff]  ;;  %v1293_v42 = vpop.permute.xlu1 %1292 }
 0x4d6   :  { %v1880_v14 = vsel %vm1848_vm10, %v1847_v41, %v15376_v6  ;;  %v1891_v61 = vsel %vm1881_vm11, %v1858_v46, %v15377_v20  ;;  %1438 = vrot.lane.b32.xlu0 %v7408_v24, %s7456_s25  ;;  %v15378_v52 = vld [vmem:[#allocation145_spill] sm:$0xff]  ;;  %v15379_v56 = vld [vmem:[#allocation320_spill] sm:$0xff]  ;;  %v1345_v46 = vpop.permute.xlu2 %1344  ;;  %v15382_v6 = vld [vmem:[#allocation358_spill] sm:$0xff] }
 0x4d7   :  { %v1686_v30 = vsel %vm1683_vm5, %v1653_v55, %v15378_v52  ;;  %v1879_v21 = vsel %vm1848_vm10, %v1846_v11, %v15379_v56  ;;  %v15380_v9 = vld [vmem:[#allocation352_spill] sm:$0xff]  ;;  %v1924_v41 = vsel %vm1914_vm12, %v1891_v61, %v9811_v19  ;;  %v1291_v11 = vpop.permute.xlu0 %1290  ;;  %v15386_v61 = vld [vmem:[#allocation185_spill] sm:$0xff] }
 0x4d8   :  { %v1913_v32 = vsel %vm1881_vm11, %v1880_v14, %v15380_v9  ;;  %v15381_v50 = vld [vmem:[#allocation152_spill] sm:$0xff]  ;;  %v1912_v20 = vsel %vm1881_vm11, %v1879_v21, %v15382_v6  ;;  %v10399_v55 = vsel %vm1947_vm13, %v1924_v41, %v1345_v46  ;;  %v15387_v21 = vld [vmem:[#allocation55_spill] sm:$0xff]  ;;  %v15391_v6 = vld [vmem:[#allocation74_spill] sm:$0xff] }
 0x4d9   :  { %v1696_v23 = vsel %vm1683_vm5, %v1663_v34, %v15381_v50  ;;  %v10396_v18 = vsel %vm1914_vm12, %v1913_v32, %v1293_v42  ;;  %15383 = vst [vmem:[#allocation252_spill] sm:$0xff] %v10399_v55  ;;  %v15384_v52 = vld [vmem:[#allocation132_spill] sm:$0xff]  ;;  %v10408_v34 = vsel %vm1914_vm12, %v1912_v20, %v1291_v11  ;;  %v10413_v32 = vsel %vm1584_vm2, %v9627_v37, %v15387_v21  ;;  %v15390_v50 = vld [vmem:[#allocation205_spill] sm:$0xff]  ;;  %v15392_v20 = vld [vmem:[#allocation206_spill] sm:$0xff] }
 0x4da   :  { %v1685_v14 = vsel %vm1683_vm5, %v1652_v57, %v15384_v52  ;;  %v15385_v56 = vld [vmem:[#allocation164_spill] sm:$0xff]  ;;  %v1729_v9 = vsel %vm1716_vm6, %v1696_v23, %v15386_v61  ;;  %v1623_v23 = vsel %vm1617_vm3, %v10413_v32, %v15391_v6  ;;  %v15393_v52 = vld [vmem:[#allocation239_spill] sm:$0xff]  ;;  %v15396_v21 = vld [vmem:[#allocation226_spill] sm:$0xff] }
 0x4db   :  { %v1719_v19 = vsel %vm1716_vm6, %v1686_v30, %v15385_v56  ;;  %v15388_v41 = vld [vmem:[#allocation172_spill] sm:$0xff]  ;;  %v1762_v30 = vsel %vm1749_vm7, %v1729_v9, %v15390_v50  ;;  %v15394_v56 = vld [vmem:[#allocation246_spill] sm:$0xff] }
 0x4dc   :  { %v1718_v42 = vsel %vm1716_vm6, %v1685_v14, %v15388_v41  ;;  %v15389_v46 = vld [vmem:[#allocation204_spill] sm:$0xff]  ;;  %v1795_v61 = vsel %vm1782_vm8, %v1762_v30, %v15394_v56  ;;  %v15395_v14 = vld [vmem:[#allocation82_spill] sm:$0xff] }
 0x4dd   :  { %v1752_v57 = vsel %vm1749_vm7, %v1719_v19, %v15389_v46  ;;  %v1751_v11 = vsel %vm1749_vm7, %v1718_v42, %v15392_v20  ;;  %v1622_v19 = vsel %vm1617_vm3, %v9712_v28, %v15395_v14  ;;  %v15397_v41 = vld [vmem:[#allocation260_spill] sm:$0xff]  ;;  %v15398_v50 = vld [vmem:[#allocation282_spill] sm:$0xff] }
 0x4de   :  { %v1785_v37 = vsel %vm1782_vm8, %v1752_v57, %v15393_v52  ;;  %v1784_v9 = vsel %vm1782_vm8, %v1751_v11, %v15396_v21  ;;  %v1828_v6 = vsel %vm1815_vm9, %v1795_v61, %v15398_v50  ;;  %v15399_v42 = vld [vmem:[#allocation268_spill] sm:$0xff]  ;;  %v15400_v57 = vld [vmem:[#allocation301_spill] sm:$0xff]  ;;  %v15401_v30 = vld [vmem:[#allocation302_spill] sm:$0xff] }
 0x4df   :  { %v1818_v46 = vsel %vm1815_vm9, %v1785_v37, %v15397_v41  ;;  %v1817_v20 = vsel %vm1815_vm9, %v1784_v9, %v15399_v42  ;;  %v1861_v56 = vsel %vm1848_vm10, %v1828_v6, %v15401_v30  ;;  %v7409_v14 = vld [vmem:[%s14701_s0 + $0x60] sm:$0xff]  ;;  %v7410_v11 = vld [vmem:[%s14701_s0 + $0x68] sm:$0xff]  ;;  %v15404_v41 = vld [vmem:[#allocation336_spill] sm:$0xff] }
 0x4e0   :  { %v1851_v52 = vsel %vm1848_vm10, %v1818_v46, %v15400_v57  ;;  %1446 = vrot.lane.b32.xlu1 %v7409_v14, %s7456_s25  ;;  %1448 = vrot.lane.b32.xlu2 %v7410_v11, %s7456_s25  ;;  %v15402_v37 = vld [vmem:[#allocation114_spill] sm:$0xff]  ;;  %v15403_v21 = vld [vmem:[#allocation303_spill] sm:$0xff]  ;;  %v7411_v42 = vld [vmem:[%s14701_s0 + $0x58] sm:$0xff] }
 0x4e1   :  { %v1656_v61 = vsel %vm1650_vm4, %v1623_v23, %v15402_v37  ;;  %v1850_v9 = vsel %vm1848_vm10, %v1817_v20, %v15403_v21  ;;  %v1884_v46 = vsel %vm1881_vm11, %v1851_v52, %v15404_v41  ;;  %v15405_v50 = vld [vmem:[#allocation343_spill] sm:$0xff]  ;;  %1444 = vrot.lane.b32.xlu0 %v7411_v42, %s7456_s25  ;;  %v15406_v57 = vld [vmem:[#allocation116_spill] sm:$0xff]  ;;  %v1331_v37 = vpop.permute.xlu1 %1330 }
 0x4e2   :  { %v1894_v6 = vsel %vm1881_vm11, %v1861_v56, %v15405_v50  ;;  %v1655_v30 = vsel %vm1650_vm4, %v1622_v19, %v15406_v57  ;;  %v15407_v14 = vld [vmem:[#allocation323_spill] sm:$0xff]  ;;  %v1351_v56 = vpop.permute.xlu2 %1350  ;;  %v15409_v21 = vld [vmem:[#allocation148_spill] sm:$0xff] }
 0x4e3   :  { %v1883_v23 = vsel %vm1881_vm11, %v1850_v9, %v15407_v14  ;;  %v15408_v11 = vld [vmem:[#allocation355_spill] sm:$0xff]  ;;  %v1927_v52 = vsel %vm1914_vm12, %v1894_v6, %v9912_v33  ;;  %v1689_v41 = vsel %vm1683_vm5, %v1656_v61, %v15409_v21  ;;  %v1329_v9 = vpop.permute.xlu0 %1328  ;;  %v15413_v61 = vld [vmem:[#allocation4_spill] sm:$0xff] }
 0x4e4   :  { %v1917_v20 = vsel %vm1914_vm12, %v1884_v46, %v15408_v11  ;;  %v1916_v50 = vsel %vm1914_vm12, %v1883_v23, %v9502_v45  ;;  %v10481_v19 = vsel %vm1947_vm13, %v1927_v52, %v1351_v56  ;;  %v15411_v57 = vld [vmem:[#allocation135_spill] sm:$0xff]  ;;  %v1526_v45 = vsel %vm1518_vm0, %v10283_v63, %v15413_v61  ;;  %v15421_v61 = vld [vmem:[#allocation45_spill] sm:$0xff] }
 0x4e5   :  { %v10478_v55 = vsel %vm1947_vm13, %v1917_v20, %v1331_v37  ;;  %v1688_v46 = vsel %vm1683_vm5, %v1655_v30, %v15411_v57  ;;  %v15412_v14 = vld [vmem:[#allocation167_spill] sm:$0xff]  ;;  %v10488_v6 = vsel %vm1947_vm13, %v1916_v50, %v1329_v9  ;;  %v15416_v37 = vld [vmem:[#allocation2_spill] sm:$0xff] }
 0x4e6   :  { %15410 = vst [vmem:[#allocation125_spill] sm:$0xff] %v10478_v55  ;;  %v1722_v33 = vsel %vm1716_vm6, %v1689_v41, %v15412_v14  ;;  %v15414_v23 = vld [vmem:[#allocation175_spill] sm:$0xff]  ;;  %v1527_v56 = vsel %vm1518_vm0, %v7408_v24, %v15416_v37  ;;  %v15417_v30 = vld [vmem:[#allocation26_spill] sm:$0xff]  ;;  %v15418_v41 = vld [vmem:[#allocation209_spill] sm:$0xff] }
 0x4e7   :  { %v1721_v11 = vsel %vm1716_vm6, %v1688_v46, %v15414_v23  ;;  %v15415_v20 = vld [vmem:[#allocation207_spill] sm:$0xff]  ;;  %v1559_v21 = vsel %vm1551_vm1, %v1526_v45, %v15417_v30  ;;  %v15419_v9 = vld [vmem:[#allocation242_spill] sm:$0xff]  ;;  %v15420_v14 = vld [vmem:[#allocation24_spill] sm:$0xff] }
 0x4e8   :  { %v1755_v52 = vsel %vm1749_vm7, %v1722_v33, %v15415_v20  ;;  %v1754_v50 = vsel %vm1749_vm7, %v1721_v11, %v15418_v41  ;;  %v1560_v63 = vsel %vm1551_vm1, %v1527_v56, %v15420_v14  ;;  %v10509_v46 = vsel %vm1584_vm2, %v1559_v21, %v15421_v61  ;;  %v15422_v33 = vld [vmem:[#allocation229_spill] sm:$0xff]  ;;  %v15423_v24 = vld [vmem:[#allocation263_spill] sm:$0xff]  ;;  %v15424_v45 = vld [vmem:[#allocation58_spill] sm:$0xff] }
 0x4e9   :  { %v1788_v57 = vsel %vm1782_vm8, %v1755_v52, %v15419_v9  ;;  %v1787_v23 = vsel %vm1782_vm8, %v1754_v50, %v15422_v33  ;;  %v10517_v37 = vsel %vm1584_vm2, %v1560_v63, %v15424_v45  ;;  %v15425_v11 = vld [vmem:[#allocation271_spill] sm:$0xff]  ;;  %v15426_v30 = vld [vmem:[#allocation304_spill] sm:$0xff]  ;;  %v7412_v21 = vld [vmem:[%s14701_s0 + $0x78] sm:$0xff] }
 0x4ea   :  { %v1821_v20 = vsel %vm1815_vm9, %v1788_v57, %v15423_v24  ;;  %v1820_v52 = vsel %vm1815_vm9, %v1787_v23, %v15425_v11  ;;  %1452 = vrot.lane.b32.xlu1 %v7412_v21, %s7456_s25  ;;  %v7413_v41 = vld [vmem:[%s14701_s0 + $0x80] sm:$0xff]  ;;  %v15427_v50 = vld [vmem:[#allocation77_spill] sm:$0xff]  ;;  %v15428_v57 = vld [vmem:[#allocation84_spill] sm:$0xff] }
 0x4eb   :  { %v1854_v56 = vsel %vm1848_vm10, %v1821_v20, %v15426_v30  ;;  %1454 = vrot.lane.b32.xlu2 %v7413_v41, %s7456_s25  ;;  %v1626_v9 = vsel %vm1617_vm3, %v10517_v37, %v15427_v50  ;;  %v1625_v14 = vsel %vm1617_vm3, %v10509_v46, %v15428_v57  ;;  %v15429_v63 = vld [vmem:[#allocation306_spill] sm:$0xff]  ;;  %v15430_v33 = vld [vmem:[#allocation339_spill] sm:$0xff]  ;;  %v7414_v24 = vld [vmem:[%s14701_s0 + $0x70] sm:$0xff]  ;;  %v1337_v57 = vpop.permute.xlu1 %1336 }
 0x4ec   :  { %v1853_v61 = vsel %vm1848_vm10, %v1820_v52, %v15429_v63  ;;  %v1887_v23 = vsel %vm1881_vm11, %v1854_v56, %v15430_v33  ;;  %1450 = vrot.lane.b32.xlu0 %v7414_v24, %s7456_s25  ;;  %v15431_v20 = vld [vmem:[#allocation117_spill] sm:$0xff]  ;;  %v15432_v11 = vld [vmem:[#allocation119_spill] sm:$0xff]  ;;  %v15433_v21 = vld [vmem:[#allocation326_spill] sm:$0xff]  ;;  %v1357_v56 = vpop.permute.xlu2 %1356 }
 0x4ed   :  { %v1659_v45 = vsel %vm1650_vm4, %v1626_v9, %v15431_v20  ;;  %v1658_v30 = vsel %vm1650_vm4, %v1625_v14, %v15432_v11  ;;  %v1886_v41 = vsel %vm1881_vm11, %v1853_v61, %v15433_v21  ;;  %v15434_v50 = vld [vmem:[#allocation357_spill] sm:$0xff]  ;;  %v15435_v63 = vld [vmem:[#allocation151_spill] sm:$0xff]  ;;  %v10562_v9 = vsel %vm1947_vm13, %v10000_v38, %v1357_v56  ;;  %v1335_v14 = vpop.permute.xlu0 %1334  ;;  %v15437_v61 = vld [vmem:[#allocation138_spill] sm:$0xff] }
 0x4ee   :  { %v1920_v52 = vsel %vm1914_vm12, %v1887_v23, %v15434_v50  ;;  %v1692_v33 = vsel %vm1683_vm5, %v1659_v45, %v15435_v63  ;;  %v1919_v24 = vsel %vm1914_vm12, %v1886_v41, %v9590_v4  ;;  %v1691_v20 = vsel %vm1683_vm5, %v1658_v30, %v15437_v61  ;;  %v15438_v23 = vld [vmem:[#allocation170_spill] sm:$0xff]  ;;  %v15439_v45 = vld [vmem:[#allocation5_spill] sm:$0xff] }
 0x4ef   :  { %v10558_v55 = vsel %vm1947_vm13, %v1920_v52, %v1337_v57  ;;  %v1725_v11 = vsel %vm1716_vm6, %v1692_v33, %v15438_v23  ;;  %v10569_v21 = vsel %vm1947_vm13, %v1919_v24, %v1335_v14  ;;  %v1529_v4 = vsel %vm1518_vm0, %v10366_v49, %v15439_v45  ;;  %v15440_v41 = vld [vmem:[#allocation177_spill] sm:$0xff]  ;;  %v15441_v52 = vld [vmem:[#allocation210_spill] sm:$0xff]  ;;  %v15442_v57 = vld [vmem:[#allocation3_spill] sm:$0xff] }
 0x4f0   :  { %15436 = vst [vmem:[#allocation15_spill] sm:$0xff] %v10558_v55  ;;  %v1724_v50 = vsel %vm1716_vm6, %v1691_v20, %v15440_v41  ;;  %v1758_v38 = vsel %vm1749_vm7, %v1725_v11, %v15441_v52  ;;  %v1530_v56 = vsel %vm1518_vm0, %v7411_v42, %v15442_v57  ;;  %v15443_v30 = vld [vmem:[#allocation29_spill] sm:$0xff]  ;;  %v15444_v33 = vld [vmem:[#allocation212_spill] sm:$0xff]  ;;  %v15446_v23 = vld [vmem:[#allocation27_spill] sm:$0xff] }
 0x4f1   :  { %v1562_v63 = vsel %vm1551_vm1, %v1529_v4, %v15443_v30  ;;  %v1757_v24 = vsel %vm1749_vm7, %v1724_v50, %v15444_v33  ;;  %v15445_v14 = vld [vmem:[#allocation245_spill] sm:$0xff]  ;;  %v1563_v49 = vsel %vm1551_vm1, %v1530_v56, %v15446_v23  ;;  %v15447_v45 = vld [vmem:[#allocation48_spill] sm:$0xff]  ;;  %v15449_v42 = vld [vmem:[#allocation266_spill] sm:$0xff] }
 0x4f2   :  { %v1791_v61 = vsel %vm1782_vm8, %v1758_v38, %v15445_v14  ;;  %v10590_v20 = vsel %vm1584_vm2, %v1562_v63, %v15447_v45  ;;  %v15448_v11 = vld [vmem:[#allocation232_spill] sm:$0xff]  ;;  %v15450_v4 = vld [vmem:[#allocation61_spill] sm:$0xff]  ;;  %v15451_v50 = vld [vmem:[#allocation274_spill] sm:$0xff] }
 0x4f3   :  { %v1790_v41 = vsel %vm1782_vm8, %v1757_v24, %v15448_v11  ;;  %v1824_v52 = vsel %vm1815_vm9, %v1791_v61, %v15449_v42  ;;  %v10598_v57 = vsel %vm1584_vm2, %v1563_v49, %v15450_v4  ;;  %v15452_v30 = vld [vmem:[#allocation307_spill] sm:$0xff]  ;;  %v7415_v63 = vld [vmem:[%s14701_s0 + $0x90] sm:$0xff]  ;;  %v7416_v33 = vld [vmem:[%s14701_s0 + $0x98] sm:$0xff] }
 0x4f4   :  { %v1823_v38 = vsel %vm1815_vm9, %v1790_v41, %v15451_v50  ;;  %v1857_v56 = vsel %vm1848_vm10, %v1824_v52, %v15452_v30  ;;  %1458 = vrot.lane.b32.xlu1 %v7415_v63, %s7456_s25  ;;  %1460 = vrot.lane.b32.xlu2 %v7416_v33, %s7456_s25  ;;  %v15453_v24 = vld [vmem:[#allocation80_spill] sm:$0xff]  ;;  %v15454_v61 = vld [vmem:[#allocation87_spill] sm:$0xff]  ;;  %v15455_v49 = vld [vmem:[#allocation309_spill] sm:$0xff] }
 0x4f5   :  { %v1629_v14 = vsel %vm1617_vm3, %v10598_v57, %v15453_v24  ;;  %v1628_v23 = vsel %vm1617_vm3, %v10590_v20, %v15454_v61  ;;  %v1856_v45 = vsel %vm1848_vm10, %v1823_v38, %v15455_v49  ;;  %v15456_v11 = vld [vmem:[#allocation342_spill] sm:$0xff]  ;;  %v7417_v42 = vld [vmem:[%s14701_s0 + $0x88] sm:$0xff]  ;;  %v15457_v52 = vld [vmem:[#allocation120_spill] sm:$0xff]  ;;  %v1343_v61 = vpop.permute.xlu1 %1342 }
 0x4f6   :  { %v1890_v41 = vsel %vm1881_vm11, %v1857_v56, %v15456_v11  ;;  %1456 = vrot.lane.b32.xlu0 %v7417_v42, %s7456_s25  ;;  %v1662_v4 = vsel %vm1650_vm4, %v1629_v14, %v15457_v52  ;;  %v15458_v50 = vld [vmem:[#allocation122_spill] sm:$0xff]  ;;  %v15459_v63 = vld [vmem:[#allocation329_spill] sm:$0xff]  ;;  %v15460_v24 = vld [vmem:[#allocation359_spill] sm:$0xff]  ;;  %v1363_v56 = vpop.permute.xlu2 %1362 }
 0x4f7   :  { %v1661_v30 = vsel %vm1650_vm4, %v1628_v23, %v15458_v50  ;;  %v1889_v33 = vsel %vm1881_vm11, %v1856_v45, %v15459_v63  ;;  %v1923_v38 = vsel %vm1914_vm12, %v1890_v41, %v15460_v24  ;;  %v15461_v49 = vld [vmem:[#allocation154_spill] sm:$0xff]  ;;  %v10643_v14 = vsel %vm1947_vm13, %v10079_v0, %v1363_v56  ;;  %v1341_v23 = vpop.permute.xlu0 %1340  ;;  %v15462_v45 = vld [vmem:[#allocation141_spill] sm:$0xff] }
 0x4f8   :  { %v1695_v11 = vsel %vm1683_vm5, %v1662_v4, %v15461_v49  ;;  %v1922_v42 = vsel %vm1914_vm12, %v1889_v33, %v9688_v51  ;;  %v10639_v55 = vsel %vm1947_vm13, %v1923_v38, %v1343_v61  ;;  %v1694_v52 = vsel %vm1683_vm5, %v1661_v30, %v15462_v45  ;;  %v15463_v41 = vld [vmem:[#allocation173_spill] sm:$0xff]  ;;  %v15464_v4 = vld [vmem:[#allocation180_spill] sm:$0xff]  ;;  %v15466_v38 = vld [vmem:[#allocation215_spill] sm:$0xff] }
 0x4f9   :  { %v1728_v50 = vsel %vm1716_vm6, %v1695_v11, %v15463_v41  ;;  %v10650_v63 = vsel %vm1947_vm13, %v1922_v42, %v1341_v23  ;;  %v1727_v51 = vsel %vm1716_vm6, %v1694_v52, %v15464_v4  ;;  %v15465_v33 = vld [vmem:[#allocation213_spill] sm:$0xff]  ;;  %v15467_v61 = vld [vmem:[#allocation248_spill] sm:$0xff]  ;;  %v15468_v49 = vld [vmem:[#allocation235_spill] sm:$0xff] }
 0x4fa   :  { %v1761_v24 = vsel %vm1749_vm7, %v1728_v50, %v15465_v33  ;;  %v1760_v0 = vsel %vm1749_vm7, %v1727_v51, %v15466_v38  ;;  %v15469_v45 = vld [vmem:[#allocation269_spill] sm:$0xff]  ;;  %v15471_v41 = vld [vmem:[#allocation310_spill] sm:$0xff]  ;;  %v7418_v50 = vld [vmem:[%s14701_s0 + $0xa8] sm:$0xff] }
 0x4fb   :  { %v1794_v56 = vsel %vm1782_vm8, %v1761_v24, %v15467_v61  ;;  %v1793_v30 = vsel %vm1782_vm8, %v1760_v0, %v15468_v49  ;;  %v15470_v42 = vld [vmem:[#allocation277_spill] sm:$0xff]  ;;  %v7419_v4 = vld [vmem:[%s14701_s0 + $0xb0] sm:$0xff]  ;;  %v7420_v0 = vld [vmem:[%s14701_s0 + $0xa0] sm:$0xff] }
 0x4fc   :  { %v1827_v11 = vsel %vm1815_vm9, %v1794_v56, %v15469_v45  ;;  %v1826_v23 = vsel %vm1815_vm9, %v1793_v30, %v15470_v42  ;;  %1464 = vrot.lane.b32.xlu1 %v7418_v50, %s7456_s25  ;;  %1466 = vrot.lane.b32.xlu2 %v7419_v4, %s7456_s25  ;;  %v15472_v51 = vld [vmem:[#allocation312_spill] sm:$0xff]  ;;  %v15473_v24 = vld [vmem:[#allocation345_spill] sm:$0xff] }
 0x4fd   :  { %v1860_v52 = vsel %vm1848_vm10, %v1827_v11, %v15471_v41  ;;  %v1859_v33 = vsel %vm1848_vm10, %v1826_v23, %v15472_v51  ;;  %v15474_v61 = vld [vmem:[#allocation332_spill] sm:$0xff]  ;;  %v1349_v30 = vpop.permute.xlu1 %1348 }
 0x4fe   :  { %v1893_v38 = vsel %vm1881_vm11, %v1860_v52, %v15473_v24  ;;  %1462 = vrot.lane.b32.xlu0 %v7420_v0, %s7456_s25  ;;  %v1892_v56 = vsel %vm1881_vm11, %v1859_v33, %v15474_v61  ;;  %v1369_v45 = vpop.permute.xlu2 %1368  ;;  %v7424_v0 = vld [vmem:[%s14701_s0 + $0xd8] sm:$0xff] }
 0x4ff   :  { %v1926_v49 = vsel %vm1914_vm12, %v1893_v38, %v9504_v62  ;;  %v1925_v11 = vsel %vm1914_vm12, %v1892_v56, %v9798_v7  ;;  %v10695_v23 = vsel %vm1947_vm13, %v10162_v15, %v1369_v45  ;;  %v1347_v41 = vpop.permute.xlu0 %1346  ;;  %v7421_v62 = vld [vmem:[%s14701_s0 + $0xc0] sm:$0xff]  ;;  %v7422_v7 = vld [vmem:[%s14701_s0 + $0xc8] sm:$0xff]  ;;  %v7423_v15 = vld [vmem:[%s14701_s0 + $0xb8] sm:$0xff] }
 0x500   :  { %v10691_v42 = vsel %vm1947_vm13, %v1926_v49, %v1349_v30  ;;  %v10698_v52 = vsel %vm1947_vm13, %v1925_v11, %v1347_v41  ;;  %v7427_v11 = vld [vmem:[%s14701_s0 + $0xf0] sm:$0xff] }
 0x504   :  { %1470 = vrot.lane.b32.xlu1 %v7421_v62, %s7456_s25  ;;  %1472 = vrot.lane.b32.xlu2 %v7422_v7, %s7456_s25 }
 0x505   :  { %v1355_v50 = vpop.permute.xlu1 %1354 }
 0x506   :  { %1468 = vrot.lane.b32.xlu0 %v7423_v15, %s7456_s25  ;;  %v1375_v4 = vpop.permute.xlu2 %1374  ;;  %v10714_v51 = vsel %vm1947_vm13, %v9600_v47, %v1355_v50  ;;  %v7425_v47 = vld [vmem:[%s14701_s0 + $0xe0] sm:$0xff]  ;;  %v15476_v15 = vld [vmem:[#allocation216_spill] sm:$0xff] }
 0x507   :  { %v10718_v33 = vsel %vm1947_vm13, %v10242_v54, %v1375_v4  ;;  %v1353_v24 = vpop.permute.xlu0 %1352  ;;  %v7426_v54 = vld [vmem:[%s14701_s0 + $0xd0] sm:$0xff]  ;;  %s7457_s0 = smov 32  }
 0x508   :  { %v10722_v38 = vsel %vm1947_vm13, %v9907_v22, %v1353_v24 }
 0x50c   :  { %1476 = vrot.lane.b32.xlu1 %v7424_v0, %s7456_s25  ;;  %1478 = vrot.lane.b32.xlu2 %v7425_v47, %s7456_s25  ;;  %v15481_v0 = vld [vmem:[#allocation7_spill] sm:$0xff] }
 0x50d   :  { %v1361_v22 = vpop.permute.xlu1 %1360 }
 0x50e   :  { %1474 = vrot.lane.b32.xlu0 %v7426_v54, %s7456_s25  ;;  %v1381_v61 = vpop.permute.xlu2 %1380  ;;  %v10738_v56 = vsel %vm1947_vm13, %v9700_v10, %v1361_v22  ;;  %v15482_v22 = vld [vmem:[#allocation252_spill] sm:$0xff] }
 0x50f   :  { %v10742_v49 = vsel %vm1947_vm13, %v10325_v35, %v1381_v61  ;;  %v1359_v30 = vpop.permute.xlu0 %1358 }
 0x510   :  { %v10746_v45 = vsel %vm1947_vm13, %v9988_v17, %v1359_v30 }
 0x514   :  { %1482 = vrot.lane.b32.xlu1 %v7427_v11, %s7456_s25  ;;  %1484 = vrot.lane.b32.xlu2 %v10133_v31, %s7456_s25  ;;  %v15486_v11 = vld [vmem:[#allocation9_spill] sm:$0xff] }
 0x515   :  { %v1367_v10 = vpop.permute.xlu1 %1366 }
 0x516   :  { %1480 = vrot.lane.b32.xlu0 %v10037_v12, %s7456_s25  ;;  %v1387_v35 = vpop.permute.xlu2 %1386  ;;  %v10758_v41 = vsel %vm1947_vm13, %v9809_v48, %v1367_v10  ;;  %v15487_v10 = vld [vmem:[#allocation11_spill] sm:$0xff] }
 0x517   :  { %v10762_v17 = vsel %vm1947_vm13, %v10408_v34, %v1387_v35  ;;  %v1365_v62 = vpop.permute.xlu0 %1364 }
 0x518   :  { %v1967_v7 = vsel %vm1947_vm13, %v10067_v36, %v1365_v62 }
 0x51c   :  { %2047 = vrot.lane.b32.xlu1 %v9695_v2, %s7457_s0  ;;  %2049 = vrot.lane.b32.xlu2 %v9748_v53, %s7457_s0 }
 0x51d   :  { %v1373_v48 = vpop.permute.xlu1 %1372 }
 0x51e   :  { %2045 = vrot.lane.b32.xlu0 %v9731_v29, %s7457_s0  ;;  %v1425_v12 = vpop.permute.xlu2 %1424  ;;  %v10774_v31 = vsel %vm1947_vm13, %v9910_v13, %v1373_v48 }
 0x51f   :  { %v10778_v36 = vsel %vm1980_vm14, %v10488_v6, %v1425_v12  ;;  %v1371_v34 = vpop.permute.xlu0 %1370  ;;  %v15490_v12 = vld [vmem:[#allocation32_spill] sm:$0xff] }
 0x520   :  { %v1970_v2 = vsel %vm1947_vm13, %v10150_v5, %v1371_v34  ;;  %v15491_v34 = vld [vmem:[#allocation85_spill] sm:$0xff] }
 0x524   :  { %2053 = vrot.lane.b32.xlu1 %v9712_v28, %s7457_s0  ;;  %2055 = vrot.lane.b32.xlu2 %v10413_v32, %s7457_s0 }
 0x525   :  { %v1379_v29 = vpop.permute.xlu1 %1378 }
 0x526   :  { %2051 = vrot.lane.b32.xlu0 %v9738_v39, %s7457_s0  ;;  %v1431_v53 = vpop.permute.xlu2 %1430  ;;  %v10790_v13 = vsel %vm1947_vm13, %v9991_v27, %v1379_v29  ;;  %v15492_v29 = vld [vmem:[#allocation313_spill] sm:$0xff] }
 0x527   :  { %v10794_v6 = vsel %vm1980_vm14, %v10569_v21, %v1431_v53  ;;  %v1377_v5 = vpop.permute.xlu0 %1376 }
 0x528   :  { %v1973_v28 = vsel %vm1947_vm13, %v10230_v25, %v1377_v5 }
 0x52c   :  { %2059 = vrot.lane.b32.xlu1 %v10509_v46, %s7457_s0  ;;  %2061 = vrot.lane.b32.xlu2 %v10517_v37, %s7457_s0 }
 0x52d   :  { %v1385_v39 = vpop.permute.xlu1 %1384 }
 0x52e   :  { %2057 = vrot.lane.b32.xlu0 %v9752_v3, %s7457_s0  ;;  %v1437_v27 = vpop.permute.xlu2 %1436  ;;  %v10806_v32 = vsel %vm1947_vm13, %v10070_v1, %v1385_v39 }
 0x52f   :  { %v10810_v21 = vsel %vm1980_vm14, %v10650_v63, %v1437_v27  ;;  %v1383_v25 = vpop.permute.xlu0 %1382 }
 0x530   :  { %v1976_v46 = vsel %vm1947_vm13, %v10313_v8, %v1383_v25  ;;  %v15495_v25 = vld [vmem:[#allocation272_spill] sm:$0xff] }
 0x534   :  { %2065 = vrot.lane.b32.xlu1 %v10590_v20, %s7457_s0  ;;  %2067 = vrot.lane.b32.xlu2 %v10598_v57, %s7457_s0 }
 0x535   :  { %v1423_v3 = vpop.permute.xlu1 %1422 }
 0x536   :  { %2063 = vrot.lane.b32.xlu0 %v9762_v59, %s7457_s0  ;;  %v1443_v1 = vpop.permute.xlu2 %1442  ;;  %v10822_v37 = vsel %vm1980_vm14, %v10153_v26, %v1423_v3  ;;  %v15496_v3 = vld [vmem:[#allocation14_spill] sm:$0xff] }
 0x537   :  { %v10826_v63 = vsel %vm1980_vm14, %v10698_v52, %v1443_v1  ;;  %v1389_v8 = vpop.permute.xlu0 %1388  ;;  %v15497_v1 = vld [vmem:[#allocation12_spill] sm:$0xff] }
 0x538   :  { %v1979_v20 = vsel %vm1947_vm13, %v10396_v18, %v1389_v8 }
 0x53c   :  { %2071 = vrot.lane.b32.xlu1 %v9744_v40, %s7457_s0  ;;  %2073 = vrot.lane.b32.xlu2 %v9487_v43, %s7457_s0  ;;  %v15477_v40 = vld [vmem:[#allocation6_spill] sm:$0xff] }
 0x53d   :  { %v1429_v59 = vpop.permute.xlu1 %1428  ;;  %v15478_v43 = vld [vmem:[#allocation10_spill] sm:$0xff] }
 0x53e   :  { %2069 = vrot.lane.b32.xlu0 %v9776_v44, %s7457_s0  ;;  %v1449_v26 = vpop.permute.xlu2 %1448  ;;  %v10838_v57 = vsel %vm1980_vm14, %v10233_v58, %v1429_v59 }
 0x53f   :  { %v10842_v52 = vsel %vm1980_vm14, %v10722_v38, %v1449_v26  ;;  %v1427_v18 = vpop.permute.xlu0 %1426  ;;  %v15480_v38 = vld [vmem:[#allocation8_spill] sm:$0xff] }
 0x540   :  { %15475 = vst [vmem:[#allocation16_spill] sm:$0xff] %v10842_v52 }
 0x544   :  { %2077 = vrot.lane.b32.xlu1 %v15476_v15, %s7457_s0  ;;  %2079 = vrot.lane.b32.xlu2 %v15477_v40, %s7457_s0  ;;  %v15500_v15 = vld [vmem:[#allocation66_spill] sm:$0xff]  ;;  %v15501_v40 = vld [vmem:[#allocation13_spill] sm:$0xff] }
 0x545   :  { %v1435_v44 = vpop.permute.xlu1 %1434 }
 0x546   :  { %2075 = vrot.lane.b32.xlu0 %v15478_v43, %s7457_s0  ;;  %v1455_v50 = vpop.permute.xlu2 %1454  ;;  %v10852_v58 = vsel %vm1980_vm14, %v10316_v16, %v1435_v44 }
 0x547   :  { %v10856_v4 = vsel %vm1980_vm14, %v10746_v45, %v1455_v50  ;;  %v1433_v24 = vpop.permute.xlu0 %1432  ;;  %v15485_v45 = vld [vmem:[#allocation251_spill] sm:$0xff] }
 0x548   :  { %15479 = vst [vmem:[#allocation17_spill] sm:$0xff] %v10856_v4 }
 0x54c   :  { %2083 = vrot.lane.b32.xlu1 %v15480_v38, %s7457_s0  ;;  %2085 = vrot.lane.b32.xlu2 %v15481_v0, %s7457_s0  ;;  %v10940_v38 = vld [vmem:[%s14702_s1] ss:$0 sm:$0xff]  ;;  %v15504_v0 = vld [vmem:[#allocation125_spill] sm:$0xff] }
 0x54d   :  { %v1441_v47 = vpop.permute.xlu1 %1440 }
 0x54e   :  { %2081 = vrot.lane.b32.xlu0 %v9820_v60, %s7457_s0  ;;  %v1461_v54 = vpop.permute.xlu2 %1460  ;;  %v10866_v16 = vsel %vm1980_vm14, %v15482_v22, %v1441_v47  ;;  %v1983_v47 = vsel %vm1980_vm14, %v15504_v0, %v1427_v18 }
 0x54f   :  { %15483 = vst [vmem:[#allocation159_spill] sm:$0xff] %v10866_v16  ;;  %v10869_v61 = vsel %vm1980_vm14, %v1967_v7, %v1461_v54  ;;  %v10871_v30 = vpop.permute.xlu0 %1438 }
 0x550   :  { %15484 = vst [vmem:[#allocation18_spill] sm:$0xff] %v10869_v61 }
 0x554   :  { %2089 = vrot.lane.b32.xlu1 %v15485_v45, %s7457_s0  ;;  %2091 = vrot.lane.b32.xlu2 %v15486_v11, %s7457_s0 }
 0x555   :  { %v1447_v60 = vpop.permute.xlu1 %1446 }
 0x556   :  { %2087 = vrot.lane.b32.xlu0 %v15487_v10, %s7457_s0  ;;  %v1467_v35 = vpop.permute.xlu2 %1466  ;;  %v10881_v62 = vsel %vm1980_vm14, %v10481_v19, %v1447_v60 }
 0x557   :  { %15488 = vst [vmem:[#allocation19_spill] sm:$0xff] %v10881_v62  ;;  %v10884_v7 = vsel %vm1980_vm14, %v1970_v2, %v1467_v35  ;;  %v10886_v48 = vpop.permute.xlu0 %1444 }
 0x558   :  { %15489 = vst [vmem:[#allocation20_spill] sm:$0xff] %v10884_v7 }
 0x55c   :  { %2095 = vrot.lane.b32.xlu1 %v15490_v12, %s7457_s0  ;;  %2097 = vrot.lane.b32.xlu2 %v15491_v34, %s7457_s0  ;;  %v15507_v12 = vld [vmem:[#allocation15_spill] sm:$0xff] }
 0x55d   :  { %v1453_v53 = vpop.permute.xlu1 %1452 }
 0x55e   :  { %2093 = vrot.lane.b32.xlu0 %v15492_v29, %s7457_s0  ;;  %v1473_v5 = vpop.permute.xlu2 %1472  ;;  %v10896_v19 = vsel %vm1980_vm14, %v10562_v9, %v1453_v53 }
 0x55f   :  { %15493 = vst [vmem:[#allocation178_spill] sm:$0xff] %v10896_v19  ;;  %v10899_v2 = vsel %vm1980_vm14, %v1973_v28, %v1473_v5  ;;  %v1451_v39 = vpop.permute.xlu0 %1450 }
 0x560   :  { %15494 = vst [vmem:[#allocation21_spill] sm:$0xff] %v10899_v2  ;;  %v10903_v27 = vsel %vm1980_vm14, %v10714_v51, %v1451_v39 }
 0x564   :  { %2101 = vrot.lane.b32.xlu1 %v15495_v25, %s7457_s0  ;;  %2103 = vrot.lane.b32.xlu2 %v15496_v3, %s7457_s0 }
 0x566   :  { %2099 = vrot.lane.b32.xlu0 %v15497_v1, %s7457_s0  ;;  %v1459_v8 = vpop.permute.xlu1 %1458  ;;  %v1479_v9 = vpop.permute.xlu2 %1478 }
 0x567   :  { %v10913_v28 = vsel %vm1980_vm14, %v10643_v14, %v1459_v8  ;;  %v10916_v59 = vsel %vm1980_vm14, %v1976_v46, %v1479_v9 }
 0x568   :  { %15498 = vst [vmem:[#allocation22_spill] sm:$0xff] %v10913_v28  ;;  %v1457_v51 = vpop.permute.xlu0 %1456 }
 0x569   :  { %15499 = vst [vmem:[#allocation23_spill] sm:$0xff] %v10916_v59  ;;  %v10920_v26 = vsel %vm1980_vm14, %v10738_v56, %v1457_v51 }
 0x56c   :  { %2107 = vrot.lane.b32.xlu1 %v15500_v15, %s7457_s0 }
 0x56e   :  { %2105 = vrot.lane.b32.xlu0 %v15501_v40, %s7457_s0  ;;  %v1465_v43 = vpop.permute.xlu1 %1464  ;;  %v1485_v44 = vpop.permute.xlu2 %1484 }
 0x56f   :  { %v10928_v14 = vsel %vm1980_vm14, %v10695_v23, %v1465_v43  ;;  %v10931_v46 = vsel %vm1980_vm14, %v1979_v20, %v1485_v44  ;;  %v10947_v23 = vld [vmem:[%s14703_s2] ss:$0 sm:$0xff]  ;;  %v1989_v44 = vsel %vm1980_vm14, %v10639_v55, %v10871_v30  ;;  %v14727_v30 = vmov 2131351028  }
 0x570   :  { %15502 = vst [vmem:[#allocation219_spill] sm:$0xff] %v10928_v14  ;;  %v1463_v50 = vpop.permute.xlu0 %1462 }
 0x571   :  { %15503 = vst [vmem:[#allocation25_spill] sm:$0xff] %v10931_v46  ;;  %v10935_v56 = vsel %vm1980_vm14, %v10758_v41, %v1463_v50 }
 0x576   :  { %v1471_v54 = vpop.permute.xlu1 %1470  ;;  %v2050_v20 = vpop.permute.xlu2 %2049 }
 0x577   :  { %v10951_v41 = vsel %vm1980_vm14, %v10718_v33, %v1471_v54  ;;  %v2144_v22 = vsel %vm2141_vm15, %v1983_v47, %v2050_v20  ;;  %v1986_v33 = vsel %vm1980_vm14, %v15507_v12, %v1433_v24  ;;  %v14725_v12 = vmov 2475754826  }
 0x578   :  { %15505 = vst [vmem:[#allocation28_spill] sm:$0xff] %v10951_v41  ;;  %v1469_v45 = vpop.permute.xlu0 %1468  ;;  %v2180_v11 = vmul.f32 %v10940_v38, %v2144_v22 }
 0x579   :  { %v10957_v10 = vsel %vm1980_vm14, %v10774_v31, %v1469_v45 }
 0x57a   :  { %15506 = vst [vmem:[#allocation30_spill] sm:$0xff] %v10957_v10  ;;  %v10960_v18 = vadd.f32 %v10947_v23, %v2180_v11  ;;  %v14735_v11 = vmov 683565275  }
 0x57c   :  { %v14724_v60 = vand.u32 2147483647, %v10960_v18  ;;  %v2559_v35 = vand.u32 2139095040, %v10960_v18 }
 0x57e   :  { %v2560_v34 = vshrl.u32 %v2559_v35, 23  ;;  %v2563_v29 = vand.u32 8388607, %v14724_v60  ;;  %v1477_v53 = vpop.permute.xlu1 %1476  ;;  %v2056_v5 = vpop.permute.xlu2 %2055 }
 0x57f   :  { %v10970_v31 = vsel %vm1980_vm14, %v10742_v49, %v1477_v53  ;;  %v2147_v39 = vsel %vm2141_vm15, %v1986_v33, %v2056_v5  ;;  %v14729_v53 = vmov 2102212464  }
 0x580   :  { %15508 = vst [vmem:[#allocation255_spill] sm:$0xff] %v10970_v31  ;;  %v1475_v25 = vpop.permute.xlu0 %1474  ;;  %v7249_v3 = vadd.s32 4294967169, %v2560_v34  ;;  %v2564_v1 = vor.u32 8388608, %v2563_v29  ;;  %v2183_v8 = vmul.f32 %v10940_v38, %v2147_v39 }
 0x581   :  { %v10976_v24 = vsel %vm1980_vm14, %v10790_v13, %v1475_v25  ;;  %v14731_v25 = vmov 920167782  }
 0x582   :  { %15509 = vst [vmem:[#allocation31_spill] sm:$0xff] %v10976_v24  ;;  %v2566_v9 = vadd.s32 1, %v7249_v3  ;;  %v10979_v51 = vadd.f32 %v10947_v23, %v2183_v8  ;;  %v10981_v15 = vshll.u32 %v2564_v1, 8  ;;  %v14733_v8 = vmov 1326507024  }
 0x584   :  { %vm2567_vm0 = vcmp.gt.s32.totalorder %v2566_v9, 0  ;;  %v14723_v40 = vand.u32 2147483647, %v10979_v51  ;;  %v3024_v43 = vand.u32 2139095040, %v10979_v51  ;;  %v2605_v54 = vand.u32 65535, %v10981_v15 }
 0x585   :  { %v2568_v49 = vsel %vm2567_vm0, %v2566_v9, 0  ;;  %v2606_v20 = vshrl.u32 %v10981_v15, 16 }
 0x586   :  { %v2570_v50 = vand.u32 31, %v2568_v49  ;;  %v1483_v0 = vpop.permute.xlu1 %1482  ;;  %v3025_v22 = vshrl.u32 %v3024_v43, 23  ;;  %v2569_v45 = vshrl.u32 %v2568_v49, 5  ;;  %v10998_v55 = vand.u32 8388607, %v14723_v40 }
 0x587   :  { %v10990_v13 = vsel %vm1980_vm14, %v10762_v17, %v1483_v0 }
 0x588   :  { %15510 = vst [vmem:[#allocation35_spill] sm:$0xff] %v10990_v13  ;;  %v2571_v47 = vsub.s32 32, %v2570_v50  ;;  %v2573_v35 = vshll.u32 %v14735_v11, %v2570_v50  ;;  %v2576_v33 = vshll.u32 %v14725_v12, %v2570_v50  ;;  %v2579_v29 = vshll.u32 %v14727_v30, %v2570_v50 }
 0x589   :  { %v2582_v39 = vshll.u32 %v14729_v53, %v2570_v50  ;;  %v2585_v1 = vshll.u32 %v14731_v25, %v2570_v50  ;;  %v7258_v40 = vadd.s32 4294967169, %v3025_v22  ;;  %vm2588_vm1 = vcmp.lt.s32.totalorder %v2569_v45, 1 }
 0x58a   :  { %v2574_v17 = vshrl.u32 %v14725_v12, %v2571_v47  ;;  %v2577_v34 = vshrl.u32 %v14727_v30, %v2571_v47  ;;  %v2580_v5 = vshrl.u32 %v14729_v53, %v2571_v47  ;;  %v2583_v3 = vshrl.u32 %v14731_v25, %v2571_v47 }
 0x58b   :  { %v2586_v9 = vshrl.u32 %v14733_v8, %v2571_v47  ;;  %vm2591_vm2 = vcmp.lt.s32.totalorder %v2569_v45, 4  ;;  %v2572_v30 = vshrl.u32 %v14735_v11, %v2571_v47  ;;  %vm2590_vm3 = vcmp.lt.s32.totalorder %v2569_v45, 3 }
 0x58c   :  { %v2575_v49 = vor.u32 %v2574_v17, %v2573_v35  ;;  %v2578_v43 = vor.u32 %v2577_v34, %v2576_v33  ;;  %v2581_v0 = vor.u32 %v2580_v5, %v2579_v29  ;;  %v2584_v60 = vor.u32 %v2583_v3, %v2582_v39  ;;  %v2062_v33 = vpop.permute.xlu2 %2061 }
 0x58d   :  { %v2587_v12 = vor.u32 %v2586_v9, %v2585_v1  ;;  %v3031_v50 = vadd.s32 1, %v7258_v40  ;;  %vm2589_vm4 = vcmp.lt.s32.totalorder %v2569_v45, 2  ;;  %v3029_v3 = vor.u32 8388608, %v10998_v55 }
 0x58e   :  { %v2593_v13 = vsel %vm2591_vm2, %v2581_v0, 2102212464  ;;  %v2596_v53 = vsel %vm2588_vm1, %v2575_v49, %v2578_v43  ;;  %v2600_v46 = vsel %vm2588_vm1, %v2578_v43, %v2581_v0  ;;  %v2597_v31 = vsel %vm2591_vm2, %v2584_v60, 920167782 }
 0x58f   :  { %v2601_v59 = vsel %vm2591_vm2, %v2587_v12, 1326507024  ;;  %v2592_v25 = vsel %vm2588_vm1, %v2572_v30, %v2575_v49  ;;  %v2598_v8 = vsel %vm2590_vm3, %v2581_v0, %v2597_v31  ;;  %v2594_v17 = vsel %vm2590_vm3, %v2578_v43, %v2593_v13 }
 0x590   :  { %v2602_v35 = vsel %vm2590_vm3, %v2584_v60, %v2601_v59  ;;  %v2599_v22 = vsel %vm2589_vm4, %v2596_v53, %v2598_v8  ;;  %vm3032_vm5 = vcmp.gt.s32.totalorder %v3031_v50, 0  ;;  %v2150_v1 = vsel %vm2141_vm15, %v1989_v44, %v2062_v33 }
 0x591   :  { %v2603_v34 = vsel %vm2589_vm4, %v2600_v46, %v2602_v35  ;;  %v2629_v39 = vand.u32 65535, %v2599_v22  ;;  %v2630_v47 = vshrl.u32 %v2599_v22, 16  ;;  %v11011_v9 = vsel %vm2589_vm4, %v2592_v25, %v2594_v17 }
 0x592   :  { %v2607_v29 = vand.u32 65535, %v2603_v34  ;;  %v2608_v5 = vshrl.u32 %v2603_v34, 16  ;;  %v3033_v12 = vsel %vm3032_vm5, %v3031_v50, 0  ;;  %v14737_v33 = vmov 0  }
 0x593   :  { %v2632_v60 = vmul.u32 %v2630_v47, %v2605_v54  ;;  %v2633_v13 = vmul.u32 %v2629_v39, %v2606_v20  ;;  %v2631_v53 = vmul.u32 %v2629_v39, %v2605_v54  ;;  %v2634_v8 = vmul.u32 %v2630_v47, %v2606_v20 }
 0x594   :  { %v2610_v40 = vmul.u32 %v2608_v5, %v2605_v54  ;;  %v2611_v45 = vmul.u32 %v2607_v29, %v2606_v20  ;;  %v2609_v31 = vmul.u32 %v2607_v29, %v2605_v54  ;;  %v2612_v59 = vmul.u32 %v2608_v5, %v2606_v20 }
 0x595   :  { %v2635_v0 = vshll.u32 %v2632_v60, 16  ;;  %v2636_v35 = vshrl.u32 %v2632_v60, 16  ;;  %v2637_v44 = vshll.u32 %v2633_v13, 16  ;;  %v3035_v25 = vand.u32 31, %v3033_v12 }
 0x596   :  { %v2613_v30 = vshll.u32 %v2610_v40, 16  ;;  %v2614_v46 = vshrl.u32 %v2610_v40, 16  ;;  %v2615_v49 = vshll.u32 %v2611_v45, 16  ;;  %v2616_v43 = vshrl.u32 %v2611_v45, 16 }
 0x597   :  { %v2638_v50 = vshrl.u32 %v2633_v13, 16  ;;  %vm2639_vm7 = vc.u32 %v2631_v53, %v2635_v0  ;;  %v2641_v22 = vadd.s32 %v2635_v0, %v2631_v53  ;;  %v11015_v54 = vsub.s32 32, %v3035_v25 }
 0x598   :  { %vm2617_vm6 = vc.u32 %v2609_v31, %v2613_v30  ;;  %v2619_v55 = vadd.s32 %v2613_v30, %v2609_v31  ;;  %v2640_v29 = vsel %vm2639_vm7, 1, %v14737_v33  ;;  %v11018_v39 = vshrl.u32 %v3033_v12, 5 }
 0x599   :  { %v2618_v17 = vsel %vm2617_vm6, 1, %v14737_v33  ;;  %v2642_v5 = vadd.s32 %v2640_v29, %v2634_v8  ;;  %vm2643_vm9 = vc.u32 %v2641_v22, %v2637_v44  ;;  %v11021_v45 = vadd.s32 %v2641_v22, %v2637_v44 }
 0x59a   :  { %v2620_v34 = vadd.s32 %v2618_v17, %v2612_v59  ;;  %vm2621_vm8 = vc.u32 %v2619_v55, %v2615_v49  ;;  %v2644_v40 = vsel %vm2643_vm9, 1, %v14737_v33  ;;  %v3038_v31 = vshll.u32 %v14735_v11, %v3035_v25 }
 0x59b   :  { %v2622_v20 = vsel %vm2621_vm8, 1, %v14737_v33  ;;  %v2646_v60 = vadd.s32 %v2644_v40, %v2642_v5  ;;  %v15511_v59 = vmov 2475754826   ;;  %v15512_v53 = vmov 2131351028  }
 0x59c   :  { %v2624_v47 = vadd.s32 %v2622_v20, %v2620_v34  ;;  %v3039_v13 = vshrl.u32 %v15511_v59, %v11015_v54  ;;  %v3041_v30 = vshll.u32 %v15511_v59, %v3035_v25  ;;  %v3042_v49 = vshrl.u32 %v15512_v53, %v11015_v54 }
 0x59d   :  { %v3044_v12 = vshll.u32 %v15512_v53, %v3035_v25  ;;  %v15513_v0 = vmov 2102212464   ;;  %v2647_v17 = vadd.s32 %v2646_v60, %v2636_v35  ;;  %v15514_v29 = vmov 920167782  }
 0x59e   :  { %v2625_v8 = vadd.s32 %v2624_v47, %v2614_v46  ;;  %v3045_v55 = vshrl.u32 %v15513_v0, %v11015_v54  ;;  %v3047_v44 = vshll.u32 %v15513_v0, %v3035_v25  ;;  %v11033_v22 = vor.u32 %v3039_v13, %v3038_v31 }
 0x59f   :  { %v11035_v34 = vor.u32 %v3042_v49, %v3041_v30  ;;  %v3048_v20 = vshrl.u32 %v15514_v29, %v11015_v54  ;;  %v3050_v46 = vshll.u32 %v15514_v29, %v3035_v25  ;;  %v15515_v47 = vmov 1326507024  }
 0x5a0   :  { %v11039_v5 = vadd.s32 %v2625_v8, %v2616_v43  ;;  %v3046_v40 = vor.u32 %v3045_v55, %v3044_v12  ;;  %v3051_v11 = vshrl.u32 %v15515_v47, %v11015_v54  ;;  %v2648_v33 = vadd.s32 %v2647_v17, %v2638_v50 }
 0x5a1   :  { %v3049_v41 = vor.u32 %v3048_v20, %v3047_v44  ;;  %v2186_v2 = vmul.f32 %v10940_v38, %v2150_v1  ;;  %vm3053_vm11 = vcmp.lt.s32.totalorder %v11018_v39, 1  ;;  %v11048_v31 = vshll.u32 %v3029_v3, 8 }
 0x5a2   :  { %vm2651_vm10 = vc.u32 %v11039_v5, %v11021_v45  ;;  %v3052_v35 = vor.u32 %v3051_v11, %v3050_v46  ;;  %v2649_v43 = vmul.u32 %v10981_v15, %v11011_v9  ;;  %v2652_v60 = vadd.s32 1, %v2648_v33 }
 0x5a3   :  { %vm3056_vm12 = vcmp.lt.s32.totalorder %v11018_v39, 4  ;;  %v3061_v25 = vsel %vm3053_vm11, %v11033_v22, %v11035_v34  ;;  %vm3055_vm13 = vcmp.lt.s32.totalorder %v11018_v39, 3  ;;  %v3065_v3 = vsel %vm3053_vm11, %v11035_v34, %v3046_v40 }
 0x5a4   :  { %v3062_v11 = vsel %vm3056_vm12, %v3049_v41, 920167782  ;;  %v3066_v15 = vsel %vm3056_vm12, %v3052_v35, 1326507024  ;;  %v2653_v1 = vsel %vm2651_vm10, %v2652_v60, %v2648_v33  ;;  %vm3054_vm0 = vcmp.lt.s32.totalorder %v11018_v39, 2 }
 0x5a5   :  { %v3063_v9 = vsel %vm3055_vm13, %v3046_v40, %v3062_v11  ;;  %v3067_v50 = vsel %vm3055_vm13, %v3049_v41, %v3066_v15  ;;  %v2654_v13 = vadd.s32 %v2653_v1, %v2649_v43  ;;  %v3070_v8 = vand.u32 65535, %v11048_v31 }
 0x5a6   :  { %v3064_v30 = vsel %vm3054_vm0, %v3061_v25, %v3063_v9  ;;  %v3068_v49 = vsel %vm3054_vm0, %v3065_v3, %v3067_v50  ;;  %v3071_v12 = vshrl.u32 %v11048_v31, 16  ;;  %v11077_v25 = vadd.f32 %v10947_v23, %v2186_v2 }
 0x5a7   :  { %v3072_v33 = vand.u32 65535, %v3068_v49  ;;  %v3073_v55 = vshrl.u32 %v3068_v49, 16  ;;  %v3095_v44 = vshrl.u32 %v3064_v30, 16  ;;  %v2655_v17 = vadd.s32 536870912, %v2654_v13 }
 0x5a8   :  { %v3094_v20 = vand.u32 65535, %v3064_v30  ;;  %vm2558_vm1 = vcmp.lt.s32.totalorder %v10960_v18, 0 }
 0x5a9   :  { %v3075_v46 = vmul.u32 %v3073_v55, %v3070_v8  ;;  %v3076_v35 = vmul.u32 %v3072_v33, %v3071_v12  ;;  %v2656_v60 = vshrl.u32 %v2655_v17, 30  ;;  %v3097_v41 = vmul.u32 %v3095_v44, %v3070_v8 }
 0x5aa   :  { %v3074_v43 = vmul.u32 %v3072_v33, %v3070_v8  ;;  %v3077_v3 = vmul.u32 %v3073_v55, %v3071_v12  ;;  %v3098_v1 = vmul.u32 %v3094_v20, %v3071_v12  ;;  %v3096_v14 = vmul.u32 %v3094_v20, %v3070_v8 }
 0x5ab   :  { %v3078_v11 = vshll.u32 %v3075_v46, 16  ;;  %v2657_v15 = vshll.u32 %v2656_v60, 30  ;;  %v3100_v9 = vshll.u32 %v3097_v41, 16  ;;  %v3080_v50 = vshll.u32 %v3076_v35, 16 }
 0x5ac   :  { %v3058_v17 = vsel %vm3056_vm12, %v3046_v40, 2102212464  ;;  %v3079_v7 = vshrl.u32 %v3075_v46, 16  ;;  %v15516_v33 = vmov 0   ;;  %v3099_v2 = vmul.u32 %v3095_v44, %v3071_v12 }
 0x5ad   :  { %vm3082_vm2 = vc.u32 %v3074_v43, %v3078_v11  ;;  %v3084_v49 = vadd.s32 %v3078_v11, %v3074_v43  ;;  %v2658_v30 = vsub.s32 %v2654_v13, %v2657_v15  ;;  %vm3104_vm4 = vc.u32 %v3096_v14, %v3100_v9 }
 0x5ae   :  { %v3083_v28 = vsel %vm3082_vm2, 1, %v15516_v33  ;;  %v3102_v24 = vshll.u32 %v3098_v1, 16  ;;  %v3105_v43 = vsel %vm3104_vm4, 1, %v15516_v33  ;;  %v3106_v8 = vadd.s32 %v3100_v9, %v3096_v14 }
 0x5af   :  { %v3085_v61 = vadd.s32 %v3083_v28, %v3077_v3  ;;  %vm3086_vm3 = vc.u32 %v3084_v49, %v3080_v50  ;;  %vm2659_vm5 = vcmp.lt.s32.totalorder %v2658_v30, 0  ;;  %v2660_v55 = vsub.s32 0, %v2658_v30 }
 0x5b0   :  { %v3087_v19 = vsel %vm3086_vm3, 1, %v15516_v33  ;;  %v3489_v13 = vand.u32 2139095040, %v11077_v25  ;;  %v2680_v40 = vsub.s32 4, %v2656_v60  ;;  %v15517_v46 = vmov 683565275  }
 0x5b1   :  { %v3089_v4 = vadd.s32 %v3087_v19, %v3085_v61  ;;  %v2661_v20 = vsel %vm2659_vm5, %v2660_v55, %v2658_v30  ;;  %v3037_v11 = vshrl.u32 %v15517_v46, %v11015_v54  ;;  %v3107_v28 = vadd.s32 %v3105_v43, %v3099_v2  ;;  %v1481_v61 = vpop.permute.xlu0 %1480 }
 0x5b2   :  { %v15518_v12 = vand.u32 2147483647, %v10960_v18  ;;  %v2662_v15 = vclz %v2661_v20  ;;  %vm3108_vm7 = vc.u32 %v3106_v8, %v3102_v24  ;;  %v3059_v14 = vsel %vm3055_vm13, %v11035_v34, %v3058_v17 }
 0x5b3   :  { %v3090_v3 = vadd.s32 %v3089_v4, %v3079_v7  ;;  %v3057_v19 = vsel %vm3053_vm11, %v3037_v11, %v11033_v22  ;;  %v3081_v54 = vshrl.u32 %v3076_v35, 16  ;;  %v3109_v9 = vsel %vm3108_vm7, 1, %v15516_v33 }
 0x5b4   :  { %vm11090_vm6 = vcmp.le.f32.partialorder %v15518_v12, 0.7853982  ;;  %v7250_v50 = vadd.s32 4294967294, %v2662_v15  ;;  %v3101_v49 = vshrl.u32 %v3097_v41, 16  ;;  %v3111_v2 = vadd.s32 %v3109_v9, %v3107_v28 }
 0x5b5   :  { %v3490_v55 = vshrl.u32 %v3489_v13, 23  ;;  %v2681_v4 = vsel %vm2558_vm1, %v2680_v40, %v2656_v60  ;;  %v3091_v7 = vadd.s32 %v3090_v3, %v3081_v54  ;;  %v14739_v43 = vand.u32 2147483647, %v11077_v25 }
 0x5b6   :  { %v11106_v22 = vsel %vm1980_vm14, %v10806_v32, %v1481_v61  ;;  %v2650_v34 = vadd.s32 %v11021_v45, %v11039_v5  ;;  %vm7251_vm8 = vcmp.lt.s32.totalorder %v7250_v50, 0  ;;  %v3103_v35 = vshrl.u32 %v3098_v1, 16  ;;  %v2048_v32 = vpop.permute.xlu1 %2047 }
 0x5b7   :  { %15521 = vst [vmem:[#allocation275_spill] sm:$0xff] %v11106_v22  ;;  %v3112_v17 = vadd.s32 %v3111_v2, %v3101_v49  ;;  %v2665_v20 = vsel %vm7251_vm8, 0, %v7250_v50  ;;  %v3060_v41 = vsel %vm3054_vm0, %v3057_v19, %v3059_v14  ;;  %v3110_v13 = vadd.s32 %v3106_v8, %v3102_v24 }
 0x5b8   :  { %v7267_v11 = vadd.s32 4294967169, %v3490_v55  ;;  %v2666_v60 = vsub.s32 32, %v2665_v20  ;;  %v2670_v40 = vsub.s32 4294967266, %v2665_v20  ;;  %v2683_v28 = vsel %vm11090_vm6, 0, %v2681_v4 }
 0x5b9   :  { %v3113_v12 = vadd.s32 %v3112_v17, %v3103_v35  ;;  %vm3116_vm9 = vc.u32 %v3091_v7, %v3110_v13  ;;  %v3493_v45 = vand.u32 8388607, %v14739_v43  ;;  %v2667_v1 = vshll.u32 %v2658_v30, %v2665_v20 }
 0x5ba   :  { %v3496_v5 = vadd.s32 1, %v7267_v11  ;;  %v2668_v15 = vshrl.u32 %v2650_v34, %v2666_v60  ;;  %v2671_v3 = vadd.s32 127, %v2670_v40  ;;  %v2700_v39 = vadd.s32 3, %v2683_v28 }
 0x5bb   :  { %v3117_v61 = vadd.s32 1, %v3113_v12  ;;  %v3114_v24 = vmul.u32 %v11048_v31, %v3060_v41  ;;  %v2143_v8 = vsel %vm2141_vm15, %v10778_v36, %v2048_v32  ;;  %v3494_v49 = vor.u32 8388608, %v3493_v45 }
 0x5bc   :  { %vm3497_vm10 = vcmp.gt.s32.totalorder %v3496_v5, 0  ;;  %v2669_v19 = vor.u32 %v2668_v15, %v2667_v1  ;;  %v2672_v14 = vshll.u32 %v2671_v3, 23  ;;  %v2179_v30 = vmul.f32 %v10940_v38, %v2143_v8 }
 0x5bd   :  { %v3118_v54 = vsel %vm3116_vm9, %v3117_v61, %v3113_v12  ;;  %v3498_v9 = vsel %vm3497_vm10, %v3496_v5, 0  ;;  %v11122_v31 = vand.u32 3, %v2700_v39  ;;  %v11124_v20 = vadd.s32 %v3110_v13, %v3091_v7 }
 0x5be   :  { %v3119_v50 = vadd.s32 %v3118_v54, %v3114_v24  ;;  %v3500_v2 = vand.u32 31, %v3498_v9  ;;  %v2673_v55 = vor.u32 4788187, %v2672_v14  ;;  %v2676_v17 = vcvt.s32.f32 %v2669_v19 }
 0x5bf   :  { %v11130_v60 = vshll.u32 %v3494_v49, 8  ;;  %v11136_v32 = vadd.f32 %v10947_v23, %v2179_v30  ;;  %v11142_v15 = vshrl.u32 %v3498_v9, 5  ;;  %vm3023_vm11 = vcmp.lt.s32.totalorder %v10979_v51, 0 }
 0x5c0   :  { %v3120_v4 = vadd.s32 536870912, %v3119_v50  ;;  %v11120_v34 = vsub.s32 32, %v3500_v2  ;;  %v2674_v35 = vand.u32 2147483647, %v2673_v55  ;;  %v3503_v28 = vshll.u32 %v15517_v46, %v3500_v2 }
 0x5c1   :  { %v3506_v13 = vshll.u32 %v15511_v59, %v3500_v2  ;;  %v3512_v5 = vshll.u32 %v15513_v0, %v3500_v2  ;;  %v3509_v3 = vshll.u32 %v15512_v53, %v3500_v2  ;;  %v3515_v54 = vshll.u32 %v15514_v29, %v3500_v2 }
 0x5c2   :  { %v3121_v36 = vshrl.u32 %v3120_v4, 30  ;;  %v3504_v41 = vshrl.u32 %v15511_v59, %v11120_v34  ;;  %v3507_v11 = vshrl.u32 %v15512_v53, %v11120_v34  ;;  %v2677_v40 = vmul.f32 %v2676_v17, %v2674_v35 }
 0x5c3   :  { %v3513_v12 = vshrl.u32 %v15514_v29, %v11120_v34  ;;  %v3510_v45 = vshrl.u32 %v15513_v0, %v11120_v34  ;;  %v3516_v61 = vshrl.u32 %v15515_v47, %v11120_v34  ;;  %v11158_v9 = vand.u32 65535, %v11130_v60 }
 0x5c4   :  { %v3122_v7 = vshll.u32 %v3121_v36, 30  ;;  %v2678_v1 = vxor.u32 2147483648, %v2677_v40  ;;  %v11149_v24 = vor.u32 %v3504_v41, %v3503_v28  ;;  %v11151_v8 = vor.u32 %v3507_v11, %v3506_v13 }
 0x5c5   :  { %v3514_v19 = vor.u32 %v3513_v12, %v3512_v5  ;;  %v11161_v49 = vshrl.u32 %v11130_v60, 16  ;;  %v3511_v30 = vor.u32 %v3510_v45, %v3509_v3  ;;  %vm3518_vm13 = vcmp.lt.s32.totalorder %v11142_v15, 1 }
 0x5c6   :  { %v11147_v39 = vsub.s32 %v3119_v50, %v3122_v7  ;;  %v2679_v14 = vsel %vm2558_vm1, %v2678_v1, %v2677_v40  ;;  %vm3521_vm0 = vcmp.lt.s32.totalorder %v11142_v15, 4  ;;  %v2404_v2 = vand.u32 2139095040, %v11136_v32 }
 0x5c7   :  { %v11166_v50 = vsel %vm11090_vm6, %v10960_v18, %v2679_v14  ;;  %v3517_v17 = vor.u32 %v3516_v61, %v3515_v54  ;;  %v3526_v44 = vsel %vm3518_vm13, %v11149_v24, %v11151_v8  ;;  %v3527_v41 = vsel %vm3521_vm0, %v3514_v19, 920167782 }
 0x5c8   :  { %vm3124_vm12 = vcmp.lt.s32.totalorder %v11147_v39, 0  ;;  %v3125_v55 = vsub.s32 0, %v11147_v39  ;;  %v2684_v4 = vmul.f32 %v11166_v50, %v11166_v50  ;;  %vm3520_vm1 = vcmp.lt.s32.totalorder %v11142_v15, 3 }
 0x5c9   :  { %v3145_v12 = vsub.s32 4, %v3121_v36  ;;  %vm3519_vm2 = vcmp.lt.s32.totalorder %v11142_v15, 2  ;;  %v3528_v7 = vsel %vm3520_vm1, %v3511_v30, %v3527_v41  ;;  %v3530_v61 = vsel %vm3518_vm13, %v11151_v8, %v3511_v30 }
 0x5ca   :  { %v3126_v35 = vsel %vm3124_vm12, %v3125_v55, %v11147_v39  ;;  %v2685_v11 = vmul.f32 -0.001358992, %v2684_v4  ;;  %v2692_v40 = vmul.f32 -0.00019511016, %v2684_v4  ;;  %v3529_v3 = vsel %vm3519_vm2, %v3526_v44, %v3528_v7 }
 0x5cb   :  { %v3127_v28 = vclz %v3126_v35  ;;  %v3531_v14 = vsel %vm3521_vm0, %v3517_v17, 1326507024  ;;  %v3560_v54 = vshrl.u32 %v3529_v3, 16  ;;  %v11194_v55 = vshrl.u32 %v2404_v2, 23 }
 0x5cc   :  { %v2686_v45 = vadd.f32 0.041655596, %v2685_v11  ;;  %v2693_v5 = vadd.f32 0.008332121, %v2692_v40  ;;  %v3532_v11 = vsel %vm3520_vm1, %v3514_v19, %v3531_v14  ;;  %v11200_v44 = vsel %vm3023_vm11, %v3145_v12, %v3121_v36 }
 0x5cd   :  { %v7259_v1 = vadd.s32 4294967294, %v3127_v28  ;;  %v11204_v28 = vshrl.u32 %v15517_v46, %v11120_v34  ;;  %v3533_v17 = vsel %vm3519_vm2, %v3530_v61, %v3532_v11  ;;  %vm2703_vm4 = vcmp.eq.s32.totalorder %v11122_v31, 0 }
 0x5ce   :  { %v2687_v35 = vmul.f32 %v2686_v45, %v2684_v4  ;;  %v2694_v41 = vmul.f32 %v2693_v5, %v2684_v4  ;;  %v3559_v5 = vand.u32 65535, %v3529_v3  ;;  %vm2706_vm5 = vcmp.eq.s32.totalorder %v11122_v31, 2 }
 0x5cf   :  { %vm7260_vm3 = vcmp.lt.s32.totalorder %v7259_v1, 0  ;;  %v3523_v36 = vsel %vm3521_vm0, %v3511_v30, 2102212464  ;;  %v3537_v12 = vand.u32 65535, %v3533_v17  ;;  %vm7206_vm6 = vcmask 326656  }
 0x5d0   :  { %v3130_v40 = vsel %vm7260_vm3, 0, %v7259_v1  ;;  %v2688_v2 = vadd.f32 -0.4999988, %v2687_v35  ;;  %v2695_v7 = vadd.f32 -0.16666654, %v2694_v41  ;;  %v3538_v1 = vshrl.u32 %v3533_v17, 16 }
 0x5d1   :  { %v3131_v45 = vsub.s32 32, %v3130_v40  ;;  %v3135_v19 = vsub.s32 4294967266, %v3130_v40  ;;  %vm2702_vm7 = vcmp.lt.s32.totalorder %v11122_v31, 2  ;;  %v11215_v35 = vmul.u32 %v3560_v54, %v11158_v9 }
 0x5d2   :  { %v2689_v34 = vmul.f32 %v2688_v2, %v2684_v4  ;;  %v2696_v14 = vmul.f32 %v2695_v7, %v2684_v4  ;;  %vm2699_vm8 = vweird.f32 %v10960_v18  ;;  %v3132_v3 = vshll.u32 %v11147_v39, %v3130_v40 }
 0x5d3   :  { %v3133_v61 = vshrl.u32 %v11124_v20, %v3131_v45  ;;  %v3136_v41 = vadd.s32 127, %v3135_v19  ;;  %v3540_v11 = vmul.u32 %v3538_v1, %v11158_v9  ;;  %v3541_v30 = vmul.u32 %v3537_v12, %v11161_v49 }
 0x5d4   :  { %v2690_v17 = vadd.f32 1.0, %v2689_v34  ;;  %v2697_v43 = vadd.f32 1.0, %v2696_v14  ;;  %v15522_v4 = vand.u32 2147483647, %v10979_v51  ;;  %v3561_v20 = vmul.u32 %v3559_v5, %v11158_v9 }
 0x5d5   :  { %v11229_v7 = vmul.u32 %v3559_v5, %v11161_v49  ;;  %v3134_v45 = vor.u32 %v3133_v61, %v3132_v3  ;;  %v3137_v39 = vshll.u32 %v3136_v41, 23  ;;  %v3539_v40 = vmul.u32 %v3537_v12, %v11158_v9 }
 0x5d6   :  { %vm11223_vm9 = vcmp.le.f32.partialorder %v15522_v4, 0.7853982  ;;  %v3543_v19 = vshll.u32 %v3540_v11, 16  ;;  %v2698_v13 = vmul.f32 %v2697_v43, %v11166_v50  ;;  %v2707_v34 = vxor.u32 2147483648, %v2690_v17 }
 0x5d7   :  { %v3542_v14 = vmul.u32 %v3538_v1, %v11161_v49  ;;  %v3545_v22 = vshll.u32 %v3541_v30, 16  ;;  %v3138_v4 = vor.u32 4788187, %v3137_v39  ;;  %v3565_v10 = vshll.u32 %v11215_v35, 16 }
 0x5d8   :  { %vm3547_vm10 = vc.u32 %v3539_v40, %v3543_v19  ;;  %v3549_v62 = vadd.s32 %v3543_v19, %v3539_v40  ;;  %v2704_v52 = vxor.u32 2147483648, %v2698_v13  ;;  %v3544_v16 = vshrl.u32 %v3540_v11, 16 }
 0x5d9   :  { %v3548_v5 = vsel %vm3547_vm10, 1, %v15516_v33  ;;  %v3564_v61 = vmul.u32 %v3560_v54, %v11161_v49  ;;  %v3139_v3 = vand.u32 2147483647, %v3138_v4  ;;  %v3141_v9 = vcvt.s32.f32 %v3134_v45 }
 0x5da   :  { %v3550_v12 = vadd.s32 %v3548_v5, %v3542_v14  ;;  %vm3551_vm12 = vc.u32 %v3549_v62, %v3545_v22  ;;  %v2705_v43 = vsel %vm2703_vm4, %v2690_v17, %v2704_v52  ;;  %v2708_v50 = vsel %vm2706_vm5, %v2707_v34, %v2698_v13 }
 0x5db   :  { %v3552_v1 = vsel %vm3551_vm12, 1, %v15516_v33  ;;  %vm3569_vm0 = vc.u32 %v3561_v20, %v3565_v10  ;;  %v2709_v41 = vsel %vm2702_vm7, %v2705_v43, %v2708_v50  ;;  %v3142_v11 = vmul.f32 %v3141_v9, %v3139_v3 }
 0x5dc   :  { %v3554_v39 = vadd.s32 %v3552_v1, %v3550_v12  ;;  %v3570_v49 = vsel %vm3569_vm0, 1, %v15516_v33  ;;  %v2710_v54 = vsel %vm2699_vm8, nan, %v2709_v41  ;;  %v3567_v62 = vshll.u32 %v11229_v7, 16 }
 0x5dd   :  { %v3571_v22 = vadd.s32 %v3565_v10, %v3561_v20  ;;  %v3572_v52 = vadd.s32 %v3570_v49, %v3564_v61  ;;  %7209 = vst.msk [vmem:[%s14704_s3 + $0x10] sm:$0xff] %vm7206_vm6, %v2710_v54  ;;  %v3143_v13 = vxor.u32 2147483648, %v3142_v11  ;;  %v3148_v31 = vsel %vm11223_vm9, 0, %v11200_v44 }
 0x5de   :  { %v3555_v17 = vadd.s32 %v3554_v39, %v3544_v16  ;;  %v7246_v45 = vadd.s32 4294967169, %v11194_v55  ;;  %v3522_v18 = vsel %vm3518_vm13, %v11204_v28, %v11149_v24  ;;  %v3524_v10 = vsel %vm3520_vm1, %v11151_v8, %v3523_v36 }
 0x5df   :  { %vm3573_vm3 = vc.u32 %v3571_v22, %v3567_v62  ;;  %v15525_v20 = vand.u32 2147483647, %v11136_v32  ;;  %v3144_v44 = vsel %vm3023_vm11, %v3143_v13, %v3142_v11  ;;  %v3546_v16 = vshrl.u32 %v3541_v30, 16 }
 0x5e0   :  { %v3574_v55 = vsel %vm3573_vm3, 1, %v15516_v33  ;;  %v2411_v19 = vadd.s32 1, %v7246_v45  ;;  %v11273_v24 = vsel %vm11223_vm9, %v10979_v51, %v3144_v44  ;;  %v3165_v28 = vadd.s32 3, %v3148_v31 }
 0x5e1   :  { %v11265_v40 = vand.u32 8388607, %v15525_v20  ;;  %v3566_v8 = vshrl.u32 %v11215_v35, 16  ;;  %v3576_v36 = vadd.s32 %v3574_v55, %v3572_v52  ;;  %v3149_v34 = vmul.f32 %v11273_v24, %v11273_v24 }
 0x5e2   :  { %v3525_v14 = vsel %vm3519_vm2, %v3522_v18, %v3524_v10  ;;  %v11280_v4 = vadd.s32 %v3555_v17, %v3546_v16  ;;  %vm2412_vm11 = vcmp.gt.s32.totalorder %v2411_v19, 0  ;;  %v1992_v30 = vsel %vm1980_vm14, %v10691_v42, %v10886_v48 }
 0x5e3   :  { %v3568_v2 = vshrl.u32 %v11229_v7, 16  ;;  %v3577_v5 = vadd.s32 %v3576_v36, %v3566_v8  ;;  %v2413_v61 = vsel %vm2412_vm11, %v2411_v19, 0  ;;  %v3150_v3 = vmul.f32 -0.001358992, %v3149_v34 }
 0x5e4   :  { %v3157_v35 = vmul.f32 -0.00019511016, %v3149_v34  ;;  %v11286_v9 = vadd.s32 %v3571_v22, %v3567_v62  ;;  %v2415_v12 = vand.u32 31, %v2413_v61  ;;  %v11288_v43 = vand.u32 3, %v3165_v28 }
 0x5e5   :  { %v3578_v15 = vadd.s32 %v3577_v5, %v3568_v2  ;;  %v3579_v50 = vmul.u32 %v11130_v60, %v3525_v14  ;;  %v2409_v1 = vor.u32 8388608, %v11265_v40  ;;  %v3151_v41 = vadd.f32 0.041655596, %v3150_v3  ;;  %v2068_v40 = vpop.permute.xlu2 %2067 }
 0x5e6   :  { %v3158_v11 = vadd.f32 0.008332121, %v3157_v35  ;;  %vm3581_vm14 = vc.u32 %v11280_v4, %v11286_v9  ;;  %v2416_v42 = vsub.s32 32, %v2415_v12  ;;  %v11294_v7 = vshrl.u32 %v2413_v61, 5 }
 0x5e7   :  { %v3582_v48 = vadd.s32 1, %v3578_v15  ;;  %v2418_v39 = vshll.u32 %v15517_v46, %v2415_v12  ;;  %v2421_v49 = vshll.u32 %v15511_v59, %v2415_v12  ;;  %v3152_v54 = vmul.f32 %v3151_v41, %v3149_v34 }
 0x5e8   :  { %v3159_v62 = vmul.f32 %v3158_v11, %v3149_v34  ;;  %v2419_v22 = vshrl.u32 %v15511_v59, %v2416_v42  ;;  %v2427_v60 = vshll.u32 %v15513_v0, %v2415_v12  ;;  %v2422_v13 = vshrl.u32 %v15512_v53, %v2416_v42 }
 0x5e9   :  { %v3583_v52 = vsel %vm3581_vm14, %v3582_v48, %v3578_v15  ;;  %v2425_v31 = vshrl.u32 %v15513_v0, %v2416_v42  ;;  %v2428_v17 = vshrl.u32 %v15514_v29, %v2416_v42  ;;  %v3153_v45 = vadd.f32 -0.4999988, %v3152_v54 }
 0x5ea   :  { %v3160_v18 = vadd.f32 -0.16666654, %v3159_v62  ;;  %v3584_v10 = vadd.s32 %v3583_v52, %v3579_v50  ;;  %v2424_v20 = vshll.u32 %v15512_v53, %v2415_v12  ;;  %v2420_v44 = vor.u32 %v2419_v22, %v2418_v39 }
 0x5eb   :  { %v2423_v16 = vor.u32 %v2422_v13, %v2421_v49  ;;  %v2429_v55 = vor.u32 %v2428_v17, %v2427_v60  ;;  %v2430_v19 = vshll.u32 %v15514_v29, %v2415_v12  ;;  %v3154_v28 = vmul.f32 %v3153_v45, %v3149_v34 }
 0x5ec   :  { %v3161_v8 = vmul.f32 %v3160_v18, %v3149_v34  ;;  %vm3167_vm13 = vcmp.lt.s32.totalorder %v11288_v43, 2  ;;  %v3585_v36 = vadd.s32 536870912, %v3584_v10  ;;  %v2431_v14 = vshrl.u32 %v15515_v47, %v2416_v42 }
 0x5ed   :  { %vm3164_vm1 = vweird.f32 %v10979_v51  ;;  %vm3168_vm2 = vcmp.eq.s32.totalorder %v11288_v43, 0  ;;  %v2426_v2 = vor.u32 %v2425_v31, %v2424_v20  ;;  %vm2436_vm4 = vcmp.lt.s32.totalorder %v11294_v7, 4 }
 0x5ee   :  { %v2153_v5 = vsel %vm2141_vm15, %v1992_v30, %v2068_v40  ;;  %v3155_v61 = vadd.f32 1.0, %v3154_v28  ;;  %v3162_v3 = vadd.f32 1.0, %v3161_v8  ;;  %v11311_v35 = vshrl.u32 %v3585_v36, 30 }
 0x5ef   :  { %v2432_v12 = vor.u32 %v2431_v14, %v2430_v19  ;;  %vm2433_vm5 = vcmp.lt.s32.totalorder %v11294_v7, 1  ;;  %vm2435_vm7 = vcmp.lt.s32.totalorder %v11294_v7, 3  ;;  %v2442_v34 = vsel %vm2436_vm4, %v2429_v55, 920167782 }
 0x5f0   :  { %v11317_v15 = vshll.u32 %v2409_v1, 8  ;;  %v3163_v50 = vmul.f32 %v3162_v3, %v11273_v24  ;;  %v3172_v41 = vxor.u32 2147483648, %v3155_v61  ;;  %v3587_v11 = vshll.u32 %v11311_v35, 30 }
 0x5f1   :  { %v2441_v30 = vsel %vm2433_vm5, %v2420_v44, %v2423_v16  ;;  %vm3171_vm8 = vcmp.eq.s32.totalorder %v11288_v43, 2  ;;  %v2443_v48 = vsel %vm2435_vm7, %v2426_v2, %v2442_v34  ;;  %v2446_v39 = vsel %vm2436_vm4, %v2432_v12, 1326507024 }
 0x5f2   :  { %v2189_v49 = vmul.f32 %v10940_v38, %v2153_v5  ;;  %v3169_v1 = vxor.u32 2147483648, %v3163_v50  ;;  %v3588_v54 = vsub.s32 %v3584_v10, %v3587_v11  ;;  %vm2434_vm9 = vcmp.lt.s32.totalorder %v11294_v7, 2 }
 0x5f3   :  { %v2445_v24 = vsel %vm2433_vm5, %v2423_v16, %v2426_v2  ;;  %v2444_v62 = vsel %vm2434_vm9, %v2441_v30, %v2443_v48  ;;  %v2447_v22 = vsel %vm2435_vm7, %v2429_v55, %v2446_v39  ;;  %v2450_v60 = vand.u32 65535, %v11317_v15 }
 0x5f4   :  { %v2451_v52 = vshrl.u32 %v11317_v15, 16  ;;  %v3170_v38 = vsel %vm3168_vm2, %v3155_v61, %v3169_v1  ;;  %v3173_v13 = vsel %vm3171_vm8, %v3172_v41, %v3163_v50  ;;  %vm3589_vm10 = vcmp.lt.s32.totalorder %v3588_v54, 0 }
 0x5f5   :  { %v3590_v31 = vsub.s32 0, %v3588_v54  ;;  %v3174_v17 = vsel %vm3167_vm13, %v3170_v38, %v3173_v13  ;;  %v2417_v45 = vshrl.u32 %v15517_v46, %v2416_v42  ;;  %v2448_v18 = vsel %vm2434_vm9, %v2445_v24, %v2447_v22 }
 0x5f6   :  { %v2475_v10 = vshrl.u32 %v2444_v62, 16  ;;  %v3175_v20 = vsel %vm3164_vm1, nan, %v3174_v17  ;;  %v2452_v55 = vand.u32 65535, %v2448_v18  ;;  %v2474_v19 = vand.u32 65535, %v2444_v62 }
 0x5f7   :  { %v3591_v40 = vsel %vm3589_vm10, %v3590_v31, %v3588_v54  ;;  %7212 = vst.msk [vmem:[%s14704_s3 + $0x28] sm:$0xff] %vm7206_vm6, %v3175_v20  ;;  %v2438_v43 = vsel %vm2436_vm4, %v2426_v2, 2102212464  ;;  %v2453_v42 = vshrl.u32 %v2448_v18, 16  ;;  %v3580_v36 = vadd.s32 %v11286_v9, %v11280_v4 }
 0x5f8   :  { %v3592_v28 = vclz %v3591_v40  ;;  %v2477_v8 = vmul.u32 %v2475_v10, %v2450_v60  ;;  %v11356_v51 = vadd.f32 %v10947_v23, %v2189_v49  ;;  %v2437_v5 = vsel %vm2433_vm5, %v2417_v45, %v2420_v44 }
 0x5f9   :  { %v2455_v61 = vmul.u32 %v2453_v42, %v2450_v60  ;;  %v2456_v3 = vmul.u32 %v2452_v55, %v2451_v52  ;;  %v2439_v12 = vsel %vm2435_vm7, %v2423_v16, %v2438_v43  ;;  %v2476_v34 = vmul.u32 %v2474_v19, %v2450_v60 }
 0x5fa   :  { %v7268_v14 = vadd.s32 4294967294, %v3592_v28  ;;  %v2478_v50 = vmul.u32 %v2474_v19, %v2451_v52  ;;  %v2480_v2 = vshll.u32 %v2477_v8, 16  ;;  %v2454_v41 = vmul.u32 %v2452_v55, %v2450_v60 }
 0x5fb   :  { %v2457_v11 = vmul.u32 %v2453_v42, %v2451_v52  ;;  %v2458_v30 = vshll.u32 %v2455_v61, 16  ;;  %v2460_v9 = vshll.u32 %v2456_v3, 16  ;;  %v2479_v23 = vmul.u32 %v2475_v10, %v2451_v52 }
 0x5fc   :  { %vm7269_vm12 = vcmp.lt.s32.totalorder %v7268_v14, 0  ;;  %v2482_v48 = vshll.u32 %v2478_v50, 16  ;;  %vm2484_vm3 = vc.u32 %v2476_v34, %v2480_v2  ;;  %v2486_v16 = vadd.s32 %v2480_v2, %v2476_v34 }
 0x5fd   :  { %v3595_v4 = vsel %vm7269_vm12, 0, %v7268_v14  ;;  %vm2462_vm0 = vc.u32 %v2454_v41, %v2458_v30  ;;  %v2464_v24 = vadd.s32 %v2458_v30, %v2454_v41  ;;  %v2485_v60 = vsel %vm2484_vm3, 1, %v15516_v33  ;;  %v2046_v14 = vpop.permute.xlu0 %2045 }
 0x5fe   :  { %v3596_v39 = vsub.s32 32, %v3595_v4  ;;  %v3597_v49 = vshll.u32 %v3588_v54, %v3595_v4  ;;  %v3600_v1 = vsub.s32 4294967266, %v3595_v4  ;;  %v2463_v44 = vsel %vm2462_vm0, 1, %v15516_v33 }
 0x5ff   :  { %v2465_v38 = vadd.s32 %v2463_v44, %v2457_v11  ;;  %vm2466_vm11 = vc.u32 %v2464_v24, %v2460_v9  ;;  %v2481_v13 = vshrl.u32 %v2477_v8, 16  ;;  %v2487_v31 = vadd.s32 %v2485_v60, %v2479_v23 }
 0x600   :  { %v3598_v62 = vshrl.u32 %v3580_v36, %v3596_v39  ;;  %v3601_v22 = vadd.s32 127, %v3600_v1  ;;  %vm2488_vm14 = vc.u32 %v2486_v16, %v2482_v48  ;;  %v2467_v54 = vsel %vm2466_vm11, 1, %v15516_v33 }
 0x601   :  { %v2489_v45 = vsel %vm2488_vm14, 1, %v15516_v33  ;;  %v2459_v18 = vshrl.u32 %v2455_v61, 16  ;;  %v2469_v10 = vadd.s32 %v2467_v54, %v2465_v38  ;;  %v3951_v40 = vand.u32 2147483647, %v11356_v51 }
 0x602   :  { %v3599_v52 = vor.u32 %v3598_v62, %v3597_v49  ;;  %v3602_v17 = vshll.u32 %v3601_v22, 23  ;;  %v2491_v20 = vadd.s32 %v2489_v45, %v2487_v31  ;;  %vm3488_vm13 = vcmp.lt.s32.totalorder %v11077_v25, 0 }
 0x603   :  { %v3610_v19 = vsub.s32 4, %v11311_v35  ;;  %v3954_v28 = vand.u32 2139095040, %v11356_v51  ;;  %v2461_v43 = vshrl.u32 %v2456_v3, 16  ;;  %v2470_v42 = vadd.s32 %v2469_v10, %v2459_v18 }
 0x604   :  { %v3603_v55 = vor.u32 4788187, %v3602_v17  ;;  %v2483_v8 = vshrl.u32 %v2478_v50, 16  ;;  %v2492_v36 = vadd.s32 %v2491_v20, %v2481_v13  ;;  %v3606_v2 = vcvt.s32.f32 %v3599_v52  ;;  %v11396_v17 = vld [vmem:[%s14703_s2] ss:$0 sm:$0xff] }
 0x605   :  { %v2440_v61 = vsel %vm2434_vm9, %v2437_v5, %v2439_v12  ;;  %v3955_v41 = vshrl.u32 %v3954_v28, 23  ;;  %v2471_v11 = vadd.s32 %v2470_v42, %v2461_v43  ;;  %v2490_v30 = vadd.s32 %v2486_v16, %v2482_v48 }
 0x606   :  { %v3604_v34 = vand.u32 2147483647, %v3603_v55  ;;  %v2493_v4 = vadd.s32 %v2492_v36, %v2483_v8  ;;  %v3958_v9 = vand.u32 8388607, %v3951_v40  ;;  %v3611_v3 = vsel %vm3488_vm13, %v3610_v19, %v11311_v35  ;;  %v11385_v35 = vld [vmem:[%s14702_s1] ss:$0 sm:$0xff] }
 0x607   :  { %v7276_v50 = vadd.s32 4294967169, %v3955_v41  ;;  %v2142_v39 = vsel %vm2141_vm15, %v10822_v37, %v2046_v14  ;;  %vm2496_vm1 = vc.u32 %v2471_v11, %v2490_v30  ;;  %v15526_v7 = vand.u32 2147483647, %v11077_v25 }
 0x608   :  { %v3607_v23 = vmul.f32 %v3606_v2, %v3604_v34  ;;  %v2497_v49 = vadd.s32 1, %v2493_v4  ;;  %v2494_v12 = vmul.u32 %v11317_v15, %v2440_v61  ;;  %v3959_v24 = vor.u32 8388608, %v3958_v9 }
 0x609   :  { %vm3487_vm2 = vcmp.le.f32.partialorder %v15526_v7, 0.7853982  ;;  %v3961_v48 = vadd.s32 1, %v7276_v50  ;;  %v2178_v16 = vmul.f32 %v11385_v35, %v2142_v39  ;;  %vm2403_vm5 = vcmp.lt.s32.totalorder %v11136_v32, 0 }
 0x60a   :  { %v3608_v5 = vxor.u32 2147483648, %v3607_v23  ;;  %v3613_v1 = vsel %vm3487_vm2, 0, %v3611_v3  ;;  %v2498_v44 = vsel %vm2496_vm1, %v2497_v49, %v2493_v4  ;;  %v11391_v52 = vshll.u32 %v3959_v24, 8 }
 0x60b   :  { %v2499_v62 = vadd.s32 %v2498_v44, %v2494_v12  ;;  %vm3962_vm4 = vcmp.gt.s32.totalorder %v3961_v48, 0  ;;  %v3630_v60 = vadd.s32 3, %v3613_v1  ;;  %v11399_v54 = vadd.f32 %v11396_v17, %v2178_v16 }
 0x60c   :  { %v3609_v37 = vsel %vm3488_vm13, %v3608_v5, %v3607_v23  ;;  %v3963_v38 = vsel %vm3962_vm4, %v3961_v48, 0  ;;  %v11406_v42 = vadd.s32 %v2490_v30, %v2471_v11  ;;  %v11409_v8 = vand.u32 65535, %v11391_v52 }
 0x60d   :  { %v3612_v22 = vsel %vm3487_vm2, %v11077_v25, %v3609_v37  ;;  %v2500_v13 = vadd.s32 536870912, %v2499_v62  ;;  %v3965_v31 = vand.u32 31, %v3963_v38  ;;  %v11403_v28 = vand.u32 3, %v3630_v60 }
 0x60e   :  { %v3614_v15 = vmul.f32 %v3612_v22, %v3612_v22  ;;  %v11412_v36 = vshrl.u32 %v11391_v52, 16  ;;  %v2246_v14 = vand.u32 2147483647, %v11399_v54  ;;  %v11417_v41 = vshrl.u32 %v3963_v38, 5 }
 0x60f   :  { %v2501_v10 = vshrl.u32 %v2500_v13, 30  ;;  %v11401_v20 = vsub.s32 32, %v3965_v31  ;;  %v3968_v4 = vshll.u32 %v15517_v46, %v3965_v31  ;;  %v3971_v30 = vshll.u32 %v15511_v59, %v3965_v31 }
 0x610   :  { %v3615_v45 = vmul.f32 -0.001358992, %v3614_v15  ;;  %v3622_v18 = vmul.f32 -0.00019511016, %v3614_v15  ;;  %vm3636_vm7 = vcmp.eq.s32.totalorder %v11403_v28, 2  ;;  %vm3633_vm9 = vcmp.eq.s32.totalorder %v11403_v28, 0 }
 0x611   :  { %v2502_v43 = vshll.u32 %v2501_v10, 30  ;;  %v3969_v11 = vshrl.u32 %v15511_v59, %v11401_v20  ;;  %v3972_v9 = vshrl.u32 %v15512_v53, %v11401_v20  ;;  %v2525_v39 = vsub.s32 4, %v2501_v10 }
 0x612   :  { %v3616_v55 = vadd.f32 0.041655596, %v3615_v45  ;;  %v3623_v19 = vadd.f32 0.008332121, %v3622_v18  ;;  %v3975_v49 = vshrl.u32 %v15513_v0, %v11401_v20  ;;  %v3977_v7 = vshll.u32 %v15513_v0, %v3965_v31 }
 0x613   :  { %v11415_v61 = vsub.s32 %v2499_v62, %v2502_v43  ;;  %v3978_v5 = vshrl.u32 %v15514_v29, %v11401_v20  ;;  %vm3632_vm10 = vcmp.lt.s32.totalorder %v11403_v28, 2  ;;  %v3981_v44 = vshrl.u32 %v15515_v47, %v11401_v20 }
 0x614   :  { %v3617_v34 = vmul.f32 %v3616_v55, %v3614_v15  ;;  %v3624_v2 = vmul.f32 %v3623_v19, %v3614_v15  ;;  %vm3629_vm12 = vweird.f32 %v11077_v25  ;;  %v3970_v16 = vor.u32 %v3969_v11, %v3968_v4 }
 0x615   :  { %vm2504_vm8 = vcmp.lt.s32.totalorder %v11415_v61, 0  ;;  %v2505_v50 = vsub.s32 0, %v11415_v61  ;;  %v3974_v37 = vshll.u32 %v15512_v53, %v3965_v31  ;;  %v3979_v62 = vor.u32 %v3978_v5, %v3977_v7 }
 0x616   :  { %v3618_v23 = vadd.f32 -0.4999988, %v3617_v34  ;;  %v3625_v3 = vadd.f32 -0.16666654, %v3624_v2  ;;  %v11440_v13 = vor.u32 %v3972_v9, %v3971_v30  ;;  %v11445_v18 = vsel %vm2403_vm5, %v2525_v39, %v2501_v10 }
 0x617   :  { %v2506_v1 = vsel %vm2504_vm8, %v2505_v50, %v11415_v61  ;;  %v3976_v55 = vor.u32 %v3975_v49, %v3974_v37  ;;  %v2249_v19 = vand.u32 2139095040, %v11399_v54  ;;  %v15527_v2 = vand.u32 2147483647, %v11136_v32 }
 0x618   :  { %v3619_v12 = vmul.f32 %v3618_v23, %v3614_v15  ;;  %v3626_v48 = vmul.f32 %v3625_v3, %v3614_v15  ;;  %v2507_v24 = vclz %v2506_v1  ;;  %v3980_v15 = vshll.u32 %v15514_v29, %v3965_v31 }
 0x619   :  { %vm11450_vm0 = vcmp.le.f32.partialorder %v15527_v2, 0.7853982  ;;  %vm3986_vm3 = vcmp.lt.s32.totalorder %v11417_v41, 4  ;;  %vm3983_vm14 = vcmp.lt.s32.totalorder %v11417_v41, 1  ;;  %vm3984_vm13 = vcmp.lt.s32.totalorder %v11417_v41, 2 }
 0x61a   :  { %v3620_v38 = vadd.f32 1.0, %v3619_v12  ;;  %v3627_v60 = vadd.f32 1.0, %v3626_v48  ;;  %v7247_v45 = vadd.s32 4294967294, %v2507_v24  ;;  %v3982_v11 = vor.u32 %v3981_v44, %v3980_v15 }
 0x61b   :  { %v3992_v31 = vsel %vm3986_vm3, %v3979_v62, 920167782  ;;  %vm3985_vm1 = vcmp.lt.s32.totalorder %v11417_v41, 3  ;;  %v3991_v30 = vsel %vm3983_vm14, %v3970_v16, %v11440_v13  ;;  %v3995_v7 = vsel %vm3983_vm14, %v11440_v13, %v3976_v55 }
 0x61c   :  { %v3628_v43 = vmul.f32 %v3627_v60, %v3612_v22  ;;  %v3637_v34 = vxor.u32 2147483648, %v3620_v38  ;;  %vm7248_vm11 = vcmp.lt.s32.totalorder %v7247_v45, 0  ;;  %v3993_v49 = vsel %vm3985_vm1, %v3976_v55, %v3992_v31 }
 0x61d   :  { %v2510_v22 = vsel %vm7248_vm11, 0, %v7247_v45  ;;  %v3996_v5 = vsel %vm3986_vm3, %v3982_v11, 1326507024  ;;  %v3994_v1 = vsel %vm3984_vm13, %v3991_v30, %v3993_v49  ;;  %v2528_v2 = vsel %vm11450_vm0, 0, %v11445_v18 }
 0x61e   :  { %v3634_v10 = vxor.u32 2147483648, %v3628_v43  ;;  %v3638_v9 = vsel %vm3636_vm7, %v3637_v34, %v3628_v43  ;;  %v2511_v23 = vsub.s32 32, %v2510_v22  ;;  %v2512_v3 = vshll.u32 %v11415_v61, %v2510_v22 }
 0x61f   :  { %v2515_v50 = vsub.s32 4294967266, %v2510_v22  ;;  %v3997_v24 = vsel %vm3985_vm1, %v3979_v62, %v3996_v5  ;;  %v4024_v37 = vand.u32 65535, %v3994_v1  ;;  %v2250_v62 = vshrl.u32 %v2249_v19, 23 }
 0x620   :  { %v3635_v39 = vsel %vm3633_vm9, %v3620_v38, %v3634_v10  ;;  %v2513_v48 = vshrl.u32 %v11406_v42, %v2511_v23  ;;  %v4025_v38 = vshrl.u32 %v3994_v1, 16  ;;  %v3967_v42 = vshrl.u32 %v15517_v46, %v11401_v20 }
 0x621   :  { %v3639_v12 = vsel %vm3632_vm10, %v3635_v39, %v3638_v9  ;;  %v2516_v61 = vadd.s32 127, %v2515_v50  ;;  %v3998_v15 = vsel %vm3984_vm13, %v3995_v7, %v3997_v24  ;;  %v4028_v31 = vmul.u32 %v4024_v37, %v11412_v36 }
 0x622   :  { %v3640_v44 = vsel %vm3629_vm12, nan, %v3639_v12  ;;  %v2514_v28 = vor.u32 %v2513_v48, %v2512_v3  ;;  %v4002_v25 = vand.u32 65535, %v3998_v15  ;;  %v4003_v45 = vshrl.u32 %v3998_v15, 16 }
 0x623   :  { %7215 = vst.msk [vmem:[%s14704_s3 + $0x40] sm:$0xff] %vm7206_vm6, %v3640_v44  ;;  %v2517_v60 = vshll.u32 %v2516_v61, 23  ;;  %v4027_v43 = vmul.u32 %v4025_v38, %v11409_v8  ;;  %v3987_v11 = vsel %vm3983_vm14, %v3967_v42, %v3970_v16  ;;  %v3988_v20 = vsel %vm3986_vm3, %v3976_v55, 2102212464 }
 0x624   :  { %v4005_v10 = vmul.u32 %v4003_v45, %v11409_v8  ;;  %v4006_v22 = vmul.u32 %v4002_v25, %v11412_v36  ;;  %v4026_v30 = vmul.u32 %v4024_v37, %v11409_v8  ;;  %v2521_v9 = vcvt.s32.f32 %v2514_v28 }
 0x625   :  { %v2518_v34 = vor.u32 4788187, %v2517_v60  ;;  %v4029_v23 = vmul.u32 %v4025_v38, %v11412_v36  ;;  %v4030_v3 = vshll.u32 %v4027_v43, 16  ;;  %v4004_v18 = vmul.u32 %v4002_v25, %v11409_v8 }
 0x626   :  { %v4007_v16 = vmul.u32 %v4003_v45, %v11412_v36  ;;  %v4008_v50 = vshll.u32 %v4005_v10, 16  ;;  %v4032_v39 = vshll.u32 %v4028_v31, 16  ;;  %v4010_v7 = vshll.u32 %v4006_v22, 16 }
 0x627   :  { %v2519_v19 = vand.u32 2147483647, %v2518_v34  ;;  %vm4034_vm2 = vc.u32 %v4026_v30, %v4030_v3  ;;  %v4036_v55 = vadd.s32 %v4030_v3, %v4026_v30  ;;  %v7243_v48 = vadd.s32 4294967169, %v2250_v62 }
 0x628   :  { %vm4012_vm4 = vc.u32 %v4004_v18, %v4008_v50  ;;  %v4014_v5 = vadd.s32 %v4008_v50, %v4004_v18  ;;  %v4035_v12 = vsel %vm4034_vm2, 1, %v15516_v33  ;;  %v3989_v8 = vsel %vm3985_vm1, %v11440_v13, %v3988_v20 }
 0x629   :  { %v2522_v49 = vmul.f32 %v2521_v9, %v2519_v19  ;;  %v4013_v1 = vsel %vm4012_vm4, 1, %v15516_v33  ;;  %v4037_v44 = vadd.s32 %v4035_v12, %v4029_v23  ;;  %vm4038_vm7 = vc.u32 %v4036_v55, %v4032_v39 }
 0x62a   :  { %v4015_v36 = vadd.s32 %v4013_v1, %v4007_v16  ;;  %vm4016_vm8 = vc.u32 %v4014_v5, %v4010_v7  ;;  %v4039_v24 = vsel %vm4038_vm7, 1, %v15516_v33  ;;  %v4031_v28 = vshrl.u32 %v4027_v43, 16 }
 0x62b   :  { %v2523_v61 = vxor.u32 2147483648, %v2522_v49  ;;  %v4017_v38 = vsel %vm4016_vm8, 1, %v15516_v33  ;;  %v4041_v60 = vadd.s32 %v4039_v24, %v4037_v44  ;;  %v4009_v15 = vshrl.u32 %v4005_v10, 16 }
 0x62c   :  { %v4019_v25 = vadd.s32 %v4017_v38, %v4015_v36  ;;  %v2256_v45 = vadd.s32 1, %v7243_v48  ;;  %v2545_v13 = vadd.s32 3, %v2528_v2  ;;  %v4033_v34 = vshrl.u32 %v4028_v31, 16 }
 0x62d   :  { %v2524_v37 = vsel %vm2403_vm5, %v2523_v61, %v2522_v49  ;;  %v4042_v20 = vadd.s32 %v4041_v60, %v4031_v28  ;;  %v3990_v30 = vsel %vm3984_vm13, %v3987_v11, %v3989_v8  ;;  %v4011_v19 = vshrl.u32 %v4006_v22, 16 }
 0x62e   :  { %v2527_v42 = vsel %vm11450_vm0, %v11136_v32, %v2524_v37  ;;  %v4020_v9 = vadd.s32 %v4019_v25, %v4009_v15  ;;  %vm2257_vm5 = vcmp.gt.s32.totalorder %v2256_v45, 0  ;;  %v11523_v4 = vadd.s32 %v4036_v55, %v4032_v39 }
 0x62f   :  { %v2529_v62 = vmul.f32 %v2527_v42, %v2527_v42  ;;  %v4043_v3 = vadd.s32 %v4042_v20, %v4033_v34  ;;  %v2258_v18 = vsel %vm2257_vm5, %v2256_v45, 0  ;;  %v2253_v10 = vand.u32 8388607, %v2246_v14 }
 0x630   :  { %v11521_v16 = vadd.s32 %v4020_v9, %v4011_v19  ;;  %v2260_v2 = vand.u32 31, %v2258_v18  ;;  %v2546_v41 = vand.u32 3, %v2545_v13  ;;  %v4044_v11 = vmul.u32 %v11391_v52, %v3990_v30  ;;  %v2054_v30 = vpop.permute.xlu1 %2053 }
 0x631   :  { %v2530_v23 = vmul.f32 -0.001358992, %v2529_v62  ;;  %v2537_v43 = vmul.f32 -0.00019511016, %v2529_v62  ;;  %v4047_v49 = vadd.s32 1, %v4043_v3  ;;  %v2254_v61 = vor.u32 8388608, %v2253_v10 }
 0x632   :  { %vm4046_vm9 = vc.u32 %v11521_v16, %v11523_v4  ;;  %v11530_v22 = vsub.s32 32, %v2260_v2  ;;  %v11532_v1 = vshrl.u32 %v2258_v18, 5  ;;  %vm2548_vm10 = vcmp.eq.s32.totalorder %v2546_v41, 0 }
 0x633   :  { %v2531_v31 = vadd.f32 0.041655596, %v2530_v23  ;;  %v2538_v50 = vadd.f32 0.008332121, %v2537_v43  ;;  %v4048_v12 = vsel %vm4046_vm9, %v4047_v49, %v4043_v3  ;;  %vm2547_vm12 = vcmp.lt.s32.totalorder %v2546_v41, 2 }
 0x634   :  { %v4049_v39 = vadd.s32 %v4048_v12, %v4044_v11  ;;  %v2264_v8 = vshrl.u32 %v15511_v59, %v11530_v22  ;;  %v2267_v52 = vshrl.u32 %v15512_v53, %v11530_v22  ;;  %v2270_v36 = vshrl.u32 %v15513_v0, %v11530_v22 }
 0x635   :  { %v2532_v7 = vmul.f32 %v2531_v31, %v2529_v62  ;;  %v2539_v5 = vmul.f32 %v2538_v50, %v2529_v62  ;;  %v2263_v38 = vshll.u32 %v15517_v46, %v2260_v2  ;;  %v2273_v28 = vshrl.u32 %v15514_v29, %v11530_v22 }
 0x636   :  { %v4050_v44 = vadd.s32 536870912, %v4049_v39  ;;  %vm2544_vm0 = vweird.f32 %v11136_v32  ;;  %v2266_v15 = vshll.u32 %v15511_v59, %v2260_v2  ;;  %v2269_v25 = vshll.u32 %v15512_v53, %v2260_v2 }
 0x637   :  { %v2533_v55 = vadd.f32 -0.4999988, %v2532_v7  ;;  %v2540_v48 = vadd.f32 -0.16666654, %v2539_v5  ;;  %v2276_v45 = vshrl.u32 %v15515_v47, %v11530_v22  ;;  %v2275_v20 = vshll.u32 %v15514_v29, %v2260_v2 }
 0x638   :  { %v11544_v60 = vshrl.u32 %v4050_v44, 30  ;;  %v11553_v9 = vor.u32 %v2264_v8, %v2263_v38  ;;  %v11555_v23 = vor.u32 %v2267_v52, %v2266_v15  ;;  %v11557_v43 = vor.u32 %v2270_v36, %v2269_v25 }
 0x639   :  { %v2534_v24 = vmul.f32 %v2533_v55, %v2529_v62  ;;  %v2541_v37 = vmul.f32 %v2540_v48, %v2529_v62  ;;  %v2272_v62 = vshll.u32 %v15513_v0, %v2260_v2  ;;  %v2277_v31 = vor.u32 %v2276_v45, %v2275_v20 }
 0x63a   :  { %v4052_v19 = vshll.u32 %v11544_v60, 30  ;;  %vm2551_vm3 = vcmp.eq.s32.totalorder %v2546_v41, 2  ;;  %v11559_v49 = vshll.u32 %v2254_v61, 8  ;;  %v2146_v2 = vsel %vm2141_vm15, %v10794_v6, %v2054_v30 }
 0x63b   :  { %v2535_v13 = vadd.f32 1.0, %v2534_v24  ;;  %v2542_v34 = vadd.f32 1.0, %v2541_v37  ;;  %v2274_v10 = vor.u32 %v2273_v28, %v2272_v62  ;;  %vm2278_vm11 = vcmp.lt.s32.totalorder %v11532_v1, 1 }
 0x63c   :  { %v4053_v50 = vsub.s32 %v4049_v39, %v4052_v19  ;;  %vm2280_vm14 = vcmp.lt.s32.totalorder %v11532_v1, 3  ;;  %vm2281_vm13 = vcmp.lt.s32.totalorder %v11532_v1, 4  ;;  %v2286_v5 = vsel %vm2278_vm11, %v11553_v9, %v11555_v23 }
 0x63d   :  { %v2543_v3 = vmul.f32 %v2542_v34, %v2527_v42  ;;  %v2552_v18 = vxor.u32 2147483648, %v2535_v13  ;;  %v2287_v6 = vsel %vm2281_vm13, %v2274_v10, 920167782  ;;  %v2290_v39 = vsel %vm2278_vm11, %v11555_v23, %v11557_v43 }
 0x63e   :  { %vm4054_vm1 = vcmp.lt.s32.totalorder %v4053_v50, 0  ;;  %v4055_v42 = vsub.s32 0, %v4053_v50  ;;  %v2291_v55 = vsel %vm2281_vm13, %v2277_v31, 1326507024  ;;  %vm2279_vm2 = vcmp.lt.s32.totalorder %v11532_v1, 2 }
 0x63f   :  { %v2549_v11 = vxor.u32 2147483648, %v2543_v3  ;;  %v2553_v7 = vsel %vm2551_vm3, %v2552_v18, %v2543_v3  ;;  %v2288_v44 = vsel %vm2280_vm14, %v11557_v43, %v2287_v6  ;;  %v2292_v24 = vsel %vm2280_vm14, %v2274_v10, %v2291_v55 }
 0x640   :  { %v4056_v61 = vsel %vm4054_vm1, %v4055_v42, %v4053_v50  ;;  %v2289_v36 = vsel %vm2279_vm2, %v2286_v5, %v2288_v44  ;;  %v2293_v41 = vsel %vm2279_vm2, %v2290_v39, %v2292_v24  ;;  %v2295_v37 = vand.u32 65535, %v11559_v49 }
 0x641   :  { %v2550_v12 = vsel %vm2548_vm10, %v2535_v13, %v2549_v11  ;;  %v4057_v52 = vclz %v4056_v61  ;;  %v2296_v32 = vshrl.u32 %v11559_v49, 16  ;;  %v2297_v28 = vand.u32 65535, %v2293_v41 }
 0x642   :  { %v2554_v48 = vsel %vm2547_vm12, %v2550_v12, %v2553_v7  ;;  %v2298_v15 = vshrl.u32 %v2293_v41, 16  ;;  %v2320_v25 = vshrl.u32 %v2289_v36, 16  ;;  %v2182_v45 = vmul.f32 %v11385_v35, %v2146_v2 }
 0x643   :  { %v2555_v8 = vsel %vm2544_vm0, nan, %v2554_v48  ;;  %v7277_v38 = vadd.s32 4294967294, %v4057_v52  ;;  %v2301_v34 = vmul.u32 %v2297_v28, %v2296_v32  ;;  %v4045_v62 = vadd.s32 %v11523_v4, %v11521_v16 }
 0x644   :  { %7208 = vst.msk [vmem:[%s14704_s3 + $0x8] sm:$0xff] %vm7206_vm6, %v2555_v8  ;;  %v2300_v13 = vmul.u32 %v2298_v15, %v2295_v37  ;;  %v2319_v30 = vand.u32 65535, %v2289_v36  ;;  %v2322_v19 = vmul.u32 %v2320_v25, %v2295_v37  ;;  %vm3953_vm7 = vcmp.lt.s32.totalorder %v11356_v51, 0 }
 0x645   :  { %vm7278_vm4 = vcmp.lt.s32.totalorder %v7277_v38, 0  ;;  %v2299_v10 = vmul.u32 %v2297_v28, %v2295_v37  ;;  %v2302_v7 = vmul.u32 %v2298_v15, %v2296_v32  ;;  %v2305_v42 = vshll.u32 %v2301_v34, 16 }
 0x646   :  { %v4060_v20 = vsel %vm7278_vm4, 0, %v7277_v38  ;;  %v2303_v31 = vshll.u32 %v2300_v13, 16  ;;  %v11603_v2 = vadd.f32 %v11396_v17, %v2182_v45  ;;  %vm11607_vm5 = vcmp.le.f32.partialorder %v3951_v40, 0.7853982 }
 0x647   :  { %v4061_v3 = vsub.s32 32, %v4060_v20  ;;  %v4065_v18 = vsub.s32 4294967266, %v4060_v20  ;;  %v4062_v11 = vshll.u32 %v4053_v50, %v4060_v20  ;;  %v2321_v39 = vmul.u32 %v2319_v30, %v2295_v37 }
 0x648   :  { %vm2307_vm8 = vc.u32 %v2299_v10, %v2303_v31  ;;  %v2309_v6 = vadd.s32 %v2303_v31, %v2299_v10  ;;  %v2323_v55 = vmul.u32 %v2319_v30, %v2296_v32  ;;  %v2325_v50 = vshll.u32 %v2322_v19, 16 }
 0x649   :  { %v4063_v5 = vshrl.u32 %v4045_v62, %v4061_v3  ;;  %v4066_v12 = vadd.s32 127, %v4065_v18  ;;  %v2308_v4 = vsel %vm2307_vm8, 1, %v15516_v33  ;;  %v4075_v8 = vsub.s32 4, %v11544_v60 }
 0x64a   :  { %v2310_v44 = vadd.s32 %v2308_v4, %v2302_v7  ;;  %vm2311_vm9 = vc.u32 %v2309_v6, %v2305_v42  ;;  %v2324_v36 = vmul.u32 %v2320_v25, %v2296_v32  ;;  %vm2329_vm10 = vc.u32 %v2321_v39, %v2325_v50  ;;  %v2074_v6 = vpop.permute.xlu2 %2073 }
 0x64b   :  { %v4064_v48 = vor.u32 %v4063_v5, %v4062_v11  ;;  %v4067_v61 = vshll.u32 %v4066_v12, 23  ;;  %v2312_v52 = vsel %vm2311_vm9, 1, %v15516_v33  ;;  %v2304_v40 = vshrl.u32 %v2300_v13, 16 }
 0x64c   :  { %v2314_v41 = vadd.s32 %v2312_v52, %v2310_v44  ;;  %v2330_v38 = vsel %vm2329_vm10, 1, %v15516_v33  ;;  %v2283_v37 = vsel %vm2281_vm13, %v11557_v43, 2102212464  ;;  %v2327_v28 = vshll.u32 %v2323_v55, 16 }
 0x64d   :  { %v4068_v24 = vor.u32 4788187, %v4067_v61  ;;  %v2331_v15 = vadd.s32 %v2325_v50, %v2321_v39  ;;  %v2332_v45 = vadd.s32 %v2330_v38, %v2324_v36  ;;  %v4071_v20 = vcvt.s32.f32 %v4064_v48 }
 0x64e   :  { %v2315_v30 = vadd.s32 %v2314_v41, %v2304_v40  ;;  %v2869_v3 = vand.u32 2139095040, %v11603_v2  ;;  %v4076_v32 = vsel %vm3953_vm7, %v4075_v8, %v11544_v60  ;;  %v2262_v25 = vshrl.u32 %v15517_v46, %v11530_v22 }
 0x64f   :  { %v4069_v62 = vand.u32 2147483647, %v4068_v24  ;;  %vm2333_vm12 = vc.u32 %v2331_v15, %v2327_v28  ;;  %v2866_v13 = vand.u32 2147483647, %v11603_v2  ;;  %v2306_v43 = vshrl.u32 %v2301_v34, 16 }
 0x650   :  { %v2334_v10 = vsel %vm2333_vm12, 1, %v15516_v33  ;;  %v2870_v31 = vshrl.u32 %v2869_v3, 23  ;;  %v2282_v11 = vsel %vm2278_vm11, %v2262_v25, %v11553_v9  ;;  %v2284_v7 = vsel %vm2280_vm14, %v11555_v23, %v2283_v37 }
 0x651   :  { %v4072_v18 = vmul.f32 %v4071_v20, %v4069_v62  ;;  %v2326_v60 = vshrl.u32 %v2322_v19, 16  ;;  %v2336_v42 = vadd.s32 %v2334_v10, %v2332_v45  ;;  %v4078_v22 = vsel %vm11607_vm5, 0, %v4076_v32 }
 0x652   :  { %v11634_v12 = vadd.s32 %v2315_v30, %v2306_v43  ;;  %v7255_v34 = vadd.s32 4294967169, %v2870_v31  ;;  %v2328_v4 = vshrl.u32 %v2323_v55, 16  ;;  %v2873_v50 = vand.u32 8388607, %v2866_v13 }
 0x653   :  { %v4073_v5 = vxor.u32 2147483648, %v4072_v18  ;;  %v2337_v39 = vadd.s32 %v2336_v42, %v2326_v60  ;;  %v2285_v23 = vsel %vm2279_vm2, %v2282_v11, %v2284_v7  ;;  %v2335_v19 = vadd.s32 %v2331_v15, %v2327_v28 }
 0x654   :  { %v2876_v48 = vadd.s32 1, %v7255_v34  ;;  %v4095_v44 = vadd.s32 3, %v4078_v22  ;;  %v2156_v55 = vsel %vm2141_vm15, %v10903_v27, %v2074_v6  ;;  %v2339_v36 = vmul.u32 %v11559_v49, %v2285_v23 }
 0x655   :  { %v4074_v9 = vsel %vm3953_vm7, %v4073_v5, %v4072_v18  ;;  %v2338_v8 = vadd.s32 %v2337_v39, %v2328_v4  ;;  %vm2341_vm0 = vc.u32 %v11634_v12, %v2335_v19  ;;  %v2874_v1 = vor.u32 8388608, %v2873_v50 }
 0x656   :  { %v4077_v61 = vsel %vm11607_vm5, %v11356_v51, %v4074_v9  ;;  %vm2877_vm3 = vcmp.gt.s32.totalorder %v2876_v48, 0  ;;  %v2192_v16 = vmul.f32 %v11385_v35, %v2156_v55  ;;  %v11650_v28 = vand.u32 3, %v4095_v44 }
 0x657   :  { %v4079_v52 = vmul.f32 %v4077_v61, %v4077_v61  ;;  %v2342_v24 = vadd.s32 1, %v2338_v8  ;;  %v2878_v40 = vsel %vm2877_vm3, %v2876_v48, 0  ;;  %v11654_v30 = vshll.u32 %v2874_v1, 8 }
 0x658   :  { %v2880_v37 = vand.u32 31, %v2878_v40  ;;  %v11657_v25 = vadd.f32 %v11396_v17, %v2192_v16  ;;  %v11659_v18 = vshrl.u32 %v2878_v40, 5  ;;  %vm4101_vm11 = vcmp.eq.s32.totalorder %v11650_v28, 2 }
 0x659   :  { %v4080_v41 = vmul.f32 -0.001358992, %v4079_v52  ;;  %v4087_v38 = vmul.f32 -0.00019511016, %v4079_v52  ;;  %v2343_v15 = vsel %vm2341_vm0, %v2342_v24, %v2338_v8  ;;  %vm4098_vm14 = vcmp.eq.s32.totalorder %v11650_v28, 0 }
 0x65a   :  { %v2344_v27 = vadd.s32 %v2343_v15, %v2339_v36  ;;  %v11652_v20 = vsub.s32 32, %v2880_v37  ;;  %v2883_v60 = vshll.u32 %v15517_v46, %v2880_v37  ;;  %v2886_v17 = vshll.u32 %v15511_v59, %v2880_v37 }
 0x65b   :  { %v4081_v45 = vadd.f32 0.041655596, %v4080_v41  ;;  %v4088_v62 = vadd.f32 0.008332121, %v4087_v38  ;;  %v2889_v42 = vshll.u32 %v15512_v53, %v2880_v37  ;;  %v2892_v22 = vshll.u32 %v15513_v0, %v2880_v37 }
 0x65c   :  { %v2345_v32 = vadd.s32 536870912, %v2344_v27  ;;  %v2884_v35 = vshrl.u32 %v15511_v59, %v11652_v20  ;;  %v2887_v43 = vshrl.u32 %v15512_v53, %v11652_v20  ;;  %v2893_v10 = vshrl.u32 %v15514_v29, %v11652_v20 }
 0x65d   :  { %v4082_v3 = vmul.f32 %v4081_v45, %v4079_v52  ;;  %v4089_v49 = vmul.f32 %v4088_v62, %v4079_v52  ;;  %v2890_v5 = vshrl.u32 %v15513_v0, %v11652_v20  ;;  %vm4097_vm13 = vcmp.lt.s32.totalorder %v11650_v28, 2 }
 0x65e   :  { %v2346_v7 = vshrl.u32 %v2345_v32, 30  ;;  %v2895_v39 = vshll.u32 %v15514_v29, %v2880_v37  ;;  %vm4094_vm1 = vweird.f32 %v11356_v51  ;;  %vm2248_vm2 = vcmp.lt.s32.totalorder %v11399_v54, 0 }
 0x65f   :  { %v4083_v31 = vadd.f32 -0.4999988, %v4082_v3  ;;  %v4090_v11 = vadd.f32 -0.16666654, %v4089_v49  ;;  %v2885_v50 = vor.u32 %v2884_v35, %v2883_v60  ;;  %v11679_v9 = vor.u32 %v2887_v43, %v2886_v17 }
 0x660   :  { %v2347_v4 = vshll.u32 %v2346_v7, 30  ;;  %v2894_v23 = vor.u32 %v2893_v10, %v2892_v22  ;;  %v2896_v48 = vshrl.u32 %v15515_v47, %v11652_v20  ;;  %v2340_v55 = vadd.s32 %v2335_v19, %v11634_v12 }
 0x661   :  { %v4084_v34 = vmul.f32 %v4083_v31, %v4079_v52  ;;  %v4091_v6 = vmul.f32 %v4090_v11, %v4079_v52  ;;  %v2891_v36 = vor.u32 %v2890_v5, %v2889_v42  ;;  %vm2898_vm4 = vcmp.lt.s32.totalorder %v11659_v18, 1 }
 0x662   :  { %v2348_v52 = vsub.s32 %v2344_v27, %v2347_v4  ;;  %v2897_v24 = vor.u32 %v2896_v48, %v2895_v39  ;;  %vm2901_vm7 = vcmp.lt.s32.totalorder %v11659_v18, 4  ;;  %vm11688_vm8 = vcmp.le.f32.partialorder %v2246_v14, 0.7853982 }
 0x663   :  { %v4085_v44 = vadd.f32 1.0, %v4084_v34  ;;  %v4092_v8 = vadd.f32 1.0, %v4091_v6  ;;  %v2906_v12 = vsel %vm2898_vm4, %v2885_v50, %v11679_v9  ;;  %v2907_v19 = vsel %vm2901_vm7, %v2894_v23, 920167782 }
 0x664   :  { %vm2349_vm5 = vcmp.lt.s32.totalorder %v2348_v52, 0  ;;  %v2350_v38 = vsub.s32 0, %v2348_v52  ;;  %v2915_v37 = vand.u32 65535, %v11654_v30  ;;  %v2370_v45 = vsub.s32 4, %v2346_v7 }
 0x665   :  { %v4093_v1 = vmul.f32 %v4092_v8, %v4077_v61  ;;  %v4102_v40 = vxor.u32 2147483648, %v4085_v44  ;;  %v4419_v61 = vand.u32 2139095040, %v11657_v25  ;;  %vm2900_vm9 = vcmp.lt.s32.totalorder %v11659_v18, 3 }
 0x666   :  { %v2351_v15 = vsel %vm2349_vm5, %v2350_v38, %v2348_v52  ;;  %vm2899_vm10 = vcmp.lt.s32.totalorder %v11659_v18, 2  ;;  %v2908_v27 = vsel %vm2900_vm9, %v2891_v36, %v2907_v19  ;;  %v2910_v32 = vsel %vm2898_vm4, %v11679_v9, %v2891_v36 }
 0x667   :  { %v4099_v16 = vxor.u32 2147483648, %v4093_v1  ;;  %v4103_v14 = vsel %vm4101_vm11, %v4102_v40, %v4093_v1  ;;  %v2352_v62 = vclz %v2351_v15  ;;  %v2909_v49 = vsel %vm2899_vm10, %v2906_v12, %v2908_v27 }
 0x668   :  { %v2911_v35 = vsel %vm2901_vm7, %v2897_v24, 1326507024  ;;  %v2916_v31 = vshrl.u32 %v11654_v30, 16  ;;  %v4416_v11 = vand.u32 2147483647, %v11657_v25  ;;  %v2371_v17 = vsel %vm2248_vm2, %v2370_v45, %v2346_v7 }
 0x669   :  { %v4100_v3 = vsel %vm4098_vm14, %v4085_v44, %v4099_v16  ;;  %v7244_v10 = vadd.s32 4294967294, %v2352_v62  ;;  %v2912_v42 = vsel %vm2900_vm9, %v2894_v23, %v2911_v35  ;;  %v4420_v5 = vshrl.u32 %v4419_v61, 23 }
 0x66a   :  { %v4104_v43 = vsel %vm4097_vm13, %v4100_v3, %v4103_v14  ;;  %v2913_v28 = vsel %vm2899_vm10, %v2910_v32, %v2912_v42  ;;  %v2939_v22 = vand.u32 65535, %v2909_v49  ;;  %v2940_v34 = vshrl.u32 %v2909_v49, 16 }
 0x66b   :  { %v4105_v60 = vsel %vm4094_vm1, nan, %v4104_v43  ;;  %vm7245_vm12 = vcmp.lt.s32.totalorder %v7244_v10, 0  ;;  %v2882_v6 = vshrl.u32 %v15517_v46, %v11652_v20  ;;  %v2917_v7 = vand.u32 65535, %v2913_v28 }
 0x66c   :  { %7218 = vst.msk [vmem:[%s14704_s3 + $0x58] sm:$0xff] %vm7206_vm6, %v4105_v60  ;;  %v2355_v51 = vsel %vm7245_vm12, 0, %v7244_v10  ;;  %v2918_v4 = vshrl.u32 %v2913_v28, 16  ;;  %v2373_v48 = vsel %vm11688_vm8, 0, %v2371_v17  ;;  %v2942_v44 = vmul.u32 %v2940_v34, %v2915_v37 }
 0x66d   :  { %v2356_v39 = vsub.s32 32, %v2355_v51  ;;  %v2360_v23 = vsub.s32 4294967266, %v2355_v51  ;;  %v2902_v8 = vsel %vm2898_vm4, %v2882_v6, %v2885_v50  ;;  %v2903_v24 = vsel %vm2901_vm7, %v2891_v36, 2102212464 }
 0x66e   :  { %v2920_v1 = vmul.u32 %v2918_v4, %v2915_v37  ;;  %v2921_v40 = vmul.u32 %v2917_v7, %v2916_v31  ;;  %v2357_v38 = vshll.u32 %v2348_v52, %v2355_v51  ;;  %v2943_v20 = vmul.u32 %v2939_v22, %v2916_v31 }
 0x66f   :  { %v2358_v12 = vshrl.u32 %v2340_v55, %v2356_v39  ;;  %v2361_v19 = vadd.s32 127, %v2360_v23  ;;  %v2919_v61 = vmul.u32 %v2917_v7, %v2915_v37  ;;  %v2922_v16 = vmul.u32 %v2918_v4, %v2916_v31 }
 0x670   :  { %v2923_v15 = vshll.u32 %v2920_v1, 16  ;;  %v2941_v45 = vmul.u32 %v2939_v22, %v2915_v37  ;;  %v2944_v27 = vmul.u32 %v2940_v34, %v2916_v31  ;;  %v2945_v3 = vshll.u32 %v2942_v44, 16 }
 0x671   :  { %v2359_v14 = vor.u32 %v2358_v12, %v2357_v38  ;;  %v2362_v62 = vshll.u32 %v2361_v19, 23  ;;  %v2925_v49 = vshll.u32 %v2921_v40, 16  ;;  %v2947_v32 = vshll.u32 %v2943_v20, 16 }
 0x672   :  { %vm2927_vm0 = vc.u32 %v2919_v61, %v2923_v15  ;;  %v2929_v50 = vadd.s32 %v2923_v15, %v2919_v61  ;;  %vm2949_vm3 = vc.u32 %v2941_v45, %v2945_v3  ;;  %v2951_v10 = vadd.s32 %v2945_v3, %v2941_v45 }
 0x673   :  { %v2363_v35 = vor.u32 4788187, %v2362_v62  ;;  %v2366_v36 = vcvt.s32.f32 %v2359_v14  ;;  %v2928_v43 = vsel %vm2927_vm0, 1, %v15516_v33  ;;  %v2950_v52 = vsel %vm2949_vm3, 1, %v15516_v33 }
 0x674   :  { %v2930_v55 = vadd.s32 %v2928_v43, %v2922_v16  ;;  %vm2931_vm11 = vc.u32 %v2929_v50, %v2925_v49  ;;  %v2952_v17 = vadd.s32 %v2950_v52, %v2944_v27  ;;  %v7285_v31 = vadd.s32 4294967169, %v4420_v5 }
 0x675   :  { %v2364_v60 = vand.u32 2147483647, %v2363_v35  ;;  %v2932_v37 = vsel %vm2931_vm11, 1, %v15516_v33  ;;  %v2904_v42 = vsel %vm2900_vm9, %v11679_v9, %v2903_v24  ;;  %v2924_v28 = vshrl.u32 %v2920_v1, 16 }
 0x676   :  { %v2934_v22 = vadd.s32 %v2932_v37, %v2930_v55  ;;  %vm2953_vm14 = vc.u32 %v2951_v10, %v2947_v32  ;;  %v2390_v51 = vadd.s32 3, %v2373_v48  ;;  %v4426_v7 = vadd.s32 1, %v7285_v31 }
 0x677   :  { %v2367_v34 = vmul.f32 %v2366_v36, %v2364_v60  ;;  %v2954_v6 = vsel %vm2953_vm14, 1, %v15516_v33  ;;  %v2926_v4 = vshrl.u32 %v2921_v40, 16  ;;  %v2946_v23 = vshrl.u32 %v2942_v44, 16 }
 0x678   :  { %v2935_v39 = vadd.s32 %v2934_v22, %v2924_v28  ;;  %v2956_v38 = vadd.s32 %v2954_v6, %v2952_v17  ;;  %v2905_v5 = vsel %vm2899_vm10, %v2902_v8, %v2904_v42  ;;  %vm4427_vm13 = vcmp.gt.s32.totalorder %v4426_v7, 0  ;;  %v2052_v6 = vpop.permute.xlu0 %2051 }
 0x679   :  { %v2368_v12 = vxor.u32 2147483648, %v2367_v34  ;;  %v2948_v9 = vshrl.u32 %v2943_v20, 16  ;;  %v4428_v1 = vsel %vm4427_vm13, %v4426_v7, 0  ;;  %v11751_v61 = vadd.s32 %v2951_v10, %v2947_v32 }
 0x67a   :  { %v11747_v19 = vadd.s32 %v2935_v39, %v2926_v4  ;;  %v2957_v24 = vadd.s32 %v2956_v38, %v2946_v23  ;;  %v4430_v16 = vand.u32 31, %v4428_v1  ;;  %v11758_v40 = vand.u32 3, %v2390_v51 }
 0x67b   :  { %v2369_v48 = vsel %vm2248_vm2, %v2368_v12, %v2367_v34  ;;  %v4423_v8 = vand.u32 8388607, %v4416_v11  ;;  %v2959_v15 = vmul.u32 %v11654_v30, %v2905_v5  ;;  %v11769_v41 = vshrl.u32 %v4428_v1, 5 }
 0x67c   :  { %v11756_v44 = vsel %vm11688_vm8, %v11399_v54, %v2369_v48  ;;  %v2958_v18 = vadd.s32 %v2957_v24, %v2948_v9  ;;  %vm2961_vm1 = vc.u32 %v11747_v19, %v11751_v61  ;;  %v11767_v45 = vsub.s32 32, %v4430_v16 }
 0x67d   :  { %v2374_v20 = vmul.f32 %v11756_v44, %v11756_v44  ;;  %v4433_v62 = vshll.u32 %v15517_v46, %v4430_v16  ;;  %v4436_v27 = vshll.u32 %v15511_v59, %v4430_v16  ;;  %v4442_v32 = vshll.u32 %v15513_v0, %v4430_v16 }
 0x67e   :  { %v2962_v14 = vadd.s32 1, %v2958_v18  ;;  %v4434_v50 = vshrl.u32 %v15511_v59, %v11767_v45  ;;  %v4437_v35 = vshrl.u32 %v15512_v53, %v11767_v45  ;;  %v4440_v36 = vshrl.u32 %v15513_v0, %v11767_v45 }
 0x67f   :  { %v2375_v3 = vmul.f32 -0.001358992, %v2374_v20  ;;  %v2382_v49 = vmul.f32 -0.00019511016, %v2374_v20  ;;  %v4443_v43 = vshrl.u32 %v15514_v29, %v11767_v45  ;;  %v4439_v60 = vshll.u32 %v15512_v53, %v4430_v16 }
 0x680   :  { %v2963_v30 = vsel %vm2961_vm1, %v2962_v14, %v2958_v18  ;;  %v4435_v37 = vor.u32 %v4434_v50, %v4433_v62  ;;  %v4445_v31 = vshll.u32 %v15514_v29, %v4430_v16  ;;  %v4446_v42 = vshrl.u32 %v15515_v47, %v11767_v45 }
 0x681   :  { %v2376_v55 = vadd.f32 0.041655596, %v2375_v3  ;;  %v2383_v52 = vadd.f32 0.008332121, %v2382_v49  ;;  %v2964_v10 = vadd.s32 %v2963_v30, %v2959_v15  ;;  %v4444_v17 = vor.u32 %v4443_v43, %v4442_v32  ;;  %v11820_v49 = vld [vmem:[%s14702_s1] ss:$0 sm:$0xff] }
 0x682   :  { %v4438_v51 = vor.u32 %v4437_v35, %v4436_v27  ;;  %v4424_v7 = vor.u32 8388608, %v4423_v8  ;;  %v4441_v4 = vor.u32 %v4440_v36, %v4439_v60  ;;  %v4447_v39 = vor.u32 %v4446_v42, %v4445_v31 }
 0x683   :  { %v2377_v28 = vmul.f32 %v2376_v55, %v2374_v20  ;;  %v2384_v22 = vmul.f32 %v2383_v52, %v2374_v20  ;;  %v2965_v34 = vadd.s32 536870912, %v2964_v10  ;;  %vm4451_vm2 = vcmp.lt.s32.totalorder %v11769_v41, 4 }
 0x684   :  { %vm2393_vm4 = vcmp.eq.s32.totalorder %v11758_v40, 0  ;;  %vm4448_vm7 = vcmp.lt.s32.totalorder %v11769_v41, 1  ;;  %vm4450_vm8 = vcmp.lt.s32.totalorder %v11769_v41, 3  ;;  %v4457_v5 = vsel %vm4451_vm2, %v4444_v17, 920167782 }
 0x685   :  { %v2378_v23 = vadd.f32 -0.4999988, %v2377_v28  ;;  %v2385_v38 = vadd.f32 -0.16666654, %v2384_v22  ;;  %v11786_v12 = vshrl.u32 %v2965_v34, 30  ;;  %v2145_v9 = vsel %vm2141_vm15, %v10838_v57, %v2052_v6 }
 0x686   :  { %vm2392_vm5 = vcmp.lt.s32.totalorder %v11758_v40, 2  ;;  %v4456_v16 = vsel %vm4448_vm7, %v4435_v37, %v4438_v51  ;;  %vm2389_vm9 = vweird.f32 %v11399_v54  ;;  %vm4449_vm10 = vcmp.lt.s32.totalorder %v11769_v41, 2  ;;  %v11860_v54 = vld [vmem:[%s14703_s2] ss:$0 sm:$0xff] }
 0x687   :  { %v2379_v24 = vmul.f32 %v2378_v23, %v2374_v20  ;;  %v2386_v1 = vmul.f32 %v2385_v38, %v2374_v20  ;;  %v2967_v48 = vshll.u32 %v11786_v12, 30  ;;  %v4458_v18 = vsel %vm4450_vm8, %v4441_v4, %v4457_v5 }
 0x688   :  { %v4461_v8 = vsel %vm4451_vm2, %v4447_v39, 1326507024  ;;  %v11806_v57 = vshll.u32 %v4424_v7, 8  ;;  %v4460_v62 = vsel %vm4448_vm7, %v4438_v51, %v4441_v4  ;;  %vm2396_vm12 = vcmp.eq.s32.totalorder %v11758_v40, 2 }
 0x689   :  { %v2380_v20 = vadd.f32 1.0, %v2379_v24  ;;  %v2387_v15 = vadd.f32 1.0, %v2386_v1  ;;  %v11808_v14 = vsub.s32 %v2964_v10, %v2967_v48  ;;  %v4459_v27 = vsel %vm4449_vm10, %v4456_v16, %v4458_v18 }
 0x68a   :  { %v4462_v3 = vsel %vm4450_vm8, %v4444_v17, %v4461_v8  ;;  %v2181_v50 = vmul.f32 %v11820_v49, %v2145_v9  ;;  %v4465_v43 = vand.u32 65535, %v11806_v57  ;;  %v4466_v55 = vshrl.u32 %v11806_v57, 16 }
 0x68b   :  { %v2388_v32 = vmul.f32 %v2387_v15, %v11756_v44  ;;  %v2397_v30 = vxor.u32 2147483648, %v2380_v20  ;;  %vm2969_vm0 = vcmp.lt.s32.totalorder %v11808_v14, 0  ;;  %v2970_v35 = vsub.s32 0, %v11808_v14 }
 0x68c   :  { %v4463_v36 = vsel %vm4449_vm10, %v4460_v62, %v4462_v3  ;;  %v4490_v52 = vshrl.u32 %v4459_v27, 16  ;;  %v4432_v17 = vshrl.u32 %v15517_v46, %v11767_v45  ;;  %v4453_v42 = vsel %vm4451_vm2, %v4441_v4, 2102212464 }
 0x68d   :  { %v2394_v10 = vxor.u32 2147483648, %v2388_v32  ;;  %v2971_v60 = vsel %vm2969_vm0, %v2970_v35, %v11808_v14  ;;  %v4467_v44 = vand.u32 65535, %v4463_v36  ;;  %v4468_v28 = vshrl.u32 %v4463_v36, 16 }
 0x68e   :  { %v2972_v31 = vclz %v2971_v60  ;;  %v4489_v22 = vand.u32 65535, %v4459_v27  ;;  %v2398_v6 = vsel %vm2396_vm12, %v2397_v30, %v2388_v32  ;;  %v2960_v7 = vadd.s32 %v11751_v61, %v11747_v19 }
 0x68f   :  { %v2395_v34 = vsel %vm2393_vm4, %v2380_v20, %v2394_v10  ;;  %v11843_v39 = vsel %vm4448_vm7, %v4432_v17, %v4435_v37  ;;  %v4471_v4 = vmul.u32 %v4467_v44, %v4466_v55  ;;  %v4492_v38 = vmul.u32 %v4490_v52, %v4465_v43 }
 0x690   :  { %v2399_v45 = vsel %vm2392_vm5, %v2395_v34, %v2398_v6  ;;  %v7256_v23 = vadd.s32 4294967294, %v2972_v31  ;;  %vm2868_vm3 = vcmp.lt.s32.totalorder %v11603_v2, 0  ;;  %v2990_v9 = vsub.s32 4, %v11786_v12 }
 0x691   :  { %v2400_v5 = vsel %vm2389_vm9, nan, %v2399_v45  ;;  %v4454_v19 = vsel %vm4450_vm8, %v4438_v51, %v4453_v42  ;;  %v4470_v61 = vmul.u32 %v4468_v28, %v4465_v43  ;;  %v4491_v40 = vmul.u32 %v4489_v22, %v4465_v43 }
 0x692   :  { %7207 = vst.msk [vmem:[%s14704_s3] sm:$0xff] %vm7206_vm6, %v2400_v5  ;;  %vm7257_vm11 = vcmp.lt.s32.totalorder %v7256_v23, 0  ;;  %v4493_v37 = vmul.u32 %v4489_v22, %v4466_v55  ;;  %v11863_v24 = vadd.f32 %v11860_v54, %v2181_v50  ;;  %v4469_v48 = vmul.u32 %v4467_v44, %v4465_v43 }
 0x693   :  { %v2975_v1 = vsel %vm7257_vm11, 0, %v7256_v23  ;;  %v4472_v51 = vmul.u32 %v4468_v28, %v4466_v55  ;;  %v4473_v16 = vshll.u32 %v4470_v61, 16  ;;  %v4475_v20 = vshll.u32 %v4471_v4, 16 }
 0x694   :  { %v2976_v18 = vsub.s32 32, %v2975_v1  ;;  %v2980_v8 = vsub.s32 4294967266, %v2975_v1  ;;  %v4495_v15 = vshll.u32 %v4492_v38, 16  ;;  %v2977_v62 = vshll.u32 %v11808_v14, %v2975_v1 }
 0x695   :  { %vm4477_vm14 = vc.u32 %v4469_v48, %v4473_v16  ;;  %v4479_v27 = vadd.s32 %v4473_v16, %v4469_v48  ;;  %v4494_v3 = vmul.u32 %v4490_v52, %v4466_v55  ;;  %v4497_v36 = vshll.u32 %v4493_v37, 16  ;;  %v2060_v55 = vpop.permute.xlu1 %2059 }
 0x696   :  { %v2978_v32 = vshrl.u32 %v2960_v7, %v2976_v18  ;;  %v2981_v30 = vadd.s32 127, %v2980_v8  ;;  %v4478_v35 = vsel %vm4477_vm14, 1, %v15516_v33  ;;  %vm4499_vm1 = vc.u32 %v4491_v40, %v4495_v15 }
 0x697   :  { %v4480_v50 = vadd.s32 %v4478_v35, %v4472_v51  ;;  %vm4481_vm13 = vc.u32 %v4479_v27, %v4475_v20  ;;  %v4501_v43 = vadd.s32 %v4495_v15, %v4491_v40  ;;  %v4500_v44 = vsel %vm4499_vm1, 1, %v15516_v33 }
 0x698   :  { %v2979_v10 = vor.u32 %v2978_v32, %v2977_v62  ;;  %v2982_v60 = vshll.u32 %v2981_v30, 23  ;;  %v4482_v17 = vsel %vm4481_vm13, 1, %v15516_v33  ;;  %v4474_v31 = vshrl.u32 %v4470_v61, 16 }
 0x699   :  { %v4484_v14 = vadd.s32 %v4482_v17, %v4480_v50  ;;  %v4502_v42 = vadd.s32 %v4500_v44, %v4494_v3  ;;  %vm4503_vm2 = vc.u32 %v4501_v43, %v4497_v36  ;;  %v2991_v28 = vsel %vm2868_vm3, %v2990_v9, %v11786_v12 }
 0x69a   :  { %v2983_v52 = vor.u32 4788187, %v2982_v60  ;;  %v4476_v22 = vshrl.u32 %v4471_v4, 16  ;;  %v4504_v34 = vsel %vm4503_vm2, 1, %v15516_v33  ;;  %v4496_v7 = vshrl.u32 %v4492_v38, 16 }
 0x69b   :  { %v4485_v6 = vadd.s32 %v4484_v14, %v4474_v31  ;;  %v4506_v45 = vadd.s32 %v4504_v34, %v4502_v42  ;;  %v2711_v23 = vand.u32 2147483647, %v11863_v24  ;;  %v2986_v40 = vcvt.s32.f32 %v2979_v10 }
 0x69c   :  { %v2984_v5 = vand.u32 2147483647, %v2983_v52  ;;  %v2714_v61 = vand.u32 2139095040, %v11863_v24  ;;  %v2149_v1 = vsel %vm2141_vm15, %v10810_v21, %v2060_v55  ;;  %vm11879_vm4 = vcmp.le.f32.partialorder %v2866_v13, 0.7853982 }
 0x69d   :  { %v4486_v12 = vadd.s32 %v4485_v6, %v4476_v22  ;;  %v4498_v4 = vshrl.u32 %v4493_v37, 16  ;;  %v4507_v9 = vadd.s32 %v4506_v45, %v4496_v7  ;;  %v2993_v51 = vsel %vm11879_vm4, 0, %v2991_v28 }
 0x69e   :  { %v2987_v38 = vmul.f32 %v2986_v40, %v2984_v5  ;;  %v4505_v16 = vadd.s32 %v4501_v43, %v4497_v36  ;;  %v2715_v18 = vshrl.u32 %v2714_v61, 23  ;;  %v4455_v8 = vsel %vm4449_vm10, %v11843_v39, %v4454_v19 }
 0x69f   :  { %v4508_v21 = vadd.s32 %v4507_v9, %v4498_v4  ;;  %v2718_v13 = vand.u32 8388607, %v2711_v23  ;;  %v2185_v20 = vmul.f32 %v11820_v49, %v2149_v1  ;;  %v3010_v3 = vadd.s32 3, %v2993_v51 }
 0x6a0   :  { %v2988_v15 = vxor.u32 2147483648, %v2987_v38  ;;  %vm4511_vm7 = vc.u32 %v4486_v12, %v4505_v16  ;;  %v7252_v37 = vadd.s32 4294967169, %v2715_v18  ;;  %v4509_v32 = vmul.u32 %v11806_v57, %v4455_v8 }
 0x6a1   :  { %v4512_v62 = vadd.s32 1, %v4508_v21  ;;  %v2719_v19 = vor.u32 8388608, %v2718_v13  ;;  %v11898_v35 = vadd.f32 %v11860_v54, %v2185_v20  ;;  %v11900_v44 = vand.u32 3, %v3010_v3 }
 0x6a2   :  { %v2989_v27 = vsel %vm2868_vm3, %v2988_v15, %v2987_v38  ;;  %v2721_v30 = vadd.s32 1, %v7252_v37  ;;  %vm4418_vm5 = vcmp.lt.s32.totalorder %v11657_v25, 0  ;;  %v11908_v7 = vadd.s32 %v4505_v16, %v4486_v12 }
 0x6a3   :  { %v2992_v41 = vsel %vm11879_vm4, %v11603_v2, %v2989_v27  ;;  %v4513_v39 = vsel %vm4511_vm7, %v4512_v62, %v4508_v21  ;;  %v11902_v31 = vshll.u32 %v2719_v19, 8  ;;  %v3334_v14 = vand.u32 2139095040, %v11898_v35 }
 0x6a4   :  { %v2994_v36 = vmul.f32 %v2992_v41, %v2992_v41  ;;  %v4514_v50 = vadd.s32 %v4513_v39, %v4509_v32  ;;  %vm2722_vm8 = vcmp.gt.s32.totalorder %v2721_v30, 0  ;;  %v3331_v61 = vand.u32 2147483647, %v11898_v35 }
 0x6a5   :  { %v2723_v43 = vsel %vm2722_vm8, %v2721_v30, 0  ;;  %v11911_v5 = vand.u32 65535, %v11902_v31  ;;  %v11914_v40 = vshrl.u32 %v11902_v31, 16  ;;  %v11917_v1 = vshrl.u32 %v3334_v14, 23 }
 0x6a6   :  { %v2995_v10 = vmul.f32 -0.001358992, %v2994_v36  ;;  %v3002_v60 = vmul.f32 -0.00019511016, %v2994_v36  ;;  %v4515_v17 = vadd.s32 536870912, %v4514_v50  ;;  %v2725_v57 = vand.u32 31, %v2723_v43 }
 0x6a7   :  { %v11905_v28 = vshrl.u32 %v2723_v43, 5  ;;  %vm3016_vm9 = vcmp.eq.s32.totalorder %v11900_v44, 2  ;;  %vm3013_vm12 = vcmp.eq.s32.totalorder %v11900_v44, 0  ;;  %vm3012_vm0 = vcmp.lt.s32.totalorder %v11900_v44, 2 }
 0x6a8   :  { %v2996_v42 = vadd.f32 0.041655596, %v2995_v10  ;;  %v3003_v55 = vadd.f32 0.008332121, %v3002_v60  ;;  %v4516_v52 = vshrl.u32 %v4515_v17, 30  ;;  %v2726_v22 = vsub.s32 32, %v2725_v57 }
 0x6a9   :  { %v2728_v12 = vshll.u32 %v15517_v46, %v2725_v57  ;;  %vm2743_vm10 = vcmp.lt.s32.totalorder %v11905_v28, 1  ;;  %v2731_v51 = vshll.u32 %v15511_v59, %v2725_v57  ;;  %vm3009_vm11 = vweird.f32 %v11603_v2 }
 0x6aa   :  { %v2997_v34 = vmul.f32 %v2996_v42, %v2994_v36  ;;  %v3004_v6 = vmul.f32 %v3003_v55, %v2994_v36  ;;  %v4517_v45 = vshll.u32 %v4516_v52, 30  ;;  %v2729_v38 = vshrl.u32 %v15511_v59, %v2726_v22 }
 0x6ab   :  { %v2732_v16 = vshrl.u32 %v15512_v53, %v2726_v22  ;;  %v2735_v18 = vshrl.u32 %v15513_v0, %v2726_v22  ;;  %v4540_v20 = vsub.s32 4, %v4516_v52  ;;  %v2734_v15 = vshll.u32 %v15512_v53, %v2725_v57 }
 0x6ac   :  { %v2998_v48 = vadd.f32 -0.4999988, %v2997_v34  ;;  %v3005_v4 = vadd.f32 -0.16666654, %v3004_v6  ;;  %v11920_v9 = vsub.s32 %v4514_v50, %v4517_v45  ;;  %v2737_v37 = vshll.u32 %v15513_v0, %v2725_v57 }
 0x6ad   :  { %v2738_v62 = vshrl.u32 %v15514_v29, %v2726_v22  ;;  %v2741_v30 = vshrl.u32 %v15515_v47, %v2726_v22  ;;  %v2730_v19 = vor.u32 %v2729_v38, %v2728_v12  ;;  %v2736_v60 = vor.u32 %v2735_v18, %v2734_v15 }
 0x6ae   :  { %v2999_v8 = vmul.f32 %v2998_v48, %v2994_v36  ;;  %v3006_v21 = vmul.f32 %v3005_v4, %v2994_v36  ;;  %vm4519_vm3 = vcmp.lt.s32.totalorder %v11920_v9, 0  ;;  %v4520_v13 = vsub.s32 0, %v11920_v9 }
 0x6af   :  { %v2733_v36 = vor.u32 %v2732_v16, %v2731_v51  ;;  %v2739_v50 = vor.u32 %v2738_v62, %v2737_v37  ;;  %v2740_v17 = vshll.u32 %v15514_v29, %v2725_v57  ;;  %v11941_v42 = vsel %vm4418_vm5, %v4540_v20, %v4516_v52 }
 0x6b0   :  { %v3000_v27 = vadd.f32 1.0, %v2999_v8  ;;  %v3007_v3 = vadd.f32 1.0, %v3006_v21  ;;  %v4521_v32 = vsel %vm4519_vm3, %v4520_v13, %v11920_v9  ;;  %v2727_v55 = vshrl.u32 %v15517_v46, %v2726_v22 }
 0x6b1   :  { %v4522_v39 = vclz %v4521_v32  ;;  %vm2744_vm14 = vcmp.lt.s32.totalorder %v11905_v28, 2  ;;  %v2742_v6 = vor.u32 %v2741_v30, %v2740_v17  ;;  %vm2745_vm13 = vcmp.lt.s32.totalorder %v11905_v28, 3 }
 0x6b2   :  { %v3008_v43 = vmul.f32 %v3007_v3, %v2992_v41  ;;  %v3017_v10 = vxor.u32 2147483648, %v3000_v27  ;;  %vm2746_vm1 = vcmp.lt.s32.totalorder %v11905_v28, 4  ;;  %v2751_v57 = vsel %vm2743_vm10, %v2730_v19, %v2733_v36 }
 0x6b3   :  { %v7286_v14 = vadd.s32 4294967294, %v4522_v39  ;;  %v2752_v52 = vsel %vm2746_vm1, %v2739_v50, 920167782  ;;  %v2747_v48 = vsel %vm2743_vm10, %v2727_v55, %v2730_v19  ;;  %v2748_v16 = vsel %vm2746_vm1, %v2736_v60, 2102212464 }
 0x6b4   :  { %v3014_v34 = vxor.u32 2147483648, %v3008_v43  ;;  %v3018_v41 = vsel %vm3016_vm9, %v3017_v10, %v3008_v43  ;;  %v2753_v4 = vsel %vm2745_vm13, %v2736_v60, %v2752_v52  ;;  %v2755_v13 = vsel %vm2743_vm10, %v2733_v36, %v2736_v60 }
 0x6b5   :  { %vm7287_vm2 = vcmp.lt.s32.totalorder %v7286_v14, 0  ;;  %v2754_v21 = vsel %vm2744_vm14, %v2751_v57, %v2753_v4  ;;  %v2756_v2 = vsel %vm2746_vm1, %v2742_v6, 1326507024  ;;  %vm11984_vm4 = vcmp.le.f32.partialorder %v4416_v11, 0.7853982 }
 0x6b6   :  { %v3015_v22 = vsel %vm3013_vm12, %v3000_v27, %v3014_v34  ;;  %v4525_v45 = vsel %vm7287_vm2, 0, %v7286_v14  ;;  %v2784_v15 = vand.u32 65535, %v2754_v21  ;;  %v2757_v37 = vsel %vm2745_vm13, %v2739_v50, %v2756_v2 }
 0x6b7   :  { %v3019_v12 = vsel %vm3012_vm0, %v3015_v22, %v3018_v41  ;;  %v4526_v38 = vsub.s32 32, %v4525_v45  ;;  %v4530_v51 = vsub.s32 4294967266, %v4525_v45  ;;  %v4527_v8 = vshll.u32 %v11920_v9, %v4525_v45 }
 0x6b8   :  { %v3020_v18 = vsel %vm3009_vm11, nan, %v3019_v12  ;;  %v2749_v9 = vsel %vm2745_vm13, %v2733_v36, %v2748_v16  ;;  %v2785_v62 = vshrl.u32 %v2754_v21, 16  ;;  %v7264_v27 = vadd.s32 4294967169, %v11917_v1 }
 0x6b9   :  { %7211 = vst.msk [vmem:[%s14704_s3 + $0x20] sm:$0xff] %vm7206_vm6, %v3020_v18  ;;  %v4528_v44 = vshrl.u32 %v11908_v7, %v4526_v38  ;;  %v4531_v20 = vadd.s32 127, %v4530_v51  ;;  %v2758_v30 = vsel %vm2744_vm14, %v2755_v13, %v2757_v37  ;;  %v2788_v50 = vmul.u32 %v2784_v15, %v11914_v40 }
 0x6ba   :  { %v2762_v39 = vand.u32 65535, %v2758_v30  ;;  %v2763_v19 = vshrl.u32 %v2758_v30, 16  ;;  %v2787_v36 = vmul.u32 %v2785_v62, %v11911_v5  ;;  %v4543_v1 = vsel %vm11984_vm4, 0, %v11941_v42 }
 0x6bb   :  { %v4529_v7 = vor.u32 %v4528_v44, %v4527_v8  ;;  %v4532_v32 = vshll.u32 %v4531_v20, 23  ;;  %v11997_v11 = vsel %vm2744_vm14, %v2747_v48, %v2749_v9  ;;  %v12001_v10 = vand.u32 8388607, %v3331_v61 }
 0x6bc   :  { %v2765_v60 = vmul.u32 %v2763_v19, %v11911_v5  ;;  %v2766_v17 = vmul.u32 %v2762_v39, %v11914_v40  ;;  %v2786_v14 = vmul.u32 %v2784_v15, %v11911_v5  ;;  %v3341_v55 = vadd.s32 1, %v7264_v27 }
 0x6bd   :  { %v4533_v43 = vor.u32 4788187, %v4532_v32  ;;  %v4536_v6 = vcvt.s32.f32 %v4529_v7  ;;  %v2789_v41 = vmul.u32 %v2785_v62, %v11914_v40  ;;  %v2790_v42 = vshll.u32 %v2787_v36, 16 }
 0x6be   :  { %v2764_v28 = vmul.u32 %v2762_v39, %v11911_v5  ;;  %v2767_v57 = vmul.u32 %v2763_v19, %v11914_v40  ;;  %v2768_v52 = vshll.u32 %v2765_v60, 16  ;;  %v2792_v22 = vshll.u32 %v2788_v50, 16 }
 0x6bf   :  { %v4534_v34 = vand.u32 2147483647, %v4533_v43  ;;  %v2770_v48 = vshll.u32 %v2766_v17, 16  ;;  %vm2794_vm7 = vc.u32 %v2786_v14, %v2790_v42  ;;  %v2796_v4 = vadd.s32 %v2790_v42, %v2786_v14 }
 0x6c0   :  { %vm2772_vm8 = vc.u32 %v2764_v28, %v2768_v52  ;;  %v2774_v12 = vadd.s32 %v2768_v52, %v2764_v28  ;;  %v2795_v38 = vsel %vm2794_vm7, 1, %v15516_v33  ;;  %vm3342_vm9 = vcmp.gt.s32.totalorder %v3341_v55, 0 }
 0x6c1   :  { %v4537_v45 = vmul.f32 %v4536_v6, %v4534_v34  ;;  %v2773_v16 = vsel %vm2772_vm8, 1, %v15516_v33  ;;  %v2797_v18 = vadd.s32 %v2795_v38, %v2789_v41  ;;  %vm2798_vm10 = vc.u32 %v2796_v4, %v2792_v22 }
 0x6c2   :  { %v2775_v8 = vadd.s32 %v2773_v16, %v2767_v57  ;;  %vm2776_vm12 = vc.u32 %v2774_v12, %v2770_v48  ;;  %v2791_v5 = vshrl.u32 %v2787_v36, 16  ;;  %v2799_v40 = vsel %vm2798_vm10, 1, %v15516_v33 }
 0x6c3   :  { %v4538_v51 = vxor.u32 2147483648, %v4537_v45  ;;  %v2777_v13 = vsel %vm2776_vm12, 1, %v15516_v33  ;;  %v2801_v44 = vadd.s32 %v2799_v40, %v2797_v18  ;;  %v3343_v20 = vsel %vm3342_vm9, %v3341_v55, 0 }
 0x6c4   :  { %v2769_v15 = vshrl.u32 %v2765_v60, 16  ;;  %v2779_v9 = vadd.s32 %v2777_v13, %v2775_v8  ;;  %v3345_v37 = vand.u32 31, %v3343_v20  ;;  %v2793_v27 = vshrl.u32 %v2788_v50, 16 }
 0x6c5   :  { %v4539_v21 = vsel %vm4418_vm5, %v4538_v51, %v4537_v45  ;;  %v2802_v7 = vadd.s32 %v2801_v44, %v2791_v5  ;;  %v3339_v32 = vor.u32 8388608, %v12001_v10  ;;  %v4560_v30 = vadd.s32 3, %v4543_v1 }
 0x6c6   :  { %v4542_v2 = vsel %vm11984_vm4, %v11657_v25, %v4539_v21  ;;  %v2771_v39 = vshrl.u32 %v2766_v17, 16  ;;  %v2780_v19 = vadd.s32 %v2779_v9, %v2769_v15  ;;  %v12019_v36 = vsub.s32 32, %v3345_v37 }
 0x6c7   :  { %v4544_v62 = vmul.f32 %v4542_v2, %v4542_v2  ;;  %v2803_v55 = vadd.s32 %v2802_v7, %v2793_v27  ;;  %v2804_v3 = vmul.u32 %v11902_v31, %v11997_v11  ;;  %v12025_v60 = vadd.s32 %v2796_v4, %v2792_v22 }
 0x6c8   :  { %v12023_v34 = vadd.s32 %v2780_v19, %v2771_v39  ;;  %v12027_v6 = vshrl.u32 %v3343_v20, 5  ;;  %v3349_v50 = vshrl.u32 %v15511_v59, %v12019_v36  ;;  %v3352_v41 = vshrl.u32 %v15512_v53, %v12019_v36 }
 0x6c9   :  { %v4545_v43 = vmul.f32 -0.001358992, %v4544_v62  ;;  %v4552_v14 = vmul.f32 -0.00019511016, %v4544_v62  ;;  %v2807_v17 = vadd.s32 1, %v2803_v55  ;;  %v3348_v31 = vshll.u32 %v15517_v46, %v3345_v37 }
 0x6ca   :  { %vm2806_vm5 = vc.u32 %v12023_v34, %v12025_v60  ;;  %v3351_v11 = vshll.u32 %v15511_v59, %v3345_v37  ;;  %v3355_v42 = vshrl.u32 %v15513_v0, %v12019_v36  ;;  %v3354_v22 = vshll.u32 %v15512_v53, %v3345_v37 }
 0x6cb   :  { %v4546_v1 = vadd.f32 0.041655596, %v4545_v43  ;;  %v4553_v10 = vadd.f32 0.008332121, %v4552_v14  ;;  %v2808_v52 = vsel %vm2806_vm5, %v2807_v17, %v2803_v55  ;;  %v3350_v48 = vor.u32 %v3349_v50, %v3348_v31 }
 0x6cc   :  { %v2809_v45 = vadd.s32 %v2808_v52, %v2804_v3  ;;  %v3357_v4 = vshll.u32 %v15513_v0, %v3345_v37  ;;  %v3358_v12 = vshrl.u32 %v15514_v29, %v12019_v36  ;;  %v3353_v16 = vor.u32 %v3352_v41, %v3351_v11 }
 0x6cd   :  { %v4547_v28 = vmul.f32 %v4546_v1, %v4544_v62  ;;  %v4554_v57 = vmul.f32 %v4553_v10, %v4544_v62  ;;  %v3361_v18 = vshrl.u32 %v15515_v47, %v12019_v36  ;;  %v3356_v5 = vor.u32 %v3355_v42, %v3354_v22 }
 0x6ce   :  { %v2810_v8 = vadd.s32 536870912, %v2809_v45  ;;  %v3359_v40 = vor.u32 %v3358_v12, %v3357_v4  ;;  %v3360_v21 = vshll.u32 %v15514_v29, %v3345_v37  ;;  %v4561_v20 = vand.u32 3, %v4560_v30 }
 0x6cf   :  { %v4548_v38 = vadd.f32 -0.4999988, %v4547_v28  ;;  %v4555_v51 = vadd.f32 -0.16666654, %v4554_v57  ;;  %vm4559_vm0 = vweird.f32 %v11657_v25  ;;  %vm3363_vm3 = vcmp.lt.s32.totalorder %v12027_v6, 1 }
 0x6d0   :  { %v12047_v15 = vshrl.u32 %v2810_v8, 30  ;;  %v3362_v9 = vor.u32 %v3361_v18, %v3360_v21  ;;  %vm3366_vm11 = vcmp.lt.s32.totalorder %v12027_v6, 4  ;;  %vm3365_vm14 = vcmp.lt.s32.totalorder %v12027_v6, 3 }
 0x6d1   :  { %v4549_v13 = vmul.f32 %v4548_v38, %v4544_v62  ;;  %v4556_v44 = vmul.f32 %v4555_v51, %v4544_v62  ;;  %v3372_v39 = vsel %vm3366_vm11, %v3359_v40, 920167782  ;;  %v3371_v62 = vsel %vm3363_vm3, %v3350_v48, %v3353_v16 }
 0x6d2   :  { %v2812_v37 = vshll.u32 %v12047_v15, 30  ;;  %v3373_v30 = vsel %vm3365_vm14, %v3356_v5, %v3372_v39  ;;  %v12059_v19 = vshll.u32 %v3339_v32, 8  ;;  %vm4562_vm13 = vcmp.lt.s32.totalorder %v4561_v20, 2 }
 0x6d3   :  { %v4550_v27 = vadd.f32 1.0, %v4549_v13  ;;  %v4557_v7 = vadd.f32 1.0, %v4556_v44  ;;  %v3375_v55 = vsel %vm3363_vm3, %v3353_v16, %v3356_v5  ;;  %vm4563_vm1 = vcmp.eq.s32.totalorder %v4561_v20, 0 }
 0x6d4   :  { %v2813_v3 = vsub.s32 %v2809_v45, %v2812_v37  ;;  %vm3364_vm2 = vcmp.lt.s32.totalorder %v12027_v6, 2  ;;  %v3376_v50 = vsel %vm3366_vm11, %v3362_v9, 1326507024  ;;  %vm4566_vm4 = vcmp.eq.s32.totalorder %v4561_v20, 2 }
 0x6d5   :  { %v4558_v43 = vmul.f32 %v4557_v7, %v4542_v2  ;;  %v4567_v14 = vxor.u32 2147483648, %v4550_v27  ;;  %v3374_v10 = vsel %vm3364_vm2, %v3371_v62, %v3373_v30  ;;  %v3377_v2 = vsel %vm3365_vm14, %v3359_v40, %v3376_v50 }
 0x6d6   :  { %vm2814_vm7 = vcmp.lt.s32.totalorder %v2813_v3, 0  ;;  %v2815_v32 = vsub.s32 0, %v2813_v3  ;;  %v3378_v17 = vsel %vm3364_vm2, %v3375_v55, %v3377_v2  ;;  %v3380_v41 = vand.u32 65535, %v12059_v19 }
 0x6d7   :  { %v4564_v1 = vxor.u32 2147483648, %v4558_v43  ;;  %v4568_v11 = vsel %vm4566_vm4, %v4567_v14, %v4558_v43  ;;  %v3382_v42 = vand.u32 65535, %v3378_v17  ;;  %v3383_v28 = vshrl.u32 %v3378_v17, 16 }
 0x6d8   :  { %v2816_v52 = vsel %vm2814_vm7, %v2815_v32, %v2813_v3  ;;  %v3347_v22 = vshrl.u32 %v15517_v46, %v12019_v36  ;;  %v3381_v45 = vshrl.u32 %v12059_v19, 16  ;;  %v3368_v38 = vsel %vm3366_vm11, %v3356_v5, 2102212464 }
 0x6d9   :  { %v4565_v31 = vsel %vm4563_vm1, %v4550_v27, %v4564_v1  ;;  %v2817_v12 = vclz %v2816_v52  ;;  %v3385_v51 = vmul.u32 %v3383_v28, %v3380_v41  ;;  %v2805_v18 = vadd.s32 %v12025_v60, %v12023_v34 }
 0x6da   :  { %v4569_v57 = vsel %vm4562_vm13, %v4565_v31, %v4568_v11  ;;  %v3386_v8 = vmul.u32 %v3382_v42, %v3381_v45  ;;  %v3404_v36 = vand.u32 65535, %v3374_v10  ;;  %vm2713_vm8 = vcmp.lt.s32.totalorder %v11863_v24, 0 }
 0x6db   :  { %v4570_v4 = vsel %vm4559_vm0, nan, %v4569_v57  ;;  %v7253_v40 = vadd.s32 4294967294, %v2817_v12  ;;  %v3367_v25 = vsel %vm3363_vm3, %v3347_v22, %v3350_v48  ;;  %v3384_v21 = vmul.u32 %v3382_v42, %v3380_v41 }
 0x6dc   :  { %7221 = vst.msk [vmem:[%s14704_s3 + $0x70] sm:$0xff] %vm7206_vm6, %v4570_v4  ;;  %v3388_v13 = vshll.u32 %v3385_v51, 16  ;;  %v2835_v5 = vsub.s32 4, %v12047_v15  ;;  %v3369_v44 = vsel %vm3365_vm14, %v3353_v16, %v3368_v38  ;;  %v3387_v20 = vmul.u32 %v3383_v28, %v3381_v45  ;;  %v2080_v16 = vpop.permute.xlu2 %2079 }
 0x6dd   :  { %v3405_v9 = vshrl.u32 %v3374_v10, 16  ;;  %vm7254_vm9 = vcmp.lt.s32.totalorder %v7253_v40, 0  ;;  %v3390_v27 = vshll.u32 %v3386_v8, 16  ;;  %v3408_v37 = vmul.u32 %v3404_v36, %v3381_v45 }
 0x6de   :  { %vm3392_vm10 = vc.u32 %v3384_v21, %v3388_v13  ;;  %v3394_v34 = vadd.s32 %v3388_v13, %v3384_v21  ;;  %v2820_v60 = vsel %vm7254_vm9, 0, %v7253_v40  ;;  %v3389_v30 = vshrl.u32 %v3385_v51, 16 }
 0x6df   :  { %v3393_v7 = vsel %vm3392_vm10, 1, %v15516_v33  ;;  %v3407_v39 = vmul.u32 %v3405_v9, %v3380_v41  ;;  %v2821_v62 = vsub.s32 32, %v2820_v60  ;;  %v2825_v48 = vsub.s32 4294967266, %v2820_v60 }
 0x6e0   :  { %v3395_v43 = vadd.s32 %v3393_v7, %v3387_v20  ;;  %vm3396_vm12 = vc.u32 %v3394_v34, %v3390_v27  ;;  %v3406_v14 = vmul.u32 %v3404_v36, %v3380_v41  ;;  %v3409_v55 = vmul.u32 %v3405_v9, %v3381_v45  ;;  %v2058_v41 = vpop.permute.xlu0 %2057 }
 0x6e1   :  { %v3410_v50 = vshll.u32 %v3407_v39, 16  ;;  %v2822_v1 = vshll.u32 %v2813_v3, %v2820_v60  ;;  %v2823_v10 = vshrl.u32 %v2805_v18, %v2821_v62  ;;  %v2826_v2 = vadd.s32 127, %v2825_v48 }
 0x6e2   :  { %v3397_v32 = vsel %vm3396_vm12, 1, %v15516_v33  ;;  %v3412_v31 = vshll.u32 %v3408_v37, 16  ;;  %v2159_v52 = vsel %vm2141_vm15, %v10920_v26, %v2080_v16  ;;  %v2836_v3 = vsel %vm2713_vm8, %v2835_v5, %v12047_v15 }
 0x6e3   :  { %v3399_v17 = vadd.s32 %v3397_v32, %v3395_v43  ;;  %vm3414_vm5 = vc.u32 %v3406_v14, %v3410_v50  ;;  %v3416_v11 = vadd.s32 %v3410_v50, %v3406_v14  ;;  %v2824_v42 = vor.u32 %v2823_v10, %v2822_v1 }
 0x6e4   :  { %v2827_v28 = vshll.u32 %v2826_v2, 23  ;;  %v3415_v57 = vsel %vm3414_vm5, 1, %v15516_v33  ;;  %v3391_v12 = vshrl.u32 %v3386_v8, 16  ;;  %v2195_v51 = vmul.f32 %v11820_v49, %v2159_v52 }
 0x6e5   :  { %v3400_v22 = vadd.s32 %v3399_v17, %v3389_v30  ;;  %v3417_v45 = vadd.s32 %v3415_v57, %v3409_v55  ;;  %vm3418_vm0 = vc.u32 %v3416_v11, %v3412_v31  ;;  %v2831_v18 = vcvt.s32.f32 %v2824_v42 }
 0x6e6   :  { %v2828_v4 = vor.u32 4788187, %v2827_v28  ;;  %v3419_v38 = vsel %vm3418_vm0, 1, %v15516_v33  ;;  %v3411_v36 = vshrl.u32 %v3407_v39, 16  ;;  %v2148_v26 = vsel %vm2141_vm15, %v10852_v58, %v2058_v41 }
 0x6e7   :  { %v3421_v40 = vadd.s32 %v3419_v38, %v3417_v45  ;;  %v3401_v13 = vadd.s32 %v3400_v22, %v3391_v12  ;;  %v12106_v20 = vadd.f32 %v11860_v54, %v2195_v51  ;;  %v2184_v15 = vmul.f32 %v11820_v49, %v2148_v26 }
 0x6e8   :  { %v2829_v21 = vand.u32 2147483647, %v2828_v4  ;;  %vm12111_vm3 = vcmp.le.f32.partialorder %v2711_v23, 0.7853982  ;;  %v3413_v5 = vshrl.u32 %v3408_v37, 16  ;;  %v3420_v34 = vadd.s32 %v3416_v11, %v3412_v31 }
 0x6e9   :  { %v3422_v9 = vadd.s32 %v3421_v40, %v3411_v36  ;;  %v4881_v60 = vand.u32 2147483647, %v12106_v20  ;;  %v4884_v58 = vand.u32 2139095040, %v12106_v20  ;;  %v2838_v7 = vsel %vm12111_vm3, 0, %v2836_v3 }
 0x6ea   :  { %v2832_v27 = vmul.f32 %v2831_v18, %v2829_v21  ;;  %v3370_v49 = vsel %vm3364_vm2, %v3367_v25, %v3369_v44  ;;  %vm3426_vm11 = vc.u32 %v3401_v13, %v3420_v34  ;;  %v12122_v48 = vadd.f32 %v11860_v54, %v2184_v15 }
 0x6eb   :  { %v3423_v39 = vadd.s32 %v3422_v9, %v3413_v5  ;;  %v4885_v23 = vshrl.u32 %v4884_v58, 23  ;;  %v4888_v30 = vand.u32 8388607, %v4881_v60  ;;  %v3424_v14 = vmul.u32 %v12059_v19, %v3370_v49 }
 0x6ec   :  { %v2833_v62 = vxor.u32 2147483648, %v2832_v27  ;;  %v2855_v25 = vadd.s32 3, %v2838_v7  ;;  %v3179_v1 = vand.u32 2139095040, %v12122_v48  ;;  %vm3333_vm13 = vcmp.lt.s32.totalorder %v11898_v35, 0 }
 0x6ed   :  { %v3427_v37 = vadd.s32 1, %v3423_v39  ;;  %v7294_v55 = vadd.s32 4294967169, %v4885_v23  ;;  %v4889_v10 = vor.u32 8388608, %v4888_v30  ;;  %v3425_v4 = vadd.s32 %v3420_v34, %v3401_v13 }
 0x6ee   :  { %v2834_v43 = vsel %vm2713_vm8, %v2833_v62, %v2832_v27  ;;  %v12133_v31 = vand.u32 3, %v2855_v25  ;;  %v3180_v57 = vshrl.u32 %v3179_v1, 23  ;;  %v3176_v38 = vand.u32 2147483647, %v12122_v48 }
 0x6ef   :  { %v2837_v6 = vsel %vm12111_vm3, %v11863_v24, %v2834_v43  ;;  %v3428_v44 = vsel %vm3426_vm11, %v3427_v37, %v3423_v39  ;;  %v4891_v54 = vadd.s32 1, %v7294_v55  ;;  %v12135_v41 = vshll.u32 %v4889_v10, 8 }
 0x6f0   :  { %v2839_v50 = vmul.f32 %v2837_v6, %v2837_v6  ;;  %v3429_v16 = vadd.s32 %v3428_v44, %v3424_v14  ;;  %vm2861_vm1 = vcmp.eq.s32.totalorder %v12133_v31, 2  ;;  %v12142_v40 = vadd.s32 4294967169, %v3180_v57 }
 0x6f1   :  { %vm4892_vm14 = vcmp.gt.s32.totalorder %v4891_v54, 0  ;;  %vm2858_vm2 = vcmp.eq.s32.totalorder %v12133_v31, 0  ;;  %v12149_v8 = vand.u32 65535, %v12135_v41  ;;  %vm2857_vm4 = vcmp.lt.s32.totalorder %v12133_v31, 2 }
 0x6f2   :  { %v2840_v2 = vmul.f32 -0.001358992, %v2839_v50  ;;  %v2847_v32 = vmul.f32 -0.00019511016, %v2839_v50  ;;  %v3430_v17 = vadd.s32 536870912, %v3429_v16  ;;  %v4893_v19 = vsel %vm4892_vm14, %v4891_v54, 0 }
 0x6f3   :  { %v4895_v52 = vand.u32 31, %v4893_v19  ;;  %v12145_v21 = vshrl.u32 %v4893_v19, 5  ;;  %vm2854_vm8 = vweird.f32 %v11863_v24  ;;  %vm12174_vm9 = vcmp.le.f32.partialorder %v3331_v61, 0.7853982 }
 0x6f4   :  { %v2841_v11 = vadd.f32 0.041655596, %v2840_v2  ;;  %v2848_v42 = vadd.f32 0.008332121, %v2847_v32  ;;  %v3431_v28 = vshrl.u32 %v3430_v17, 30 }
 0x6f5   :  { %v4896_v12 = vsub.s32 32, %v4895_v52  ;;  %v4898_v15 = vshll.u32 %v15517_v46, %v4895_v52  ;;  %v4901_v34 = vshll.u32 %v15511_v59, %v4895_v52  ;;  %v4904_v7 = vshll.u32 %v15512_v53, %v4895_v52 }
 0x6f6   :  { %v2842_v3 = vmul.f32 %v2841_v11, %v2839_v50  ;;  %v2849_v22 = vmul.f32 %v2848_v42, %v2839_v50  ;;  %v3432_v45 = vshll.u32 %v3431_v28, 30  ;;  %v3455_v26 = vsub.s32 4, %v3431_v28 }
 0x6f7   :  { %v4899_v27 = vshrl.u32 %v15511_v59, %v4896_v12  ;;  %v4902_v58 = vshrl.u32 %v15512_v53, %v4896_v12  ;;  %v4905_v23 = vshrl.u32 %v15513_v0, %v4896_v12  ;;  %v4897_v43 = vshrl.u32 %v15517_v46, %v4896_v12 }
 0x6f8   :  { %v2843_v51 = vadd.f32 -0.4999988, %v2842_v3  ;;  %v2850_v18 = vadd.f32 -0.16666654, %v2849_v22  ;;  %v12140_v36 = vsub.s32 %v3429_v16, %v3432_v45  ;;  %v12163_v30 = vsel %vm3333_vm13, %v3455_v26, %v3431_v28 }
 0x6f9   :  { %v4908_v14 = vshrl.u32 %v15514_v29, %v4896_v12  ;;  %v4907_v44 = vshll.u32 %v15513_v0, %v4895_v52  ;;  %v4900_v54 = vor.u32 %v4899_v27, %v4898_v15  ;;  %v4903_v1 = vor.u32 %v4902_v58, %v4901_v34 }
 0x6fa   :  { %v2844_v13 = vmul.f32 %v2843_v51, %v2839_v50  ;;  %v2851_v5 = vmul.f32 %v2850_v18, %v2839_v50  ;;  %vm3434_vm7 = vcmp.lt.s32.totalorder %v12140_v36, 0  ;;  %v3435_v9 = vsub.s32 0, %v12140_v36 }
 0x6fb   :  { %v4911_v50 = vshrl.u32 %v15515_v47, %v4896_v12  ;;  %v4910_v10 = vshll.u32 %v15514_v29, %v4895_v52  ;;  %v4906_v17 = vor.u32 %v4905_v23, %v4904_v7  ;;  %v4909_v19 = vor.u32 %v4908_v14, %v4907_v44 }
 0x6fc   :  { %v2845_v49 = vadd.f32 1.0, %v2844_v13  ;;  %v2852_v39 = vadd.f32 1.0, %v2851_v5  ;;  %v3436_v62 = vsel %vm3434_vm7, %v3435_v9, %v12140_v36  ;;  %vm4913_vm12 = vcmp.lt.s32.totalorder %v12145_v21, 1 }
 0x6fd   :  { %v3437_v37 = vclz %v3436_v62  ;;  %v4912_v11 = vor.u32 %v4911_v50, %v4910_v10  ;;  %vm4914_vm5 = vcmp.lt.s32.totalorder %v12145_v21, 2  ;;  %vm4915_vm0 = vcmp.lt.s32.totalorder %v12145_v21, 3 }
 0x6fe   :  { %v2853_v55 = vmul.f32 %v2852_v39, %v2837_v6  ;;  %v2862_v25 = vxor.u32 2147483648, %v2845_v49  ;;  %vm4916_vm3 = vcmp.lt.s32.totalorder %v12145_v21, 4  ;;  %v4917_v3 = vsel %vm4913_vm12, %v4897_v43, %v4900_v54 }
 0x6ff   :  { %v7265_v16 = vadd.s32 4294967294, %v3437_v37  ;;  %v4918_v45 = vsel %vm4916_vm3, %v4906_v17, 2102212464  ;;  %v4921_v12 = vsel %vm4913_vm12, %v4900_v54, %v4903_v1  ;;  %v4922_v51 = vsel %vm4916_vm3, %v4909_v19, 920167782 }
 0x700   :  { %v2859_v2 = vxor.u32 2147483648, %v2853_v55  ;;  %v2863_v32 = vsel %vm2861_vm1, %v2862_v25, %v2853_v55  ;;  %v4923_v24 = vsel %vm4915_vm0, %v4906_v17, %v4922_v51  ;;  %v4919_v15 = vsel %vm4915_vm0, %v4903_v1, %v4918_v45 }
 0x701   :  { %vm7266_vm10 = vcmp.lt.s32.totalorder %v7265_v16, 0  ;;  %v4924_v13 = vsel %vm4914_vm5, %v4921_v12, %v4923_v24  ;;  %v4925_v5 = vsel %vm4913_vm12, %v4903_v1, %v4906_v17  ;;  %v4926_v9 = vsel %vm4916_vm3, %v4912_v11, 1326507024 }
 0x702   :  { %v2860_v42 = vsel %vm2858_vm2, %v2845_v49, %v2859_v2  ;;  %v3440_v28 = vsel %vm7266_vm10, 0, %v7265_v16  ;;  %v4931_v7 = vshrl.u32 %v12135_v41, 16  ;;  %v4955_v49 = vshrl.u32 %v4924_v13, 16 }
 0x703   :  { %v2864_v61 = vsel %vm2857_vm4, %v2860_v42, %v2863_v32  ;;  %v3441_v57 = vsub.s32 32, %v3440_v28  ;;  %v3445_v52 = vsub.s32 4294967266, %v3440_v28  ;;  %v3442_v31 = vshll.u32 %v12140_v36, %v3440_v28 }
 0x704   :  { %v2865_v22 = vsel %vm2854_vm8, nan, %v2864_v61  ;;  %v4954_v36 = vand.u32 65535, %v4924_v13  ;;  %v3186_v39 = vadd.s32 1, %v12142_v40  ;;  %v12219_v43 = vand.u32 8388607, %v3176_v38 }
 0x705   :  { %7210 = vst.msk [vmem:[%s14704_s3 + $0x18] sm:$0xff] %vm7206_vm6, %v2865_v22  ;;  %v3443_v18 = vshrl.u32 %v3425_v4, %v3441_v57  ;;  %v3446_v26 = vadd.s32 127, %v3445_v52  ;;  %v4927_v4 = vsel %vm4915_vm0, %v4909_v19, %v4926_v9  ;;  %v3458_v14 = vsel %vm12174_vm9, 0, %v12163_v30 }
 0x706   :  { %v4928_v58 = vsel %vm4914_vm5, %v4925_v5, %v4927_v4  ;;  %v12226_v55 = vsel %vm4914_vm5, %v4917_v3, %v4919_v15  ;;  %v4957_v25 = vmul.u32 %v4955_v49, %v12149_v8  ;;  %v4958_v44 = vmul.u32 %v4954_v36, %v4931_v7 }
 0x707   :  { %v3444_v27 = vor.u32 %v3443_v18, %v3442_v31  ;;  %v3447_v34 = vshll.u32 %v3446_v26, 23  ;;  %v4932_v23 = vand.u32 65535, %v4928_v58  ;;  %v4933_v37 = vshrl.u32 %v4928_v58, 16 }
 0x708   :  { %v4956_v1 = vmul.u32 %v4954_v36, %v12149_v8  ;;  %v4959_v10 = vmul.u32 %v4955_v49, %v4931_v7  ;;  %v4960_v2 = vshll.u32 %v4957_v25, 16  ;;  %vm3187_vm11 = vcmp.gt.s32.totalorder %v3186_v39, 0 }
 0x709   :  { %v3448_v62 = vor.u32 4788187, %v3447_v34  ;;  %v3451_v40 = vcvt.s32.f32 %v3444_v27  ;;  %v4935_v16 = vmul.u32 %v4933_v37, %v12149_v8  ;;  %v4936_v54 = vmul.u32 %v4932_v23, %v4931_v7 }
 0x70a   :  { %v4934_v30 = vmul.u32 %v4932_v23, %v12149_v8  ;;  %v4937_v17 = vmul.u32 %v4933_v37, %v4931_v7  ;;  %v4962_v11 = vshll.u32 %v4958_v44, 16  ;;  %vm4964_vm14 = vc.u32 %v4956_v1, %v4960_v2 }
 0x70b   :  { %v3449_v50 = vand.u32 2147483647, %v3448_v62  ;;  %v4938_v21 = vshll.u32 %v4935_v16, 16  ;;  %v4940_v19 = vshll.u32 %v4936_v54, 16  ;;  %v4966_v42 = vadd.s32 %v4960_v2, %v4956_v1 }
 0x70c   :  { %v4965_v57 = vsel %vm4964_vm14, 1, %v15516_v33  ;;  %v4961_v3 = vshrl.u32 %v4957_v25, 16  ;;  %v3188_v26 = vsel %vm3187_vm11, %v3186_v39, 0  ;;  %v4939_v15 = vshrl.u32 %v4935_v16, 16 }
 0x70d   :  { %v3452_v32 = vmul.f32 %v3451_v40, %v3449_v50  ;;  %vm4942_vm1 = vc.u32 %v4934_v30, %v4938_v21  ;;  %v4944_v61 = vadd.s32 %v4938_v21, %v4934_v30  ;;  %v4967_v22 = vadd.s32 %v4965_v57, %v4959_v10 }
 0x70e   :  { %v4943_v52 = vsel %vm4942_vm1, 1, %v15516_v33  ;;  %vm4968_vm2 = vc.u32 %v4966_v42, %v4962_v11  ;;  %v3190_v5 = vand.u32 31, %v3188_v26  ;;  %v4941_v9 = vshrl.u32 %v4936_v54, 16 }
 0x70f   :  { %v3453_v28 = vxor.u32 2147483648, %v3452_v32  ;;  %v4945_v8 = vadd.s32 %v4943_v52, %v4937_v17  ;;  %vm4946_vm4 = vc.u32 %v4944_v61, %v4940_v19  ;;  %v4969_v12 = vsel %vm4968_vm2, 1, %v15516_v33 }
 0x710   :  { %v4947_v31 = vsel %vm4946_vm4, 1, %v15516_v33  ;;  %v4971_v18 = vadd.s32 %v4969_v12, %v4967_v22  ;;  %v4963_v27 = vshrl.u32 %v4958_v44, 16  ;;  %v12242_v7 = vsub.s32 32, %v3190_v5 }
 0x711   :  { %v3454_v45 = vsel %vm3333_vm13, %v3453_v28, %v3452_v32  ;;  %v4949_v13 = vadd.s32 %v4947_v31, %v4945_v8  ;;  %v3475_v49 = vadd.s32 3, %v3458_v14  ;;  %v4974_v62 = vmul.u32 %v12135_v41, %v12226_v55 }
 0x712   :  { %v3457_v51 = vsel %vm12174_vm9, %v11898_v35, %v3454_v45  ;;  %v4972_v34 = vadd.s32 %v4971_v18, %v4961_v3  ;;  %v3184_v23 = vor.u32 8388608, %v12219_v43  ;;  %v12249_v50 = vadd.s32 %v4966_v42, %v4962_v11 }
 0x713   :  { %v3459_v24 = vmul.f32 %v3457_v51, %v3457_v51  ;;  %v4950_v58 = vadd.s32 %v4949_v13, %v4939_v15  ;;  %v12251_v40 = vshrl.u32 %v3188_v26, 5  ;;  %v3193_v16 = vshll.u32 %v15517_v46, %v3190_v5 }
 0x714   :  { %v4973_v6 = vadd.s32 %v4972_v34, %v4963_v27  ;;  %v3194_v14 = vshrl.u32 %v15511_v59, %v12242_v7  ;;  %v3197_v41 = vshrl.u32 %v15512_v53, %v12242_v7  ;;  %v3196_v55 = vshll.u32 %v15511_v59, %v3190_v5 }
 0x715   :  { %v3460_v4 = vmul.f32 -0.001358992, %v3459_v24  ;;  %v3467_v36 = vmul.f32 -0.00019511016, %v3459_v24  ;;  %v12247_v25 = vadd.s32 %v4950_v58, %v4941_v9  ;;  %v3199_v10 = vshll.u32 %v15512_v53, %v3190_v5 }
 0x716   :  { %v4977_v44 = vadd.s32 1, %v4973_v6  ;;  %v3200_v2 = vshrl.u32 %v15513_v0, %v12242_v7  ;;  %v3195_v21 = vor.u32 %v3194_v14, %v3193_v16  ;;  %v3202_v19 = vshll.u32 %v15513_v0, %v3190_v5 }
 0x717   :  { %v3461_v39 = vadd.f32 0.041655596, %v3460_v4  ;;  %v3468_v37 = vadd.f32 0.008332121, %v3467_v36  ;;  %vm4976_vm13 = vc.u32 %v12247_v25, %v12249_v50  ;;  %v3203_v11 = vshrl.u32 %v15514_v29, %v12242_v7 }
 0x718   :  { %v4978_v43 = vsel %vm4976_vm13, %v4977_v44, %v4973_v6  ;;  %v3205_v42 = vshll.u32 %v15514_v29, %v3190_v5  ;;  %v3206_v28 = vshrl.u32 %v15515_v47, %v12242_v7  ;;  %v12270_v3 = vor.u32 %v3197_v41, %v3196_v55 }
 0x719   :  { %v3462_v54 = vmul.f32 %v3461_v39, %v3459_v24  ;;  %v3469_v1 = vmul.f32 %v3468_v37, %v3459_v24  ;;  %v4979_v17 = vadd.s32 %v4978_v43, %v4974_v62  ;;  %v3476_v22 = vand.u32 3, %v3475_v49 }
 0x71a   :  { %v3201_v45 = vor.u32 %v3200_v2, %v3199_v10  ;;  %v3204_v8 = vor.u32 %v3203_v11, %v3202_v19  ;;  %v3207_v12 = vor.u32 %v3206_v28, %v3205_v42  ;;  %vm3211_vm7 = vcmp.lt.s32.totalorder %v12251_v40, 4 }
 0x71b   :  { %v3463_v32 = vadd.f32 -0.4999988, %v3462_v54  ;;  %v3470_v30 = vadd.f32 -0.16666654, %v3469_v1  ;;  %v4980_v52 = vadd.s32 536870912, %v4979_v17  ;;  %vm3474_vm8 = vweird.f32 %v11898_v35  ;;  %v2066_v54 = vpop.permute.xlu1 %2065 }
 0x71c   :  { %vm3208_vm9 = vcmp.lt.s32.totalorder %v12251_v40, 1  ;;  %vm3210_vm10 = vcmp.lt.s32.totalorder %v12251_v40, 3  ;;  %vm3477_vm12 = vcmp.lt.s32.totalorder %v3476_v22, 2  ;;  %v3221_v34 = vsel %vm3211_vm7, %v3207_v12, 1326507024 }
 0x71d   :  { %v3464_v61 = vmul.f32 %v3463_v32, %v3459_v24  ;;  %v3471_v57 = vmul.f32 %v3470_v30, %v3459_v24  ;;  %v12272_v26 = vshrl.u32 %v4980_v52, 30  ;;  %v3217_v24 = vsel %vm3211_vm7, %v3204_v8, 920167782 }
 0x71e   :  { %v3216_v9 = vsel %vm3208_vm9, %v3195_v21, %v12270_v3  ;;  %v3218_v27 = vsel %vm3210_vm10, %v3201_v45, %v3217_v24  ;;  %v12288_v4 = vshll.u32 %v3184_v23, 8  ;;  %vm3209_vm5 = vcmp.lt.s32.totalorder %v12251_v40, 2 }
 0x71f   :  { %v3465_v31 = vadd.f32 1.0, %v3464_v61  ;;  %v3472_v18 = vadd.f32 1.0, %v3471_v57  ;;  %v4982_v5 = vshll.u32 %v12272_v26, 30  ;;  %vm3478_vm0 = vcmp.eq.s32.totalorder %v3476_v22, 0 }
 0x720   :  { %vm3481_vm3 = vcmp.eq.s32.totalorder %v3476_v22, 2  ;;  %v3219_v49 = vsel %vm3209_vm5, %v3216_v9, %v3218_v27  ;;  %v3222_v6 = vsel %vm3210_vm10, %v3204_v8, %v3221_v34  ;;  %v3192_v44 = vshrl.u32 %v15517_v46, %v12242_v7 }
 0x721   :  { %v3473_v15 = vmul.f32 %v3472_v18, %v3457_v51  ;;  %v3482_v13 = vxor.u32 2147483648, %v3465_v31  ;;  %v4983_v58 = vsub.s32 %v4979_v17, %v4982_v5  ;;  %v3220_v51 = vsel %vm3208_vm9, %v12270_v3, %v3201_v45 }
 0x722   :  { %v3223_v16 = vsel %vm3209_vm5, %v3220_v51, %v3222_v6  ;;  %v3225_v14 = vand.u32 65535, %v12288_v4  ;;  %v3249_v55 = vand.u32 65535, %v3219_v49  ;;  %v3226_v7 = vshrl.u32 %v12288_v4, 16 }
 0x723   :  { %v3479_v36 = vxor.u32 2147483648, %v3473_v15  ;;  %v3483_v39 = vsel %vm3481_vm3, %v3482_v13, %v3473_v15  ;;  %vm4984_vm11 = vcmp.lt.s32.totalorder %v4983_v58, 0  ;;  %v4985_v23 = vsub.s32 0, %v4983_v58 }
 0x724   :  { %v3227_v43 = vand.u32 65535, %v3223_v16  ;;  %v3228_v2 = vshrl.u32 %v3223_v16, 16  ;;  %v3250_v32 = vshrl.u32 %v3219_v49, 16  ;;  %v4975_v30 = vadd.s32 %v12249_v50, %v12247_v25  ;;  %v12327_v49 = vld [vmem:[%s14702_s1] ss:$0 sm:$0xff] }
 0x725   :  { %v3480_v62 = vsel %vm3478_vm0, %v3465_v31, %v3479_v36  ;;  %v4986_v41 = vsel %vm4984_vm11, %v4985_v23, %v4983_v58  ;;  %v2152_v35 = vsel %vm2141_vm15, %v10826_v63, %v2066_v54  ;;  %v12317_v19 = vsel %vm3208_vm9, %v3192_v44, %v3195_v21 }
 0x726   :  { %v3484_v37 = vsel %vm3477_vm12, %v3480_v62, %v3483_v39  ;;  %v4987_v10 = vclz %v4986_v41  ;;  %v3230_v11 = vmul.u32 %v3228_v2, %v3225_v14  ;;  %v3231_v42 = vmul.u32 %v3227_v43, %v3226_v7 }
 0x727   :  { %v3485_v1 = vsel %vm3474_vm8, nan, %v3484_v37  ;;  %v5005_v28 = vsub.s32 4, %v12272_v26  ;;  %v3213_v61 = vsel %vm3211_vm7, %v3201_v45, 2102212464  ;;  %v3252_v57 = vmul.u32 %v3250_v32, %v3225_v14 }
 0x728   :  { %7214 = vst.msk [vmem:[%s14704_s3 + $0x38] sm:$0xff] %vm7206_vm6, %v3485_v1  ;;  %v7295_v17 = vadd.s32 4294967294, %v4987_v10  ;;  %v3253_v52 = vmul.u32 %v3249_v55, %v3226_v7  ;;  %v3229_v22 = vmul.u32 %v3227_v43, %v3225_v14  ;;  %v3233_v25 = vshll.u32 %v3230_v11, 16 }
 0x729   :  { %v3251_v50 = vmul.u32 %v3249_v55, %v3225_v14  ;;  %v3232_v63 = vmul.u32 %v3228_v2, %v3226_v7  ;;  %v3254_v12 = vmul.u32 %v3250_v32, %v3226_v7  ;;  %v3255_v31 = vshll.u32 %v3252_v57, 16  ;;  %v12334_v14 = vld [vmem:[%s14703_s2] ss:$0 sm:$0xff] }
 0x72a   :  { %vm7296_vm14 = vcmp.lt.s32.totalorder %v7295_v17, 0  ;;  %v3235_v24 = vshll.u32 %v3231_v42, 16  ;;  %vm3237_vm1 = vc.u32 %v3229_v22, %v3233_v25  ;;  %v3239_v5 = vadd.s32 %v3233_v25, %v3229_v22 }
 0x72b   :  { %v4990_v8 = vsel %vm7296_vm14, 0, %v7295_v17  ;;  %v3238_v13 = vsel %vm3237_vm1, 1, %v15516_v33  ;;  %v3257_v9 = vshll.u32 %v3253_v52, 16  ;;  %vm3259_vm2 = vc.u32 %v3251_v50, %v3255_v31 }
 0x72c   :  { %v4991_v18 = vsub.s32 32, %v4990_v8  ;;  %v4995_v21 = vsub.s32 4294967266, %v4990_v8  ;;  %v4992_v15 = vshll.u32 %v4983_v58, %v4990_v8  ;;  %v3240_v34 = vadd.s32 %v3238_v13, %v3232_v63  ;;  %v2086_v58 = vpop.permute.xlu2 %2085 }
 0x72d   :  { %vm3241_vm4 = vc.u32 %v3239_v5, %v3235_v24  ;;  %v3260_v36 = vsel %vm3259_vm2, 1, %v15516_v33  ;;  %v3261_v51 = vadd.s32 %v3255_v31, %v3251_v50  ;;  %v2188_v6 = vmul.f32 %v12327_v49, %v2152_v35 }
 0x72e   :  { %v4993_v45 = vshrl.u32 %v4975_v30, %v4991_v18  ;;  %v4996_v27 = vadd.s32 127, %v4995_v21  ;;  %v3242_v23 = vsel %vm3241_vm4, 1, %v15516_v33  ;;  %v3262_v37 = vadd.s32 %v3260_v36, %v3254_v12 }
 0x72f   :  { %v3234_v44 = vshrl.u32 %v3230_v11, 16  ;;  %v3244_v16 = vadd.s32 %v3242_v23, %v3240_v34  ;;  %vm3263_vm13 = vc.u32 %v3261_v51, %v3257_v9  ;;  %v12337_v54 = vadd.f32 %v12334_v14, %v2188_v6 }
 0x730   :  { %v4994_v62 = vor.u32 %v4993_v45, %v4992_v15  ;;  %v4997_v39 = vshll.u32 %v4996_v27, 23  ;;  %v3236_v41 = vshrl.u32 %v3231_v42, 16  ;;  %v3264_v43 = vsel %vm3263_vm13, 1, %v15516_v33 }
 0x731   :  { %v2162_v55 = vsel %vm2141_vm15, %v10935_v56, %v2086_v58  ;;  %v3245_v10 = vadd.s32 %v3244_v16, %v3234_v44  ;;  %v3256_v7 = vshrl.u32 %v3252_v57, 16  ;;  %v3266_v2 = vadd.s32 %v3264_v43, %v3262_v37 }
 0x732   :  { %v4998_v1 = vor.u32 4788187, %v4997_v39  ;;  %v3796_v32 = vand.u32 2147483647, %v12337_v54  ;;  %v5001_v35 = vcvt.s32.f32 %v4994_v62  ;;  %v3214_v17 = vsel %vm3210_vm10, %v12270_v3, %v3213_v61 }
 0x733   :  { %v3799_v11 = vand.u32 2139095040, %v12337_v54  ;;  %v3246_v22 = vadd.s32 %v3245_v10, %v3236_v41  ;;  %v3258_v42 = vshrl.u32 %v3253_v52, 16  ;;  %v3267_v25 = vadd.s32 %v3266_v2, %v3256_v7 }
 0x734   :  { %v4999_v30 = vand.u32 2147483647, %v4998_v1  ;;  %v2198_v50 = vmul.f32 %v12327_v49, %v2162_v55  ;;  %vm4883_vm7 = vcmp.lt.s32.totalorder %v12106_v20, 0  ;;  %v3265_v57 = vadd.s32 %v3261_v51, %v3257_v9 }
 0x735   :  { %v3800_v8 = vshrl.u32 %v3799_v11, 23  ;;  %v5006_v63 = vsel %vm4883_vm7, %v5005_v28, %v12272_v26  ;;  %v3215_v12 = vsel %vm3209_vm5, %v12317_v19, %v3214_v17  ;;  %v3268_v31 = vadd.s32 %v3267_v25, %v3258_v42 }
 0x736   :  { %v5002_v56 = vmul.f32 %v5001_v35, %v4999_v30  ;;  %v3803_v3 = vand.u32 8388607, %v3796_v32  ;;  %vm3271_vm8 = vc.u32 %v3246_v22, %v3265_v57  ;;  %vm4882_vm9 = vcmp.le.f32.partialorder %v4881_v60, 0.7853982 }
 0x737   :  { %v7273_v52 = vadd.s32 4294967169, %v3800_v8  ;;  %v3272_v18 = vadd.s32 1, %v3268_v31  ;;  %v12358_v21 = vadd.f32 %v12334_v14, %v2198_v50  ;;  %v5008_v26 = vsel %vm4882_vm9, 0, %v5006_v63 }
 0x738   :  { %v5003_v61 = vxor.u32 2147483648, %v5002_v56  ;;  %v3269_v28 = vmul.u32 %v12288_v4, %v3215_v12  ;;  %v3804_v13 = vor.u32 8388608, %v3803_v3  ;;  %v5025_v45 = vadd.s32 3, %v5008_v26 }
 0x739   :  { %v3806_v40 = vadd.s32 1, %v7273_v52  ;;  %v3273_v15 = vsel %vm3271_vm8, %v3272_v18, %v3268_v31  ;;  %v5346_v60 = vand.u32 2147483647, %v12358_v21  ;;  %v5349_v4 = vand.u32 2139095040, %v12358_v21 }
 0x73a   :  { %v5004_v24 = vsel %vm4883_vm7, %v5003_v61, %v5002_v56  ;;  %v3274_v9 = vadd.s32 %v3273_v15, %v3269_v28  ;;  %v12363_v58 = vshll.u32 %v3804_v13, 8  ;;  %v12366_v37 = vand.u32 3, %v5025_v45 }
 0x73b   :  { %v5007_v19 = vsel %vm4882_vm9, %v12106_v20, %v5004_v24  ;;  %vm3807_vm10 = vcmp.gt.s32.totalorder %v3806_v40, 0  ;;  %v12368_v44 = vadd.s32 %v3265_v57, %v3246_v22  ;;  %v12372_v55 = vand.u32 8388607, %v5346_v60 }
 0x73c   :  { %v5009_v5 = vmul.f32 %v5007_v19, %v5007_v19  ;;  %v3808_v27 = vsel %vm3807_vm10, %v3806_v40, 0  ;;  %v3275_v51 = vadd.s32 536870912, %v3274_v9  ;;  %vm3178_vm12 = vcmp.lt.s32.totalorder %v12122_v48, 0 }
 0x73d   :  { %v3810_v6 = vand.u32 31, %v3808_v27  ;;  %v12375_v10 = vshrl.u32 %v3808_v27, 5  ;;  %v12378_v7 = vand.u32 65535, %v12363_v58  ;;  %v12381_v2 = vshrl.u32 %v12363_v58, 16 }
 0x73e   :  { %v5010_v34 = vmul.f32 -0.001358992, %v5009_v5  ;;  %v5017_v36 = vmul.f32 -0.00019511016, %v5009_v5  ;;  %v3276_v23 = vshrl.u32 %v3275_v51, 30  ;;  %v5350_v30 = vshrl.u32 %v5349_v4, 23 }
 0x73f   :  { %v3811_v16 = vsub.s32 32, %v3810_v6  ;;  %v3813_v22 = vshll.u32 %v15517_v46, %v3810_v6  ;;  %vm5028_vm5 = vcmp.eq.s32.totalorder %v12366_v37, 0  ;;  %vm5031_vm0 = vcmp.eq.s32.totalorder %v12366_v37, 2 }
 0x740   :  { %v5011_v62 = vadd.f32 0.041655596, %v5010_v34  ;;  %v5018_v39 = vadd.f32 0.008332121, %v5017_v36  ;;  %v3277_v43 = vshll.u32 %v3276_v23, 30  ;;  %v3816_v25 = vshll.u32 %v15511_v59, %v3810_v6 }
 0x741   :  { %v3814_v42 = vshrl.u32 %v15511_v59, %v3811_v16  ;;  %v3817_v50 = vshrl.u32 %v15512_v53, %v3811_v16  ;;  %v3820_v56 = vshrl.u32 %v15513_v0, %v3811_v16  ;;  %vm5027_vm3 = vcmp.lt.s32.totalorder %v12366_v37, 2 }
 0x742   :  { %v5012_v1 = vmul.f32 %v5011_v62, %v5009_v5  ;;  %v5019_v41 = vmul.f32 %v5018_v39, %v5009_v5  ;;  %v12383_v11 = vsub.s32 %v3274_v9, %v3277_v43  ;;  %vm5024_vm14 = vweird.f32 %v12106_v20 }
 0x743   :  { %v3300_v12 = vsub.s32 4, %v3276_v23  ;;  %v3819_v31 = vshll.u32 %v15512_v53, %v3810_v6  ;;  %v3822_v3 = vshll.u32 %v15513_v0, %v3810_v6  ;;  %v3823_v61 = vshrl.u32 %v15514_v29, %v3811_v16 }
 0x744   :  { %v5013_v35 = vadd.f32 -0.4999988, %v5012_v1  ;;  %v5020_v17 = vadd.f32 -0.16666654, %v5019_v41  ;;  %vm3279_vm11 = vcmp.lt.s32.totalorder %v12383_v11, 0  ;;  %v3280_v63 = vsub.s32 0, %v12383_v11 }
 0x745   :  { %v3826_v26 = vshrl.u32 %v15515_v47, %v3811_v16  ;;  %vm12403_vm1 = vcmp.le.f32.partialorder %v3176_v38, 0.7853982  ;;  %v3815_v15 = vor.u32 %v3814_v42, %v3813_v22  ;;  %v3818_v13 = vor.u32 %v3817_v50, %v3816_v25 }
 0x746   :  { %v5014_v57 = vmul.f32 %v5013_v35, %v5009_v5  ;;  %v5021_v8 = vmul.f32 %v5020_v17, %v5009_v5  ;;  %v3281_v24 = vsel %vm3279_vm11, %v3280_v63, %v12383_v11  ;;  %v3824_v5 = vor.u32 %v3823_v61, %v3822_v3 }
 0x747   :  { %v3282_v40 = vclz %v3281_v24  ;;  %v3821_v27 = vor.u32 %v3820_v56, %v3819_v31  ;;  %v3825_v34 = vshll.u32 %v15514_v29, %v3810_v6  ;;  %v3812_v51 = vshrl.u32 %v15517_v46, %v3811_v16 }
 0x748   :  { %v5015_v52 = vadd.f32 1.0, %v5014_v57  ;;  %v5022_v18 = vadd.f32 1.0, %v5021_v8  ;;  %vm3828_vm2 = vcmp.lt.s32.totalorder %v12375_v10, 1  ;;  %v7303_v4 = vadd.s32 4294967169, %v5350_v30 }
 0x749   :  { %v7262_v36 = vadd.s32 4294967294, %v3282_v40  ;;  %v3301_v38 = vsel %vm3178_vm12, %v3300_v12, %v3276_v23  ;;  %v3827_v39 = vor.u32 %v3826_v26, %v3825_v34  ;;  %vm3831_vm4 = vcmp.lt.s32.totalorder %v12375_v10, 4 }
 0x74a   :  { %v5023_v9 = vmul.f32 %v5022_v18, %v5007_v19  ;;  %v5032_v45 = vxor.u32 2147483648, %v5015_v52  ;;  %vm3830_vm7 = vcmp.lt.s32.totalorder %v12375_v10, 3  ;;  %v3836_v19 = vsel %vm3828_vm2, %v3815_v15, %v3818_v13 }
 0x74b   :  { %vm7263_vm13 = vcmp.lt.s32.totalorder %v7262_v36, 0  ;;  %v3837_v6 = vsel %vm3831_vm4, %v3824_v5, 920167782  ;;  %vm3829_vm8 = vcmp.lt.s32.totalorder %v12375_v10, 2  ;;  %v3840_v25 = vsel %vm3828_vm2, %v3818_v13, %v3821_v27 }
 0x74c   :  { %v5029_v62 = vxor.u32 2147483648, %v5023_v9  ;;  %v5033_v1 = vsel %vm5031_vm0, %v5032_v45, %v5023_v9  ;;  %v3285_v41 = vsel %vm7263_vm13, 0, %v7262_v36  ;;  %v3838_v23 = vsel %vm3830_vm7, %v3821_v27, %v3837_v6 }
 0x74d   :  { %v3286_v30 = vsub.s32 32, %v3285_v41  ;;  %v3290_v35 = vsub.s32 4294967266, %v3285_v41  ;;  %v3287_v22 = vshll.u32 %v12383_v11, %v3285_v41  ;;  %v3839_v42 = vsel %vm3829_vm8, %v3836_v19, %v3838_v23 }
 0x74e   :  { %v5030_v16 = vsel %vm5028_vm5, %v5015_v52, %v5029_v62  ;;  %v3841_v20 = vsel %vm3831_vm4, %v3827_v39, 1326507024  ;;  %v3869_v56 = vand.u32 65535, %v3839_v42  ;;  %v3303_v11 = vsel %vm12403_vm1, 0, %v3301_v38 }
 0x74f   :  { %v5034_v43 = vsel %vm5027_vm3, %v5030_v16, %v5033_v1  ;;  %v3288_v37 = vshrl.u32 %v12368_v44, %v3286_v30  ;;  %v3291_v50 = vadd.s32 127, %v3290_v35  ;;  %v3833_v57 = vsel %vm3831_vm4, %v3821_v27, 2102212464 }
 0x750   :  { %v5035_v17 = vsel %vm5024_vm14, nan, %v5034_v43  ;;  %v3842_v8 = vsel %vm3830_vm7, %v3824_v5, %v3841_v20  ;;  %v3870_v63 = vshrl.u32 %v3839_v42, 16  ;;  %v5356_v3 = vadd.s32 1, %v7303_v4 }
 0x751   :  { %7224 = vst.msk [vmem:[%s14704_s3 + $0x88] sm:$0xff] %vm7206_vm6, %v5035_v17  ;;  %v3289_v12 = vor.u32 %v3288_v37, %v3287_v22  ;;  %v3292_v31 = vshll.u32 %v3291_v50, 23  ;;  %v3843_v44 = vsel %vm3829_vm8, %v3840_v25, %v3842_v8  ;;  %v3873_v24 = vmul.u32 %v3869_v56, %v12381_v2 }
 0x752   :  { %v3847_v61 = vand.u32 65535, %v3843_v44  ;;  %v3848_v52 = vshrl.u32 %v3843_v44, 16  ;;  %v3872_v18 = vmul.u32 %v3870_v63, %v12378_v7  ;;  %v3320_v40 = vadd.s32 3, %v3303_v11 }
 0x753   :  { %v3293_v26 = vor.u32 4788187, %v3292_v31  ;;  %v3832_v9 = vsel %vm3828_vm2, %v3812_v51, %v3815_v15  ;;  %v3834_v5 = vsel %vm3830_vm7, %v3818_v13, %v3833_v57  ;;  %v3296_v45 = vcvt.s32.f32 %v3289_v12 }
 0x754   :  { %v3850_v27 = vmul.u32 %v3848_v52, %v12378_v7  ;;  %v3851_v34 = vmul.u32 %v3847_v61, %v12381_v2  ;;  %v3871_v36 = vmul.u32 %v3869_v56, %v12378_v7  ;;  %v3874_v62 = vmul.u32 %v3870_v63, %v12381_v2 }
 0x755   :  { %v3294_v4 = vand.u32 2147483647, %v3293_v26  ;;  %v3875_v38 = vshll.u32 %v3872_v18, 16  ;;  %vm5357_vm9 = vcmp.gt.s32.totalorder %v5356_v3, 0  ;;  %v3849_v39 = vmul.u32 %v3847_v61, %v12378_v7 }
 0x756   :  { %v3852_v19 = vmul.u32 %v3848_v52, %v12381_v2  ;;  %v3853_v15 = vshll.u32 %v3850_v27, 16  ;;  %v3877_v51 = vshll.u32 %v3873_v24, 16  ;;  %v3855_v13 = vshll.u32 %v3851_v34, 16 }
 0x757   :  { %v3297_v6 = vmul.f32 %v3296_v45, %v3294_v4  ;;  %vm3879_vm10 = vc.u32 %v3871_v36, %v3875_v38  ;;  %v3881_v16 = vadd.s32 %v3875_v38, %v3871_v36  ;;  %v5358_v23 = vsel %vm5357_vm9, %v5356_v3, 0 }
 0x758   :  { %vm3857_vm5 = vc.u32 %v3849_v39, %v3853_v15  ;;  %v3859_v1 = vadd.s32 %v3853_v15, %v3849_v39  ;;  %v3880_v41 = vsel %vm3879_vm10, 1, %v15516_v33  ;;  %v3835_v7 = vsel %vm3829_vm8, %v3832_v9, %v3834_v5 }
 0x759   :  { %v3298_v43 = vxor.u32 2147483648, %v3297_v6  ;;  %v3858_v30 = vsel %vm3857_vm5, 1, %v15516_v33  ;;  %v3882_v35 = vadd.s32 %v3880_v41, %v3874_v62  ;;  %vm3883_vm0 = vc.u32 %v3881_v16, %v3877_v51 }
 0x75a   :  { %v3860_v2 = vadd.s32 %v3858_v30, %v3852_v19  ;;  %vm3861_vm3 = vc.u32 %v3859_v1, %v3855_v13  ;;  %v3884_v17 = vsel %vm3883_vm0, 1, %v15516_v33  ;;  %v3876_v25 = vshrl.u32 %v3872_v18, 16 }
 0x75b   :  { %v3299_v22 = vsel %vm3178_vm12, %v3298_v43, %v3297_v6  ;;  %v3862_v42 = vsel %vm3861_vm3, 1, %v15516_v33  ;;  %v3886_v37 = vadd.s32 %v3884_v17, %v3882_v35  ;;  %v3854_v20 = vshrl.u32 %v3850_v27, 16 }
 0x75c   :  { %v3302_v50 = vsel %vm12403_vm1, %v12122_v48, %v3299_v22  ;;  %v3864_v56 = vadd.s32 %v3862_v42, %v3860_v2  ;;  %v5360_v11 = vand.u32 31, %v5358_v23  ;;  %v3878_v57 = vshrl.u32 %v3873_v24, 16 }
 0x75d   :  { %v3304_v10 = vmul.f32 %v3302_v50, %v3302_v50  ;;  %v3887_v8 = vadd.s32 %v3886_v37, %v3876_v25  ;;  %v5354_v63 = vor.u32 8388608, %v12372_v55  ;;  %v12473_v12 = vand.u32 3, %v3320_v40 }
 0x75e   :  { %v3856_v31 = vshrl.u32 %v3851_v34, 16  ;;  %v3865_v44 = vadd.s32 %v3864_v56, %v3854_v20  ;;  %v12475_v3 = vsub.s32 32, %v5360_v11  ;;  %v3889_v28 = vmul.u32 %v12363_v58, %v3835_v7 }
 0x75f   :  { %v3305_v61 = vmul.f32 -0.001358992, %v3304_v10  ;;  %v3312_v52 = vmul.f32 -0.00019511016, %v3304_v10  ;;  %v3888_v18 = vadd.s32 %v3887_v8, %v3878_v57  ;;  %v12480_v9 = vadd.s32 %v3881_v16, %v3877_v51 }
 0x760   :  { %v12478_v26 = vadd.s32 %v3865_v44, %v3856_v31  ;;  %v12482_v5 = vshrl.u32 %v5358_v23, 5  ;;  %v5364_v55 = vshrl.u32 %v15511_v59, %v12475_v3  ;;  %v5363_v27 = vshll.u32 %v15517_v46, %v5360_v11 }
 0x761   :  { %v3306_v24 = vadd.f32 0.041655596, %v3305_v61  ;;  %v3313_v40 = vadd.f32 0.008332121, %v3312_v52  ;;  %v3892_v45 = vadd.s32 1, %v3888_v18  ;;  %v5366_v34 = vshll.u32 %v15511_v59, %v5360_v11 }
 0x762   :  { %vm3891_vm12 = vc.u32 %v12478_v26, %v12480_v9  ;;  %v5367_v58 = vshrl.u32 %v15512_v53, %v12475_v3  ;;  %v5370_v36 = vshrl.u32 %v15513_v0, %v12475_v3  ;;  %v5369_v39 = vshll.u32 %v15512_v53, %v5360_v11 }
 0x763   :  { %v3307_v4 = vmul.f32 %v3306_v24, %v3304_v10  ;;  %v3314_v62 = vmul.f32 %v3313_v40, %v3304_v10  ;;  %v3893_v38 = vsel %vm3891_vm12, %v3892_v45, %v3888_v18  ;;  %v12495_v15 = vor.u32 %v5364_v55, %v5363_v27 }
 0x764   :  { %v3894_v19 = vadd.s32 %v3893_v38, %v3889_v28  ;;  %v5372_v51 = vshll.u32 %v15513_v0, %v5360_v11  ;;  %v5373_v6 = vshrl.u32 %v15514_v29, %v12475_v3  ;;  %v5375_v1 = vshll.u32 %v15514_v29, %v5360_v11 }
 0x765   :  { %v3308_v13 = vadd.f32 -0.4999988, %v3307_v4  ;;  %v3315_v16 = vadd.f32 -0.16666654, %v3314_v62  ;;  %v5376_v41 = vshrl.u32 %v15515_v47, %v12475_v3  ;;  %v12503_v43 = vor.u32 %v5367_v58, %v5366_v34 }
 0x766   :  { %v3895_v23 = vadd.s32 536870912, %v3894_v19  ;;  %v5371_v30 = vor.u32 %v5370_v36, %v5369_v39  ;;  %v5374_v35 = vor.u32 %v5373_v6, %v5372_v51  ;;  %vm5381_vm11 = vcmp.lt.s32.totalorder %v12482_v5, 4 }
 0x767   :  { %v3309_v7 = vmul.f32 %v3308_v13, %v3304_v10  ;;  %v3316_v2 = vmul.f32 %v3315_v16, %v3304_v10  ;;  %v5377_v17 = vor.u32 %v5376_v41, %v5375_v1  ;;  %vm3319_vm14 = vweird.f32 %v12122_v48 }
 0x768   :  { %v12507_v22 = vshrl.u32 %v3895_v23, 30  ;;  %v5387_v42 = vsel %vm5381_vm11, %v5374_v35, 920167782  ;;  %v12511_v25 = vshll.u32 %v5354_v63, 8  ;;  %vm5378_vm1 = vcmp.lt.s32.totalorder %v12482_v5, 1 }
 0x769   :  { %v3310_v37 = vadd.f32 1.0, %v3309_v7  ;;  %v3317_v20 = vadd.f32 1.0, %v3316_v2  ;;  %vm5380_vm2 = vcmp.lt.s32.totalorder %v12482_v5, 3  ;;  %v5386_v11 = vsel %vm5378_vm1, %v12495_v15, %v12503_v43 }
 0x76a   :  { %v3897_v56 = vshll.u32 %v12507_v22, 30  ;;  %v5388_v10 = vsel %vm5380_vm2, %v5371_v30, %v5387_v42  ;;  %v5390_v57 = vsel %vm5378_vm1, %v12503_v43, %v5371_v30  ;;  %vm3322_vm4 = vcmp.lt.s32.totalorder %v12473_v12, 2 }
 0x76b   :  { %v3318_v8 = vmul.f32 %v3317_v20, %v3302_v50  ;;  %v3327_v63 = vxor.u32 2147483648, %v3310_v37  ;;  %v5391_v31 = vsel %vm5381_vm11, %v5377_v17, 1326507024  ;;  %vm3323_vm13 = vcmp.eq.s32.totalorder %v12473_v12, 0 }
 0x76c   :  { %v3898_v44 = vsub.s32 %v3894_v19, %v3897_v56  ;;  %vm5379_vm7 = vcmp.lt.s32.totalorder %v12482_v5, 2  ;;  %v5392_v61 = vsel %vm5380_vm2, %v5374_v35, %v5391_v31  ;;  %vm3326_vm8 = vcmp.eq.s32.totalorder %v12473_v12, 2 }
 0x76d   :  { %v3324_v52 = vxor.u32 2147483648, %v3318_v8  ;;  %v5389_v50 = vsel %vm5379_vm7, %v5386_v11, %v5388_v10  ;;  %v5393_v18 = vsel %vm5379_vm7, %v5390_v57, %v5392_v61  ;;  %v5395_v55 = vand.u32 65535, %v12511_v25  ;;  %v2064_v10 = vpop.permute.xlu0 %2063 }
 0x76e   :  { %vm3899_vm9 = vcmp.lt.s32.totalorder %v3898_v44, 0  ;;  %v3900_v28 = vsub.s32 0, %v3898_v44  ;;  %v5397_v24 = vand.u32 65535, %v5393_v18  ;;  %v3328_v45 = vsel %vm3326_vm8, %v3327_v63, %v3318_v8 }
 0x76f   :  { %v3325_v40 = vsel %vm3323_vm13, %v3310_v37, %v3324_v52  ;;  %v5396_v27 = vshrl.u32 %v12511_v25, 16  ;;  %v5398_v34 = vshrl.u32 %v5393_v18, 16  ;;  %v5419_v4 = vand.u32 65535, %v5389_v50 }
 0x770   :  { %v3329_v58 = vsel %vm3322_vm4, %v3325_v40, %v3328_v45  ;;  %v3901_v36 = vsel %vm3899_vm9, %v3900_v28, %v3898_v44  ;;  %v5420_v62 = vshrl.u32 %v5389_v50, 16  ;;  %v5362_v6 = vshrl.u32 %v15517_v46, %v12475_v3  ;;  %v2072_v28 = vpop.permute.xlu1 %2071 }
 0x771   :  { %v3330_v38 = vsel %vm3319_vm14, nan, %v3329_v58  ;;  %v3902_v39 = vclz %v3901_v36  ;;  %v5400_v19 = vmul.u32 %v5398_v34, %v5395_v55  ;;  %v5401_v51 = vmul.u32 %v5397_v24, %v5396_v27 }
 0x772   :  { %7213 = vst.msk [vmem:[%s14704_s3 + $0x30] sm:$0xff] %vm7206_vm6, %v3330_v38  ;;  %v3890_v12 = vadd.s32 %v12480_v9, %v12478_v26  ;;  %v5399_v16 = vmul.u32 %v5397_v24, %v5395_v55  ;;  %v5383_v48 = vsel %vm5381_vm11, %v5371_v30, 2102212464  ;;  %v5402_v41 = vmul.u32 %v5398_v34, %v5396_v27  ;;  %v15545_v38 = vld [vmem:[#allocation16_spill] sm:$0xff] }
 0x773   :  { %v7274_v13 = vadd.s32 4294967294, %v3902_v39  ;;  %v5403_v1 = vshll.u32 %v5400_v19, 16  ;;  %v5405_v23 = vshll.u32 %v5401_v51, 16  ;;  %v5422_v35 = vmul.u32 %v5420_v62, %v5395_v55 }
 0x774   :  { %v5421_v2 = vmul.u32 %v5419_v4, %v5395_v55  ;;  %vm3798_vm0 = vcmp.lt.s32.totalorder %v12337_v54, 0  ;;  %v5423_v42 = vmul.u32 %v5419_v4, %v5396_v27  ;;  %v5404_v20 = vshrl.u32 %v5400_v19, 16 }
 0x775   :  { %vm7275_vm10 = vcmp.lt.s32.totalorder %v7274_v13, 0  ;;  %vm5407_vm5 = vc.u32 %v5399_v16, %v5403_v1  ;;  %v5409_v7 = vadd.s32 %v5403_v1, %v5399_v16  ;;  %v5425_v26 = vshll.u32 %v5422_v35, 16 }
 0x776   :  { %v3905_v17 = vsel %vm7275_vm10, 0, %v7274_v13  ;;  %v5408_v3 = vsel %vm5407_vm5, 1, %v15516_v33  ;;  %v5424_v30 = vmul.u32 %v5420_v62, %v5396_v27  ;;  %v5427_v52 = vshll.u32 %v5423_v42, 16 }
 0x777   :  { %v3906_v9 = vsub.s32 32, %v3905_v17  ;;  %v3910_v37 = vsub.s32 4294967266, %v3905_v17  ;;  %v5410_v56 = vadd.s32 %v5408_v3, %v5402_v41  ;;  %v3907_v11 = vshll.u32 %v3898_v44, %v3905_v17  ;;  %v15544_v44 = vld [vmem:[#allocation159_spill] sm:$0xff] }
 0x778   :  { %vm5411_vm3 = vc.u32 %v5409_v7, %v5405_v23  ;;  %vm5429_vm12 = vc.u32 %v5421_v2, %v5425_v26  ;;  %v5431_v50 = vadd.s32 %v5425_v26, %v5421_v2  ;;  %v3920_v40 = vsub.s32 4, %v12507_v22 }
 0x779   :  { %v3908_v57 = vshrl.u32 %v3890_v12, %v3906_v9  ;;  %v3911_v8 = vadd.s32 127, %v3910_v37  ;;  %v5412_v63 = vsel %vm5411_vm3, 1, %v15516_v33  ;;  %v5430_v31 = vsel %vm5429_vm12, 1, %v15516_v33 }
 0x77a   :  { %v5414_v61 = vadd.s32 %v5412_v63, %v5410_v56  ;;  %v5432_v18 = vadd.s32 %v5430_v31, %v5424_v30  ;;  %v2151_v45 = vsel %vm2141_vm15, %v15544_v44, %v2064_v10  ;;  %v5382_v27 = vsel %vm5378_vm1, %v5362_v6, %v12495_v15 }
 0x77b   :  { %v3909_v55 = vor.u32 %v3908_v57, %v3907_v11  ;;  %v3912_v24 = vshll.u32 %v3911_v8, 23  ;;  %vm5433_vm11 = vc.u32 %v5431_v50, %v5427_v52  ;;  %v2187_v58 = vmul.f32 %v12327_v49, %v2151_v45 }
 0x77c   :  { %v5415_v34 = vadd.s32 %v5414_v61, %v5404_v20  ;;  %v5406_v4 = vshrl.u32 %v5401_v51, 16  ;;  %v5434_v62 = vsel %vm5433_vm11, 1, %v15516_v33  ;;  %v2155_v39 = vsel %vm2141_vm15, %v15545_v38, %v2072_v28 }
 0x77d   :  { %v3913_v36 = vor.u32 4788187, %v3912_v24  ;;  %v5384_v19 = vsel %vm5380_vm2, %v12503_v43, %v5383_v48  ;;  %v5426_v12 = vshrl.u32 %v5422_v35, 16  ;;  %v5436_v13 = vadd.s32 %v5434_v62, %v5432_v18 }
 0x77e   :  { %v12571_v16 = vadd.f32 %v12334_v14, %v2187_v58  ;;  %v3916_v6 = vcvt.s32.f32 %v3909_v55  ;;  %v3921_v51 = vsel %vm3798_vm0, %v3920_v40, %v12507_v22  ;;  %v5416_v1 = vadd.s32 %v5415_v34, %v5406_v4 }
 0x77f   :  { %v3914_v15 = vand.u32 2147483647, %v3913_v36  ;;  %v5428_v41 = vshrl.u32 %v5423_v42, 16  ;;  %v5437_v23 = vadd.s32 %v5436_v13, %v5426_v12  ;;  %v2191_v2 = vmul.f32 %v12327_v49, %v2155_v39 }
 0x780   :  { %v3641_v7 = vand.u32 2147483647, %v12571_v16  ;;  %vm12580_vm14 = vcmp.le.f32.partialorder %v3796_v32, 0.7853982  ;;  %v5435_v35 = vadd.s32 %v5431_v50, %v5427_v52  ;;  %v3644_v17 = vand.u32 2139095040, %v12571_v16 }
 0x781   :  { %v3917_v48 = vmul.f32 %v3916_v6, %v3914_v15  ;;  %v3923_v22 = vsel %vm12580_vm14, 0, %v3921_v51  ;;  %v5385_v3 = vsel %vm5379_vm7, %v5382_v27, %v5384_v19  ;;  %v5438_v42 = vadd.s32 %v5437_v23, %v5428_v41 }
 0x782   :  { %vm5441_vm1 = vc.u32 %v5416_v1, %v5435_v35  ;;  %v3645_v49 = vshrl.u32 %v3644_v17, 23  ;;  %v3648_v32 = vand.u32 8388607, %v3641_v7  ;;  %v12592_v37 = vadd.f32 %v12334_v14, %v2191_v2 }
 0x783   :  { %v3918_v26 = vxor.u32 2147483648, %v3917_v48  ;;  %v5442_v9 = vadd.s32 1, %v5438_v42  ;;  %v5439_v56 = vmul.u32 %v12511_v25, %v5385_v3  ;;  %v3940_v30 = vadd.s32 3, %v3923_v22 }
 0x784   :  { %v7270_v11 = vadd.s32 4294967169, %v3645_v49  ;;  %v3649_v63 = vor.u32 8388608, %v3648_v32  ;;  %v4264_v61 = vand.u32 2139095040, %v12592_v37  ;;  %vm5348_vm4 = vcmp.lt.s32.totalorder %v12358_v21, 0 }
 0x785   :  { %v3919_v20 = vsel %vm3798_vm0, %v3918_v26, %v3917_v48  ;;  %v5443_v10 = vsel %vm5441_vm1, %v5442_v9, %v5438_v42  ;;  %v12601_v18 = vand.u32 3, %v3940_v30  ;;  %v5440_v36 = vadd.s32 %v5435_v35, %v5416_v1 }
 0x786   :  { %v3922_v5 = vsel %vm12580_vm14, %v12337_v54, %v3919_v20  ;;  %v5444_v8 = vadd.s32 %v5443_v10, %v5439_v56  ;;  %v3651_v31 = vadd.s32 1, %v7270_v11  ;;  %v12603_v40 = vshll.u32 %v3649_v63, 8 }
 0x787   :  { %v3924_v57 = vmul.f32 %v3922_v5, %v3922_v5  ;;  %v4265_v45 = vshrl.u32 %v4264_v61, 23  ;;  %vm3946_vm13 = vcmp.eq.s32.totalorder %v12601_v18, 2  ;;  %v4261_v62 = vand.u32 2147483647, %v12592_v37 }
 0x788   :  { %v5445_v50 = vadd.s32 536870912, %v5444_v8  ;;  %vm3652_vm2 = vcmp.gt.s32.totalorder %v3651_v31, 0  ;;  %v12611_v12 = vand.u32 65535, %v12603_v40  ;;  %vm3943_vm7 = vcmp.eq.s32.totalorder %v12601_v18, 0 }
 0x789   :  { %v3925_v14 = vmul.f32 -0.001358992, %v3924_v57  ;;  %v3932_v52 = vmul.f32 -0.00019511016, %v3924_v57  ;;  %v3653_v25 = vsel %vm3652_vm2, %v3651_v31, 0  ;;  %v12617_v51 = vadd.s32 4294967169, %v4265_v45 }
 0x78a   :  { %v5446_v24 = vshrl.u32 %v5445_v50, 30  ;;  %v3655_v44 = vand.u32 31, %v3653_v25  ;;  %v12614_v15 = vshrl.u32 %v3653_v25, 5  ;;  %vm3942_vm8 = vcmp.lt.s32.totalorder %v12601_v18, 2 }
 0x78b   :  { %v3926_v28 = vadd.f32 0.041655596, %v3925_v14  ;;  %v3933_v55 = vadd.f32 0.008332121, %v3932_v52  ;;  %vm3939_vm10 = vweird.f32 %v12337_v54  ;;  %vm12642_vm5 = vcmp.le.f32.partialorder %v5346_v60, 0.7853982 }
 0x78c   :  { %v5447_v58 = vshll.u32 %v5446_v24, 30  ;;  %v3656_v4 = vsub.s32 32, %v3655_v44  ;;  %v5470_v13 = vsub.s32 4, %v5446_v24  ;;  %v3658_v6 = vshll.u32 %v15517_v46, %v3655_v44 }
 0x78d   :  { %v3927_v27 = vmul.f32 %v3926_v28, %v3924_v57  ;;  %v3934_v34 = vmul.f32 %v3933_v55, %v3924_v57  ;;  %v3661_v43 = vshll.u32 %v15511_v59, %v3655_v44  ;;  %v3664_v35 = vshll.u32 %v15512_v53, %v3655_v44 }
 0x78e   :  { %v12608_v19 = vsub.s32 %v5444_v8, %v5447_v58  ;;  %v3659_v2 = vshrl.u32 %v15511_v59, %v3656_v4  ;;  %v3662_v48 = vshrl.u32 %v15512_v53, %v3656_v4  ;;  %v3665_v42 = vshrl.u32 %v15513_v0, %v3656_v4 }
 0x78f   :  { %v3928_v38 = vadd.f32 -0.4999988, %v3927_v27  ;;  %v3935_v39 = vadd.f32 -0.16666654, %v3934_v34  ;;  %v12631_v49 = vsel %vm5348_vm4, %v5470_v13, %v5446_v24  ;;  %v3657_v32 = vshrl.u32 %v15517_v46, %v3656_v4 }
 0x790   :  { %vm5449_vm9 = vcmp.lt.s32.totalorder %v12608_v19, 0  ;;  %v5450_v23 = vsub.s32 0, %v12608_v19  ;;  %v3668_v9 = vshrl.u32 %v15514_v29, %v3656_v4  ;;  %v3667_v11 = vshll.u32 %v15513_v0, %v3655_v44 }
 0x791   :  { %v3929_v1 = vmul.f32 %v3928_v38, %v3924_v57  ;;  %v3936_v41 = vmul.f32 %v3935_v39, %v3924_v57  ;;  %v3671_v30 = vshrl.u32 %v15515_v47, %v3656_v4  ;;  %v3660_v57 = vor.u32 %v3659_v2, %v3658_v6 }
 0x792   :  { %v5451_v3 = vsel %vm5449_vm9, %v5450_v23, %v12608_v19  ;;  %v3663_v8 = vor.u32 %v3662_v48, %v3661_v43  ;;  %v3670_v63 = vshll.u32 %v15514_v29, %v3655_v44  ;;  %v3666_v14 = vor.u32 %v3665_v42, %v3664_v35 }
 0x793   :  { %v3930_v17 = vadd.f32 1.0, %v3929_v1  ;;  %v3937_v22 = vadd.f32 1.0, %v3936_v41  ;;  %v5452_v26 = vclz %v5451_v3  ;;  %v3669_v52 = vor.u32 %v3668_v9, %v3667_v11 }
 0x794   :  { %v3672_v50 = vor.u32 %v3671_v30, %v3670_v63  ;;  %vm3673_vm3 = vcmp.lt.s32.totalorder %v12614_v15, 1  ;;  %vm3674_vm12 = vcmp.lt.s32.totalorder %v12614_v15, 2  ;;  %vm3675_vm11 = vcmp.lt.s32.totalorder %v12614_v15, 3 }
 0x795   :  { %v3938_v20 = vmul.f32 %v3937_v22, %v3922_v5  ;;  %v3947_v56 = vxor.u32 2147483648, %v3930_v17  ;;  %v7304_v10 = vadd.s32 4294967294, %v5452_v26  ;;  %vm3676_vm14 = vcmp.lt.s32.totalorder %v12614_v15, 4 }
 0x796   :  { %v3677_v44 = vsel %vm3673_vm3, %v3657_v32, %v3660_v57  ;;  %v3678_v27 = vsel %vm3676_vm14, %v3666_v14, 2102212464  ;;  %v3681_v34 = vsel %vm3673_vm3, %v3660_v57, %v3663_v8  ;;  %v3682_v58 = vsel %vm3676_vm14, %v3669_v52, 920167782 }
 0x797   :  { %v3944_v31 = vxor.u32 2147483648, %v3938_v20  ;;  %v3948_v61 = vsel %vm3946_vm13, %v3947_v56, %v3938_v20  ;;  %vm7305_vm0 = vcmp.lt.s32.totalorder %v7304_v10, 0  ;;  %v3683_v54 = vsel %vm3675_vm11, %v3666_v14, %v3682_v58 }
 0x798   :  { %v5455_v28 = vsel %vm7305_vm0, 0, %v7304_v10  ;;  %v3679_v39 = vsel %vm3675_vm11, %v3663_v8, %v3678_v27  ;;  %v3684_v13 = vsel %vm3674_vm12, %v3681_v34, %v3683_v54  ;;  %v3685_v6 = vsel %vm3673_vm3, %v3663_v8, %v3666_v14 }
 0x799   :  { %v3945_v25 = vsel %vm3943_vm7, %v3930_v17, %v3944_v31  ;;  %v5456_v55 = vsub.s32 32, %v5455_v28  ;;  %v5460_v24 = vsub.s32 4294967266, %v5455_v28  ;;  %v5457_v18 = vshll.u32 %v12608_v19, %v5455_v28 }
 0x79a   :  { %v3949_v60 = vsel %vm3942_vm8, %v3945_v25, %v3948_v61  ;;  %v3686_v1 = vsel %vm3676_vm14, %v3672_v50, 1326507024  ;;  %v3714_v19 = vand.u32 65535, %v3684_v13  ;;  %v3691_v43 = vshrl.u32 %v12603_v40, 16 }
 0x79b   :  { %v3950_v45 = vsel %vm3939_vm10, nan, %v3949_v60  ;;  %v5458_v4 = vshrl.u32 %v5440_v36, %v5456_v55  ;;  %v5461_v38 = vadd.s32 127, %v5460_v24  ;;  %v3687_v36 = vsel %vm3675_vm11, %v3669_v52, %v3686_v1 }
 0x79c   :  { %7217 = vst.msk [vmem:[%s14704_s3 + $0x50] sm:$0xff] %vm7206_vm6, %v3950_v45  ;;  %v3688_v2 = vsel %vm3674_vm12, %v3685_v6, %v3687_v36  ;;  %v3715_v48 = vshrl.u32 %v3684_v13, 16  ;;  %v4271_v35 = vadd.s32 1, %v12617_v51  ;;  %v12687_v42 = vand.u32 8388607, %v4261_v62 }
 0x79d   :  { %v5459_v41 = vor.u32 %v5458_v4, %v5457_v18  ;;  %v5462_v23 = vshll.u32 %v5461_v38, 23  ;;  %v3692_v22 = vand.u32 65535, %v3688_v2  ;;  %v3693_v3 = vshrl.u32 %v3688_v2, 16 }
 0x79e   :  { %v5473_v26 = vsel %vm12642_vm5, 0, %v12631_v49  ;;  %v12694_v32 = vsel %vm3674_vm12, %v3677_v44, %v3679_v39  ;;  %v3717_v9 = vmul.u32 %v3715_v48, %v12611_v12  ;;  %v3718_v20 = vmul.u32 %v3714_v19, %v3691_v43 }
 0x79f   :  { %v5463_v17 = vor.u32 4788187, %v5462_v23  ;;  %v5466_v51 = vcvt.s32.f32 %v5459_v41  ;;  %v3695_v11 = vmul.u32 %v3693_v3, %v12611_v12  ;;  %v3696_v30 = vmul.u32 %v3692_v22, %v3691_v43 }
 0x7a0   :  { %v3716_v10 = vmul.u32 %v3714_v19, %v12611_v12  ;;  %v3719_v57 = vmul.u32 %v3715_v48, %v3691_v43  ;;  %v3720_v8 = vshll.u32 %v3717_v9, 16  ;;  %vm4272_vm1 = vcmp.gt.s32.totalorder %v4271_v35, 0 }
 0x7a1   :  { %v5464_v56 = vand.u32 2147483647, %v5463_v17  ;;  %v3694_v49 = vmul.u32 %v3692_v22, %v12611_v12  ;;  %v3697_v31 = vmul.u32 %v3693_v3, %v3691_v43  ;;  %v3698_v15 = vshll.u32 %v3695_v11, 16 }
 0x7a2   :  { %v3700_v61 = vshll.u32 %v3696_v30, 16  ;;  %v3722_v14 = vshll.u32 %v3718_v20, 16  ;;  %vm3724_vm2 = vc.u32 %v3716_v10, %v3720_v8  ;;  %v3726_v52 = vadd.s32 %v3720_v8, %v3716_v10 }
 0x7a3   :  { %v5467_v63 = vmul.f32 %v5466_v51, %v5464_v56  ;;  %vm3702_vm13 = vc.u32 %v3694_v49, %v3698_v15  ;;  %v3704_v25 = vadd.s32 %v3698_v15, %v3694_v49  ;;  %v3725_v28 = vsel %vm3724_vm2, 1, %v15516_v33 }
 0x7a4   :  { %v3703_v60 = vsel %vm3702_vm13, 1, %v15516_v33  ;;  %v3721_v55 = vshrl.u32 %v3717_v9, 16  ;;  %v3727_v24 = vadd.s32 %v3725_v28, %v3719_v57  ;;  %vm3728_vm7 = vc.u32 %v3726_v52, %v3722_v14 }
 0x7a5   :  { %v5468_v50 = vxor.u32 2147483648, %v5467_v63  ;;  %v3705_v12 = vadd.s32 %v3703_v60, %v3697_v31  ;;  %vm3706_vm8 = vc.u32 %v3704_v25, %v3700_v61  ;;  %v3729_v45 = vsel %vm3728_vm7, 1, %v15516_v33 }
 0x7a6   :  { %v3707_v34 = vsel %vm3706_vm8, 1, %v15516_v33  ;;  %v3731_v58 = vadd.s32 %v3729_v45, %v3727_v24  ;;  %v4273_v18 = vsel %vm4272_vm1, %v4271_v35, 0  ;;  %v3699_v38 = vshrl.u32 %v3695_v11, 16 }
 0x7a7   :  { %v5469_v44 = vsel %vm5348_vm4, %v5468_v50, %v5467_v63  ;;  %v3709_v54 = vadd.s32 %v3707_v34, %v3705_v12  ;;  %v4275_v39 = vand.u32 31, %v4273_v18  ;;  %v3701_v13 = vshrl.u32 %v3696_v30, 16 }
 0x7a8   :  { %v5472_v27 = vsel %vm12642_vm5, %v12358_v21, %v5469_v44  ;;  %v3723_v6 = vshrl.u32 %v3718_v20, 16  ;;  %v3732_v1 = vadd.s32 %v3731_v58, %v3721_v55  ;;  %v5490_v2 = vadd.s32 3, %v5473_v26 }
 0x7a9   :  { %v5474_v4 = vmul.f32 %v5472_v27, %v5472_v27  ;;  %v3710_v36 = vadd.s32 %v3709_v54, %v3699_v38  ;;  %v12710_v19 = vsub.s32 32, %v4275_v39  ;;  %v3734_v43 = vmul.u32 %v12603_v40, %v12694_v32 }
 0x7aa   :  { %v3733_v5 = vadd.s32 %v3732_v1, %v3723_v6  ;;  %v4269_v48 = vor.u32 8388608, %v12687_v42  ;;  %v12717_v3 = vadd.s32 %v3726_v52, %v3722_v14  ;;  %v12719_v20 = vshrl.u32 %v4273_v18, 5 }
 0x7ab   :  { %v5475_v41 = vmul.f32 -0.001358992, %v5474_v4  ;;  %v5482_v23 = vmul.f32 -0.00019511016, %v5474_v4  ;;  %v12715_v22 = vadd.s32 %v3710_v36, %v3701_v13  ;;  %v4278_v56 = vshll.u32 %v15517_v46, %v4275_v39 }
 0x7ac   :  { %v3737_v9 = vadd.s32 1, %v3733_v5  ;;  %v4279_v26 = vshrl.u32 %v15511_v59, %v12710_v19  ;;  %v4282_v40 = vshrl.u32 %v15512_v53, %v12710_v19  ;;  %v4281_v32 = vshll.u32 %v15511_v59, %v4275_v39 }
 0x7ad   :  { %v5476_v35 = vadd.f32 0.041655596, %v5475_v41  ;;  %v5483_v17 = vadd.f32 0.008332121, %v5482_v23  ;;  %vm3736_vm4 = vc.u32 %v12715_v22, %v12717_v3  ;;  %v4284_v30 = vshll.u32 %v15512_v53, %v4275_v39 }
 0x7ae   :  { %v3738_v42 = vsel %vm3736_vm4, %v3737_v9, %v3733_v5  ;;  %v4285_v10 = vshrl.u32 %v15513_v0, %v12710_v19  ;;  %v4280_v49 = vor.u32 %v4279_v26, %v4278_v56  ;;  %v4287_v31 = vshll.u32 %v15513_v0, %v4275_v39  ;;  %v2092_v56 = vpop.permute.xlu2 %2091 }
 0x7af   :  { %v5477_v51 = vmul.f32 %v5476_v35, %v5474_v4  ;;  %v5484_v11 = vmul.f32 %v5483_v17, %v5474_v4  ;;  %v3739_v63 = vadd.s32 %v3738_v42, %v3734_v43  ;;  %v4288_v15 = vshrl.u32 %v15514_v29, %v12710_v19 }
 0x7b0   :  { %v4290_v61 = vshll.u32 %v15514_v29, %v4275_v39  ;;  %v4291_v14 = vshrl.u32 %v15515_v47, %v12710_v19  ;;  %v12738_v28 = vor.u32 %v4282_v40, %v4281_v32  ;;  %v5491_v60 = vand.u32 3, %v5490_v2 }
 0x7b1   :  { %v5478_v57 = vadd.f32 -0.4999988, %v5477_v51  ;;  %v5485_v8 = vadd.f32 -0.16666654, %v5484_v11  ;;  %v3740_v25 = vadd.s32 536870912, %v3739_v63  ;;  %v4286_v55 = vor.u32 %v4285_v10, %v4284_v30 }
 0x7b2   :  { %v4289_v24 = vor.u32 %v4288_v15, %v4287_v31  ;;  %v4292_v44 = vor.u32 %v4291_v14, %v4290_v61  ;;  %vm4296_vm9 = vcmp.lt.s32.totalorder %v12719_v20, 4  ;;  %vm5489_vm10 = vweird.f32 %v12358_v21 }
 0x7b3   :  { %v5479_v52 = vmul.f32 %v5478_v57, %v5474_v4  ;;  %v5486_v50 = vmul.f32 %v5485_v8, %v5474_v4  ;;  %v12740_v34 = vshrl.u32 %v3740_v25, 30  ;;  %vm4293_vm5 = vcmp.lt.s32.totalorder %v12719_v20, 1  ;;  %v15550_v57 = vld [vmem:[#allocation30_spill] sm:$0xff] }
 0x7b4   :  { %vm4295_vm0 = vcmp.lt.s32.totalorder %v12719_v20, 3  ;;  %v4302_v58 = vsel %vm4296_vm9, %v4289_v24, 920167782  ;;  %v4301_v54 = vsel %vm4293_vm5, %v4280_v49, %v12738_v28  ;;  %vm5492_vm3 = vcmp.lt.s32.totalorder %v5491_v60, 2 }
 0x7b5   :  { %v5480_v12 = vadd.f32 1.0, %v5479_v52  ;;  %v5487_v45 = vadd.f32 1.0, %v5486_v50  ;;  %v3742_v38 = vshll.u32 %v12740_v34, 30  ;;  %v4303_v39 = vsel %vm4295_vm0, %v4286_v55, %v4302_v58 }
 0x7b6   :  { %v4306_v13 = vsel %vm4296_vm9, %v4292_v44, 1326507024  ;;  %v12756_v6 = vshll.u32 %v4269_v48, 8  ;;  %vm4294_vm12 = vcmp.lt.s32.totalorder %v12719_v20, 2  ;;  %vm5493_vm11 = vcmp.eq.s32.totalorder %v5491_v60, 0 }
 0x7b7   :  { %v5488_v18 = vmul.f32 %v5487_v45, %v5472_v27  ;;  %v5497_v4 = vxor.u32 2147483648, %v5480_v12  ;;  %v3743_v41 = vsub.s32 %v3739_v63, %v3742_v38  ;;  %v4305_v27 = vsel %vm4293_vm5, %v12738_v28, %v4286_v55 }
 0x7b8   :  { %vm5496_vm14 = vcmp.eq.s32.totalorder %v5491_v60, 2  ;;  %v4304_v23 = vsel %vm4294_vm12, %v4301_v54, %v4303_v39  ;;  %v4307_v36 = vsel %vm4295_vm0, %v4289_v24, %v4306_v13  ;;  %v4277_v35 = vshrl.u32 %v15517_v46, %v12710_v19 }
 0x7b9   :  { %v5494_v1 = vxor.u32 2147483648, %v5488_v18  ;;  %v5498_v5 = vsel %vm5496_vm14, %v5497_v4, %v5488_v18  ;;  %vm3744_vm1 = vcmp.lt.s32.totalorder %v3743_v41, 0  ;;  %v3745_v43 = vsub.s32 0, %v3743_v41 }
 0x7ba   :  { %v4308_v17 = vsel %vm4294_vm12, %v4305_v27, %v4307_v36  ;;  %v4310_v9 = vand.u32 65535, %v12756_v6  ;;  %v4334_v40 = vand.u32 65535, %v4304_v23  ;;  %v4311_v19 = vshrl.u32 %v12756_v6, 16 }
 0x7bb   :  { %v5495_v2 = vsel %vm5493_vm11, %v5480_v12, %v5494_v1  ;;  %v3746_v51 = vsel %vm3744_vm1, %v3745_v43, %v3743_v41  ;;  %v4312_v11 = vand.u32 65535, %v4308_v17  ;;  %v4313_v32 = vshrl.u32 %v4308_v17, 16 }
 0x7bc   :  { %v5499_v48 = vsel %vm5492_vm3, %v5495_v2, %v5498_v5  ;;  %v3747_v42 = vclz %v3746_v51  ;;  %v4335_v30 = vshrl.u32 %v4304_v23, 16  ;;  %v3735_v10 = vadd.s32 %v12717_v3, %v12715_v22  ;;  %v12795_v23 = vld [vmem:[%s14702_s1] ss:$0 sm:$0xff] }
 0x7bd   :  { %v5500_v26 = vsel %vm5489_vm10, nan, %v5499_v48  ;;  %v2165_v21 = vsel %vm2141_vm15, %v15550_v57, %v2092_v56  ;;  %v12785_v63 = vsel %vm4293_vm5, %v4277_v35, %v4280_v49  ;;  %v4315_v31 = vmul.u32 %v4313_v32, %v4310_v9 }
 0x7be   :  { %7227 = vst.msk [vmem:[%s14704_s3 + $0xa0] sm:$0xff] %vm7206_vm6, %v5500_v26  ;;  %v7271_v8 = vadd.s32 4294967294, %v3747_v42  ;;  %v4316_v15 = vmul.u32 %v4312_v11, %v4311_v19  ;;  %v3765_v61 = vsub.s32 4, %v12740_v34  ;;  %v4298_v14 = vsel %vm4296_vm9, %v4286_v55, 2102212464 }
 0x7bf   :  { %v4337_v52 = vmul.u32 %v4335_v30, %v4310_v9  ;;  %v4338_v50 = vmul.u32 %v4334_v40, %v4311_v19  ;;  %v4314_v25 = vmul.u32 %v4312_v11, %v4310_v9  ;;  %v4318_v22 = vshll.u32 %v4315_v31, 16 }
 0x7c0   :  { %vm7272_vm2 = vcmp.lt.s32.totalorder %v7271_v8, 0  ;;  %v4336_v3 = vmul.u32 %v4334_v40, %v4310_v9  ;;  %v4317_v24 = vmul.u32 %v4313_v32, %v4311_v19  ;;  %v4339_v44 = vmul.u32 %v4335_v30, %v4311_v19  ;;  %v12802_v9 = vld [vmem:[%s14703_s2] ss:$0 sm:$0xff]  ;;  %v15551_v40 = vld [vmem:[#allocation19_spill] sm:$0xff] }
 0x7c1   :  { %v3750_v60 = vsel %vm7272_vm2, 0, %v7271_v8  ;;  %v4340_v12 = vshll.u32 %v4337_v52, 16  ;;  %v4320_v58 = vshll.u32 %v4316_v15, 16  ;;  %vm4322_vm13 = vc.u32 %v4314_v25, %v4318_v22 }
 0x7c2   :  { %v3751_v45 = vsub.s32 32, %v3750_v60  ;;  %v3755_v49 = vsub.s32 4294967266, %v3750_v60  ;;  %v3752_v18 = vshll.u32 %v3743_v41, %v3750_v60  ;;  %v4323_v4 = vsel %vm4322_vm13, 1, %v15516_v33  ;;  %v2070_v41 = vpop.permute.xlu0 %2069 }
 0x7c3   :  { %v4324_v38 = vadd.s32 %v4318_v22, %v4314_v25  ;;  %v4342_v54 = vshll.u32 %v4338_v50, 16  ;;  %v4325_v13 = vadd.s32 %v4323_v4, %v4317_v24  ;;  %vm4344_vm7 = vc.u32 %v4336_v3, %v4340_v12 }
 0x7c4   :  { %v3753_v55 = vshrl.u32 %v3735_v10, %v3751_v45  ;;  %v3756_v39 = vadd.s32 127, %v3755_v49  ;;  %v4345_v1 = vsel %vm4344_vm7, 1, %v15516_v33  ;;  %v4346_v27 = vadd.s32 %v4340_v12, %v4336_v3 }
 0x7c5   :  { %vm4326_vm8 = vc.u32 %v4324_v38, %v4320_v58  ;;  %v2201_v36 = vmul.f32 %v12795_v23, %v2165_v21  ;;  %v4347_v48 = vadd.s32 %v4345_v1, %v4339_v44  ;;  %v4319_v35 = vshrl.u32 %v4315_v31, 16 }
 0x7c6   :  { %v3754_v2 = vor.u32 %v3753_v55, %v3752_v18  ;;  %v3757_v5 = vshll.u32 %v3756_v39, 23  ;;  %v4327_v43 = vsel %vm4326_vm8, 1, %v15516_v33  ;;  %vm4348_vm4 = vc.u32 %v4346_v27, %v4342_v54 }
 0x7c7   :  { %v4329_v17 = vadd.s32 %v4327_v43, %v4325_v13  ;;  %v12805_v56 = vadd.f32 %v12802_v9, %v2201_v36  ;;  %v4321_v51 = vshrl.u32 %v4316_v15, 16  ;;  %v4349_v11 = vsel %vm4348_vm4, 1, %v15516_v33 }
 0x7c8   :  { %v3758_v26 = vor.u32 4788187, %v3757_v5  ;;  %v2154_v42 = vsel %vm2141_vm15, %v15551_v40, %v2070_v41  ;;  %v4341_v32 = vshrl.u32 %v4337_v52, 16  ;;  %v4351_v30 = vadd.s32 %v4349_v11, %v4347_v48 }
 0x7c9   :  { %v4330_v19 = vadd.s32 %v4329_v17, %v4319_v35  ;;  %v5811_v10 = vand.u32 2147483647, %v12805_v56  ;;  %v3761_v21 = vcvt.s32.f32 %v3754_v2  ;;  %v4299_v8 = vsel %vm4295_vm0, %v12738_v28, %v4298_v14 }
 0x7ca   :  { %v3759_v57 = vand.u32 2147483647, %v3758_v26  ;;  %v5814_v31 = vand.u32 2139095040, %v12805_v56  ;;  %v4343_v15 = vshrl.u32 %v4338_v50, 16  ;;  %v4352_v22 = vadd.s32 %v4351_v30, %v4341_v32 }
 0x7cb   :  { %v4331_v25 = vadd.s32 %v4330_v19, %v4321_v51  ;;  %v2190_v3 = vmul.f32 %v12795_v23, %v2154_v42  ;;  %vm3643_vm9 = vcmp.lt.s32.totalorder %v12571_v16, 0  ;;  %v4350_v52 = vadd.s32 %v4346_v27, %v4342_v54 }
 0x7cc   :  { %v3762_v60 = vmul.f32 %v3761_v21, %v3759_v57  ;;  %v5815_v24 = vshrl.u32 %v5814_v31, 23  ;;  %v3766_v44 = vsel %vm3643_vm9, %v3765_v61, %v12740_v34  ;;  %v4300_v12 = vsel %vm4294_vm12, %v12785_v63, %v4299_v8 }
 0x7cd   :  { %v4353_v45 = vadd.s32 %v4352_v22, %v4343_v15  ;;  %v5818_v28 = vand.u32 8388607, %v5811_v10  ;;  %vm4356_vm10 = vc.u32 %v4331_v25, %v4350_v52  ;;  %vm3642_vm5 = vcmp.le.f32.partialorder %v3641_v7, 0.7853982 }
 0x7ce   :  { %v3763_v14 = vxor.u32 2147483648, %v3762_v60  ;;  %v7312_v50 = vadd.s32 4294967169, %v5815_v24  ;;  %v12826_v58 = vadd.f32 %v12802_v9, %v2190_v3  ;;  %v3768_v34 = vsel %vm3642_vm5, 0, %v3766_v44 }
 0x7cf   :  { %v4357_v49 = vadd.s32 1, %v4353_v45  ;;  %v4354_v61 = vmul.u32 %v12756_v6, %v4300_v12  ;;  %v5819_v38 = vor.u32 8388608, %v5818_v28  ;;  %v3785_v39 = vadd.s32 3, %v3768_v34 }
 0x7d0   :  { %v3764_v18 = vsel %vm3643_vm9, %v3763_v14, %v3762_v60  ;;  %v5821_v20 = vadd.s32 1, %v7312_v50  ;;  %v4106_v7 = vand.u32 2147483647, %v12826_v58  ;;  %v4109_v6 = vand.u32 2139095040, %v12826_v58 }
 0x7d1   :  { %v3767_v63 = vsel %vm3642_vm5, %v12571_v16, %v3764_v18  ;;  %v4358_v4 = vsel %vm4356_vm10, %v4357_v49, %v4353_v45  ;;  %v12831_v2 = vshll.u32 %v5819_v38, 8  ;;  %v12834_v35 = vand.u32 3, %v3785_v39 }
 0x7d2   :  { %v3769_v54 = vmul.f32 %v3767_v63, %v3767_v63  ;;  %v4359_v55 = vadd.s32 %v4358_v4, %v4354_v61  ;;  %vm5822_vm0 = vcmp.gt.s32.totalorder %v5821_v20, 0  ;;  %v12836_v17 = vadd.s32 %v4350_v52, %v4331_v25 }
 0x7d3   :  { %v5823_v13 = vsel %vm5822_vm0, %v5821_v20, 0  ;;  %v12840_v42 = vand.u32 8388607, %v4106_v7  ;;  %vm4263_vm3 = vcmp.lt.s32.totalorder %v12592_v37, 0  ;;  %v12846_v32 = vand.u32 65535, %v12831_v2 }
 0x7d4   :  { %v3770_v1 = vmul.f32 -0.001358992, %v3769_v54  ;;  %v3777_v27 = vmul.f32 -0.00019511016, %v3769_v54  ;;  %v4360_v36 = vadd.s32 536870912, %v4359_v55  ;;  %v5825_v41 = vand.u32 31, %v5823_v13 }
 0x7d5   :  { %v12843_v19 = vshrl.u32 %v5823_v13, 5  ;;  %v12849_v30 = vshrl.u32 %v12831_v2, 16  ;;  %v4110_v57 = vshrl.u32 %v4109_v6, 23  ;;  %vm3788_vm12 = vcmp.eq.s32.totalorder %v12834_v35, 0 }
 0x7d6   :  { %v3771_v5 = vadd.f32 0.041655596, %v3770_v1  ;;  %v3778_v43 = vadd.f32 0.008332121, %v3777_v27  ;;  %v4361_v48 = vshrl.u32 %v4360_v36, 30  ;;  %v5826_v26 = vsub.s32 32, %v5825_v41 }
 0x7d7   :  { %v5828_v25 = vshll.u32 %v15517_v46, %v5825_v41  ;;  %vm3791_vm11 = vcmp.eq.s32.totalorder %v12834_v35, 2  ;;  %v5831_v22 = vshll.u32 %v15511_v59, %v5825_v41  ;;  %vm3787_vm14 = vcmp.lt.s32.totalorder %v12834_v35, 2 }
 0x7d8   :  { %v3772_v51 = vmul.f32 %v3771_v5, %v3769_v54  ;;  %v3779_v11 = vmul.f32 %v3778_v43, %v3769_v54  ;;  %v4362_v40 = vshll.u32 %v4361_v48, 30  ;;  %v5829_v15 = vshrl.u32 %v15511_v59, %v5826_v26 }
 0x7d9   :  { %v5832_v3 = vshrl.u32 %v15512_v53, %v5826_v26  ;;  %v5835_v60 = vshrl.u32 %v15513_v0, %v5826_v26  ;;  %vm3784_vm2 = vweird.f32 %v12571_v16  ;;  %v4385_v12 = vsub.s32 4, %v4361_v48 }
 0x7da   :  { %v3773_v21 = vadd.f32 -0.4999988, %v3772_v51  ;;  %v3780_v8 = vadd.f32 -0.16666654, %v3779_v11  ;;  %v12851_v31 = vsub.s32 %v4359_v55, %v4362_v40  ;;  %v5834_v45 = vshll.u32 %v15512_v53, %v5825_v41 }
 0x7db   :  { %v5837_v28 = vshll.u32 %v15513_v0, %v5825_v41  ;;  %v5838_v14 = vshrl.u32 %v15514_v29, %v5826_v26  ;;  %v5841_v34 = vshrl.u32 %v15515_v47, %v5826_v26  ;;  %vm12871_vm13 = vcmp.le.f32.partialorder %v4261_v62, 0.7853982 }
 0x7dc   :  { %v3774_v52 = vmul.f32 %v3773_v21, %v3769_v54  ;;  %v3781_v24 = vmul.f32 %v3780_v8, %v3769_v54  ;;  %vm4364_vm1 = vcmp.lt.s32.totalorder %v12851_v31, 0  ;;  %v4365_v44 = vsub.s32 0, %v12851_v31 }
 0x7dd   :  { %v5830_v4 = vor.u32 %v5829_v15, %v5828_v25  ;;  %v5833_v38 = vor.u32 %v5832_v3, %v5831_v22  ;;  %v5839_v54 = vor.u32 %v5838_v14, %v5837_v28  ;;  %v5836_v13 = vor.u32 %v5835_v60, %v5834_v45 }
 0x7de   :  { %v3775_v50 = vadd.f32 1.0, %v3774_v52  ;;  %v3782_v49 = vadd.f32 1.0, %v3781_v24  ;;  %v4366_v18 = vsel %vm4364_vm1, %v4365_v44, %v12851_v31  ;;  %v5840_v1 = vshll.u32 %v15514_v29, %v5825_v41 }
 0x7df   :  { %v4367_v20 = vclz %v4366_v18  ;;  %v5827_v36 = vshrl.u32 %v15517_v46, %v5826_v26  ;;  %vm5843_vm7 = vcmp.lt.s32.totalorder %v12843_v19, 1  ;;  %v7279_v6 = vadd.s32 4294967169, %v4110_v57 }
 0x7e0   :  { %v3783_v55 = vmul.f32 %v3782_v49, %v3767_v63  ;;  %v3792_v39 = vxor.u32 2147483648, %v3775_v50  ;;  %v4386_v62 = vsel %vm4263_vm3, %v4385_v12, %v4361_v48  ;;  %v5842_v43 = vor.u32 %v5841_v34, %v5840_v1 }
 0x7e1   :  { %v7283_v27 = vadd.s32 4294967294, %v4367_v20  ;;  %vm5846_vm8 = vcmp.lt.s32.totalorder %v12843_v19, 4  ;;  %vm5845_vm9 = vcmp.lt.s32.totalorder %v12843_v19, 3  ;;  %v5851_v63 = vsel %vm5843_vm7, %v5830_v4, %v5833_v38 }
 0x7e2   :  { %v3789_v5 = vxor.u32 2147483648, %v3783_v55  ;;  %v5852_v41 = vsel %vm5846_vm8, %v5839_v54, 920167782  ;;  %v3793_v51 = vsel %vm3791_vm11, %v3792_v39, %v3783_v55  ;;  %vm5844_vm10 = vcmp.lt.s32.totalorder %v12843_v19, 2 }
 0x7e3   :  { %vm7284_vm4 = vcmp.lt.s32.totalorder %v7283_v27, 0  ;;  %v5853_v48 = vsel %vm5845_vm9, %v5836_v13, %v5852_v41  ;;  %v5855_v22 = vsel %vm5843_vm7, %v5833_v38, %v5836_v13  ;;  %v5856_v16 = vsel %vm5846_vm8, %v5842_v43, 1326507024 }
 0x7e4   :  { %v3790_v26 = vsel %vm3788_vm12, %v3775_v50, %v3789_v5  ;;  %v4370_v11 = vsel %vm7284_vm4, 0, %v7283_v27  ;;  %v5854_v15 = vsel %vm5844_vm10, %v5851_v63, %v5853_v48  ;;  %v5848_v52 = vsel %vm5846_vm8, %v5836_v13, 2102212464 }
 0x7e5   :  { %v3794_v40 = vsel %vm3787_vm14, %v3790_v26, %v3793_v51  ;;  %v4371_v57 = vsub.s32 32, %v4370_v11  ;;  %v4375_v21 = vsub.s32 4294967266, %v4370_v11  ;;  %v4372_v25 = vshll.u32 %v12851_v31, %v4370_v11 }
 0x7e6   :  { %v3795_v8 = vsel %vm3784_vm2, nan, %v3794_v40  ;;  %v5884_v60 = vand.u32 65535, %v5854_v15  ;;  %v4388_v31 = vsel %vm12871_vm13, 0, %v4386_v62  ;;  %v5857_v24 = vsel %vm5845_vm9, %v5839_v54, %v5856_v16 }
 0x7e7   :  { %7216 = vst.msk [vmem:[%s14704_s3 + $0x48] sm:$0xff] %vm7206_vm6, %v3795_v8  ;;  %v4373_v35 = vshrl.u32 %v12836_v17, %v4371_v57  ;;  %v4376_v3 = vadd.s32 127, %v4375_v21  ;;  %v5885_v44 = vshrl.u32 %v5854_v15, 16  ;;  %v5858_v17 = vsel %vm5844_vm10, %v5855_v22, %v5857_v24 }
 0x7e8   :  { %v4116_v28 = vadd.s32 1, %v7279_v6  ;;  %v5862_v14 = vand.u32 65535, %v5858_v17  ;;  %v5863_v50 = vshrl.u32 %v5858_v17, 16  ;;  %v5888_v18 = vmul.u32 %v5884_v60, %v12849_v30 }
 0x7e9   :  { %v4374_v12 = vor.u32 %v4373_v35, %v4372_v25  ;;  %v4377_v45 = vshll.u32 %v4376_v3, 23  ;;  %v5887_v49 = vmul.u32 %v5885_v44, %v12846_v32  ;;  %v4405_v20 = vadd.s32 3, %v4388_v31 }
 0x7ea   :  { %v5847_v55 = vsel %vm5843_vm7, %v5827_v36, %v5830_v4  ;;  %v5849_v54 = vsel %vm5845_vm9, %v5833_v38, %v5848_v52  ;;  %v5865_v13 = vmul.u32 %v5863_v50, %v12846_v32  ;;  %v5866_v1 = vmul.u32 %v5862_v14, %v12849_v30 }
 0x7eb   :  { %v4378_v34 = vor.u32 4788187, %v4377_v45  ;;  %v4381_v39 = vcvt.s32.f32 %v4374_v12  ;;  %v5886_v27 = vmul.u32 %v5884_v60, %v12846_v32  ;;  %v5889_v5 = vmul.u32 %v5885_v44, %v12849_v30 }
 0x7ec   :  { %v5890_v62 = vshll.u32 %v5887_v49, 16  ;;  %vm4117_vm5 = vcmp.gt.s32.totalorder %v4116_v28, 0  ;;  %v5864_v43 = vmul.u32 %v5862_v14, %v12846_v32  ;;  %v5867_v63 = vmul.u32 %v5863_v50, %v12849_v30 }
 0x7ed   :  { %v4379_v6 = vand.u32 2147483647, %v4378_v34  ;;  %v5868_v4 = vshll.u32 %v5865_v13, 16  ;;  %v5892_v36 = vshll.u32 %v5888_v18, 16  ;;  %v5870_v38 = vshll.u32 %v5866_v1, 16 }
 0x7ee   :  { %vm5894_vm0 = vc.u32 %v5886_v27, %v5890_v62  ;;  %v5896_v26 = vadd.s32 %v5890_v62, %v5886_v27  ;;  %v4118_v48 = vsel %vm4117_vm5, %v4116_v28, 0  ;;  %v5850_v32 = vsel %vm5844_vm10, %v5847_v55, %v5849_v54 }
 0x7ef   :  { %v4382_v41 = vmul.f32 %v4381_v39, %v4379_v6  ;;  %vm5872_vm12 = vc.u32 %v5864_v43, %v5868_v4  ;;  %v5874_v51 = vadd.s32 %v5868_v4, %v5864_v43  ;;  %v5895_v11 = vsel %vm5894_vm0, 1, %v15516_v33 }
 0x7f0   :  { %v5873_v57 = vsel %vm5872_vm12, 1, %v15516_v33  ;;  %v5897_v21 = vadd.s32 %v5895_v11, %v5889_v5  ;;  %vm5898_vm11 = vc.u32 %v5896_v26, %v5892_v36  ;;  %v5891_v22 = vshrl.u32 %v5887_v49, 16 }
 0x7f1   :  { %v4383_v40 = vxor.u32 2147483648, %v4382_v41  ;;  %v5875_v30 = vadd.s32 %v5873_v57, %v5867_v63  ;;  %vm5876_vm14 = vc.u32 %v5874_v51, %v5870_v38  ;;  %v5899_v8 = vsel %vm5898_vm11, 1, %v15516_v33 }
 0x7f2   :  { %v5877_v15 = vsel %vm5876_vm14, 1, %v15516_v33  ;;  %v5901_v35 = vadd.s32 %v5899_v8, %v5897_v21  ;;  %v5869_v16 = vshrl.u32 %v5865_v13, 16  ;;  %v4120_v31 = vand.u32 31, %v4118_v48 }
 0x7f3   :  { %v4384_v25 = vsel %vm4263_vm3, %v4383_v40, %v4382_v41  ;;  %v5879_v60 = vadd.s32 %v5877_v15, %v5875_v30  ;;  %v5893_v52 = vshrl.u32 %v5888_v18, 16  ;;  %v4114_v44 = vor.u32 8388608, %v12840_v42 }
 0x7f4   :  { %v4387_v3 = vsel %vm12871_vm13, %v12592_v37, %v4384_v25  ;;  %v5902_v24 = vadd.s32 %v5901_v35, %v5891_v22  ;;  %v12941_v12 = vand.u32 3, %v4405_v20  ;;  %v5871_v45 = vshrl.u32 %v5866_v1, 16 }
 0x7f5   :  { %v4389_v19 = vmul.f32 %v4387_v3, %v4387_v3  ;;  %v5880_v17 = vadd.s32 %v5879_v60, %v5869_v16  ;;  %v12943_v28 = vsub.s32 32, %v4120_v31  ;;  %v5904_v61 = vmul.u32 %v12831_v2, %v5850_v32 }
 0x7f6   :  { %v5903_v49 = vadd.s32 %v5902_v24, %v5893_v52  ;;  %v12948_v55 = vadd.s32 %v5896_v26, %v5892_v36  ;;  %v12950_v54 = vshrl.u32 %v4118_v48, 5  ;;  %v4123_v13 = vshll.u32 %v15517_v46, %v4120_v31 }
 0x7f7   :  { %v4390_v14 = vmul.f32 -0.001358992, %v4389_v19  ;;  %v4397_v50 = vmul.f32 -0.00019511016, %v4389_v19  ;;  %v12946_v34 = vadd.s32 %v5880_v17, %v5871_v45  ;;  %v4124_v42 = vshrl.u32 %v15511_v59, %v12943_v28 }
 0x7f8   :  { %v5907_v39 = vadd.s32 1, %v5903_v49  ;;  %v4126_v1 = vshll.u32 %v15511_v59, %v4120_v31  ;;  %v4127_v2 = vshrl.u32 %v15512_v53, %v12943_v28  ;;  %v4130_v27 = vshrl.u32 %v15513_v0, %v12943_v28 }
 0x7f9   :  { %v4391_v18 = vadd.f32 0.041655596, %v4390_v14  ;;  %v4398_v20 = vadd.f32 0.008332121, %v4397_v50  ;;  %vm5906_vm3 = vc.u32 %v12946_v34, %v12948_v55  ;;  %v4129_v43 = vshll.u32 %v15512_v53, %v4120_v31 }
 0x7fa   :  { %v5908_v62 = vsel %vm5906_vm3, %v5907_v39, %v5903_v49  ;;  %v12963_v4 = vor.u32 %v4124_v42, %v4123_v13  ;;  %v4132_v36 = vshll.u32 %v15513_v0, %v4120_v31  ;;  %v4133_v41 = vshrl.u32 %v15514_v29, %v12943_v28 }
 0x7fb   :  { %v4392_v6 = vmul.f32 %v4391_v18, %v4389_v19  ;;  %v4399_v5 = vmul.f32 %v4398_v20, %v4389_v19  ;;  %v5909_v63 = vadd.s32 %v5908_v62, %v5904_v61  ;;  %v4135_v51 = vshll.u32 %v15514_v29, %v4120_v31 }
 0x7fc   :  { %v4136_v11 = vshrl.u32 %v15515_v47, %v12943_v28  ;;  %v12971_v40 = vor.u32 %v4127_v2, %v4126_v1  ;;  %v4131_v57 = vor.u32 %v4130_v27, %v4129_v43  ;;  %v4134_v21 = vor.u32 %v4133_v41, %v4132_v36 }
 0x7fd   :  { %v4393_v38 = vadd.f32 -0.4999988, %v4392_v6  ;;  %v4400_v26 = vadd.f32 -0.16666654, %v4399_v5  ;;  %v5910_v48 = vadd.s32 536870912, %v5909_v63  ;;  %vm4141_vm1 = vcmp.lt.s32.totalorder %v12950_v54, 4 }
 0x7fe   :  { %v4137_v8 = vor.u32 %v4136_v11, %v4135_v51  ;;  %vm4404_vm2 = vweird.f32 %v12592_v37  ;;  %v4147_v15 = vsel %vm4141_vm1, %v4134_v21, 920167782  ;;  %v12979_v22 = vshll.u32 %v4114_v44, 8 }
 0x7ff   :  { %v4394_v32 = vmul.f32 %v4393_v38, %v4389_v19  ;;  %v4401_v30 = vmul.f32 %v4400_v26, %v4389_v19  ;;  %v12975_v25 = vshrl.u32 %v5910_v48, 30  ;;  %vm4138_vm13 = vcmp.lt.s32.totalorder %v12950_v54, 1 }
 0x800   :  { %vm4140_vm7 = vcmp.lt.s32.totalorder %v12950_v54, 3  ;;  %v4146_v31 = vsel %vm4138_vm13, %v12963_v4, %v12971_v40  ;;  %v4150_v52 = vsel %vm4138_vm13, %v12971_v40, %v4131_v57  ;;  %vm4407_vm8 = vcmp.lt.s32.totalorder %v12941_v12, 2 }
 0x801   :  { %v4395_v35 = vadd.f32 1.0, %v4394_v32  ;;  %v4402_v16 = vadd.f32 1.0, %v4401_v30  ;;  %v5912_v60 = vshll.u32 %v12975_v25, 30  ;;  %v4148_v19 = vsel %vm4140_vm7, %v4131_v57, %v4147_v15 }
 0x802   :  { %v4151_v45 = vsel %vm4141_vm1, %v4137_v8, 1326507024  ;;  %vm4408_vm4 = vcmp.eq.s32.totalorder %v12941_v12, 0  ;;  %vm4139_vm9 = vcmp.lt.s32.totalorder %v12950_v54, 2  ;;  %vm4411_vm10 = vcmp.eq.s32.totalorder %v12941_v12, 2 }
 0x803   :  { %v4403_v24 = vmul.f32 %v4402_v16, %v4387_v3  ;;  %v4412_v44 = vxor.u32 2147483648, %v4395_v35  ;;  %v5913_v17 = vsub.s32 %v5909_v63, %v5912_v60  ;;  %v4152_v14 = vsel %vm4140_vm7, %v4134_v21, %v4151_v45 }
 0x804   :  { %v4149_v3 = vsel %vm4139_vm9, %v4146_v31, %v4148_v19  ;;  %v4153_v49 = vsel %vm4139_vm9, %v4150_v52, %v4152_v14  ;;  %v4155_v42 = vand.u32 65535, %v12979_v22  ;;  %v4156_v13 = vshrl.u32 %v12979_v22, 16  ;;  %v2078_v19 = vpop.permute.xlu1 %2077 }
 0x805   :  { %v4409_v50 = vxor.u32 2147483648, %v4403_v24  ;;  %vm5914_vm5 = vcmp.lt.s32.totalorder %v5913_v17, 0  ;;  %v5915_v61 = vsub.s32 0, %v5913_v17  ;;  %v4157_v18 = vand.u32 65535, %v4153_v49 }
 0x806   :  { %v4413_v39 = vsel %vm4411_vm10, %v4412_v44, %v4403_v24  ;;  %v4158_v1 = vshrl.u32 %v4153_v49, 16  ;;  %v4179_v6 = vand.u32 65535, %v4149_v3  ;;  %v4180_v5 = vshrl.u32 %v4149_v3, 16 }
 0x807   :  { %v4410_v20 = vsel %vm4408_vm4, %v4395_v35, %v4409_v50  ;;  %v5916_v27 = vsel %vm5914_vm5, %v5915_v61, %v5913_v17  ;;  %v4161_v36 = vmul.u32 %v4157_v18, %v4156_v13  ;;  %v4122_v41 = vshrl.u32 %v15517_v46, %v12943_v28  ;;  %v2098_v61 = vpop.permute.xlu2 %2097 }
 0x808   :  { %v4414_v2 = vsel %vm4407_vm8, %v4410_v20, %v4413_v39  ;;  %v5917_v43 = vclz %v5916_v27  ;;  %v4160_v63 = vmul.u32 %v4158_v1, %v4155_v42  ;;  %v5905_v12 = vadd.s32 %v12948_v55, %v12946_v34 }
 0x809   :  { %v4415_v62 = vsel %vm4404_vm2, nan, %v4414_v2  ;;  %v4159_v26 = vmul.u32 %v4157_v18, %v4155_v42  ;;  %v4143_v37 = vsel %vm4141_vm1, %v4131_v57, 2102212464  ;;  %v4162_v11 = vmul.u32 %v4158_v1, %v4156_v13 }
 0x80a   :  { %7220 = vst.msk [vmem:[%s14704_s3 + $0x68] sm:$0xff] %vm7206_vm6, %v4415_v62  ;;  %v7313_v38 = vadd.s32 4294967294, %v5917_v43  ;;  %v4163_v51 = vshll.u32 %v4160_v63, 16  ;;  %v4165_v48 = vshll.u32 %v4161_v36, 16  ;;  %v4182_v21 = vmul.u32 %v4180_v5, %v4155_v42  ;;  %v15555_v62 = vld [vmem:[#allocation31_spill] sm:$0xff] }
 0x80b   :  { %v4181_v30 = vmul.u32 %v4179_v6, %v4155_v42  ;;  %vm5813_vm11 = vcmp.lt.s32.totalorder %v12805_v56, 0  ;;  %v4183_v15 = vmul.u32 %v4179_v6, %v4156_v13  ;;  %v4164_v16 = vshrl.u32 %v4160_v63, 16 }
 0x80c   :  { %vm7314_vm0 = vcmp.lt.s32.totalorder %v7313_v38, 0  ;;  %vm4167_vm12 = vc.u32 %v4159_v26, %v4163_v51  ;;  %v4169_v32 = vadd.s32 %v4163_v51, %v4159_v26  ;;  %v4185_v34 = vshll.u32 %v4182_v21, 16 }
 0x80d   :  { %v5920_v8 = vsel %vm7314_vm0, 0, %v7313_v38  ;;  %v4168_v28 = vsel %vm4167_vm12, 1, %v15516_v33  ;;  %v4184_v57 = vmul.u32 %v4180_v5, %v4156_v13  ;;  %v4187_v50 = vshll.u32 %v4183_v15, 16 }
 0x80e   :  { %v5921_v55 = vsub.s32 32, %v5920_v8  ;;  %v5925_v35 = vsub.s32 4294967266, %v5920_v8  ;;  %v4170_v60 = vadd.s32 %v4168_v28, %v4162_v11  ;;  %v5922_v31 = vshll.u32 %v5913_v17, %v5920_v8  ;;  %v15554_v17 = vld [vmem:[#allocation17_spill] sm:$0xff] }
 0x80f   :  { %vm4171_vm14 = vc.u32 %v4169_v32, %v4165_v48  ;;  %vm4189_vm3 = vc.u32 %v4181_v30, %v4185_v34  ;;  %v4191_v3 = vadd.s32 %v4185_v34, %v4181_v30  ;;  %v5935_v20 = vsub.s32 4, %v12975_v25 }
 0x810   :  { %v5923_v52 = vshrl.u32 %v5905_v12, %v5921_v55  ;;  %v5926_v24 = vadd.s32 127, %v5925_v35  ;;  %v4172_v44 = vsel %vm4171_vm14, 1, %v15516_v33  ;;  %v4190_v45 = vsel %vm4189_vm3, 1, %v15516_v33 }
 0x811   :  { %v4174_v14 = vadd.s32 %v4172_v44, %v4170_v60  ;;  %v4192_v49 = vadd.s32 %v4190_v45, %v4184_v57  ;;  %v2158_v39 = vsel %vm2141_vm15, %v15554_v17, %v2078_v19  ;;  %v4142_v13 = vsel %vm4138_vm13, %v4122_v41, %v12963_v4 }
 0x812   :  { %v5924_v42 = vor.u32 %v5923_v52, %v5922_v31  ;;  %v5927_v18 = vshll.u32 %v5926_v24, 23  ;;  %vm4193_vm1 = vc.u32 %v4191_v3, %v4187_v50  ;;  %v2194_v2 = vmul.f32 %v12795_v23, %v2158_v39 }
 0x813   :  { %v4175_v1 = vadd.s32 %v4174_v14, %v4164_v16  ;;  %v4166_v6 = vshrl.u32 %v4161_v36, 16  ;;  %v4194_v5 = vsel %vm4193_vm1, 1, %v15516_v33  ;;  %v2168_v43 = vsel %vm2141_vm15, %v15555_v62, %v2098_v61 }
 0x814   :  { %v5928_v27 = vor.u32 4788187, %v5927_v18  ;;  %v4144_v63 = vsel %vm4140_vm7, %v12971_v40, %v4143_v37  ;;  %v4186_v12 = vshrl.u32 %v4182_v21, 16  ;;  %v4196_v38 = vadd.s32 %v4194_v5, %v4192_v49 }
 0x815   :  { %v13039_v26 = vadd.f32 %v12802_v9, %v2194_v2  ;;  %v5931_v41 = vcvt.s32.f32 %v5924_v42  ;;  %v5936_v36 = vsel %vm5813_vm11, %v5935_v20, %v12975_v25  ;;  %v4176_v51 = vadd.s32 %v4175_v1, %v4166_v6 }
 0x816   :  { %v5929_v4 = vand.u32 2147483647, %v5928_v27  ;;  %v4188_v11 = vshrl.u32 %v4183_v15, 16  ;;  %v4197_v48 = vadd.s32 %v4196_v38, %v4186_v12  ;;  %v2204_v30 = vmul.f32 %v12795_v23, %v2168_v43 }
 0x817   :  { %v4726_v32 = vand.u32 2147483647, %v13039_v26  ;;  %vm13048_vm2 = vcmp.le.f32.partialorder %v5811_v10, 0.7853982  ;;  %v4195_v21 = vadd.s32 %v4191_v3, %v4187_v50  ;;  %v4729_v8 = vand.u32 2139095040, %v13039_v26 }
 0x818   :  { %v5932_v37 = vmul.f32 %v5931_v41, %v5929_v4  ;;  %v5938_v25 = vsel %vm13048_vm2, 0, %v5936_v36  ;;  %v4145_v28 = vsel %vm4139_vm9, %v4142_v13, %v4144_v63  ;;  %v4198_v15 = vadd.s32 %v4197_v48, %v4188_v11 }
 0x819   :  { %vm4201_vm13 = vc.u32 %v4176_v51, %v4195_v21  ;;  %v4730_v23 = vshrl.u32 %v4729_v8, 23  ;;  %v4733_v10 = vand.u32 8388607, %v4726_v32  ;;  %v13060_v35 = vadd.f32 %v12802_v9, %v2204_v30 }
 0x81a   :  { %v5933_v34 = vxor.u32 2147483648, %v5932_v37  ;;  %v4202_v55 = vadd.s32 1, %v4198_v15  ;;  %v4199_v60 = vmul.u32 %v12979_v22, %v4145_v28  ;;  %v5955_v57 = vadd.s32 3, %v5938_v25 }
 0x81b   :  { %v7291_v31 = vadd.s32 4294967169, %v4730_v23  ;;  %v4734_v44 = vor.u32 8388608, %v4733_v10  ;;  %v6279_v14 = vand.u32 2139095040, %v13060_v35  ;;  %vm4108_vm8 = vcmp.lt.s32.totalorder %v12826_v58, 0 }
 0x81c   :  { %v5934_v16 = vsel %vm5813_vm11, %v5933_v34, %v5932_v37  ;;  %v4203_v19 = vsel %vm4201_vm13, %v4202_v55, %v4198_v15  ;;  %v13069_v49 = vand.u32 3, %v5955_v57  ;;  %v4200_v27 = vadd.s32 %v4195_v21, %v4176_v51 }
 0x81d   :  { %v5937_v54 = vsel %vm13048_vm2, %v12805_v56, %v5934_v16  ;;  %v4204_v24 = vadd.s32 %v4203_v19, %v4199_v60  ;;  %v4736_v45 = vadd.s32 1, %v7291_v31  ;;  %v13071_v20 = vshll.u32 %v4734_v44, 8 }
 0x81e   :  { %v5939_v52 = vmul.f32 %v5937_v54, %v5937_v54  ;;  %v6280_v39 = vshrl.u32 %v6279_v14, 23  ;;  %vm5961_vm4 = vcmp.eq.s32.totalorder %v13069_v49, 2  ;;  %v6276_v5 = vand.u32 2147483647, %v13060_v35 }
 0x81f   :  { %v4205_v3 = vadd.s32 536870912, %v4204_v24  ;;  %vm4737_vm7 = vcmp.gt.s32.totalorder %v4736_v45, 0  ;;  %v13079_v12 = vand.u32 65535, %v13071_v20  ;;  %vm5958_vm9 = vcmp.eq.s32.totalorder %v13069_v49, 0 }
 0x820   :  { %v5940_v9 = vmul.f32 -0.001358992, %v5939_v52  ;;  %v5947_v50 = vmul.f32 -0.00019511016, %v5939_v52  ;;  %v4738_v22 = vsel %vm4737_vm7, %v4736_v45, 0  ;;  %v13085_v36 = vadd.s32 4294967169, %v6280_v39 }
 0x821   :  { %v4206_v18 = vshrl.u32 %v4205_v3, 30  ;;  %v4740_v17 = vand.u32 31, %v4738_v22  ;;  %v13082_v4 = vshrl.u32 %v4738_v22, 5  ;;  %vm5957_vm10 = vcmp.lt.s32.totalorder %v13069_v49, 2 }
 0x822   :  { %v5941_v61 = vadd.f32 0.041655596, %v5940_v9  ;;  %v5948_v42 = vadd.f32 0.008332121, %v5947_v50  ;;  %vm5954_vm0 = vweird.f32 %v12805_v56  ;;  %vm13110_vm12 = vcmp.le.f32.partialorder %v4106_v7, 0.7853982 }
 0x823   :  { %v4207_v2 = vshll.u32 %v4206_v18, 30  ;;  %v4741_v6 = vsub.s32 32, %v4740_v17  ;;  %v4230_v38 = vsub.s32 4, %v4206_v18  ;;  %v4743_v41 = vshll.u32 %v15517_v46, %v4740_v17 }
 0x824   :  { %v5942_v13 = vmul.f32 %v5941_v61, %v5939_v52  ;;  %v5949_v1 = vmul.f32 %v5948_v42, %v5939_v52  ;;  %v4746_v40 = vshll.u32 %v15511_v59, %v4740_v17  ;;  %v4749_v21 = vshll.u32 %v15512_v53, %v4740_v17 }
 0x825   :  { %v13076_v63 = vsub.s32 %v4204_v24, %v4207_v2  ;;  %v4744_v30 = vshrl.u32 %v15511_v59, %v4741_v6  ;;  %v4747_v37 = vshrl.u32 %v15512_v53, %v4741_v6  ;;  %v4750_v15 = vshrl.u32 %v15513_v0, %v4741_v6 }
 0x826   :  { %v5943_v62 = vadd.f32 -0.4999988, %v5942_v13  ;;  %v5950_v43 = vadd.f32 -0.16666654, %v5949_v1  ;;  %v13099_v23 = vsel %vm4108_vm8, %v4230_v38, %v4206_v18  ;;  %v4742_v10 = vshrl.u32 %v15517_v46, %v4741_v6 }
 0x827   :  { %vm4209_vm5 = vcmp.lt.s32.totalorder %v13076_v63, 0  ;;  %v4210_v48 = vsub.s32 0, %v13076_v63  ;;  %v4753_v55 = vshrl.u32 %v15514_v29, %v4741_v6  ;;  %v4752_v31 = vshll.u32 %v15513_v0, %v4740_v17 }
 0x828   :  { %v5944_v51 = vmul.f32 %v5943_v62, %v5939_v52  ;;  %v5951_v11 = vmul.f32 %v5950_v43, %v5939_v52  ;;  %v4756_v57 = vshrl.u32 %v15515_v47, %v4741_v6  ;;  %v4745_v52 = vor.u32 %v4744_v30, %v4743_v41 }
 0x829   :  { %v4211_v28 = vsel %vm4209_vm5, %v4210_v48, %v13076_v63  ;;  %v4748_v24 = vor.u32 %v4747_v37, %v4746_v40  ;;  %v4755_v44 = vshll.u32 %v15514_v29, %v4740_v17  ;;  %v4751_v9 = vor.u32 %v4750_v15, %v4749_v21 }
 0x82a   :  { %v5945_v8 = vadd.f32 1.0, %v5944_v51  ;;  %v5952_v25 = vadd.f32 1.0, %v5951_v11  ;;  %v4212_v34 = vclz %v4211_v28  ;;  %v4754_v50 = vor.u32 %v4753_v55, %v4752_v31 }
 0x82b   :  { %v4757_v3 = vor.u32 %v4756_v57, %v4755_v44  ;;  %vm4758_vm14 = vcmp.lt.s32.totalorder %v13082_v4, 1  ;;  %vm4759_vm3 = vcmp.lt.s32.totalorder %v13082_v4, 2  ;;  %vm4760_vm1 = vcmp.lt.s32.totalorder %v13082_v4, 3 }
 0x82c   :  { %v5953_v16 = vmul.f32 %v5952_v25, %v5937_v54  ;;  %v5962_v60 = vxor.u32 2147483648, %v5945_v8  ;;  %v7280_v19 = vadd.s32 4294967294, %v4212_v34  ;;  %vm4761_vm2 = vcmp.lt.s32.totalorder %v13082_v4, 4 }
 0x82d   :  { %v4762_v17 = vsel %vm4758_vm14, %v4742_v10, %v4745_v52  ;;  %v4763_v13 = vsel %vm4761_vm2, %v4751_v9, 2102212464  ;;  %v4766_v1 = vsel %vm4758_vm14, %v4745_v52, %v4748_v24  ;;  %v4767_v2 = vsel %vm4761_vm2, %v4754_v50, 920167782 }
 0x82e   :  { %v5959_v45 = vxor.u32 2147483648, %v5953_v16  ;;  %v5963_v14 = vsel %vm5961_vm4, %v5962_v60, %v5953_v16  ;;  %vm7281_vm11 = vcmp.lt.s32.totalorder %v7280_v19, 0  ;;  %v4768_v56 = vsel %vm4760_vm1, %v4751_v9, %v4767_v2 }
 0x82f   :  { %v4215_v61 = vsel %vm7281_vm11, 0, %v7280_v19  ;;  %v4764_v43 = vsel %vm4760_vm1, %v4748_v24, %v4763_v13  ;;  %v4769_v38 = vsel %vm4759_vm3, %v4766_v1, %v4768_v56  ;;  %v4770_v41 = vsel %vm4758_vm14, %v4748_v24, %v4751_v9 }
 0x830   :  { %v5960_v22 = vsel %vm5958_vm9, %v5945_v8, %v5959_v45  ;;  %v4216_v42 = vsub.s32 32, %v4215_v61  ;;  %v4220_v18 = vsub.s32 4294967266, %v4215_v61  ;;  %v4217_v49 = vshll.u32 %v13076_v63, %v4215_v61 }
 0x831   :  { %v5964_v7 = vsel %vm5957_vm10, %v5960_v22, %v5963_v14  ;;  %v4771_v51 = vsel %vm4761_vm2, %v4757_v3, 1326507024  ;;  %v4799_v63 = vand.u32 65535, %v4769_v38  ;;  %v4776_v40 = vshrl.u32 %v13071_v20, 16 }
 0x832   :  { %v5965_v39 = vsel %vm5954_vm0, nan, %v5964_v7  ;;  %v4218_v6 = vshrl.u32 %v4200_v27, %v4216_v42  ;;  %v4221_v62 = vadd.s32 127, %v4220_v18  ;;  %v4772_v27 = vsel %vm4760_vm1, %v4754_v50, %v4771_v51 }
 0x833   :  { %7230 = vst.msk [vmem:[%s14704_s3 + $0xb8] sm:$0xff] %vm7206_vm6, %v5965_v39  ;;  %v4773_v30 = vsel %vm4759_vm3, %v4770_v41, %v4772_v27  ;;  %v4800_v37 = vshrl.u32 %v4769_v38, 16  ;;  %v6286_v21 = vadd.s32 1, %v13085_v36  ;;  %v13155_v15 = vand.u32 8388607, %v6276_v5 }
 0x834   :  { %v4219_v11 = vor.u32 %v4218_v6, %v4217_v49  ;;  %v4222_v48 = vshll.u32 %v4221_v62, 23  ;;  %v4777_v25 = vand.u32 65535, %v4773_v30  ;;  %v4778_v28 = vshrl.u32 %v4773_v30, 16 }
 0x835   :  { %v4233_v34 = vsel %vm13110_vm12, 0, %v13099_v23  ;;  %v13162_v10 = vsel %vm4759_vm3, %v4762_v17, %v4764_v43  ;;  %v4802_v55 = vmul.u32 %v4800_v37, %v13079_v12  ;;  %v4803_v16 = vmul.u32 %v4799_v63, %v4776_v40 }
 0x836   :  { %v4223_v8 = vor.u32 4788187, %v4222_v48  ;;  %v4226_v36 = vcvt.s32.f32 %v4219_v11  ;;  %v4780_v31 = vmul.u32 %v4778_v28, %v13079_v12  ;;  %v4781_v57 = vmul.u32 %v4777_v25, %v4776_v40 }
 0x837   :  { %v4801_v19 = vmul.u32 %v4799_v63, %v13079_v12  ;;  %v4804_v52 = vmul.u32 %v4800_v37, %v4776_v40  ;;  %v4805_v24 = vshll.u32 %v4802_v55, 16  ;;  %vm6287_vm13 = vcmp.gt.s32.totalorder %v6286_v21, 0 }
 0x838   :  { %v4224_v60 = vand.u32 2147483647, %v4223_v8  ;;  %v4779_v23 = vmul.u32 %v4777_v25, %v13079_v12  ;;  %v4782_v45 = vmul.u32 %v4778_v28, %v4776_v40  ;;  %v4783_v4 = vshll.u32 %v4780_v31, 16 }
 0x839   :  { %v4785_v14 = vshll.u32 %v4781_v57, 16  ;;  %v4807_v9 = vshll.u32 %v4803_v16, 16  ;;  %vm4809_vm7 = vc.u32 %v4801_v19, %v4805_v24  ;;  %v4811_v50 = vadd.s32 %v4805_v24, %v4801_v19 }
 0x83a   :  { %v4227_v44 = vmul.f32 %v4226_v36, %v4224_v60  ;;  %vm4787_vm4 = vc.u32 %v4779_v23, %v4783_v4  ;;  %v4789_v22 = vadd.s32 %v4783_v4, %v4779_v23  ;;  %v4810_v61 = vsel %vm4809_vm7, 1, %v15516_v33 }
 0x83b   :  { %v4788_v7 = vsel %vm4787_vm4, 1, %v15516_v33  ;;  %v4806_v42 = vshrl.u32 %v4802_v55, 16  ;;  %v4812_v18 = vadd.s32 %v4810_v61, %v4804_v52  ;;  %vm4813_vm9 = vc.u32 %v4811_v50, %v4807_v9 }
 0x83c   :  { %v4228_v3 = vxor.u32 2147483648, %v4227_v44  ;;  %v4790_v12 = vadd.s32 %v4788_v7, %v4782_v45  ;;  %vm4791_vm10 = vc.u32 %v4789_v22, %v4785_v14  ;;  %v4814_v39 = vsel %vm4813_vm9, 1, %v15516_v33 }
 0x83d   :  { %v4792_v1 = vsel %vm4791_vm10, 1, %v15516_v33  ;;  %v4816_v2 = vadd.s32 %v4814_v39, %v4812_v18  ;;  %v6288_v49 = vsel %vm6287_vm13, %v6286_v21, 0  ;;  %v4784_v62 = vshrl.u32 %v4780_v31, 16 }
 0x83e   :  { %v4229_v17 = vsel %vm4108_vm8, %v4228_v3, %v4227_v44  ;;  %v4794_v56 = vadd.s32 %v4792_v1, %v4790_v12  ;;  %v6290_v43 = vand.u32 31, %v6288_v49  ;;  %v4786_v38 = vshrl.u32 %v4781_v57, 16 }
 0x83f   :  { %v4232_v13 = vsel %vm13110_vm12, %v12826_v58, %v4229_v17  ;;  %v4808_v41 = vshrl.u32 %v4803_v16, 16  ;;  %v4817_v51 = vadd.s32 %v4816_v2, %v4806_v42  ;;  %v4250_v30 = vadd.s32 3, %v4233_v34 }
 0x840   :  { %v4234_v6 = vmul.f32 %v4232_v13, %v4232_v13  ;;  %v4795_v27 = vadd.s32 %v4794_v56, %v4784_v62  ;;  %v13178_v63 = vsub.s32 32, %v6290_v43  ;;  %v4819_v40 = vmul.u32 %v13071_v20, %v13162_v10 }
 0x841   :  { %v4818_v54 = vadd.s32 %v4817_v51, %v4808_v41  ;;  %v6284_v37 = vor.u32 8388608, %v13155_v15  ;;  %v13185_v28 = vadd.s32 %v4811_v50, %v4807_v9  ;;  %v13187_v16 = vshrl.u32 %v6288_v49, 5 }
 0x842   :  { %v4235_v11 = vmul.f32 -0.001358992, %v4234_v6  ;;  %v4242_v48 = vmul.f32 -0.00019511016, %v4234_v6  ;;  %v13183_v25 = vadd.s32 %v4795_v27, %v4786_v38  ;;  %v6293_v60 = vshll.u32 %v15517_v46, %v6290_v43 }
 0x843   :  { %v4822_v55 = vadd.s32 1, %v4818_v54  ;;  %v6294_v34 = vshrl.u32 %v15511_v59, %v13178_v63  ;;  %v6297_v20 = vshrl.u32 %v15512_v53, %v13178_v63  ;;  %v6296_v10 = vshll.u32 %v15511_v59, %v6290_v43 }
 0x844   :  { %v4236_v21 = vadd.f32 0.041655596, %v4235_v11  ;;  %v4243_v8 = vadd.f32 0.008332121, %v4242_v48  ;;  %vm4821_vm8 = vc.u32 %v13183_v25, %v13185_v28  ;;  %v6299_v57 = vshll.u32 %v15512_v53, %v6290_v43 }
 0x845   :  { %v4823_v15 = vsel %vm4821_vm8, %v4822_v55, %v4818_v54  ;;  %v6300_v19 = vshrl.u32 %v15513_v0, %v13178_v63  ;;  %v6295_v23 = vor.u32 %v6294_v34, %v6293_v60  ;;  %v6302_v45 = vshll.u32 %v15513_v0, %v6290_v43  ;;  %v2076_v60 = vpop.permute.xlu0 %2075 }
 0x846   :  { %v4237_v36 = vmul.f32 %v4236_v21, %v4234_v6  ;;  %v4244_v31 = vmul.f32 %v4243_v8, %v4234_v6  ;;  %v4824_v44 = vadd.s32 %v4823_v15, %v4819_v40  ;;  %v6303_v4 = vshrl.u32 %v15514_v29, %v13178_v63 }
 0x847   :  { %v6305_v14 = vshll.u32 %v15514_v29, %v6290_v43  ;;  %v6306_v9 = vshrl.u32 %v15515_v47, %v13178_v63  ;;  %v13206_v61 = vor.u32 %v6297_v20, %v6296_v10  ;;  %v4251_v7 = vand.u32 3, %v4250_v30 }
 0x848   :  { %v4238_v52 = vadd.f32 -0.4999988, %v4237_v36  ;;  %v4245_v24 = vadd.f32 -0.16666654, %v4244_v31  ;;  %v4825_v22 = vadd.s32 536870912, %v4824_v44  ;;  %v6301_v42 = vor.u32 %v6300_v19, %v6299_v57 }
 0x849   :  { %v6304_v18 = vor.u32 %v6303_v4, %v6302_v45  ;;  %v6307_v17 = vor.u32 %v6306_v9, %v6305_v14  ;;  %vm6311_vm5 = vcmp.lt.s32.totalorder %v13187_v16, 4  ;;  %vm4249_vm0 = vweird.f32 %v12826_v58 }
 0x84a   :  { %v4239_v50 = vmul.f32 %v4238_v52, %v4234_v6  ;;  %v4246_v3 = vmul.f32 %v4245_v24, %v4234_v6  ;;  %v13208_v1 = vshrl.u32 %v4825_v22, 30  ;;  %vm6308_vm12 = vcmp.lt.s32.totalorder %v13187_v16, 1  ;;  %v15560_v52 = vld [vmem:[#allocation178_spill] sm:$0xff] }
 0x84b   :  { %vm6310_vm11 = vcmp.lt.s32.totalorder %v13187_v16, 3  ;;  %v6317_v2 = vsel %vm6311_vm5, %v6304_v18, 920167782  ;;  %v6316_v56 = vsel %vm6308_vm12, %v6295_v23, %v13206_v61  ;;  %vm4252_vm14 = vcmp.lt.s32.totalorder %v4251_v7, 2 }
 0x84c   :  { %v4240_v12 = vadd.f32 1.0, %v4239_v50  ;;  %v4247_v39 = vadd.f32 1.0, %v4246_v3  ;;  %v4827_v62 = vshll.u32 %v13208_v1, 30  ;;  %v6318_v43 = vsel %vm6310_vm11, %v6301_v42, %v6317_v2 }
 0x84d   :  { %v6321_v38 = vsel %vm6311_vm5, %v6307_v17, 1326507024  ;;  %v13224_v41 = vshll.u32 %v6284_v37, 8  ;;  %vm6309_vm3 = vcmp.lt.s32.totalorder %v13187_v16, 2  ;;  %vm4253_vm1 = vcmp.eq.s32.totalorder %v4251_v7, 0 }
 0x84e   :  { %v4248_v49 = vmul.f32 %v4247_v39, %v4232_v13  ;;  %v4257_v6 = vxor.u32 2147483648, %v4240_v12  ;;  %v4828_v11 = vsub.s32 %v4824_v44, %v4827_v62  ;;  %v6320_v13 = vsel %vm6308_vm12, %v13206_v61, %v6301_v42 }
 0x84f   :  { %vm4256_vm2 = vcmp.eq.s32.totalorder %v4251_v7, 2  ;;  %v6319_v48 = vsel %vm6309_vm3, %v6316_v56, %v6318_v43  ;;  %v6322_v27 = vsel %vm6310_vm11, %v6304_v18, %v6321_v38  ;;  %v6292_v21 = vshrl.u32 %v15517_v46, %v13178_v63 }
 0x850   :  { %v4254_v51 = vxor.u32 2147483648, %v4248_v49  ;;  %v4258_v54 = vsel %vm4256_vm2, %v4257_v6, %v4248_v49  ;;  %vm4829_vm13 = vcmp.lt.s32.totalorder %v4828_v11, 0  ;;  %v4830_v40 = vsub.s32 0, %v4828_v11 }
 0x851   :  { %v6323_v8 = vsel %vm6309_vm3, %v6320_v13, %v6322_v27  ;;  %v6325_v55 = vand.u32 65535, %v13224_v41  ;;  %v6349_v20 = vand.u32 65535, %v6319_v48  ;;  %v6326_v63 = vshrl.u32 %v13224_v41, 16 }
 0x852   :  { %v4255_v30 = vsel %vm4253_vm1, %v4240_v12, %v4254_v51  ;;  %v4831_v36 = vsel %vm4829_vm13, %v4830_v40, %v4828_v11  ;;  %v6327_v31 = vand.u32 65535, %v6323_v8  ;;  %v6328_v10 = vshrl.u32 %v6323_v8, 16 }
 0x853   :  { %v4259_v37 = vsel %vm4252_vm14, %v4255_v30, %v4258_v54  ;;  %v4832_v15 = vclz %v4831_v36  ;;  %v6350_v57 = vshrl.u32 %v6319_v48, 16  ;;  %v4820_v19 = vadd.s32 %v13185_v28, %v13183_v25  ;;  %v13263_v48 = vld [vmem:[%s14702_s1] ss:$0 sm:$0xff] }
 0x854   :  { %v4260_v34 = vsel %vm4249_vm0, nan, %v4259_v37  ;;  %v2157_v58 = vsel %vm2141_vm15, %v15560_v52, %v2076_v60  ;;  %v13253_v44 = vsel %vm6308_vm12, %v6292_v21, %v6295_v23  ;;  %v6330_v45 = vmul.u32 %v6328_v10, %v6325_v55 }
 0x855   :  { %7219 = vst.msk [vmem:[%s14704_s3 + $0x60] sm:$0xff] %vm7206_vm6, %v4260_v34  ;;  %v7292_v24 = vadd.s32 4294967294, %v4832_v15  ;;  %v6331_v4 = vmul.u32 %v6327_v31, %v6326_v63  ;;  %v4850_v14 = vsub.s32 4, %v13208_v1  ;;  %v6313_v9 = vsel %vm6311_vm5, %v6301_v42, 2102212464 }
 0x856   :  { %v6352_v50 = vmul.u32 %v6350_v57, %v6325_v55  ;;  %v6353_v3 = vmul.u32 %v6349_v20, %v6326_v63  ;;  %v6329_v22 = vmul.u32 %v6327_v31, %v6325_v55  ;;  %v6333_v25 = vshll.u32 %v6330_v45, 16 }
 0x857   :  { %vm7293_vm7 = vcmp.lt.s32.totalorder %v7292_v24, 0  ;;  %v6351_v28 = vmul.u32 %v6349_v20, %v6325_v55  ;;  %v6332_v18 = vmul.u32 %v6328_v10, %v6326_v63  ;;  %v6354_v17 = vmul.u32 %v6350_v57, %v6326_v63  ;;  %v13270_v55 = vld [vmem:[%s14703_s2] ss:$0 sm:$0xff] }
 0x858   :  { %v4835_v7 = vsel %vm7293_vm7, 0, %v7292_v24  ;;  %v6355_v12 = vshll.u32 %v6352_v50, 16  ;;  %v6335_v2 = vshll.u32 %v6331_v4, 16  ;;  %vm6337_vm4 = vc.u32 %v6329_v22, %v6333_v25  ;;  %v15561_v20 = vld [vmem:[#allocation18_spill] sm:$0xff] }
 0x859   :  { %v4836_v39 = vsub.s32 32, %v4835_v7  ;;  %v4840_v23 = vsub.s32 4294967266, %v4835_v7  ;;  %v4837_v49 = vshll.u32 %v4828_v11, %v4835_v7  ;;  %v6338_v6 = vsel %vm6337_vm4, 1, %v15516_v33  ;;  %v2084_v11 = vpop.permute.xlu1 %2083 }
 0x85a   :  { %v6339_v62 = vadd.s32 %v6333_v25, %v6329_v22  ;;  %v6357_v56 = vshll.u32 %v6353_v3, 16  ;;  %v6340_v38 = vadd.s32 %v6338_v6, %v6332_v18  ;;  %vm6359_vm9 = vc.u32 %v6351_v28, %v6355_v12 }
 0x85b   :  { %v4838_v42 = vshrl.u32 %v4820_v19, %v4836_v39  ;;  %v4841_v43 = vadd.s32 127, %v4840_v23  ;;  %v6360_v51 = vsel %vm6359_vm9, 1, %v15516_v33  ;;  %v6361_v13 = vadd.s32 %v6355_v12, %v6351_v28 }
 0x85c   :  { %vm6341_vm10 = vc.u32 %v6339_v62, %v6335_v2  ;;  %v2193_v27 = vmul.f32 %v13263_v48, %v2157_v58  ;;  %v6362_v37 = vadd.s32 %v6360_v51, %v6354_v17  ;;  %v6334_v21 = vshrl.u32 %v6330_v45, 16 }
 0x85d   :  { %v4839_v30 = vor.u32 %v4838_v42, %v4837_v49  ;;  %v4842_v54 = vshll.u32 %v4841_v43, 23  ;;  %v6342_v40 = vsel %vm6341_vm10, 1, %v15516_v33  ;;  %vm6363_vm8 = vc.u32 %v6361_v13, %v6357_v56 }
 0x85e   :  { %v6344_v8 = vadd.s32 %v6342_v40, %v6340_v38  ;;  %v13273_v60 = vadd.f32 %v13270_v55, %v2193_v27  ;;  %v6336_v36 = vshrl.u32 %v6331_v4, 16  ;;  %v6364_v31 = vsel %vm6363_vm8, 1, %v15516_v33 }
 0x85f   :  { %v4843_v34 = vor.u32 4788187, %v4842_v54  ;;  %v2161_v15 = vsel %vm2141_vm15, %v15561_v20, %v2084_v11  ;;  %v6356_v10 = vshrl.u32 %v6352_v50, 16  ;;  %v6366_v57 = vadd.s32 %v6364_v31, %v6362_v37 }
 0x860   :  { %v6345_v63 = vadd.s32 %v6344_v8, %v6334_v21  ;;  %v4571_v19 = vand.u32 2147483647, %v13273_v60  ;;  %v4846_v58 = vcvt.s32.f32 %v4839_v30  ;;  %v6314_v24 = vsel %vm6310_vm11, %v13206_v61, %v6313_v9 }
 0x861   :  { %v4844_v52 = vand.u32 2147483647, %v4843_v34  ;;  %v4574_v45 = vand.u32 2139095040, %v13273_v60  ;;  %v6358_v4 = vshrl.u32 %v6353_v3, 16  ;;  %v6367_v25 = vadd.s32 %v6366_v57, %v6356_v10 }
 0x862   :  { %v6346_v22 = vadd.s32 %v6345_v63, %v6336_v36  ;;  %v2197_v28 = vmul.f32 %v13263_v48, %v2161_v15  ;;  %vm4728_vm5 = vcmp.lt.s32.totalorder %v13039_v26, 0  ;;  %v6365_v50 = vadd.s32 %v6361_v13, %v6357_v56 }
 0x863   :  { %v4847_v7 = vmul.f32 %v4846_v58, %v4844_v52  ;;  %v4575_v18 = vshrl.u32 %v4574_v45, 23  ;;  %v4851_v17 = vsel %vm4728_vm5, %v4850_v14, %v13208_v1  ;;  %v6315_v12 = vsel %vm6309_vm3, %v13253_v44, %v6314_v24 }
 0x864   :  { %v6368_v39 = vadd.s32 %v6367_v25, %v6358_v4  ;;  %v4578_v61 = vand.u32 8388607, %v4571_v19  ;;  %vm6371_vm0 = vc.u32 %v6346_v22, %v6365_v50  ;;  %vm4727_vm12 = vcmp.le.f32.partialorder %v4726_v32, 0.7853982 }
 0x865   :  { %v4848_v9 = vxor.u32 2147483648, %v4847_v7  ;;  %v7288_v3 = vadd.s32 4294967169, %v4575_v18  ;;  %v13294_v2 = vadd.f32 %v13270_v55, %v2197_v28  ;;  %v4853_v1 = vsel %vm4727_vm12, 0, %v4851_v17 }
 0x866   :  { %v6372_v23 = vadd.s32 1, %v6368_v39  ;;  %v6369_v14 = vmul.u32 %v13224_v41, %v6315_v12  ;;  %v4579_v62 = vor.u32 8388608, %v4578_v61  ;;  %v4870_v43 = vadd.s32 3, %v4853_v1 }
 0x867   :  { %v4849_v49 = vsel %vm4728_vm5, %v4848_v9, %v4847_v7  ;;  %v4581_v16 = vadd.s32 1, %v7288_v3  ;;  %v5191_v32 = vand.u32 2147483647, %v13294_v2  ;;  %v5194_v41 = vand.u32 2139095040, %v13294_v2 }
 0x868   :  { %v4852_v44 = vsel %vm4727_vm12, %v13039_v26, %v4849_v49  ;;  %v6373_v6 = vsel %vm6371_vm0, %v6372_v23, %v6368_v39  ;;  %v13299_v30 = vshll.u32 %v4579_v62, 8  ;;  %v13302_v21 = vand.u32 3, %v4870_v43 }
 0x869   :  { %v4854_v56 = vmul.f32 %v4852_v44, %v4852_v44  ;;  %v6374_v42 = vadd.s32 %v6373_v6, %v6369_v14  ;;  %vm4582_vm11 = vcmp.gt.s32.totalorder %v4581_v16, 0  ;;  %v13304_v8 = vadd.s32 %v6365_v50, %v6346_v22 }
 0x86a   :  { %v4583_v38 = vsel %vm4582_vm11, %v4581_v16, 0  ;;  %v13308_v15 = vand.u32 8388607, %v5191_v32  ;;  %vm6278_vm14 = vcmp.lt.s32.totalorder %v13060_v35, 0  ;;  %v13314_v10 = vand.u32 65535, %v13299_v30 }
 0x86b   :  { %v4855_v51 = vmul.f32 -0.001358992, %v4854_v56  ;;  %v4862_v13 = vmul.f32 -0.00019511016, %v4854_v56  ;;  %v6375_v27 = vadd.s32 536870912, %v6374_v42  ;;  %v4585_v11 = vand.u32 31, %v4583_v38 }
 0x86c   :  { %v13311_v63 = vshrl.u32 %v4583_v38, 5  ;;  %v13317_v57 = vshrl.u32 %v13299_v30, 16  ;;  %v5195_v52 = vshrl.u32 %v5194_v41, 23  ;;  %vm4873_vm3 = vcmp.eq.s32.totalorder %v13302_v21, 0 }
 0x86d   :  { %v4856_v54 = vadd.f32 0.041655596, %v4855_v51  ;;  %v4863_v40 = vadd.f32 0.008332121, %v4862_v13  ;;  %v6376_v37 = vshrl.u32 %v6375_v27, 30  ;;  %v4586_v34 = vsub.s32 32, %v4585_v11 }
 0x86e   :  { %v4588_v22 = vshll.u32 %v15517_v46, %v4585_v11  ;;  %vm4876_vm1 = vcmp.eq.s32.totalorder %v13302_v21, 2  ;;  %v4591_v25 = vshll.u32 %v15511_v59, %v4585_v11  ;;  %vm4872_vm2 = vcmp.lt.s32.totalorder %v13302_v21, 2 }
 0x86f   :  { %v4857_v36 = vmul.f32 %v4856_v54, %v4854_v56  ;;  %v4864_v31 = vmul.f32 %v4863_v40, %v4854_v56  ;;  %v6377_v20 = vshll.u32 %v6376_v37, 30  ;;  %v4589_v4 = vshrl.u32 %v15511_v59, %v4586_v34 }
 0x870   :  { %v4592_v28 = vshrl.u32 %v15512_v53, %v4586_v34  ;;  %v4595_v7 = vshrl.u32 %v15513_v0, %v4586_v34  ;;  %vm4869_vm7 = vweird.f32 %v13039_v26  ;;  %v6400_v12 = vsub.s32 4, %v6376_v37 }
 0x871   :  { %v4858_v58 = vadd.f32 -0.4999988, %v4857_v36  ;;  %v4865_v24 = vadd.f32 -0.16666654, %v4864_v31  ;;  %v13319_v45 = vsub.s32 %v6374_v42, %v6377_v20  ;;  %v4594_v39 = vshll.u32 %v15512_v53, %v4585_v11 }
 0x872   :  { %v4597_v61 = vshll.u32 %v15513_v0, %v4585_v11  ;;  %v4598_v9 = vshrl.u32 %v15514_v29, %v4586_v34  ;;  %v4601_v1 = vshrl.u32 %v15515_v47, %v4586_v34  ;;  %vm13339_vm4 = vcmp.le.f32.partialorder %v6276_v5, 0.7853982 }
 0x873   :  { %v4859_v50 = vmul.f32 %v4858_v58, %v4854_v56  ;;  %v4866_v18 = vmul.f32 %v4865_v24, %v4854_v56  ;;  %vm6379_vm13 = vcmp.lt.s32.totalorder %v13319_v45, 0  ;;  %v6380_v17 = vsub.s32 0, %v13319_v45 }
 0x874   :  { %v4590_v6 = vor.u32 %v4589_v4, %v4588_v22  ;;  %v4593_v62 = vor.u32 %v4592_v28, %v4591_v25  ;;  %v4599_v56 = vor.u32 %v4598_v9, %v4597_v61  ;;  %v4596_v38 = vor.u32 %v4595_v7, %v4594_v39 }
 0x875   :  { %v4860_v3 = vadd.f32 1.0, %v4859_v50  ;;  %v4867_v23 = vadd.f32 1.0, %v4866_v18  ;;  %v6381_v49 = vsel %vm6379_vm13, %v6380_v17, %v13319_v45  ;;  %v4600_v51 = vshll.u32 %v15514_v29, %v4585_v11 }
 0x876   :  { %v6382_v16 = vclz %v6381_v49  ;;  %v4587_v27 = vshrl.u32 %v15517_v46, %v4586_v34  ;;  %vm4603_vm9 = vcmp.lt.s32.totalorder %v13311_v63, 1  ;;  %v7300_v41 = vadd.s32 4294967169, %v5195_v52 }
 0x877   :  { %v4868_v42 = vmul.f32 %v4867_v23, %v4852_v44  ;;  %v4877_v43 = vxor.u32 2147483648, %v4860_v3  ;;  %v6401_v5 = vsel %vm6278_vm14, %v6400_v12, %v6376_v37  ;;  %v4602_v40 = vor.u32 %v4601_v1, %v4600_v51 }
 0x878   :  { %v7322_v13 = vadd.s32 4294967294, %v6382_v16  ;;  %vm4606_vm10 = vcmp.lt.s32.totalorder %v13311_v63, 4  ;;  %vm4605_vm5 = vcmp.lt.s32.totalorder %v13311_v63, 3  ;;  %v4611_v44 = vsel %vm4603_vm9, %v4590_v6, %v4593_v62 }
 0x879   :  { %v4874_v54 = vxor.u32 2147483648, %v4868_v42  ;;  %v4612_v11 = vsel %vm4606_vm10, %v4599_v56, 920167782  ;;  %v4878_v36 = vsel %vm4876_vm1, %v4877_v43, %v4868_v42  ;;  %vm4604_vm0 = vcmp.lt.s32.totalorder %v13311_v63, 2 }
 0x87a   :  { %vm7323_vm8 = vcmp.lt.s32.totalorder %v7322_v13, 0  ;;  %v4613_v37 = vsel %vm4605_vm5, %v4596_v38, %v4612_v11  ;;  %v4615_v25 = vsel %vm4603_vm9, %v4593_v62, %v4596_v38  ;;  %v4616_v26 = vsel %vm4606_vm10, %v4602_v40, 1326507024 }
 0x87b   :  { %v4875_v34 = vsel %vm4873_vm3, %v4860_v3, %v4874_v54  ;;  %v6385_v31 = vsel %vm7323_vm8, 0, %v7322_v13  ;;  %v4614_v4 = vsel %vm4604_vm0, %v4611_v44, %v4613_v37  ;;  %v4608_v50 = vsel %vm4606_vm10, %v4596_v38, 2102212464 }
 0x87c   :  { %v4879_v20 = vsel %vm4872_vm2, %v4875_v34, %v4878_v36  ;;  %v6386_v52 = vsub.s32 32, %v6385_v31  ;;  %v6390_v58 = vsub.s32 4294967266, %v6385_v31  ;;  %v6387_v22 = vshll.u32 %v13319_v45, %v6385_v31 }
 0x87d   :  { %v4880_v24 = vsel %vm4869_vm7, nan, %v4879_v20  ;;  %v4644_v7 = vand.u32 65535, %v4614_v4  ;;  %v6403_v45 = vsel %vm13339_vm4, 0, %v6401_v5  ;;  %v4617_v18 = vsel %vm4605_vm5, %v4599_v56, %v4616_v26 }
 0x87e   :  { %7223 = vst.msk [vmem:[%s14704_s3 + $0x80] sm:$0xff] %vm7206_vm6, %v4880_v24  ;;  %v6388_v21 = vshrl.u32 %v13304_v8, %v6386_v52  ;;  %v6391_v28 = vadd.s32 127, %v6390_v58  ;;  %v4645_v17 = vshrl.u32 %v4614_v4, 16  ;;  %v4618_v8 = vsel %vm4604_vm0, %v4615_v25, %v4617_v18 }
 0x87f   :  { %v5201_v61 = vadd.s32 1, %v7300_v41  ;;  %v4622_v9 = vand.u32 65535, %v4618_v8  ;;  %v4623_v3 = vshrl.u32 %v4618_v8, 16  ;;  %v4648_v49 = vmul.u32 %v4644_v7, %v13317_v57 }
 0x880   :  { %v6389_v12 = vor.u32 %v6388_v21, %v6387_v22  ;;  %v6392_v39 = vshll.u32 %v6391_v28, 23  ;;  %v4647_v23 = vmul.u32 %v4645_v17, %v13314_v10  ;;  %v6420_v16 = vadd.s32 3, %v6403_v45 }
 0x881   :  { %v4607_v42 = vsel %vm4603_vm9, %v4587_v27, %v4590_v6  ;;  %v4609_v56 = vsel %vm4605_vm5, %v4593_v62, %v4608_v50  ;;  %v4625_v38 = vmul.u32 %v4623_v3, %v13314_v10  ;;  %v4626_v51 = vmul.u32 %v4622_v9, %v13317_v57 }
 0x882   :  { %v6393_v1 = vor.u32 4788187, %v6392_v39  ;;  %v6396_v43 = vcvt.s32.f32 %v6389_v12  ;;  %v4646_v13 = vmul.u32 %v4644_v7, %v13314_v10  ;;  %v4649_v54 = vmul.u32 %v4645_v17, %v13317_v57 }
 0x883   :  { %v4650_v5 = vshll.u32 %v4647_v23, 16  ;;  %vm5202_vm12 = vcmp.gt.s32.totalorder %v5201_v61, 0  ;;  %v4624_v40 = vmul.u32 %v4622_v9, %v13314_v10  ;;  %v4627_v44 = vmul.u32 %v4623_v3, %v13317_v57 }
 0x884   :  { %v6394_v41 = vand.u32 2147483647, %v6393_v1  ;;  %v4628_v6 = vshll.u32 %v4625_v38, 16  ;;  %v4652_v27 = vshll.u32 %v4648_v49, 16  ;;  %v4630_v62 = vshll.u32 %v4626_v51, 16 }
 0x885   :  { %vm4654_vm11 = vc.u32 %v4646_v13, %v4650_v5  ;;  %v4656_v34 = vadd.s32 %v4650_v5, %v4646_v13  ;;  %v5203_v37 = vsel %vm5202_vm12, %v5201_v61, 0  ;;  %v4610_v10 = vsel %vm4604_vm0, %v4607_v42, %v4609_v56 }
 0x886   :  { %v6397_v11 = vmul.f32 %v6396_v43, %v6394_v41  ;;  %vm4632_vm3 = vc.u32 %v4624_v40, %v4628_v6  ;;  %v4634_v36 = vadd.s32 %v4628_v6, %v4624_v40  ;;  %v4655_v31 = vsel %vm4654_vm11, 1, %v15516_v33 }
 0x887   :  { %v4633_v52 = vsel %vm4632_vm3, 1, %v15516_v33  ;;  %v4657_v58 = vadd.s32 %v4655_v31, %v4649_v54  ;;  %vm4658_vm1 = vc.u32 %v4656_v34, %v4652_v27  ;;  %v4651_v25 = vshrl.u32 %v4647_v23, 16 }
 0x888   :  { %v6398_v20 = vxor.u32 2147483648, %v6397_v11  ;;  %v4635_v57 = vadd.s32 %v4633_v52, %v4627_v44  ;;  %vm4636_vm2 = vc.u32 %v4634_v36, %v4630_v62  ;;  %v4659_v24 = vsel %vm4658_vm1, 1, %v15516_v33 }
 0x889   :  { %v4637_v4 = vsel %vm4636_vm2, 1, %v15516_v33  ;;  %v4661_v21 = vadd.s32 %v4659_v24, %v4657_v58  ;;  %v4629_v26 = vshrl.u32 %v4625_v38, 16  ;;  %v5205_v45 = vand.u32 31, %v5203_v37 }
 0x88a   :  { %v6399_v22 = vsel %vm6278_vm14, %v6398_v20, %v6397_v11  ;;  %v4639_v7 = vadd.s32 %v4637_v4, %v4635_v57  ;;  %v4653_v50 = vshrl.u32 %v4648_v49, 16  ;;  %v5199_v17 = vor.u32 8388608, %v13308_v15 }
 0x88b   :  { %v6402_v28 = vsel %vm13339_vm4, %v13060_v35, %v6399_v22  ;;  %v4662_v18 = vadd.s32 %v4661_v21, %v4651_v25  ;;  %v13409_v12 = vand.u32 3, %v6420_v16  ;;  %v4631_v39 = vshrl.u32 %v4626_v51, 16 }
 0x88c   :  { %v6404_v63 = vmul.f32 %v6402_v28, %v6402_v28  ;;  %v4640_v8 = vadd.s32 %v4639_v7, %v4629_v26  ;;  %v13411_v61 = vsub.s32 32, %v5205_v45  ;;  %v4664_v14 = vmul.u32 %v13299_v30, %v4610_v10 }
 0x88d   :  { %v4663_v23 = vadd.s32 %v4662_v18, %v4653_v50  ;;  %v13416_v42 = vadd.s32 %v4656_v34, %v4652_v27  ;;  %v13418_v56 = vshrl.u32 %v5203_v37, 5  ;;  %v5208_v38 = vshll.u32 %v15517_v46, %v5205_v45 }
 0x88e   :  { %v6405_v9 = vmul.f32 -0.001358992, %v6404_v63  ;;  %v6412_v3 = vmul.f32 -0.00019511016, %v6404_v63  ;;  %v13414_v1 = vadd.s32 %v4640_v8, %v4631_v39  ;;  %v5209_v15 = vshrl.u32 %v15511_v59, %v13411_v61 }
 0x88f   :  { %v4667_v43 = vadd.s32 1, %v4663_v23  ;;  %v5211_v51 = vshll.u32 %v15511_v59, %v5205_v45  ;;  %v5212_v30 = vshrl.u32 %v15512_v53, %v13411_v61  ;;  %v5215_v13 = vshrl.u32 %v15513_v0, %v13411_v61 }
 0x890   :  { %v6406_v49 = vadd.f32 0.041655596, %v6405_v9  ;;  %v6413_v16 = vadd.f32 0.008332121, %v6412_v3  ;;  %vm4666_vm14 = vc.u32 %v13414_v1, %v13416_v42  ;;  %v5214_v40 = vshll.u32 %v15512_v53, %v5205_v45 }
 0x891   :  { %v4668_v5 = vsel %vm4666_vm14, %v4667_v43, %v4663_v23  ;;  %v13431_v6 = vor.u32 %v5209_v15, %v5208_v38  ;;  %v5217_v27 = vshll.u32 %v15513_v0, %v5205_v45  ;;  %v5218_v11 = vshrl.u32 %v15514_v29, %v13411_v61 }
 0x892   :  { %v6407_v41 = vmul.f32 %v6406_v49, %v6404_v63  ;;  %v6414_v54 = vmul.f32 %v6413_v16, %v6404_v63  ;;  %v4669_v44 = vadd.s32 %v4668_v5, %v4664_v14  ;;  %v5220_v36 = vshll.u32 %v15514_v29, %v5205_v45 }
 0x893   :  { %v5221_v31 = vshrl.u32 %v15515_v47, %v13411_v61  ;;  %v13439_v20 = vor.u32 %v5212_v30, %v5211_v51  ;;  %v5216_v52 = vor.u32 %v5215_v13, %v5214_v40  ;;  %v5219_v58 = vor.u32 %v5218_v11, %v5217_v27 }
 0x894   :  { %v6408_v62 = vadd.f32 -0.4999988, %v6407_v41  ;;  %v6415_v34 = vadd.f32 -0.16666654, %v6414_v54  ;;  %v4670_v37 = vadd.s32 536870912, %v4669_v44  ;;  %vm5226_vm13 = vcmp.lt.s32.totalorder %v13418_v56, 4 }
 0x895   :  { %v5222_v24 = vor.u32 %v5221_v31, %v5220_v36  ;;  %vm6419_vm7 = vweird.f32 %v13060_v35  ;;  %v5232_v4 = vsel %vm5226_vm13, %v5219_v58, 920167782  ;;  %v13447_v25 = vshll.u32 %v5199_v17, 8 }
 0x896   :  { %v6409_v10 = vmul.f32 %v6408_v62, %v6404_v63  ;;  %v6416_v57 = vmul.f32 %v6415_v34, %v6404_v63  ;;  %v13443_v22 = vshrl.u32 %v4670_v37, 30  ;;  %vm5223_vm4 = vcmp.lt.s32.totalorder %v13418_v56, 1 }
 0x897   :  { %vm5225_vm9 = vcmp.lt.s32.totalorder %v13418_v56, 3  ;;  %v5231_v45 = vsel %vm5223_vm4, %v13431_v6, %v13439_v20  ;;  %v5235_v50 = vsel %vm5223_vm4, %v13439_v20, %v5216_v52  ;;  %vm6422_vm10 = vcmp.lt.s32.totalorder %v13409_v12, 2 }
 0x898   :  { %v6410_v21 = vadd.f32 1.0, %v6409_v10  ;;  %v6417_v26 = vadd.f32 1.0, %v6416_v57  ;;  %v4672_v7 = vshll.u32 %v13443_v22, 30  ;;  %v5233_v63 = vsel %vm5225_vm9, %v5216_v52, %v5232_v4 }
 0x899   :  { %v5236_v39 = vsel %vm5226_vm13, %v5222_v24, 1326507024  ;;  %vm6423_vm8 = vcmp.eq.s32.totalorder %v13409_v12, 0  ;;  %vm5224_vm5 = vcmp.lt.s32.totalorder %v13418_v56, 2  ;;  %vm6426_vm0 = vcmp.eq.s32.totalorder %v13409_v12, 2 }
 0x89a   :  { %v6418_v18 = vmul.f32 %v6417_v26, %v6402_v28  ;;  %v6427_v17 = vxor.u32 2147483648, %v6410_v21  ;;  %v4673_v8 = vsub.s32 %v4669_v44, %v4672_v7  ;;  %v5237_v9 = vsel %vm5225_vm9, %v5219_v58, %v5236_v39 }
 0x89b   :  { %v5234_v28 = vsel %vm5224_vm5, %v5231_v45, %v5233_v63  ;;  %v5238_v23 = vsel %vm5224_vm5, %v5235_v50, %v5237_v9  ;;  %v5240_v15 = vand.u32 65535, %v13447_v25  ;;  %v5241_v38 = vshrl.u32 %v13447_v25, 16  ;;  %v2104_v63 = vpop.permute.xlu2 %2103 }
 0x89c   :  { %v6424_v3 = vxor.u32 2147483648, %v6418_v18  ;;  %vm4674_vm12 = vcmp.lt.s32.totalorder %v4673_v8, 0  ;;  %v4675_v14 = vsub.s32 0, %v4673_v8  ;;  %v5242_v49 = vand.u32 65535, %v5238_v23 }
 0x89d   :  { %v6428_v43 = vsel %vm6426_vm0, %v6427_v17, %v6418_v18  ;;  %v5243_v51 = vshrl.u32 %v5238_v23, 16  ;;  %v5264_v41 = vand.u32 65535, %v5234_v28  ;;  %v5265_v54 = vshrl.u32 %v5234_v28, 16 }
 0x89e   :  { %v6425_v16 = vsel %vm6423_vm8, %v6410_v21, %v6424_v3  ;;  %v4676_v13 = vsel %vm4674_vm12, %v4675_v14, %v4673_v8  ;;  %v5246_v27 = vmul.u32 %v5242_v49, %v5241_v38  ;;  %v5207_v11 = vshrl.u32 %v15517_v46, %v13411_v61  ;;  %v2082_v14 = vpop.permute.xlu0 %2081 }
 0x89f   :  { %v6429_v30 = vsel %vm6422_vm10, %v6425_v16, %v6428_v43  ;;  %v4677_v40 = vclz %v4676_v13  ;;  %v5245_v44 = vmul.u32 %v5243_v51, %v5240_v15  ;;  %v4665_v12 = vadd.s32 %v13416_v42, %v13414_v1 }
 0x8a0   :  { %v6430_v5 = vsel %vm6419_vm7, nan, %v6429_v30  ;;  %v5244_v34 = vmul.u32 %v5242_v49, %v5240_v15  ;;  %v5228_v35 = vsel %vm5226_vm13, %v5216_v52, 2102212464  ;;  %v5247_v31 = vmul.u32 %v5243_v51, %v5241_v38 }
 0x8a1   :  { %7233 = vst.msk [vmem:[%s14704_s3 + $0xd0] sm:$0xff] %vm7206_vm6, %v6430_v5  ;;  %v7289_v62 = vadd.s32 4294967294, %v4677_v40  ;;  %v5248_v36 = vshll.u32 %v5245_v44, 16  ;;  %v5250_v37 = vshll.u32 %v5246_v27, 16  ;;  %v5267_v58 = vmul.u32 %v5265_v54, %v5240_v15  ;;  %v15565_v5 = vld [vmem:[#allocation22_spill] sm:$0xff] }
 0x8a2   :  { %v5266_v57 = vmul.u32 %v5264_v41, %v5240_v15  ;;  %vm4573_vm1 = vcmp.lt.s32.totalorder %v13273_v60, 0  ;;  %v5268_v4 = vmul.u32 %v5264_v41, %v5241_v38  ;;  %v5249_v26 = vshrl.u32 %v5245_v44, 16 }
 0x8a3   :  { %vm7290_vm11 = vcmp.lt.s32.totalorder %v7289_v62, 0  ;;  %vm5252_vm3 = vc.u32 %v5244_v34, %v5248_v36  ;;  %v5254_v10 = vadd.s32 %v5248_v36, %v5244_v34  ;;  %v5270_v1 = vshll.u32 %v5267_v58, 16 }
 0x8a4   :  { %v4680_v24 = vsel %vm7290_vm11, 0, %v7289_v62  ;;  %v5253_v61 = vsel %vm5252_vm3, 1, %v15516_v33  ;;  %v5269_v52 = vmul.u32 %v5265_v54, %v5241_v38  ;;  %v5272_v3 = vshll.u32 %v5268_v4, 16 }
 0x8a5   :  { %v4681_v42 = vsub.s32 32, %v4680_v24  ;;  %v4685_v21 = vsub.s32 4294967266, %v4680_v24  ;;  %v5255_v7 = vadd.s32 %v5253_v61, %v5247_v31  ;;  %v4682_v45 = vshll.u32 %v4673_v8, %v4680_v24  ;;  %v15564_v8 = vld [vmem:[#allocation275_spill] sm:$0xff] }
 0x8a6   :  { %vm5256_vm2 = vc.u32 %v5254_v10, %v5250_v37  ;;  %vm5274_vm14 = vc.u32 %v5266_v57, %v5270_v1  ;;  %v5276_v28 = vadd.s32 %v5270_v1, %v5266_v57  ;;  %v4695_v16 = vsub.s32 4, %v13443_v22 }
 0x8a7   :  { %v4683_v50 = vshrl.u32 %v4665_v12, %v4681_v42  ;;  %v4686_v18 = vadd.s32 127, %v4685_v21  ;;  %v5257_v17 = vsel %vm5256_vm2, 1, %v15516_v33  ;;  %v5275_v39 = vsel %vm5274_vm14, 1, %v15516_v33 }
 0x8a8   :  { %v5259_v9 = vadd.s32 %v5257_v17, %v5255_v7  ;;  %v5277_v23 = vadd.s32 %v5275_v39, %v5269_v52  ;;  %v2171_v43 = vsel %vm2141_vm15, %v15564_v8, %v2104_v63  ;;  %v5227_v38 = vsel %vm5223_vm4, %v5207_v11, %v13431_v6 }
 0x8a9   :  { %v4684_v15 = vor.u32 %v4683_v50, %v4682_v45  ;;  %v4687_v49 = vshll.u32 %v4686_v18, 23  ;;  %vm5278_vm13 = vc.u32 %v5276_v28, %v5272_v3  ;;  %v2207_v30 = vmul.f32 %v13263_v48, %v2171_v43 }
 0x8aa   :  { %v5260_v51 = vadd.s32 %v5259_v9, %v5249_v26  ;;  %v5251_v41 = vshrl.u32 %v5246_v27, 16  ;;  %v5279_v54 = vsel %vm5278_vm13, 1, %v15516_v33  ;;  %v2160_v40 = vsel %vm2141_vm15, %v15565_v5, %v2082_v14 }
 0x8ab   :  { %v4688_v13 = vor.u32 4788187, %v4687_v49  ;;  %v5229_v44 = vsel %vm5225_vm9, %v13439_v20, %v5228_v35  ;;  %v5271_v12 = vshrl.u32 %v5267_v58, 16  ;;  %v5281_v62 = vadd.s32 %v5279_v54, %v5277_v23 }
 0x8ac   :  { %v13507_v34 = vadd.f32 %v13270_v55, %v2207_v30  ;;  %v4691_v11 = vcvt.s32.f32 %v4684_v15  ;;  %v4696_v27 = vsel %vm4573_vm1, %v4695_v16, %v13443_v22  ;;  %v5261_v36 = vadd.s32 %v5260_v51, %v5251_v41 }
 0x8ad   :  { %v4689_v6 = vand.u32 2147483647, %v4688_v13  ;;  %v5273_v31 = vshrl.u32 %v5268_v4, 16  ;;  %v5282_v37 = vadd.s32 %v5281_v62, %v5271_v12  ;;  %v2196_v57 = vmul.f32 %v13263_v48, %v2160_v40 }
 0x8ae   :  { %v6741_v10 = vand.u32 2147483647, %v13507_v34  ;;  %vm13516_vm7 = vcmp.le.f32.partialorder %v4571_v19, 0.7853982  ;;  %v5280_v58 = vadd.s32 %v5276_v28, %v5272_v3  ;;  %v6744_v24 = vand.u32 2139095040, %v13507_v34 }
 0x8af   :  { %v4692_v35 = vmul.f32 %v4691_v11, %v4689_v6  ;;  %v4698_v22 = vsel %vm13516_vm7, 0, %v4696_v27  ;;  %v5230_v61 = vsel %vm5224_vm5, %v5227_v38, %v5229_v44  ;;  %v5283_v4 = vadd.s32 %v5282_v37, %v5273_v31 }
 0x8b0   :  { %vm5286_vm4 = vc.u32 %v5261_v36, %v5280_v58  ;;  %v6745_v48 = vshrl.u32 %v6744_v24, 23  ;;  %v6748_v19 = vand.u32 8388607, %v6741_v10  ;;  %v13528_v21 = vadd.f32 %v13270_v55, %v2196_v57 }
 0x8b1   :  { %v4693_v1 = vxor.u32 2147483648, %v4692_v35  ;;  %v5287_v42 = vadd.s32 1, %v5283_v4  ;;  %v5284_v7 = vmul.u32 %v13447_v25, %v5230_v61  ;;  %v4715_v52 = vadd.s32 3, %v4698_v22 }
 0x8b2   :  { %v7330_v45 = vadd.s32 4294967169, %v6745_v48  ;;  %v6749_v17 = vor.u32 8388608, %v6748_v19  ;;  %v5039_v9 = vand.u32 2139095040, %v13528_v21  ;;  %vm5193_vm10 = vcmp.lt.s32.totalorder %v13294_v2, 0 }
 0x8b3   :  { %v4694_v26 = vsel %vm4573_vm1, %v4693_v1, %v4692_v35  ;;  %v5288_v63 = vsel %vm5286_vm4, %v5287_v42, %v5283_v4  ;;  %v13537_v23 = vand.u32 3, %v4715_v52  ;;  %v5285_v13 = vadd.s32 %v5280_v58, %v5261_v36 }
 0x8b4   :  { %v4697_v56 = vsel %vm13516_vm7, %v13273_v60, %v4694_v26  ;;  %v5289_v18 = vadd.s32 %v5288_v63, %v5284_v7  ;;  %v6751_v39 = vadd.s32 1, %v7330_v45  ;;  %v13539_v16 = vshll.u32 %v6749_v17, 8 }
 0x8b5   :  { %v4699_v50 = vmul.f32 %v4697_v56, %v4697_v56  ;;  %v5040_v43 = vshrl.u32 %v5039_v9, 23  ;;  %vm4721_vm8 = vcmp.eq.s32.totalorder %v13537_v23, 2  ;;  %v5036_v54 = vand.u32 2147483647, %v13528_v21 }
 0x8b6   :  { %v5290_v28 = vadd.s32 536870912, %v5289_v18  ;;  %vm6752_vm9 = vcmp.gt.s32.totalorder %v6751_v39, 0  ;;  %v13547_v12 = vand.u32 65535, %v13539_v16  ;;  %vm4718_vm5 = vcmp.eq.s32.totalorder %v13537_v23, 0 }
 0x8b7   :  { %v4700_v55 = vmul.f32 -0.001358992, %v4699_v50  ;;  %v4707_v3 = vmul.f32 -0.00019511016, %v4699_v50  ;;  %v6753_v25 = vsel %vm6752_vm9, %v6751_v39, 0  ;;  %v13553_v27 = vadd.s32 4294967169, %v5040_v43 }
 0x8b8   :  { %v5291_v49 = vshrl.u32 %v5290_v28, 30  ;;  %v6755_v8 = vand.u32 31, %v6753_v25  ;;  %v13550_v6 = vshrl.u32 %v6753_v25, 5  ;;  %vm4717_vm0 = vcmp.lt.s32.totalorder %v13537_v23, 2 }
 0x8b9   :  { %v4701_v14 = vadd.f32 0.041655596, %v4700_v55  ;;  %v4708_v15 = vadd.f32 0.008332121, %v4707_v3  ;;  %vm4714_vm11 = vweird.f32 %v13273_v60  ;;  %vm13578_vm3 = vcmp.le.f32.partialorder %v5191_v32, 0.7853982 }
 0x8ba   :  { %v5292_v30 = vshll.u32 %v5291_v49, 30  ;;  %v6756_v41 = vsub.s32 32, %v6755_v8  ;;  %v5315_v62 = vsub.s32 4, %v5291_v49  ;;  %v6758_v11 = vshll.u32 %v15517_v46, %v6755_v8 }
 0x8bb   :  { %v4702_v38 = vmul.f32 %v4701_v14, %v4699_v50  ;;  %v4709_v51 = vmul.f32 %v4708_v15, %v4699_v50  ;;  %v6761_v20 = vshll.u32 %v15511_v59, %v6755_v8  ;;  %v6764_v58 = vshll.u32 %v15512_v53, %v6755_v8 }
 0x8bc   :  { %v13544_v44 = vsub.s32 %v5289_v18, %v5292_v30  ;;  %v6759_v57 = vshrl.u32 %v15511_v59, %v6756_v41  ;;  %v6762_v35 = vshrl.u32 %v15512_v53, %v6756_v41  ;;  %v6765_v4 = vshrl.u32 %v15513_v0, %v6756_v41 }
 0x8bd   :  { %v4703_v5 = vadd.f32 -0.4999988, %v4702_v38  ;;  %v4710_v40 = vadd.f32 -0.16666654, %v4709_v51  ;;  %v13567_v48 = vsel %vm5193_vm10, %v5315_v62, %v5291_v49  ;;  %v6757_v19 = vshrl.u32 %v15517_v46, %v6756_v41 }
 0x8be   :  { %vm5294_vm12 = vcmp.lt.s32.totalorder %v13544_v44, 0  ;;  %v5295_v37 = vsub.s32 0, %v13544_v44  ;;  %v6768_v42 = vshrl.u32 %v15514_v29, %v6756_v41  ;;  %v6767_v45 = vshll.u32 %v15513_v0, %v6755_v8 }
 0x8bf   :  { %v4704_v36 = vmul.f32 %v4703_v5, %v4699_v50  ;;  %v4711_v31 = vmul.f32 %v4710_v40, %v4699_v50  ;;  %v6771_v52 = vshrl.u32 %v15515_v47, %v6756_v41  ;;  %v6760_v50 = vor.u32 %v6759_v57, %v6758_v11 }
 0x8c0   :  { %v5296_v61 = vsel %vm5294_vm12, %v5295_v37, %v13544_v44  ;;  %v6763_v18 = vor.u32 %v6762_v35, %v6761_v20  ;;  %v6770_v17 = vshll.u32 %v15514_v29, %v6755_v8  ;;  %v6766_v55 = vor.u32 %v6765_v4, %v6764_v58 }
 0x8c1   :  { %v4705_v24 = vadd.f32 1.0, %v4704_v36  ;;  %v4712_v22 = vadd.f32 1.0, %v4711_v31  ;;  %v5297_v1 = vclz %v5296_v61  ;;  %v6769_v3 = vor.u32 %v6768_v42, %v6767_v45 }
 0x8c2   :  { %v6772_v28 = vor.u32 %v6771_v52, %v6770_v17  ;;  %vm6773_vm2 = vcmp.lt.s32.totalorder %v13550_v6, 1  ;;  %vm6774_vm14 = vcmp.lt.s32.totalorder %v13550_v6, 2  ;;  %vm6775_vm13 = vcmp.lt.s32.totalorder %v13550_v6, 3 }
 0x8c3   :  { %v4713_v26 = vmul.f32 %v4712_v22, %v4697_v56  ;;  %v4722_v7 = vxor.u32 2147483648, %v4705_v24  ;;  %v7301_v63 = vadd.s32 4294967294, %v5297_v1  ;;  %vm6776_vm7 = vcmp.lt.s32.totalorder %v13550_v6, 4 }
 0x8c4   :  { %v6777_v8 = vsel %vm6773_vm2, %v6757_v19, %v6760_v50  ;;  %v6778_v38 = vsel %vm6776_vm7, %v6766_v55, 2102212464  ;;  %v6781_v51 = vsel %vm6773_vm2, %v6760_v50, %v6763_v18  ;;  %v6782_v30 = vsel %vm6776_vm7, %v6769_v3, 920167782 }
 0x8c5   :  { %v4719_v39 = vxor.u32 2147483648, %v4713_v26  ;;  %v4723_v9 = vsel %vm4721_vm8, %v4722_v7, %v4713_v26  ;;  %vm7302_vm1 = vcmp.lt.s32.totalorder %v7301_v63, 0  ;;  %v6783_v60 = vsel %vm6775_vm13, %v6766_v55, %v6782_v30 }
 0x8c6   :  { %v5300_v14 = vsel %vm7302_vm1, 0, %v7301_v63  ;;  %v6779_v40 = vsel %vm6775_vm13, %v6763_v18, %v6778_v38  ;;  %v6784_v62 = vsel %vm6774_vm14, %v6781_v51, %v6783_v60  ;;  %v6785_v11 = vsel %vm6773_vm2, %v6763_v18, %v6766_v55 }
 0x8c7   :  { %v4720_v25 = vsel %vm4718_vm5, %v4705_v24, %v4719_v39  ;;  %v5301_v15 = vsub.s32 32, %v5300_v14  ;;  %v5305_v49 = vsub.s32 4294967266, %v5300_v14  ;;  %v5302_v23 = vshll.u32 %v13544_v44, %v5300_v14 }
 0x8c8   :  { %v4724_v32 = vsel %vm4717_vm0, %v4720_v25, %v4723_v9  ;;  %v6786_v36 = vsel %vm6776_vm7, %v6772_v28, 1326507024  ;;  %v6814_v44 = vand.u32 65535, %v6784_v62  ;;  %v6791_v20 = vshrl.u32 %v13539_v16, 16 }
 0x8c9   :  { %v4725_v43 = vsel %vm4714_vm11, nan, %v4724_v32  ;;  %v5303_v41 = vshrl.u32 %v5285_v13, %v5301_v15  ;;  %v5306_v5 = vadd.s32 127, %v5305_v49  ;;  %v6787_v13 = vsel %vm6775_vm13, %v6769_v3, %v6786_v36 }
 0x8ca   :  { %7222 = vst.msk [vmem:[%s14704_s3 + $0x78] sm:$0xff] %vm7206_vm6, %v4725_v43  ;;  %v6788_v57 = vsel %vm6774_vm14, %v6785_v11, %v6787_v13  ;;  %v6815_v35 = vshrl.u32 %v6784_v62, 16  ;;  %v5046_v58 = vadd.s32 1, %v13553_v27  ;;  %v13623_v4 = vand.u32 8388607, %v5036_v54 }
 0x8cb   :  { %v5304_v31 = vor.u32 %v5303_v41, %v5302_v23  ;;  %v5307_v37 = vshll.u32 %v5306_v5, 23  ;;  %v6792_v22 = vand.u32 65535, %v6788_v57  ;;  %v6793_v61 = vshrl.u32 %v6788_v57, 16 }
 0x8cc   :  { %v5318_v1 = vsel %vm13578_vm3, 0, %v13567_v48  ;;  %v13630_v19 = vsel %vm6774_vm14, %v6777_v8, %v6779_v40  ;;  %v6817_v42 = vmul.u32 %v6815_v35, %v13547_v12  ;;  %v6818_v26 = vmul.u32 %v6814_v44, %v6791_v20 }
 0x8cd   :  { %v5308_v24 = vor.u32 4788187, %v5307_v37  ;;  %v5311_v27 = vcvt.s32.f32 %v5304_v31  ;;  %v6795_v45 = vmul.u32 %v6793_v61, %v13547_v12  ;;  %v6796_v52 = vmul.u32 %v6792_v22, %v6791_v20 }
 0x8ce   :  { %v6816_v63 = vmul.u32 %v6814_v44, %v13547_v12  ;;  %v6819_v50 = vmul.u32 %v6815_v35, %v6791_v20  ;;  %v6820_v18 = vshll.u32 %v6817_v42, 16  ;;  %vm5047_vm4 = vcmp.gt.s32.totalorder %v5046_v58, 0 }
 0x8cf   :  { %v5309_v7 = vand.u32 2147483647, %v5308_v24  ;;  %v6794_v48 = vmul.u32 %v6792_v22, %v13547_v12  ;;  %v6797_v39 = vmul.u32 %v6793_v61, %v6791_v20  ;;  %v6798_v6 = vshll.u32 %v6795_v45, 16 }
 0x8d0   :  { %v6800_v9 = vshll.u32 %v6796_v52, 16  ;;  %v6822_v55 = vshll.u32 %v6818_v26, 16  ;;  %vm6824_vm9 = vc.u32 %v6816_v63, %v6820_v18  ;;  %v6826_v3 = vadd.s32 %v6820_v18, %v6816_v63 }
 0x8d1   :  { %v5312_v17 = vmul.f32 %v5311_v27, %v5309_v7  ;;  %vm6802_vm8 = vc.u32 %v6794_v48, %v6798_v6  ;;  %v6804_v25 = vadd.s32 %v6798_v6, %v6794_v48  ;;  %v6825_v14 = vsel %vm6824_vm9, 1, %v15516_v33 }
 0x8d2   :  { %v6803_v32 = vsel %vm6802_vm8, 1, %v15516_v33  ;;  %v6821_v15 = vshrl.u32 %v6817_v42, 16  ;;  %v6827_v49 = vadd.s32 %v6825_v14, %v6819_v50  ;;  %vm6828_vm5 = vc.u32 %v6826_v3, %v6822_v55 }
 0x8d3   :  { %v5313_v28 = vxor.u32 2147483648, %v5312_v17  ;;  %v6805_v12 = vadd.s32 %v6803_v32, %v6797_v39  ;;  %vm6806_vm0 = vc.u32 %v6804_v25, %v6800_v9  ;;  %v6829_v43 = vsel %vm6828_vm5, 1, %v15516_v33 }
 0x8d4   :  { %v6807_v51 = vsel %vm6806_vm0, 1, %v15516_v33  ;;  %v6831_v30 = vadd.s32 %v6829_v43, %v6827_v49  ;;  %v5048_v23 = vsel %vm5047_vm4, %v5046_v58, 0  ;;  %v6799_v5 = vshrl.u32 %v6795_v45, 16 }
 0x8d5   :  { %v5314_v8 = vsel %vm5193_vm10, %v5313_v28, %v5312_v17  ;;  %v6809_v60 = vadd.s32 %v6807_v51, %v6805_v12  ;;  %v5050_v40 = vand.u32 31, %v5048_v23  ;;  %v6801_v62 = vshrl.u32 %v6796_v52, 16 }
 0x8d6   :  { %v5317_v38 = vsel %vm13578_vm3, %v13294_v2, %v5314_v8  ;;  %v6823_v11 = vshrl.u32 %v6818_v26, 16  ;;  %v6832_v36 = vadd.s32 %v6831_v30, %v6821_v15  ;;  %v5335_v57 = vadd.s32 3, %v5318_v1 }
 0x8d7   :  { %v5319_v41 = vmul.f32 %v5317_v38, %v5317_v38  ;;  %v6810_v13 = vadd.s32 %v6809_v60, %v6799_v5  ;;  %v13646_v44 = vsub.s32 32, %v5050_v40  ;;  %v6834_v20 = vmul.u32 %v13539_v16, %v13630_v19 }
 0x8d8   :  { %v6833_v56 = vadd.s32 %v6832_v36, %v6823_v11  ;;  %v5044_v35 = vor.u32 8388608, %v13623_v4  ;;  %v13653_v61 = vadd.s32 %v6826_v3, %v6822_v55  ;;  %v13655_v26 = vshrl.u32 %v5048_v23, 5 }
 0x8d9   :  { %v5320_v31 = vmul.f32 -0.001358992, %v5319_v41  ;;  %v5327_v37 = vmul.f32 -0.00019511016, %v5319_v41  ;;  %v13651_v22 = vadd.s32 %v6810_v13, %v6801_v62  ;;  %v5053_v7 = vshll.u32 %v15517_v46, %v5050_v40 }
 0x8da   :  { %v6837_v42 = vadd.s32 1, %v6833_v56  ;;  %v5054_v1 = vshrl.u32 %v15511_v59, %v13646_v44  ;;  %v5057_v16 = vshrl.u32 %v15512_v53, %v13646_v44  ;;  %v5056_v19 = vshll.u32 %v15511_v59, %v5050_v40 }
 0x8db   :  { %v5321_v58 = vadd.f32 0.041655596, %v5320_v31  ;;  %v5328_v24 = vadd.f32 0.008332121, %v5327_v37  ;;  %vm6836_vm10 = vc.u32 %v13651_v22, %v13653_v61  ;;  %v5059_v52 = vshll.u32 %v15512_v53, %v5050_v40 }
 0x8dc   :  { %v6838_v4 = vsel %vm6836_vm10, %v6837_v42, %v6833_v56  ;;  %v5060_v63 = vshrl.u32 %v15513_v0, %v13646_v44  ;;  %v5055_v48 = vor.u32 %v5054_v1, %v5053_v7  ;;  %v5062_v39 = vshll.u32 %v15513_v0, %v5050_v40  ;;  %v2090_v7 = vpop.permute.xlu1 %2089 }
 0x8dd   :  { %v5322_v27 = vmul.f32 %v5321_v58, %v5319_v41  ;;  %v5329_v45 = vmul.f32 %v5328_v24, %v5319_v41  ;;  %v6839_v17 = vadd.s32 %v6838_v4, %v6834_v20  ;;  %v5063_v6 = vshrl.u32 %v15514_v29, %v13646_v44 }
 0x8de   :  { %v5065_v9 = vshll.u32 %v15514_v29, %v5050_v40  ;;  %v5066_v55 = vshrl.u32 %v15515_v47, %v13646_v44  ;;  %v13674_v14 = vor.u32 %v5057_v16, %v5056_v19  ;;  %v5336_v32 = vand.u32 3, %v5335_v57 }
 0x8df   :  { %v5323_v50 = vadd.f32 -0.4999988, %v5322_v27  ;;  %v5330_v18 = vadd.f32 -0.16666654, %v5329_v45  ;;  %v6840_v25 = vadd.s32 536870912, %v6839_v17  ;;  %v5061_v15 = vor.u32 %v5060_v63, %v5059_v52 }
 0x8e0   :  { %v5064_v49 = vor.u32 %v5063_v6, %v5062_v39  ;;  %v5067_v8 = vor.u32 %v5066_v55, %v5065_v9  ;;  %vm5071_vm12 = vcmp.lt.s32.totalorder %v13655_v26, 4  ;;  %vm5334_vm11 = vweird.f32 %v13294_v2 }
 0x8e1   :  { %v5324_v3 = vmul.f32 %v5323_v50, %v5319_v41  ;;  %v5331_v28 = vmul.f32 %v5330_v18, %v5319_v41  ;;  %v13676_v51 = vshrl.u32 %v6840_v25, 30  ;;  %vm5068_vm3 = vcmp.lt.s32.totalorder %v13655_v26, 1  ;;  %v15570_v50 = vld [vmem:[#allocation20_spill] sm:$0xff] }
 0x8e2   :  { %vm5070_vm1 = vcmp.lt.s32.totalorder %v13655_v26, 3  ;;  %v5077_v30 = vsel %vm5071_vm12, %v5064_v49, 920167782  ;;  %v5076_v60 = vsel %vm5068_vm3, %v5055_v48, %v13674_v14  ;;  %vm5337_vm2 = vcmp.lt.s32.totalorder %v5336_v32, 2 }
 0x8e3   :  { %v5325_v12 = vadd.f32 1.0, %v5324_v3  ;;  %v5332_v43 = vadd.f32 1.0, %v5331_v28  ;;  %v6842_v5 = vshll.u32 %v13676_v51, 30  ;;  %v5078_v40 = vsel %vm5070_vm1, %v5061_v15, %v5077_v30 }
 0x8e4   :  { %v5081_v62 = vsel %vm5071_vm12, %v5067_v8, 1326507024  ;;  %v13692_v11 = vshll.u32 %v5044_v35, 8  ;;  %vm5069_vm14 = vcmp.lt.s32.totalorder %v13655_v26, 2  ;;  %vm5338_vm13 = vcmp.eq.s32.totalorder %v5336_v32, 0 }
 0x8e5   :  { %v5333_v23 = vmul.f32 %v5332_v43, %v5317_v38  ;;  %v5342_v41 = vxor.u32 2147483648, %v5325_v12  ;;  %v6843_v31 = vsub.s32 %v6839_v17, %v6842_v5  ;;  %v5080_v38 = vsel %vm5068_vm3, %v13674_v14, %v5061_v15 }
 0x8e6   :  { %vm5341_vm7 = vcmp.eq.s32.totalorder %v5336_v32, 2  ;;  %v5079_v37 = vsel %vm5069_vm14, %v5076_v60, %v5078_v40  ;;  %v5082_v13 = vsel %vm5070_vm1, %v5064_v49, %v5081_v62  ;;  %v5052_v58 = vshrl.u32 %v15517_v46, %v13646_v44 }
 0x8e7   :  { %v5339_v36 = vxor.u32 2147483648, %v5333_v23  ;;  %v5343_v56 = vsel %vm5341_vm7, %v5342_v41, %v5333_v23  ;;  %vm6844_vm4 = vcmp.lt.s32.totalorder %v6843_v31, 0  ;;  %v6845_v20 = vsub.s32 0, %v6843_v31 }
 0x8e8   :  { %v5083_v24 = vsel %vm5069_vm14, %v5080_v38, %v5082_v13  ;;  %v5085_v42 = vand.u32 65535, %v13692_v11  ;;  %v5109_v16 = vand.u32 65535, %v5079_v37  ;;  %v5086_v44 = vshrl.u32 %v13692_v11, 16 }
 0x8e9   :  { %v5340_v57 = vsel %vm5338_vm13, %v5325_v12, %v5339_v36  ;;  %v6846_v27 = vsel %vm6844_vm4, %v6845_v20, %v6843_v31  ;;  %v5087_v45 = vand.u32 65535, %v5083_v24  ;;  %v5088_v19 = vshrl.u32 %v5083_v24, 16 }
 0x8ea   :  { %v5344_v35 = vsel %vm5337_vm2, %v5340_v57, %v5343_v56  ;;  %v6847_v4 = vclz %v6846_v27  ;;  %v5110_v52 = vshrl.u32 %v5079_v37, 16  ;;  %v6835_v63 = vadd.s32 %v13653_v61, %v13651_v22  ;;  %v13731_v37 = vld [vmem:[%s14702_s1] ss:$0 sm:$0xff] }
 0x8eb   :  { %v5345_v1 = vsel %vm5334_vm11, nan, %v5344_v35  ;;  %v2164_v2 = vsel %vm2141_vm15, %v15570_v50, %v2090_v7  ;;  %v13721_v17 = vsel %vm5068_vm3, %v5052_v58, %v5055_v48  ;;  %v5090_v39 = vmul.u32 %v5088_v19, %v5085_v42 }
 0x8ec   :  { %7226 = vst.msk [vmem:[%s14704_s3 + $0x98] sm:$0xff] %vm7206_vm6, %v5345_v1  ;;  %v7331_v18 = vadd.s32 4294967294, %v6847_v4  ;;  %v5091_v6 = vmul.u32 %v5087_v45, %v5086_v44  ;;  %v6865_v9 = vsub.s32 4, %v13676_v51  ;;  %v5073_v55 = vsel %vm5071_vm12, %v5061_v15, 2102212464 }
 0x8ed   :  { %v5112_v3 = vmul.u32 %v5110_v52, %v5085_v42  ;;  %v5113_v28 = vmul.u32 %v5109_v16, %v5086_v44  ;;  %v5089_v25 = vmul.u32 %v5087_v45, %v5085_v42  ;;  %v5093_v22 = vshll.u32 %v5090_v39, 16 }
 0x8ee   :  { %vm7332_vm9 = vcmp.lt.s32.totalorder %v7331_v18, 0  ;;  %v5111_v61 = vmul.u32 %v5109_v16, %v5085_v42  ;;  %v5092_v49 = vmul.u32 %v5088_v19, %v5086_v44  ;;  %v5114_v8 = vmul.u32 %v5110_v52, %v5086_v44  ;;  %v13738_v42 = vld [vmem:[%s14703_s2] ss:$0 sm:$0xff]  ;;  %v15571_v16 = vld [vmem:[#allocation219_spill] sm:$0xff] }
 0x8ef   :  { %v6850_v32 = vsel %vm7332_vm9, 0, %v7331_v18  ;;  %v5115_v12 = vshll.u32 %v5112_v3, 16  ;;  %v5095_v30 = vshll.u32 %v5091_v6, 16  ;;  %vm5097_vm8 = vc.u32 %v5089_v25, %v5093_v22 }
 0x8f0   :  { %v6851_v43 = vsub.s32 32, %v6850_v32  ;;  %v6855_v48 = vsub.s32 4294967266, %v6850_v32  ;;  %v6852_v23 = vshll.u32 %v6843_v31, %v6850_v32  ;;  %v5098_v41 = vsel %vm5097_vm8, 1, %v15516_v33  ;;  %v2088_v31 = vpop.permute.xlu0 %2087 }
 0x8f1   :  { %v5099_v5 = vadd.s32 %v5093_v22, %v5089_v25  ;;  %v5117_v60 = vshll.u32 %v5113_v28, 16  ;;  %v5100_v62 = vadd.s32 %v5098_v41, %v5092_v49  ;;  %vm5119_vm5 = vc.u32 %v5111_v61, %v5115_v12 }
 0x8f2   :  { %v6853_v15 = vshrl.u32 %v6835_v63, %v6851_v43  ;;  %v6856_v40 = vadd.s32 127, %v6855_v48  ;;  %v5120_v36 = vsel %vm5119_vm5, 1, %v15516_v33  ;;  %v5121_v38 = vadd.s32 %v5115_v12, %v5111_v61 }
 0x8f3   :  { %vm5101_vm0 = vc.u32 %v5099_v5, %v5095_v30  ;;  %v2200_v13 = vmul.f32 %v13731_v37, %v2164_v2  ;;  %v5122_v35 = vadd.s32 %v5120_v36, %v5114_v8  ;;  %v5094_v58 = vshrl.u32 %v5090_v39, 16 }
 0x8f4   :  { %v6854_v57 = vor.u32 %v6853_v15, %v6852_v23  ;;  %v6857_v56 = vshll.u32 %v6856_v40, 23  ;;  %v5102_v20 = vsel %vm5101_vm0, 1, %v15516_v33  ;;  %vm5123_vm10 = vc.u32 %v5121_v38, %v5117_v60 }
 0x8f5   :  { %v5104_v24 = vadd.s32 %v5102_v20, %v5100_v62  ;;  %v13741_v7 = vadd.f32 %v13738_v42, %v2200_v13  ;;  %v5096_v27 = vshrl.u32 %v5091_v6, 16  ;;  %v5124_v45 = vsel %vm5123_vm10, 1, %v15516_v33 }
 0x8f6   :  { %v6858_v1 = vor.u32 4788187, %v6857_v56  ;;  %v2163_v4 = vsel %vm2141_vm15, %v15571_v16, %v2088_v31  ;;  %v5116_v19 = vshrl.u32 %v5112_v3, 16  ;;  %v5126_v52 = vadd.s32 %v5124_v45, %v5122_v35 }
 0x8f7   :  { %v5105_v44 = vadd.s32 %v5104_v24, %v5094_v58  ;;  %v5656_v63 = vand.u32 2147483647, %v13741_v7  ;;  %v6861_v2 = vcvt.s32.f32 %v6854_v57  ;;  %v5074_v18 = vsel %vm5070_vm1, %v13674_v14, %v5073_v55 }
 0x8f8   :  { %v6859_v50 = vand.u32 2147483647, %v6858_v1  ;;  %v5659_v39 = vand.u32 2139095040, %v13741_v7  ;;  %v5118_v6 = vshrl.u32 %v5113_v28, 16  ;;  %v5127_v22 = vadd.s32 %v5126_v52, %v5116_v19 }
 0x8f9   :  { %v5106_v25 = vadd.s32 %v5105_v44, %v5096_v27  ;;  %v2199_v61 = vmul.f32 %v13731_v37, %v2163_v4  ;;  %vm6743_vm12 = vcmp.lt.s32.totalorder %v13507_v34, 0  ;;  %v5125_v3 = vadd.s32 %v5121_v38, %v5117_v60 }
 0x8fa   :  { %v6862_v32 = vmul.f32 %v6861_v2, %v6859_v50  ;;  %v5660_v49 = vshrl.u32 %v5659_v39, 23  ;;  %v6866_v8 = vsel %vm6743_vm12, %v6865_v9, %v13676_v51  ;;  %v5075_v12 = vsel %vm5069_vm14, %v13721_v17, %v5074_v18 }
 0x8fb   :  { %v5128_v43 = vadd.s32 %v5127_v22, %v5118_v6  ;;  %v5663_v14 = vand.u32 8388607, %v5656_v63  ;;  %vm5131_vm11 = vc.u32 %v5106_v25, %v5125_v3  ;;  %vm6742_vm3 = vcmp.le.f32.partialorder %v6741_v10, 0.7853982 }
 0x8fc   :  { %v6863_v55 = vxor.u32 2147483648, %v6862_v32  ;;  %v7309_v28 = vadd.s32 4294967169, %v5660_v49  ;;  %v13762_v30 = vadd.f32 %v13738_v42, %v2199_v61  ;;  %v6868_v51 = vsel %vm6742_vm3, 0, %v6866_v8 }
 0x8fd   :  { %v5132_v48 = vadd.s32 1, %v5128_v43  ;;  %v5129_v9 = vmul.u32 %v13692_v11, %v5075_v12  ;;  %v5664_v5 = vor.u32 8388608, %v5663_v14  ;;  %v6885_v40 = vadd.s32 3, %v6868_v51 }
 0x8fe   :  { %v6864_v23 = vsel %vm6743_vm12, %v6863_v55, %v6862_v32  ;;  %v5666_v26 = vadd.s32 1, %v7309_v28  ;;  %v5501_v10 = vand.u32 2147483647, %v13762_v30  ;;  %v5504_v11 = vand.u32 2139095040, %v13762_v30 }
 0x8ff   :  { %v6867_v17 = vsel %vm6742_vm3, %v13507_v34, %v6864_v23  ;;  %v5133_v41 = vsel %vm5131_vm11, %v5132_v48, %v5128_v43  ;;  %v13767_v57 = vshll.u32 %v5664_v5, 8  ;;  %v13770_v58 = vand.u32 3, %v6885_v40 }
 0x900   :  { %v6869_v60 = vmul.f32 %v6867_v17, %v6867_v17  ;;  %v5134_v15 = vadd.s32 %v5133_v41, %v5129_v9  ;;  %vm5667_vm1 = vcmp.gt.s32.totalorder %v5666_v26, 0  ;;  %v13772_v24 = vadd.s32 %v5125_v3, %v5106_v25 }
 0x901   :  { %v5668_v62 = vsel %vm5667_vm1, %v5666_v26, 0  ;;  %v13776_v4 = vand.u32 8388607, %v5501_v10  ;;  %vm5038_vm2 = vcmp.lt.s32.totalorder %v13528_v21, 0  ;;  %v13782_v19 = vand.u32 65535, %v13767_v57 }
 0x902   :  { %v6870_v36 = vmul.f32 -0.001358992, %v6869_v60  ;;  %v6877_v38 = vmul.f32 -0.00019511016, %v6869_v60  ;;  %v5135_v13 = vadd.s32 536870912, %v5134_v15  ;;  %v5670_v31 = vand.u32 31, %v5668_v62 }
 0x903   :  { %v13779_v44 = vshrl.u32 %v5668_v62, 5  ;;  %v13785_v52 = vshrl.u32 %v13767_v57, 16  ;;  %v5505_v50 = vshrl.u32 %v5504_v11, 23  ;;  %vm6888_vm14 = vcmp.eq.s32.totalorder %v13770_v58, 0 }
 0x904   :  { %v6871_v56 = vadd.f32 0.041655596, %v6870_v36  ;;  %v6878_v20 = vadd.f32 0.008332121, %v6877_v38  ;;  %v5136_v35 = vshrl.u32 %v5135_v13, 30  ;;  %v5671_v1 = vsub.s32 32, %v5670_v31 }
 0x905   :  { %v5673_v25 = vshll.u32 %v15517_v46, %v5670_v31  ;;  %vm6891_vm13 = vcmp.eq.s32.totalorder %v13770_v58, 2  ;;  %v5676_v22 = vshll.u32 %v15511_v59, %v5670_v31  ;;  %vm6887_vm7 = vcmp.lt.s32.totalorder %v13770_v58, 2 }
 0x906   :  { %v6872_v27 = vmul.f32 %v6871_v56, %v6869_v60  ;;  %v6879_v45 = vmul.f32 %v6878_v20, %v6869_v60  ;;  %v5137_v16 = vshll.u32 %v5136_v35, 30  ;;  %v5674_v6 = vshrl.u32 %v15511_v59, %v5671_v1 }
 0x907   :  { %v5677_v61 = vshrl.u32 %v15512_v53, %v5671_v1  ;;  %v5680_v32 = vshrl.u32 %v15513_v0, %v5671_v1  ;;  %vm6884_vm9 = vweird.f32 %v13507_v34  ;;  %v5160_v12 = vsub.s32 4, %v5136_v35 }
 0x908   :  { %v6873_v2 = vadd.f32 -0.4999988, %v6872_v27  ;;  %v6880_v18 = vadd.f32 -0.16666654, %v6879_v45  ;;  %v13787_v39 = vsub.s32 %v5134_v15, %v5137_v16  ;;  %v5679_v43 = vshll.u32 %v15512_v53, %v5670_v31 }
 0x909   :  { %v5682_v14 = vshll.u32 %v15513_v0, %v5670_v31  ;;  %v5683_v55 = vshrl.u32 %v15514_v29, %v5671_v1  ;;  %v5686_v51 = vshrl.u32 %v15515_v47, %v5671_v1  ;;  %vm13807_vm8 = vcmp.le.f32.partialorder %v5036_v54, 0.7853982 }
 0x90a   :  { %v6874_v3 = vmul.f32 %v6873_v2, %v6869_v60  ;;  %v6881_v49 = vmul.f32 %v6880_v18, %v6869_v60  ;;  %vm5139_vm4 = vcmp.lt.s32.totalorder %v13787_v39, 0  ;;  %v5140_v8 = vsub.s32 0, %v13787_v39 }
 0x90b   :  { %v5675_v41 = vor.u32 %v5674_v6, %v5673_v25  ;;  %v5678_v5 = vor.u32 %v5677_v61, %v5676_v22  ;;  %v5684_v60 = vor.u32 %v5683_v55, %v5682_v14  ;;  %v5681_v62 = vor.u32 %v5680_v32, %v5679_v43 }
 0x90c   :  { %v6875_v28 = vadd.f32 1.0, %v6874_v3  ;;  %v6882_v48 = vadd.f32 1.0, %v6881_v49  ;;  %v5141_v23 = vsel %vm5139_vm4, %v5140_v8, %v13787_v39  ;;  %v5685_v36 = vshll.u32 %v15514_v29, %v5670_v31 }
 0x90d   :  { %v5142_v26 = vclz %v5141_v23  ;;  %v5672_v13 = vshrl.u32 %v15517_v46, %v5671_v1  ;;  %vm5688_vm5 = vcmp.lt.s32.totalorder %v13779_v44, 1  ;;  %v7306_v11 = vadd.s32 4294967169, %v5505_v50 }
 0x90e   :  { %v6883_v15 = vmul.f32 %v6882_v48, %v6867_v17  ;;  %v6892_v40 = vxor.u32 2147483648, %v6875_v28  ;;  %v5161_v54 = vsel %vm5038_vm2, %v5160_v12, %v5136_v35  ;;  %v5687_v20 = vor.u32 %v5686_v51, %v5685_v36 }
 0x90f   :  { %v7298_v38 = vadd.s32 4294967294, %v5142_v26  ;;  %vm5691_vm0 = vcmp.lt.s32.totalorder %v13779_v44, 4  ;;  %vm5690_vm12 = vcmp.lt.s32.totalorder %v13779_v44, 3  ;;  %v5696_v17 = vsel %vm5688_vm5, %v5675_v41, %v5678_v5 }
 0x910   :  { %v6889_v56 = vxor.u32 2147483648, %v6883_v15  ;;  %v5697_v31 = vsel %vm5691_vm0, %v5684_v60, 920167782  ;;  %v6893_v27 = vsel %vm6891_vm13, %v6892_v40, %v6883_v15  ;;  %vm5689_vm11 = vcmp.lt.s32.totalorder %v13779_v44, 2 }
 0x911   :  { %vm7299_vm10 = vcmp.lt.s32.totalorder %v7298_v38, 0  ;;  %v5698_v35 = vsel %vm5690_vm12, %v5681_v62, %v5697_v31  ;;  %v5700_v22 = vsel %vm5688_vm5, %v5678_v5, %v5681_v62  ;;  %v5701_v34 = vsel %vm5691_vm0, %v5687_v20, 1326507024 }
 0x912   :  { %v6890_v1 = vsel %vm6888_vm14, %v6875_v28, %v6889_v56  ;;  %v5145_v45 = vsel %vm7299_vm10, 0, %v7298_v38  ;;  %v5699_v6 = vsel %vm5689_vm11, %v5696_v17, %v5698_v35  ;;  %v5693_v3 = vsel %vm5691_vm0, %v5681_v62, 2102212464 }
 0x913   :  { %v6894_v16 = vsel %vm6887_vm7, %v6890_v1, %v6893_v27  ;;  %v5146_v50 = vsub.s32 32, %v5145_v45  ;;  %v5150_v2 = vsub.s32 4294967266, %v5145_v45  ;;  %v5147_v25 = vshll.u32 %v13787_v39, %v5145_v45 }
 0x914   :  { %v6895_v18 = vsel %vm6884_vm9, nan, %v6894_v16  ;;  %v5729_v32 = vand.u32 65535, %v5699_v6  ;;  %v5163_v39 = vsel %vm13807_vm8, 0, %v5161_v54  ;;  %v5702_v49 = vsel %vm5690_vm12, %v5684_v60, %v5701_v34 }
 0x915   :  { %7236 = vst.msk [vmem:[%s14704_s3 + $0xe8] sm:$0xff] %vm7206_vm6, %v6895_v18  ;;  %v5148_v58 = vshrl.u32 %v13772_v24, %v5146_v50  ;;  %v5151_v61 = vadd.s32 127, %v5150_v2  ;;  %v5730_v8 = vshrl.u32 %v5699_v6, 16  ;;  %v5703_v24 = vsel %vm5689_vm11, %v5700_v22, %v5702_v49 }
 0x916   :  { %v5511_v14 = vadd.s32 1, %v7306_v11  ;;  %v5707_v55 = vand.u32 65535, %v5703_v24  ;;  %v5708_v28 = vshrl.u32 %v5703_v24, 16  ;;  %v5733_v23 = vmul.u32 %v5729_v32, %v13785_v52 }
 0x917   :  { %v5149_v12 = vor.u32 %v5148_v58, %v5147_v25  ;;  %v5152_v43 = vshll.u32 %v5151_v61, 23  ;;  %v5732_v48 = vmul.u32 %v5730_v8, %v13782_v19  ;;  %v5180_v26 = vadd.s32 3, %v5163_v39 }
 0x918   :  { %v5692_v15 = vsel %vm5688_vm5, %v5672_v13, %v5675_v41  ;;  %v5694_v60 = vsel %vm5690_vm12, %v5678_v5, %v5693_v3  ;;  %v5710_v62 = vmul.u32 %v5708_v28, %v13782_v19  ;;  %v5711_v36 = vmul.u32 %v5707_v55, %v13785_v52 }
 0x919   :  { %v5153_v51 = vor.u32 4788187, %v5152_v43  ;;  %v5156_v40 = vcvt.s32.f32 %v5149_v12  ;;  %v5731_v38 = vmul.u32 %v5729_v32, %v13782_v19  ;;  %v5734_v56 = vmul.u32 %v5730_v8, %v13785_v52 }
 0x91a   :  { %v5735_v54 = vshll.u32 %v5732_v48, 16  ;;  %vm5512_vm3 = vcmp.gt.s32.totalorder %v5511_v14, 0  ;;  %v5709_v20 = vmul.u32 %v5707_v55, %v13782_v19  ;;  %v5712_v17 = vmul.u32 %v5708_v28, %v13785_v52 }
 0x91b   :  { %v5154_v11 = vand.u32 2147483647, %v5153_v51  ;;  %v5713_v41 = vshll.u32 %v5710_v62, 16  ;;  %v5737_v13 = vshll.u32 %v5733_v23, 16  ;;  %v5715_v5 = vshll.u32 %v5711_v36, 16 }
 0x91c   :  { %vm5739_vm1 = vc.u32 %v5731_v38, %v5735_v54  ;;  %v5741_v1 = vadd.s32 %v5735_v54, %v5731_v38  ;;  %v5513_v35 = vsel %vm5512_vm3, %v5511_v14, 0  ;;  %v5695_v19 = vsel %vm5689_vm11, %v5692_v15, %v5694_v60 }
 0x91d   :  { %v5157_v31 = vmul.f32 %v5156_v40, %v5154_v11  ;;  %vm5717_vm14 = vc.u32 %v5709_v20, %v5713_v41  ;;  %v5719_v27 = vadd.s32 %v5713_v41, %v5709_v20  ;;  %v5740_v45 = vsel %vm5739_vm1, 1, %v15516_v33 }
 0x91e   :  { %v5718_v50 = vsel %vm5717_vm14, 1, %v15516_v33  ;;  %v5742_v2 = vadd.s32 %v5740_v45, %v5734_v56  ;;  %vm5743_vm13 = vc.u32 %v5741_v1, %v5737_v13  ;;  %v5736_v22 = vshrl.u32 %v5732_v48, 16 }
 0x91f   :  { %v5158_v16 = vxor.u32 2147483648, %v5157_v31  ;;  %v5720_v52 = vadd.s32 %v5718_v50, %v5712_v17  ;;  %vm5721_vm7 = vc.u32 %v5719_v27, %v5715_v5  ;;  %v5744_v18 = vsel %vm5743_vm13, 1, %v15516_v33 }
 0x920   :  { %v5722_v6 = vsel %vm5721_vm7, 1, %v15516_v33  ;;  %v5746_v58 = vadd.s32 %v5744_v18, %v5742_v2  ;;  %v5714_v34 = vshrl.u32 %v5710_v62, 16  ;;  %v5515_v39 = vand.u32 31, %v5513_v35 }
 0x921   :  { %v5159_v25 = vsel %vm5038_vm2, %v5158_v16, %v5157_v31  ;;  %v5724_v32 = vadd.s32 %v5722_v6, %v5720_v52  ;;  %v5738_v3 = vshrl.u32 %v5733_v23, 16  ;;  %v5509_v8 = vor.u32 8388608, %v13776_v4 }
 0x922   :  { %v5162_v61 = vsel %vm13807_vm8, %v13528_v21, %v5159_v25  ;;  %v5747_v49 = vadd.s32 %v5746_v58, %v5736_v22  ;;  %v13877_v12 = vand.u32 3, %v5180_v26  ;;  %v5716_v43 = vshrl.u32 %v5711_v36, 16 }
 0x923   :  { %v5164_v44 = vmul.f32 %v5162_v61, %v5162_v61  ;;  %v5725_v24 = vadd.s32 %v5724_v32, %v5714_v34  ;;  %v13879_v14 = vsub.s32 32, %v5515_v39  ;;  %v5749_v9 = vmul.u32 %v13767_v57, %v5695_v19 }
 0x924   :  { %v5748_v48 = vadd.s32 %v5747_v49, %v5738_v3  ;;  %v13884_v15 = vadd.s32 %v5741_v1, %v5737_v13  ;;  %v13886_v60 = vshrl.u32 %v5513_v35, 5  ;;  %v5518_v62 = vshll.u32 %v15517_v46, %v5515_v39 }
 0x925   :  { %v5165_v55 = vmul.f32 -0.001358992, %v5164_v44  ;;  %v5172_v28 = vmul.f32 -0.00019511016, %v5164_v44  ;;  %v13882_v51 = vadd.s32 %v5725_v24, %v5716_v43  ;;  %v5519_v4 = vshrl.u32 %v15511_v59, %v13879_v14 }
 0x926   :  { %v5752_v40 = vadd.s32 1, %v5748_v48  ;;  %v5521_v36 = vshll.u32 %v15511_v59, %v5515_v39  ;;  %v5522_v57 = vshrl.u32 %v15512_v53, %v13879_v14  ;;  %v5525_v38 = vshrl.u32 %v15513_v0, %v13879_v14 }
 0x927   :  { %v5166_v23 = vadd.f32 0.041655596, %v5165_v55  ;;  %v5173_v26 = vadd.f32 0.008332121, %v5172_v28  ;;  %vm5751_vm2 = vc.u32 %v13882_v51, %v13884_v15  ;;  %v5524_v20 = vshll.u32 %v15512_v53, %v5515_v39 }
 0x928   :  { %v5753_v54 = vsel %vm5751_vm2, %v5752_v40, %v5748_v48  ;;  %v13899_v41 = vor.u32 %v5519_v4, %v5518_v62  ;;  %v5527_v13 = vshll.u32 %v15513_v0, %v5515_v39  ;;  %v5528_v31 = vshrl.u32 %v15514_v29, %v13879_v14 }
 0x929   :  { %v5167_v11 = vmul.f32 %v5166_v23, %v5164_v44  ;;  %v5174_v56 = vmul.f32 %v5173_v26, %v5164_v44  ;;  %v5754_v17 = vadd.s32 %v5753_v54, %v5749_v9  ;;  %v5530_v27 = vshll.u32 %v15514_v29, %v5515_v39 }
 0x92a   :  { %v5531_v45 = vshrl.u32 %v15515_v47, %v13879_v14  ;;  %v13907_v16 = vor.u32 %v5522_v57, %v5521_v36  ;;  %v5526_v50 = vor.u32 %v5525_v38, %v5524_v20  ;;  %v5529_v2 = vor.u32 %v5528_v31, %v5527_v13 }
 0x92b   :  { %v5168_v5 = vadd.f32 -0.4999988, %v5167_v11  ;;  %v5175_v1 = vadd.f32 -0.16666654, %v5174_v56  ;;  %v5755_v35 = vadd.s32 536870912, %v5754_v17  ;;  %vm5536_vm4 = vcmp.lt.s32.totalorder %v13886_v60, 4 }
 0x92c   :  { %v5532_v18 = vor.u32 %v5531_v45, %v5530_v27  ;;  %vm5179_vm9 = vweird.f32 %v13528_v21  ;;  %v5542_v6 = vsel %vm5536_vm4, %v5529_v2, 920167782  ;;  %v13915_v22 = vshll.u32 %v5509_v8, 8 }
 0x92d   :  { %v5169_v19 = vmul.f32 %v5168_v5, %v5164_v44  ;;  %v5176_v52 = vmul.f32 %v5175_v1, %v5164_v44  ;;  %v13911_v25 = vshrl.u32 %v5755_v35, 30  ;;  %vm5533_vm8 = vcmp.lt.s32.totalorder %v13886_v60, 1 }
 0x92e   :  { %vm5535_vm5 = vcmp.lt.s32.totalorder %v13886_v60, 3  ;;  %v5541_v39 = vsel %vm5533_vm8, %v13899_v41, %v13907_v16  ;;  %v5545_v3 = vsel %vm5533_vm8, %v13907_v16, %v5526_v50  ;;  %vm5182_vm0 = vcmp.lt.s32.totalorder %v13877_v12, 2 }
 0x92f   :  { %v5170_v58 = vadd.f32 1.0, %v5169_v19  ;;  %v5177_v34 = vadd.f32 1.0, %v5176_v52  ;;  %v5757_v32 = vshll.u32 %v13911_v25, 30  ;;  %v5543_v44 = vsel %vm5535_vm5, %v5526_v50, %v5542_v6 }
 0x930   :  { %v5546_v43 = vsel %vm5536_vm4, %v5532_v18, 1326507024  ;;  %vm5183_vm10 = vcmp.eq.s32.totalorder %v13877_v12, 0  ;;  %vm5534_vm12 = vcmp.lt.s32.totalorder %v13886_v60, 2  ;;  %vm5186_vm11 = vcmp.eq.s32.totalorder %v13877_v12, 2 }
 0x931   :  { %v5178_v49 = vmul.f32 %v5177_v34, %v5162_v61  ;;  %v5187_v8 = vxor.u32 2147483648, %v5170_v58  ;;  %v5758_v24 = vsub.s32 %v5754_v17, %v5757_v32  ;;  %v5547_v55 = vsel %vm5535_vm5, %v5529_v2, %v5546_v43 }
 0x932   :  { %v5544_v61 = vsel %vm5534_vm12, %v5541_v39, %v5543_v44  ;;  %v5548_v48 = vsel %vm5534_vm12, %v5545_v3, %v5547_v55  ;;  %v5550_v4 = vand.u32 65535, %v13915_v22  ;;  %v5551_v62 = vshrl.u32 %v13915_v22, 16  ;;  %v2096_v44 = vpop.permute.xlu1 %2095 }
 0x933   :  { %v5184_v28 = vxor.u32 2147483648, %v5178_v49  ;;  %vm5759_vm3 = vcmp.lt.s32.totalorder %v5758_v24, 0  ;;  %v5760_v9 = vsub.s32 0, %v5758_v24  ;;  %v5552_v23 = vand.u32 65535, %v5548_v48 }
 0x934   :  { %v5188_v40 = vsel %vm5186_vm11, %v5187_v8, %v5178_v49  ;;  %v5553_v36 = vshrl.u32 %v5548_v48, 16  ;;  %v5574_v11 = vand.u32 65535, %v5544_v61  ;;  %v5575_v56 = vshrl.u32 %v5544_v61, 16 }
 0x935   :  { %v5185_v26 = vsel %vm5183_vm10, %v5170_v58, %v5184_v28  ;;  %v5761_v38 = vsel %vm5759_vm3, %v5760_v9, %v5758_v24  ;;  %v5556_v13 = vmul.u32 %v5552_v23, %v5551_v62  ;;  %v5517_v31 = vshrl.u32 %v15517_v46, %v13879_v14  ;;  %v2094_v9 = vpop.permute.xlu0 %2093 }
 0x936   :  { %v5189_v57 = vsel %vm5182_vm0, %v5185_v26, %v5188_v40  ;;  %v5762_v20 = vclz %v5761_v38  ;;  %v5555_v17 = vmul.u32 %v5553_v36, %v5550_v4  ;;  %v5750_v12 = vadd.s32 %v13884_v15, %v13882_v51 }
 0x937   :  { %v5190_v54 = vsel %vm5179_vm9, nan, %v5189_v57  ;;  %v5554_v1 = vmul.u32 %v5552_v23, %v5550_v4  ;;  %v5538_v21 = vsel %vm5536_vm4, %v5526_v50, 2102212464  ;;  %v5557_v45 = vmul.u32 %v5553_v36, %v5551_v62 }
 0x938   :  { %7225 = vst.msk [vmem:[%s14704_s3 + $0x90] sm:$0xff] %vm7206_vm6, %v5190_v54  ;;  %v7310_v5 = vadd.s32 4294967294, %v5762_v20  ;;  %v5558_v27 = vshll.u32 %v5555_v17, 16  ;;  %v5560_v35 = vshll.u32 %v5556_v13, 16  ;;  %v5577_v2 = vmul.u32 %v5575_v56, %v5550_v4  ;;  %v15575_v54 = vld [vmem:[#allocation28_spill] sm:$0xff] }
 0x939   :  { %v5576_v52 = vmul.u32 %v5574_v11, %v5550_v4  ;;  %vm5658_vm13 = vcmp.lt.s32.totalorder %v13741_v7, 0  ;;  %v5578_v6 = vmul.u32 %v5574_v11, %v5551_v62  ;;  %v5559_v34 = vshrl.u32 %v5555_v17, 16 }
 0x93a   :  { %vm7311_vm1 = vcmp.lt.s32.totalorder %v7310_v5, 0  ;;  %vm5562_vm14 = vc.u32 %v5554_v1, %v5558_v27  ;;  %v5564_v19 = vadd.s32 %v5558_v27, %v5554_v1  ;;  %v5580_v51 = vshll.u32 %v5577_v2, 16 }
 0x93b   :  { %v5765_v18 = vsel %vm7311_vm1, 0, %v7310_v5  ;;  %v5563_v14 = vsel %vm5562_vm14, 1, %v15516_v33  ;;  %v5579_v50 = vmul.u32 %v5575_v56, %v5551_v62  ;;  %v5582_v28 = vshll.u32 %v5578_v6, 16 }
 0x93c   :  { %v5766_v15 = vsub.s32 32, %v5765_v18  ;;  %v5770_v58 = vsub.s32 4294967266, %v5765_v18  ;;  %v5565_v32 = vadd.s32 %v5563_v14, %v5557_v45  ;;  %v5767_v39 = vshll.u32 %v5758_v24, %v5765_v18  ;;  %v15574_v24 = vld [vmem:[#allocation21_spill] sm:$0xff] }
 0x93d   :  { %vm5566_vm7 = vc.u32 %v5564_v19, %v5560_v35  ;;  %vm5584_vm2 = vc.u32 %v5576_v52, %v5580_v51  ;;  %v5586_v61 = vadd.s32 %v5580_v51, %v5576_v52  ;;  %v5780_v26 = vsub.s32 4, %v13911_v25 }
 0x93e   :  { %v5768_v3 = vshrl.u32 %v5750_v12, %v5766_v15  ;;  %v5771_v49 = vadd.s32 127, %v5770_v58  ;;  %v5567_v8 = vsel %vm5566_vm7, 1, %v15516_v33  ;;  %v5585_v43 = vsel %vm5584_vm2, 1, %v15516_v33 }
 0x93f   :  { %v5569_v55 = vadd.s32 %v5567_v8, %v5565_v32  ;;  %v5587_v48 = vadd.s32 %v5585_v43, %v5579_v50  ;;  %v2167_v40 = vsel %vm2141_vm15, %v15574_v24, %v2096_v44  ;;  %v5537_v62 = vsel %vm5533_vm8, %v5517_v31, %v13899_v41 }
 0x940   :  { %v5769_v4 = vor.u32 %v5768_v3, %v5767_v39  ;;  %v5772_v23 = vshll.u32 %v5771_v49, 23  ;;  %vm5588_vm4 = vc.u32 %v5586_v61, %v5582_v28  ;;  %v2203_v57 = vmul.f32 %v13731_v37, %v2167_v40 }
 0x941   :  { %v5570_v36 = vadd.s32 %v5569_v55, %v5559_v34  ;;  %v5561_v11 = vshrl.u32 %v5556_v13, 16  ;;  %v5589_v56 = vsel %vm5588_vm4, 1, %v15516_v33  ;;  %v2166_v20 = vsel %vm2141_vm15, %v15575_v54, %v2094_v9 }
 0x942   :  { %v5773_v38 = vor.u32 4788187, %v5772_v23  ;;  %v5539_v17 = vsel %vm5535_vm5, %v13907_v16, %v5538_v21  ;;  %v5581_v12 = vshrl.u32 %v5577_v2, 16  ;;  %v5591_v5 = vadd.s32 %v5589_v56, %v5587_v48 }
 0x943   :  { %v13975_v1 = vadd.f32 %v13738_v42, %v2203_v57  ;;  %v5776_v31 = vcvt.s32.f32 %v5769_v4  ;;  %v5781_v13 = vsel %vm5658_vm13, %v5780_v26, %v13911_v25  ;;  %v5571_v27 = vadd.s32 %v5570_v36, %v5561_v11 }
 0x944   :  { %v5774_v41 = vand.u32 2147483647, %v5773_v38  ;;  %v5583_v45 = vshrl.u32 %v5578_v6, 16  ;;  %v5592_v35 = vadd.s32 %v5591_v5, %v5581_v12  ;;  %v2202_v52 = vmul.f32 %v13731_v37, %v2166_v20 }
 0x945   :  { %v6121_v19 = vand.u32 2147483647, %v13975_v1  ;;  %vm13984_vm9 = vcmp.le.f32.partialorder %v5656_v63, 0.7853982  ;;  %v5590_v2 = vadd.s32 %v5586_v61, %v5582_v28  ;;  %v6124_v18 = vand.u32 2139095040, %v13975_v1 }
 0x946   :  { %v5777_v21 = vmul.f32 %v5776_v31, %v5774_v41  ;;  %v5783_v25 = vsel %vm13984_vm9, 0, %v5781_v13  ;;  %v5540_v14 = vsel %vm5534_vm12, %v5537_v62, %v5539_v17  ;;  %v5593_v6 = vadd.s32 %v5592_v35, %v5583_v45 }
 0x947   :  { %vm5596_vm8 = vc.u32 %v5571_v27, %v5590_v2  ;;  %v6125_v37 = vshrl.u32 %v6124_v18, 23  ;;  %v6128_v63 = vand.u32 8388607, %v6121_v19  ;;  %v13996_v58 = vadd.f32 %v13738_v42, %v2202_v52 }
 0x948   :  { %v5778_v51 = vxor.u32 2147483648, %v5777_v21  ;;  %v5597_v15 = vadd.s32 1, %v5593_v6  ;;  %v5594_v32 = vmul.u32 %v13915_v22, %v5540_v14  ;;  %v5800_v50 = vadd.s32 3, %v5783_v25 }
 0x949   :  { %v7318_v39 = vadd.s32 4294967169, %v6125_v37  ;;  %v6129_v8 = vor.u32 8388608, %v6128_v63  ;;  %v5969_v55 = vand.u32 2139095040, %v13996_v58  ;;  %vm5503_vm0 = vcmp.lt.s32.totalorder %v13762_v30, 0 }
 0x94a   :  { %v5779_v34 = vsel %vm5658_vm13, %v5778_v51, %v5777_v21  ;;  %v5598_v44 = vsel %vm5596_vm8, %v5597_v15, %v5593_v6  ;;  %v14005_v48 = vand.u32 3, %v5800_v50  ;;  %v5595_v38 = vadd.s32 %v5590_v2, %v5571_v27 }
 0x94b   :  { %v5782_v60 = vsel %vm13984_vm9, %v13741_v7, %v5779_v34  ;;  %v5599_v49 = vadd.s32 %v5598_v44, %v5594_v32  ;;  %v6131_v43 = vadd.s32 1, %v7318_v39  ;;  %v14007_v26 = vshll.u32 %v6129_v8, 8 }
 0x94c   :  { %v5784_v3 = vmul.f32 %v5782_v60, %v5782_v60  ;;  %v5970_v40 = vshrl.u32 %v5969_v55, 23  ;;  %vm5806_vm10 = vcmp.eq.s32.totalorder %v14005_v48, 2  ;;  %v5966_v56 = vand.u32 2147483647, %v13996_v58 }
 0x94d   :  { %v5600_v61 = vadd.s32 536870912, %v5599_v49  ;;  %vm6132_vm5 = vcmp.gt.s32.totalorder %v6131_v43, 0  ;;  %v14015_v12 = vand.u32 65535, %v14007_v26  ;;  %vm5803_vm12 = vcmp.eq.s32.totalorder %v14005_v48, 0 }
 0x94e   :  { %v5785_v42 = vmul.f32 -0.001358992, %v5784_v3  ;;  %v5792_v28 = vmul.f32 -0.00019511016, %v5784_v3  ;;  %v6133_v22 = vsel %vm6132_vm5, %v6131_v43, 0  ;;  %v14021_v13 = vadd.s32 4294967169, %v5970_v40 }
 0x94f   :  { %v5601_v23 = vshrl.u32 %v5600_v61, 30  ;;  %v6135_v24 = vand.u32 31, %v6133_v22  ;;  %v14018_v41 = vshrl.u32 %v6133_v22, 5  ;;  %vm5802_vm11 = vcmp.lt.s32.totalorder %v14005_v48, 2 }
 0x950   :  { %v5786_v9 = vadd.f32 0.041655596, %v5785_v42  ;;  %v5793_v4 = vadd.f32 0.008332121, %v5792_v28  ;;  %vm5799_vm1 = vweird.f32 %v13741_v7  ;;  %vm14046_vm14 = vcmp.le.f32.partialorder %v5501_v10, 0.7853982 }
 0x951   :  { %v5602_v57 = vshll.u32 %v5601_v23, 30  ;;  %v6136_v11 = vsub.s32 32, %v6135_v24  ;;  %v5625_v5 = vsub.s32 4, %v5601_v23  ;;  %v6138_v31 = vshll.u32 %v15517_v46, %v6135_v24 }
 0x952   :  { %v5787_v62 = vmul.f32 %v5786_v9, %v5784_v3  ;;  %v5794_v36 = vmul.f32 %v5793_v4, %v5784_v3  ;;  %v6141_v16 = vshll.u32 %v15511_v59, %v6135_v24  ;;  %v6144_v2 = vshll.u32 %v15512_v53, %v6135_v24 }
 0x953   :  { %v14012_v17 = vsub.s32 %v5599_v49, %v5602_v57  ;;  %v6139_v52 = vshrl.u32 %v15511_v59, %v6136_v11  ;;  %v6142_v21 = vshrl.u32 %v15512_v53, %v6136_v11  ;;  %v6145_v6 = vshrl.u32 %v15513_v0, %v6136_v11 }
 0x954   :  { %v5788_v54 = vadd.f32 -0.4999988, %v5787_v62  ;;  %v5795_v20 = vadd.f32 -0.16666654, %v5794_v36  ;;  %v14035_v37 = vsel %vm5503_vm0, %v5625_v5, %v5601_v23  ;;  %v6137_v63 = vshrl.u32 %v15517_v46, %v6136_v11 }
 0x955   :  { %vm5604_vm3 = vcmp.lt.s32.totalorder %v14012_v17, 0  ;;  %v5605_v35 = vsub.s32 0, %v14012_v17  ;;  %v6148_v15 = vshrl.u32 %v15514_v29, %v6136_v11  ;;  %v6147_v39 = vshll.u32 %v15513_v0, %v6135_v24 }
 0x956   :  { %v5789_v27 = vmul.f32 %v5788_v54, %v5784_v3  ;;  %v5796_v45 = vmul.f32 %v5795_v20, %v5784_v3  ;;  %v6151_v50 = vshrl.u32 %v15515_v47, %v6136_v11  ;;  %v6140_v3 = vor.u32 %v6139_v52, %v6138_v31 }
 0x957   :  { %v5606_v14 = vsel %vm5604_vm3, %v5605_v35, %v14012_v17  ;;  %v6143_v49 = vor.u32 %v6142_v21, %v6141_v16  ;;  %v6150_v8 = vshll.u32 %v15514_v29, %v6135_v24  ;;  %v6146_v42 = vor.u32 %v6145_v6, %v6144_v2 }
 0x958   :  { %v5790_v18 = vadd.f32 1.0, %v5789_v27  ;;  %v5797_v25 = vadd.f32 1.0, %v5796_v45  ;;  %v5607_v51 = vclz %v5606_v14  ;;  %v6149_v28 = vor.u32 %v6148_v15, %v6147_v39 }
 0x959   :  { %v6152_v61 = vor.u32 %v6151_v50, %v6150_v8  ;;  %vm6153_vm7 = vcmp.lt.s32.totalorder %v14018_v41, 1  ;;  %vm6154_vm2 = vcmp.lt.s32.totalorder %v14018_v41, 2  ;;  %vm6155_vm4 = vcmp.lt.s32.totalorder %v14018_v41, 3 }
 0x95a   :  { %v5798_v34 = vmul.f32 %v5797_v25, %v5782_v60  ;;  %v5807_v32 = vxor.u32 2147483648, %v5790_v18  ;;  %v7307_v44 = vadd.s32 4294967294, %v5607_v51  ;;  %vm6156_vm9 = vcmp.lt.s32.totalorder %v14018_v41, 4 }
 0x95b   :  { %v6157_v24 = vsel %vm6153_vm7, %v6137_v63, %v6140_v3  ;;  %v6158_v62 = vsel %vm6156_vm9, %v6146_v42, 2102212464  ;;  %v6161_v36 = vsel %vm6153_vm7, %v6140_v3, %v6143_v49  ;;  %v6162_v57 = vsel %vm6156_vm9, %v6149_v28, 920167782 }
 0x95c   :  { %v5804_v43 = vxor.u32 2147483648, %v5798_v34  ;;  %v5808_v55 = vsel %vm5806_vm10, %v5807_v32, %v5798_v34  ;;  %vm7308_vm13 = vcmp.lt.s32.totalorder %v7307_v44, 0  ;;  %v6163_v7 = vsel %vm6155_vm4, %v6146_v42, %v6162_v57 }
 0x95d   :  { %v5610_v9 = vsel %vm7308_vm13, 0, %v7307_v44  ;;  %v6159_v20 = vsel %vm6155_vm4, %v6143_v49, %v6158_v62  ;;  %v6164_v5 = vsel %vm6154_vm2, %v6161_v36, %v6163_v7  ;;  %v6165_v31 = vsel %vm6153_vm7, %v6143_v49, %v6146_v42 }
 0x95e   :  { %v5805_v22 = vsel %vm5803_vm12, %v5790_v18, %v5804_v43  ;;  %v5611_v4 = vsub.s32 32, %v5610_v9  ;;  %v5615_v23 = vsub.s32 4294967266, %v5610_v9  ;;  %v5612_v48 = vshll.u32 %v14012_v17, %v5610_v9 }
 0x95f   :  { %v5809_v10 = vsel %vm5802_vm11, %v5805_v22, %v5808_v55  ;;  %v6166_v27 = vsel %vm6156_vm9, %v6152_v61, 1326507024  ;;  %v6194_v17 = vand.u32 65535, %v6164_v5  ;;  %v6171_v16 = vshrl.u32 %v14007_v26, 16 }
 0x960   :  { %v5810_v40 = vsel %vm5799_vm1, nan, %v5809_v10  ;;  %v5613_v11 = vshrl.u32 %v5595_v38, %v5611_v4  ;;  %v5616_v54 = vadd.s32 127, %v5615_v23  ;;  %v6167_v38 = vsel %vm6155_vm4, %v6149_v28, %v6166_v27 }
 0x961   :  { %7229 = vst.msk [vmem:[%s14704_s3 + $0xb0] sm:$0xff] %vm7206_vm6, %v5810_v40  ;;  %v6168_v52 = vsel %vm6154_vm2, %v6165_v31, %v6167_v38  ;;  %v6195_v21 = vshrl.u32 %v6164_v5, 16  ;;  %v5976_v2 = vadd.s32 1, %v14021_v13  ;;  %v14091_v6 = vand.u32 8388607, %v5966_v56 }
 0x962   :  { %v5614_v45 = vor.u32 %v5613_v11, %v5612_v48  ;;  %v5617_v35 = vshll.u32 %v5616_v54, 23  ;;  %v6172_v25 = vand.u32 65535, %v6168_v52  ;;  %v6173_v14 = vshrl.u32 %v6168_v52, 16 }
 0x963   :  { %v5628_v51 = vsel %vm14046_vm14, 0, %v14035_v37  ;;  %v14098_v63 = vsel %vm6154_vm2, %v6157_v24, %v6159_v20  ;;  %v6197_v15 = vmul.u32 %v6195_v21, %v14015_v12  ;;  %v6198_v34 = vmul.u32 %v6194_v17, %v6171_v16 }
 0x964   :  { %v5618_v18 = vor.u32 4788187, %v5617_v35  ;;  %v5621_v13 = vcvt.s32.f32 %v5614_v45  ;;  %v6175_v39 = vmul.u32 %v6173_v14, %v14015_v12  ;;  %v6176_v50 = vmul.u32 %v6172_v25, %v6171_v16 }
 0x965   :  { %v6196_v44 = vmul.u32 %v6194_v17, %v14015_v12  ;;  %v6199_v3 = vmul.u32 %v6195_v21, %v6171_v16  ;;  %v6200_v49 = vshll.u32 %v6197_v15, 16  ;;  %vm5977_vm8 = vcmp.gt.s32.totalorder %v5976_v2, 0 }
 0x966   :  { %v5619_v32 = vand.u32 2147483647, %v5618_v18  ;;  %v6174_v37 = vmul.u32 %v6172_v25, %v14015_v12  ;;  %v6177_v43 = vmul.u32 %v6173_v14, %v6171_v16  ;;  %v6178_v41 = vshll.u32 %v6175_v39, 16 }
 0x967   :  { %v6180_v55 = vshll.u32 %v6176_v50, 16  ;;  %v6202_v42 = vshll.u32 %v6198_v34, 16  ;;  %vm6204_vm5 = vc.u32 %v6196_v44, %v6200_v49  ;;  %v6206_v28 = vadd.s32 %v6200_v49, %v6196_v44 }
 0x968   :  { %v5622_v8 = vmul.f32 %v5621_v13, %v5619_v32  ;;  %vm6182_vm10 = vc.u32 %v6174_v37, %v6178_v41  ;;  %v6184_v22 = vadd.s32 %v6178_v41, %v6174_v37  ;;  %v6205_v9 = vsel %vm6204_vm5, 1, %v15516_v33 }
 0x969   :  { %v6183_v10 = vsel %vm6182_vm10, 1, %v15516_v33  ;;  %v6201_v4 = vshrl.u32 %v6197_v15, 16  ;;  %v6207_v23 = vadd.s32 %v6205_v9, %v6199_v3  ;;  %vm6208_vm12 = vc.u32 %v6206_v28, %v6202_v42 }
 0x96a   :  { %v5623_v61 = vxor.u32 2147483648, %v5622_v8  ;;  %v6185_v12 = vadd.s32 %v6183_v10, %v6177_v43  ;;  %vm6186_vm11 = vc.u32 %v6184_v22, %v6180_v55  ;;  %v6209_v40 = vsel %vm6208_vm12, 1, %v15516_v33 }
 0x96b   :  { %v6187_v36 = vsel %vm6186_vm11, 1, %v15516_v33  ;;  %v6211_v57 = vadd.s32 %v6209_v40, %v6207_v23  ;;  %v5978_v48 = vsel %vm5977_vm8, %v5976_v2, 0  ;;  %v6179_v54 = vshrl.u32 %v6175_v39, 16 }
 0x96c   :  { %v5624_v24 = vsel %vm5503_vm0, %v5623_v61, %v5622_v8  ;;  %v6189_v7 = vadd.s32 %v6187_v36, %v6185_v12  ;;  %v5980_v20 = vand.u32 31, %v5978_v48  ;;  %v6181_v5 = vshrl.u32 %v6176_v50, 16 }
 0x96d   :  { %v5627_v62 = vsel %vm14046_vm14, %v13762_v30, %v5624_v24  ;;  %v6203_v31 = vshrl.u32 %v6198_v34, 16  ;;  %v6212_v27 = vadd.s32 %v6211_v57, %v6201_v4  ;;  %v5645_v52 = vadd.s32 3, %v5628_v51 }
 0x96e   :  { %v5629_v11 = vmul.f32 %v5627_v62, %v5627_v62  ;;  %v6190_v38 = vadd.s32 %v6189_v7, %v6179_v54  ;;  %v14114_v17 = vsub.s32 32, %v5980_v20  ;;  %v6214_v16 = vmul.u32 %v14007_v26, %v14098_v63 }
 0x96f   :  { %v6213_v60 = vadd.s32 %v6212_v27, %v6203_v31  ;;  %v5974_v21 = vor.u32 8388608, %v14091_v6  ;;  %v14121_v14 = vadd.s32 %v6206_v28, %v6202_v42  ;;  %v14123_v34 = vshrl.u32 %v5978_v48, 5 }
 0x970   :  { %v5630_v45 = vmul.f32 -0.001358992, %v5629_v11  ;;  %v5637_v35 = vmul.f32 -0.00019511016, %v5629_v11  ;;  %v14119_v25 = vadd.s32 %v6190_v38, %v6181_v5  ;;  %v5983_v32 = vshll.u32 %v15517_v46, %v5980_v20 }
 0x971   :  { %v6217_v15 = vadd.s32 1, %v6213_v60  ;;  %v5984_v51 = vshrl.u32 %v15511_v59, %v14114_v17  ;;  %v5987_v26 = vshrl.u32 %v15512_v53, %v14114_v17  ;;  %v5986_v63 = vshll.u32 %v15511_v59, %v5980_v20 }
 0x972   :  { %v5631_v2 = vadd.f32 0.041655596, %v5630_v45  ;;  %v5638_v18 = vadd.f32 0.008332121, %v5637_v35  ;;  %vm6216_vm0 = vc.u32 %v14119_v25, %v14121_v14  ;;  %v5989_v50 = vshll.u32 %v15512_v53, %v5980_v20 }
 0x973   :  { %v6218_v6 = vsel %vm6216_vm0, %v6217_v15, %v6213_v60  ;;  %v5990_v44 = vshrl.u32 %v15513_v0, %v14114_v17  ;;  %v5985_v37 = vor.u32 %v5984_v51, %v5983_v32  ;;  %v5992_v43 = vshll.u32 %v15513_v0, %v5980_v20  ;;  %v2102_v32 = vpop.permute.xlu1 %2101 }
 0x974   :  { %v5632_v13 = vmul.f32 %v5631_v2, %v5629_v11  ;;  %v5639_v39 = vmul.f32 %v5638_v18, %v5629_v11  ;;  %v6219_v8 = vadd.s32 %v6218_v6, %v6214_v16  ;;  %v5993_v41 = vshrl.u32 %v15514_v29, %v14114_v17 }
 0x975   :  { %v5995_v55 = vshll.u32 %v15514_v29, %v5980_v20  ;;  %v5996_v42 = vshrl.u32 %v15515_v47, %v14114_v17  ;;  %v14142_v9 = vor.u32 %v5987_v26, %v5986_v63  ;;  %v5646_v10 = vand.u32 3, %v5645_v52 }
 0x976   :  { %v5633_v3 = vadd.f32 -0.4999988, %v5632_v13  ;;  %v5640_v49 = vadd.f32 -0.16666654, %v5639_v39  ;;  %v6220_v22 = vadd.s32 536870912, %v6219_v8  ;;  %v5991_v4 = vor.u32 %v5990_v44, %v5989_v50 }
 0x977   :  { %v5994_v23 = vor.u32 %v5993_v41, %v5992_v43  ;;  %v5997_v24 = vor.u32 %v5996_v42, %v5995_v55  ;;  %vm6001_vm3 = vcmp.lt.s32.totalorder %v14123_v34, 4  ;;  %vm5644_vm1 = vweird.f32 %v13762_v30 }
 0x978   :  { %v5634_v28 = vmul.f32 %v5633_v3, %v5629_v11  ;;  %v5641_v61 = vmul.f32 %v5640_v49, %v5629_v11  ;;  %v14144_v36 = vshrl.u32 %v6220_v22, 30  ;;  %vm5998_vm14 = vcmp.lt.s32.totalorder %v14123_v34, 1  ;;  %v15580_v3 = vld [vmem:[#allocation23_spill] sm:$0xff] }
 0x979   :  { %vm6000_vm13 = vcmp.lt.s32.totalorder %v14123_v34, 3  ;;  %v6007_v57 = vsel %vm6001_vm3, %v5994_v23, 920167782  ;;  %v6006_v7 = vsel %vm5998_vm14, %v5985_v37, %v14142_v9  ;;  %vm5647_vm7 = vcmp.lt.s32.totalorder %v5646_v10, 2 }
 0x97a   :  { %v5635_v12 = vadd.f32 1.0, %v5634_v28  ;;  %v5642_v40 = vadd.f32 1.0, %v5641_v61  ;;  %v6222_v54 = vshll.u32 %v14144_v36, 30  ;;  %v6008_v20 = vsel %vm6000_vm13, %v5991_v4, %v6007_v57 }
 0x97b   :  { %v6011_v5 = vsel %vm6001_vm3, %v5997_v24, 1326507024  ;;  %v14160_v31 = vshll.u32 %v5974_v21, 8  ;;  %vm5999_vm2 = vcmp.lt.s32.totalorder %v14123_v34, 2  ;;  %vm5648_vm4 = vcmp.eq.s32.totalorder %v5646_v10, 0 }
 0x97c   :  { %v5643_v48 = vmul.f32 %v5642_v40, %v5627_v62  ;;  %v5652_v11 = vxor.u32 2147483648, %v5635_v12  ;;  %v6223_v45 = vsub.s32 %v6219_v8, %v6222_v54  ;;  %v6010_v62 = vsel %vm5998_vm14, %v14142_v9, %v5991_v4 }
 0x97d   :  { %vm5651_vm9 = vcmp.eq.s32.totalorder %v5646_v10, 2  ;;  %v6009_v35 = vsel %vm5999_vm2, %v6006_v7, %v6008_v20  ;;  %v6012_v38 = vsel %vm6000_vm13, %v5994_v23, %v6011_v5  ;;  %v5982_v2 = vshrl.u32 %v15517_v46, %v14114_v17 }
 0x97e   :  { %v5649_v27 = vxor.u32 2147483648, %v5643_v48  ;;  %v5653_v60 = vsel %vm5651_vm9, %v5652_v11, %v5643_v48  ;;  %vm6224_vm8 = vcmp.lt.s32.totalorder %v6223_v45, 0  ;;  %v6225_v16 = vsub.s32 0, %v6223_v45 }
 0x97f   :  { %v6013_v18 = vsel %vm5999_vm2, %v6010_v62, %v6012_v38  ;;  %v6015_v15 = vand.u32 65535, %v14160_v31  ;;  %v6039_v26 = vand.u32 65535, %v6009_v35  ;;  %v6016_v17 = vshrl.u32 %v14160_v31, 16 }
 0x980   :  { %v5650_v52 = vsel %vm5648_vm4, %v5635_v12, %v5649_v27  ;;  %v6226_v13 = vsel %vm6224_vm8, %v6225_v16, %v6223_v45  ;;  %v6017_v39 = vand.u32 65535, %v6013_v18  ;;  %v6018_v63 = vshrl.u32 %v6013_v18, 16 }
 0x981   :  { %v5654_v21 = vsel %vm5647_vm7, %v5650_v52, %v5653_v60  ;;  %v6227_v6 = vclz %v6226_v13  ;;  %v6040_v50 = vshrl.u32 %v6009_v35, 16  ;;  %v6215_v44 = vadd.s32 %v14121_v14, %v14119_v25  ;;  %v14199_v35 = vld [vmem:[%s14702_s1] ss:$0 sm:$0xff] }
 0x982   :  { %v5655_v51 = vsel %vm5644_vm1, nan, %v5654_v21  ;;  %v2170_v30 = vsel %vm2141_vm15, %v15580_v3, %v2102_v32  ;;  %v14189_v8 = vsel %vm5998_vm14, %v5982_v2, %v5985_v37  ;;  %v6020_v43 = vmul.u32 %v6018_v63, %v6015_v15 }
 0x983   :  { %7228 = vst.msk [vmem:[%s14704_s3 + $0xa8] sm:$0xff] %vm7206_vm6, %v5655_v51  ;;  %v7319_v49 = vadd.s32 4294967294, %v6227_v6  ;;  %v6021_v41 = vmul.u32 %v6017_v39, %v6016_v17  ;;  %v6245_v55 = vsub.s32 4, %v14144_v36  ;;  %v6003_v42 = vsel %vm6001_vm3, %v5991_v4, 2102212464 }
 0x984   :  { %v6042_v28 = vmul.u32 %v6040_v50, %v6015_v15  ;;  %v6043_v61 = vmul.u32 %v6039_v26, %v6016_v17  ;;  %v6019_v22 = vmul.u32 %v6017_v39, %v6015_v15  ;;  %v6023_v25 = vshll.u32 %v6020_v43, 16 }
 0x985   :  { %vm7320_vm5 = vcmp.lt.s32.totalorder %v7319_v49, 0  ;;  %v6041_v14 = vmul.u32 %v6039_v26, %v6015_v15  ;;  %v6022_v23 = vmul.u32 %v6018_v63, %v6016_v17  ;;  %v6044_v24 = vmul.u32 %v6040_v50, %v6016_v17  ;;  %v14206_v15 = vld [vmem:[%s14703_s2] ss:$0 sm:$0xff]  ;;  %v15581_v26 = vld [vmem:[#allocation255_spill] sm:$0xff] }
 0x986   :  { %v6230_v10 = vsel %vm7320_vm5, 0, %v7319_v49  ;;  %v6045_v12 = vshll.u32 %v6042_v28, 16  ;;  %v6025_v57 = vshll.u32 %v6021_v41, 16  ;;  %vm6027_vm10 = vc.u32 %v6019_v22, %v6023_v25 }
 0x987   :  { %v6231_v40 = vsub.s32 32, %v6230_v10  ;;  %v6235_v37 = vsub.s32 4294967266, %v6230_v10  ;;  %v6232_v48 = vshll.u32 %v6223_v45, %v6230_v10  ;;  %v6028_v11 = vsel %vm6027_vm10, 1, %v15516_v33  ;;  %v2100_v45 = vpop.permute.xlu0 %2099 }
 0x988   :  { %v6029_v54 = vadd.s32 %v6023_v25, %v6019_v22  ;;  %v6047_v7 = vshll.u32 %v6043_v61, 16  ;;  %v6030_v5 = vadd.s32 %v6028_v11, %v6022_v23  ;;  %vm6049_vm12 = vc.u32 %v6041_v14, %v6045_v12 }
 0x989   :  { %v6233_v4 = vshrl.u32 %v6215_v44, %v6231_v40  ;;  %v6236_v20 = vadd.s32 127, %v6235_v37  ;;  %v6050_v27 = vsel %vm6049_vm12, 1, %v15516_v33  ;;  %v6051_v62 = vadd.s32 %v6045_v12, %v6041_v14 }
 0x98a   :  { %vm6031_vm11 = vc.u32 %v6029_v54, %v6025_v57  ;;  %v2206_v38 = vmul.f32 %v14199_v35, %v2170_v30  ;;  %v6052_v21 = vadd.s32 %v6050_v27, %v6044_v24  ;;  %v6024_v2 = vshrl.u32 %v6020_v43, 16 }
 0x98b   :  { %v6234_v52 = vor.u32 %v6233_v4, %v6232_v48  ;;  %v6237_v60 = vshll.u32 %v6236_v20, 23  ;;  %v6032_v16 = vsel %vm6031_vm11, 1, %v15516_v33  ;;  %vm6053_vm0 = vc.u32 %v6051_v62, %v6047_v7 }
 0x98c   :  { %v6034_v18 = vadd.s32 %v6032_v16, %v6030_v5  ;;  %v14209_v32 = vadd.f32 %v14206_v15, %v2206_v38  ;;  %v6026_v13 = vshrl.u32 %v6021_v41, 16  ;;  %v6054_v39 = vsel %vm6053_vm0, 1, %v15516_v33 }
 0x98d   :  { %v6238_v51 = vor.u32 4788187, %v6237_v60  ;;  %v2169_v6 = vsel %vm2141_vm15, %v15581_v26, %v2100_v45  ;;  %v6046_v63 = vshrl.u32 %v6042_v28, 16  ;;  %v6056_v50 = vadd.s32 %v6054_v39, %v6052_v21 }
 0x98e   :  { %v6035_v17 = vadd.s32 %v6034_v18, %v6024_v2  ;;  %v6586_v44 = vand.u32 2147483647, %v14209_v32  ;;  %v6241_v30 = vcvt.s32.f32 %v6234_v52  ;;  %v6004_v49 = vsel %vm6000_vm13, %v14142_v9, %v6003_v42 }
 0x98f   :  { %v6239_v3 = vand.u32 2147483647, %v6238_v51  ;;  %v6589_v43 = vand.u32 2139095040, %v14209_v32  ;;  %v6048_v41 = vshrl.u32 %v6043_v61, 16  ;;  %v6057_v25 = vadd.s32 %v6056_v50, %v6046_v63 }
 0x990   :  { %v6036_v22 = vadd.s32 %v6035_v17, %v6026_v13  ;;  %v2205_v14 = vmul.f32 %v14199_v35, %v2169_v6  ;;  %vm6123_vm3 = vcmp.lt.s32.totalorder %v13975_v1, 0  ;;  %v6055_v28 = vadd.s32 %v6051_v62, %v6047_v7 }
 0x991   :  { %v6242_v10 = vmul.f32 %v6241_v30, %v6239_v3  ;;  %v6590_v23 = vshrl.u32 %v6589_v43, 23  ;;  %v6246_v24 = vsel %vm6123_vm3, %v6245_v55, %v14144_v36  ;;  %v6005_v12 = vsel %vm5999_vm2, %v14189_v8, %v6004_v49 }
 0x992   :  { %v6058_v40 = vadd.s32 %v6057_v25, %v6048_v41  ;;  %v6593_v9 = vand.u32 8388607, %v6586_v44  ;;  %vm6061_vm1 = vc.u32 %v6036_v22, %v6055_v28  ;;  %vm6122_vm14 = vcmp.le.f32.partialorder %v6121_v19, 0.7853982 }
 0x993   :  { %v6243_v42 = vxor.u32 2147483648, %v6242_v10  ;;  %v7327_v61 = vadd.s32 4294967169, %v6590_v23  ;;  %v14230_v57 = vadd.f32 %v14206_v15, %v2205_v14  ;;  %v6248_v36 = vsel %vm6122_vm14, 0, %v6246_v24 }
 0x994   :  { %v6062_v37 = vadd.s32 1, %v6058_v40  ;;  %v6059_v55 = vmul.u32 %v14160_v31, %v6005_v12  ;;  %v6594_v54 = vor.u32 8388608, %v6593_v9  ;;  %v6265_v20 = vadd.s32 3, %v6248_v36 }
 0x995   :  { %v6244_v48 = vsel %vm6123_vm3, %v6243_v42, %v6242_v10  ;;  %v6596_v34 = vadd.s32 1, %v7327_v61  ;;  %v6431_v19 = vand.u32 2147483647, %v14230_v57  ;;  %v6434_v31 = vand.u32 2139095040, %v14230_v57 }
 0x996   :  { %v6247_v8 = vsel %vm6122_vm14, %v13975_v1, %v6244_v48  ;;  %v6063_v11 = vsel %vm6061_vm1, %v6062_v37, %v6058_v40  ;;  %v14235_v52 = vshll.u32 %v6594_v54, 8  ;;  %v14238_v2 = vand.u32 3, %v6265_v20 }
 0x997   :  { %v6249_v7 = vmul.f32 %v6247_v8, %v6247_v8  ;;  %v6064_v4 = vadd.s32 %v6063_v11, %v6059_v55  ;;  %vm6597_vm13 = vcmp.gt.s32.totalorder %v6596_v34, 0  ;;  %v14240_v18 = vadd.s32 %v6055_v28, %v6036_v22 }
 0x998   :  { %v6598_v5 = vsel %vm6597_vm13, %v6596_v34, 0  ;;  %v14244_v6 = vand.u32 8388607, %v6431_v19  ;;  %vm5968_vm7 = vcmp.lt.s32.totalorder %v13996_v58, 0  ;;  %v14250_v63 = vand.u32 65535, %v14235_v52 }
 0x999   :  { %v6250_v27 = vmul.f32 -0.001358992, %v6249_v7  ;;  %v6257_v62 = vmul.f32 -0.00019511016, %v6249_v7  ;;  %v6065_v38 = vadd.s32 536870912, %v6064_v4  ;;  %v6600_v45 = vand.u32 31, %v6598_v5 }
 0x99a   :  { %v14247_v17 = vshrl.u32 %v6598_v5, 5  ;;  %v14253_v50 = vshrl.u32 %v14235_v52, 16  ;;  %v6435_v3 = vshrl.u32 %v6434_v31, 23  ;;  %vm6268_vm2 = vcmp.eq.s32.totalorder %v14238_v2, 0 }
 0x99b   :  { %v6251_v60 = vadd.f32 0.041655596, %v6250_v27  ;;  %v6258_v16 = vadd.f32 0.008332121, %v6257_v62  ;;  %v6066_v21 = vshrl.u32 %v6065_v38, 30  ;;  %v6601_v51 = vsub.s32 32, %v6600_v45 }
 0x99c   :  { %v6603_v22 = vshll.u32 %v15517_v46, %v6600_v45  ;;  %vm6271_vm4 = vcmp.eq.s32.totalorder %v14238_v2, 2  ;;  %v6606_v25 = vshll.u32 %v15511_v59, %v6600_v45  ;;  %vm6267_vm9 = vcmp.lt.s32.totalorder %v14238_v2, 2 }
 0x99d   :  { %v6252_v13 = vmul.f32 %v6251_v60, %v6249_v7  ;;  %v6259_v39 = vmul.f32 %v6258_v16, %v6249_v7  ;;  %v6067_v26 = vshll.u32 %v6066_v21, 30  ;;  %v6604_v41 = vshrl.u32 %v15511_v59, %v6601_v51 }
 0x99e   :  { %v6607_v14 = vshrl.u32 %v15512_v53, %v6601_v51  ;;  %v6610_v10 = vshrl.u32 %v15513_v0, %v6601_v51  ;;  %vm6264_vm5 = vweird.f32 %v13975_v1  ;;  %v6090_v12 = vsub.s32 4, %v6066_v21 }
 0x99f   :  { %v6253_v30 = vadd.f32 -0.4999988, %v6252_v13  ;;  %v6260_v49 = vadd.f32 -0.16666654, %v6259_v39  ;;  %v14255_v43 = vsub.s32 %v6064_v4, %v6067_v26  ;;  %v6609_v40 = vshll.u32 %v15512_v53, %v6600_v45 }
 0x9a0   :  { %v6612_v9 = vshll.u32 %v15513_v0, %v6600_v45  ;;  %v6613_v42 = vshrl.u32 %v15514_v29, %v6601_v51  ;;  %v6616_v36 = vshrl.u32 %v15515_v47, %v6601_v51  ;;  %vm14275_vm10 = vcmp.le.f32.partialorder %v5966_v56, 0.7853982 }
 0x9a1   :  { %v6254_v28 = vmul.f32 %v6253_v30, %v6249_v7  ;;  %v6261_v23 = vmul.f32 %v6260_v49, %v6249_v7  ;;  %vm6069_vm8 = vcmp.lt.s32.totalorder %v14255_v43, 0  ;;  %v6070_v24 = vsub.s32 0, %v14255_v43 }
 0x9a2   :  { %v6605_v11 = vor.u32 %v6604_v41, %v6603_v22  ;;  %v6608_v54 = vor.u32 %v6607_v14, %v6606_v25  ;;  %v6614_v7 = vor.u32 %v6613_v42, %v6612_v9  ;;  %v6611_v5 = vor.u32 %v6610_v10, %v6609_v40 }
 0x9a3   :  { %v6255_v61 = vadd.f32 1.0, %v6254_v28  ;;  %v6262_v37 = vadd.f32 1.0, %v6261_v23  ;;  %v6071_v48 = vsel %vm6069_vm8, %v6070_v24, %v14255_v43  ;;  %v6615_v27 = vshll.u32 %v15514_v29, %v6600_v45 }
 0x9a4   :  { %v6072_v34 = vclz %v6071_v48  ;;  %v6602_v38 = vshrl.u32 %v15517_v46, %v6601_v51  ;;  %vm6618_vm12 = vcmp.lt.s32.totalorder %v14247_v17, 1  ;;  %v7324_v31 = vadd.s32 4294967169, %v6435_v3 }
 0x9a5   :  { %v6263_v4 = vmul.f32 %v6262_v37, %v6247_v8  ;;  %v6272_v20 = vxor.u32 2147483648, %v6255_v61  ;;  %v6091_v56 = vsel %vm5968_vm7, %v6090_v12, %v6066_v21  ;;  %v6617_v16 = vor.u32 %v6616_v36, %v6615_v27 }
 0x9a6   :  { %v7316_v62 = vadd.s32 4294967294, %v6072_v34  ;;  %vm6621_vm11 = vcmp.lt.s32.totalorder %v14247_v17, 4  ;;  %vm6620_vm3 = vcmp.lt.s32.totalorder %v14247_v17, 3  ;;  %v6626_v8 = vsel %vm6618_vm12, %v6605_v11, %v6608_v54 }
 0x9a7   :  { %v6269_v60 = vxor.u32 2147483648, %v6263_v4  ;;  %v6627_v45 = vsel %vm6621_vm11, %v6614_v7, 920167782  ;;  %v6273_v13 = vsel %vm6271_vm4, %v6272_v20, %v6263_v4  ;;  %vm6619_vm1 = vcmp.lt.s32.totalorder %v14247_v17, 2 }
 0x9a8   :  { %vm7317_vm0 = vcmp.lt.s32.totalorder %v7316_v62, 0  ;;  %v6628_v21 = vsel %vm6620_vm3, %v6611_v5, %v6627_v45  ;;  %v6630_v25 = vsel %vm6618_vm12, %v6608_v54, %v6611_v5  ;;  %v6631_v1 = vsel %vm6621_vm11, %v6617_v16, 1326507024 }
 0x9a9   :  { %v6270_v51 = vsel %vm6268_vm2, %v6255_v61, %v6269_v60  ;;  %v6075_v39 = vsel %vm7317_vm0, 0, %v7316_v62  ;;  %v6629_v41 = vsel %vm6619_vm1, %v6626_v8, %v6628_v21  ;;  %v6623_v28 = vsel %vm6621_vm11, %v6611_v5, 2102212464 }
 0x9aa   :  { %v6274_v26 = vsel %vm6267_vm9, %v6270_v51, %v6273_v13  ;;  %v6076_v3 = vsub.s32 32, %v6075_v39  ;;  %v6080_v30 = vsub.s32 4294967266, %v6075_v39  ;;  %v6077_v22 = vshll.u32 %v14255_v43, %v6075_v39 }
 0x9ab   :  { %v6275_v49 = vsel %vm6264_vm5, nan, %v6274_v26  ;;  %v6659_v10 = vand.u32 65535, %v6629_v41  ;;  %v6093_v43 = vsel %vm14275_vm10, 0, %v6091_v56  ;;  %v6632_v23 = vsel %vm6620_vm3, %v6614_v7, %v6631_v1 }
 0x9ac   :  { %7232 = vst.msk [vmem:[%s14704_s3 + $0xc8] sm:$0xff] %vm7206_vm6, %v6275_v49  ;;  %v6078_v2 = vshrl.u32 %v14240_v18, %v6076_v3  ;;  %v6081_v14 = vadd.s32 127, %v6080_v30  ;;  %v6660_v24 = vshrl.u32 %v6629_v41, 16  ;;  %v6633_v18 = vsel %vm6619_vm1, %v6630_v25, %v6632_v23 }
 0x9ad   :  { %v6441_v9 = vadd.s32 1, %v7324_v31  ;;  %v6637_v42 = vand.u32 65535, %v6633_v18  ;;  %v6638_v61 = vshrl.u32 %v6633_v18, 16  ;;  %v6663_v48 = vmul.u32 %v6659_v10, %v14253_v50 }
 0x9ae   :  { %v6079_v12 = vor.u32 %v6078_v2, %v6077_v22  ;;  %v6082_v40 = vshll.u32 %v6081_v14, 23  ;;  %v6662_v37 = vmul.u32 %v6660_v24, %v14250_v63  ;;  %v6110_v34 = vadd.s32 3, %v6093_v43 }
 0x9af   :  { %v6622_v4 = vsel %vm6618_vm12, %v6602_v38, %v6605_v11  ;;  %v6624_v7 = vsel %vm6620_vm3, %v6608_v54, %v6623_v28  ;;  %v6640_v5 = vmul.u32 %v6638_v61, %v14250_v63  ;;  %v6641_v27 = vmul.u32 %v6637_v42, %v14253_v50 }
 0x9b0   :  { %v6083_v36 = vor.u32 4788187, %v6082_v40  ;;  %v6086_v20 = vcvt.s32.f32 %v6079_v12  ;;  %v6661_v62 = vmul.u32 %v6659_v10, %v14250_v63  ;;  %v6664_v60 = vmul.u32 %v6660_v24, %v14253_v50 }
 0x9b1   :  { %v6665_v56 = vshll.u32 %v6662_v37, 16  ;;  %vm6442_vm14 = vcmp.gt.s32.totalorder %v6441_v9, 0  ;;  %v6639_v16 = vmul.u32 %v6637_v42, %v14250_v63  ;;  %v6642_v8 = vmul.u32 %v6638_v61, %v14253_v50 }
 0x9b2   :  { %v6084_v31 = vand.u32 2147483647, %v6083_v36  ;;  %v6643_v11 = vshll.u32 %v6640_v5, 16  ;;  %v6667_v38 = vshll.u32 %v6663_v48, 16  ;;  %v6645_v54 = vshll.u32 %v6641_v27, 16 }
 0x9b3   :  { %vm6669_vm13 = vc.u32 %v6661_v62, %v6665_v56  ;;  %v6671_v51 = vadd.s32 %v6665_v56, %v6661_v62  ;;  %v6443_v21 = vsel %vm6442_vm14, %v6441_v9, 0  ;;  %v6625_v63 = vsel %vm6619_vm1, %v6622_v4, %v6624_v7 }
 0x9b4   :  { %v6087_v45 = vmul.f32 %v6086_v20, %v6084_v31  ;;  %vm6647_vm2 = vc.u32 %v6639_v16, %v6643_v11  ;;  %v6649_v13 = vadd.s32 %v6643_v11, %v6639_v16  ;;  %v6670_v39 = vsel %vm6669_vm13, 1, %v15516_v33 }
 0x9b5   :  { %v6648_v3 = vsel %vm6647_vm2, 1, %v15516_v33  ;;  %v6672_v30 = vadd.s32 %v6670_v39, %v6664_v60  ;;  %vm6673_vm4 = vc.u32 %v6671_v51, %v6667_v38  ;;  %v6666_v25 = vshrl.u32 %v6662_v37, 16 }
 0x9b6   :  { %v6088_v26 = vxor.u32 2147483648, %v6087_v45  ;;  %v6650_v50 = vadd.s32 %v6648_v3, %v6642_v8  ;;  %vm6651_vm9 = vc.u32 %v6649_v13, %v6645_v54  ;;  %v6674_v49 = vsel %vm6673_vm4, 1, %v15516_v33 }
 0x9b7   :  { %v6652_v41 = vsel %vm6651_vm9, 1, %v15516_v33  ;;  %v6676_v2 = vadd.s32 %v6674_v49, %v6672_v30  ;;  %v6644_v1 = vshrl.u32 %v6640_v5, 16  ;;  %v6445_v43 = vand.u32 31, %v6443_v21 }
 0x9b8   :  { %v6089_v22 = vsel %vm5968_vm7, %v6088_v26, %v6087_v45  ;;  %v6654_v10 = vadd.s32 %v6652_v41, %v6650_v50  ;;  %v6668_v28 = vshrl.u32 %v6663_v48, 16  ;;  %v6439_v24 = vor.u32 8388608, %v14244_v6 }
 0x9b9   :  { %v6092_v14 = vsel %vm14275_vm10, %v13996_v58, %v6089_v22  ;;  %v6677_v23 = vadd.s32 %v6676_v2, %v6666_v25  ;;  %v14345_v12 = vand.u32 3, %v6110_v34  ;;  %v6646_v40 = vshrl.u32 %v6641_v27, 16 }
 0x9ba   :  { %v6094_v17 = vmul.f32 %v6092_v14, %v6092_v14  ;;  %v6655_v18 = vadd.s32 %v6654_v10, %v6644_v1  ;;  %v14347_v9 = vsub.s32 32, %v6445_v43  ;;  %v6679_v55 = vmul.u32 %v14235_v52, %v6625_v63 }
 0x9bb   :  { %v6678_v37 = vadd.s32 %v6677_v23, %v6668_v28  ;;  %v14352_v4 = vadd.s32 %v6671_v51, %v6667_v38  ;;  %v14354_v7 = vshrl.u32 %v6443_v21, 5  ;;  %v6448_v5 = vshll.u32 %v15517_v46, %v6445_v43 }
 0x9bc   :  { %v6095_v42 = vmul.f32 -0.001358992, %v6094_v17  ;;  %v6102_v61 = vmul.f32 -0.00019511016, %v6094_v17  ;;  %v14350_v36 = vadd.s32 %v6655_v18, %v6646_v40  ;;  %v6449_v6 = vshrl.u32 %v15511_v59, %v14347_v9 }
 0x9bd   :  { %v6682_v20 = vadd.s32 1, %v6678_v37  ;;  %v6451_v27 = vshll.u32 %v15511_v59, %v6445_v43  ;;  %v6452_v52 = vshrl.u32 %v15512_v53, %v14347_v9  ;;  %v6455_v62 = vshrl.u32 %v15513_v0, %v14347_v9 }
 0x9be   :  { %v6096_v48 = vadd.f32 0.041655596, %v6095_v42  ;;  %v6103_v34 = vadd.f32 0.008332121, %v6102_v61  ;;  %vm6681_vm7 = vc.u32 %v14350_v36, %v14352_v4  ;;  %v6454_v16 = vshll.u32 %v15512_v53, %v6445_v43 }
 0x9bf   :  { %v6683_v56 = vsel %vm6681_vm7, %v6682_v20, %v6678_v37  ;;  %v14367_v11 = vor.u32 %v6449_v6, %v6448_v5  ;;  %v6457_v38 = vshll.u32 %v15513_v0, %v6445_v43  ;;  %v6458_v45 = vshrl.u32 %v15514_v29, %v14347_v9 }
 0x9c0   :  { %v6097_v31 = vmul.f32 %v6096_v48, %v6094_v17  ;;  %v6104_v60 = vmul.f32 %v6103_v34, %v6094_v17  ;;  %v6684_v8 = vadd.s32 %v6683_v56, %v6679_v55  ;;  %v6460_v13 = vshll.u32 %v15514_v29, %v6445_v43 }
 0x9c1   :  { %v6461_v39 = vshrl.u32 %v15515_v47, %v14347_v9  ;;  %v14375_v26 = vor.u32 %v6452_v52, %v6451_v27  ;;  %v14377_v3 = vor.u32 %v6455_v62, %v6454_v16  ;;  %v6459_v30 = vor.u32 %v6458_v45, %v6457_v38 }
 0x9c2   :  { %v6098_v54 = vadd.f32 -0.4999988, %v6097_v31  ;;  %v6105_v51 = vadd.f32 -0.16666654, %v6104_v60  ;;  %v6685_v21 = vadd.s32 536870912, %v6684_v8  ;;  %vm6466_vm8 = vcmp.lt.s32.totalorder %v14354_v7, 4 }
 0x9c3   :  { %v6462_v49 = vor.u32 %v6461_v39, %v6460_v13  ;;  %vm6109_vm5 = vweird.f32 %v13996_v58  ;;  %v6472_v41 = vsel %vm6466_vm8, %v6459_v30, 920167782  ;;  %v14385_v25 = vshll.u32 %v6439_v24, 8 }
 0x9c4   :  { %v6099_v63 = vmul.f32 %v6098_v54, %v6094_v17  ;;  %v6106_v50 = vmul.f32 %v6105_v51, %v6094_v17  ;;  %v14381_v22 = vshrl.u32 %v6685_v21, 30  ;;  %vm6463_vm10 = vcmp.lt.s32.totalorder %v14354_v7, 1 }
 0x9c5   :  { %vm6465_vm12 = vcmp.lt.s32.totalorder %v14354_v7, 3  ;;  %v6471_v43 = vsel %vm6463_vm10, %v14367_v11, %v14375_v26  ;;  %v6475_v28 = vsel %vm6463_vm10, %v14375_v26, %v14377_v3  ;;  %vm6112_vm11 = vcmp.lt.s32.totalorder %v14345_v12, 2 }
 0x9c6   :  { %v6100_v2 = vadd.f32 1.0, %v6099_v63  ;;  %v6107_v1 = vadd.f32 1.0, %v6106_v50  ;;  %v6687_v10 = vshll.u32 %v14381_v22, 30  ;;  %v6473_v17 = vsel %vm6465_vm12, %v14377_v3, %v6472_v41 }
 0x9c7   :  { %v6476_v40 = vsel %vm6466_vm8, %v6462_v49, 1326507024  ;;  %vm6113_vm0 = vcmp.eq.s32.totalorder %v14345_v12, 0  ;;  %vm6464_vm3 = vcmp.lt.s32.totalorder %v14354_v7, 2  ;;  %vm6116_vm1 = vcmp.eq.s32.totalorder %v14345_v12, 2 }
 0x9c8   :  { %v6108_v23 = vmul.f32 %v6107_v1, %v6092_v14  ;;  %v6117_v24 = vxor.u32 2147483648, %v6100_v2  ;;  %v6688_v18 = vsub.s32 %v6684_v8, %v6687_v10  ;;  %v6477_v42 = vsel %vm6465_vm12, %v6459_v30, %v6476_v40 }
 0x9c9   :  { %v6474_v14 = vsel %vm6464_vm3, %v6471_v43, %v6473_v17  ;;  %v6478_v37 = vsel %vm6464_vm3, %v6475_v28, %v6477_v42  ;;  %v6480_v6 = vand.u32 65535, %v14385_v25  ;;  %v6481_v5 = vshrl.u32 %v14385_v25, 16 }
 0x9ca   :  { %v6114_v61 = vxor.u32 2147483648, %v6108_v23  ;;  %vm6689_vm14 = vcmp.lt.s32.totalorder %v6688_v18, 0  ;;  %v6690_v55 = vsub.s32 0, %v6688_v18  ;;  %v6482_v48 = vand.u32 65535, %v6478_v37 }
 0x9cb   :  { %v6118_v20 = vsel %vm6116_vm1, %v6117_v24, %v6108_v23  ;;  %v6483_v27 = vshrl.u32 %v6478_v37, 16  ;;  %v6504_v31 = vand.u32 65535, %v6474_v14  ;;  %v6505_v60 = vshrl.u32 %v6474_v14, 16 }
 0x9cc   :  { %v6115_v34 = vsel %vm6113_vm0, %v6100_v2, %v6114_v61  ;;  %v6691_v62 = vsel %vm6689_vm14, %v6690_v55, %v6688_v18  ;;  %v6486_v38 = vmul.u32 %v6482_v48, %v6481_v5  ;;  %v6447_v54 = vshrl.u32 %v15517_v46, %v14347_v9  ;;  %v2106_v55 = vpop.permute.xlu0 %2105 }
 0x9cd   :  { %v6119_v52 = vsel %vm6112_vm11, %v6115_v34, %v6118_v20  ;;  %v6692_v16 = vclz %v6691_v62  ;;  %v6485_v8 = vmul.u32 %v6483_v27, %v6480_v6  ;;  %v6484_v12 = vmul.u32 %v6482_v48, %v6480_v6  ;;  %v15584_v34 = vld [vmem:[#allocation25_spill] sm:$0xff] }
 0x9ce   :  { %v6120_v56 = vsel %vm6109_vm5, nan, %v6119_v52  ;;  %v6680_v13 = vadd.s32 %v14352_v4, %v14350_v36  ;;  %v6487_v39 = vmul.u32 %v6483_v27, %v6481_v5  ;;  %v6490_v58 = vshll.u32 %v6486_v38, 16  ;;  %v2108_v4 = vpop.permute.xlu1 %2107 }
 0x9cf   :  { %7231 = vst.msk [vmem:[%s14704_s3 + $0xc0] sm:$0xff] %vm7206_vm6, %v6120_v56  ;;  %v7328_v45 = vadd.s32 4294967294, %v6692_v16  ;;  %v6488_v51 = vshll.u32 %v6485_v8, 16  ;;  %v6507_v21 = vmul.u32 %v6505_v60, %v6480_v6  ;;  %v6506_v63 = vmul.u32 %v6504_v31, %v6480_v6  ;;  %v15585_v56 = vld [vmem:[#allocation35_spill] sm:$0xff] }
 0x9d0   :  { %v6508_v41 = vmul.u32 %v6504_v31, %v6481_v5  ;;  %v6489_v9 = vshrl.u32 %v6485_v8, 16  ;;  %vm6588_vm4 = vcmp.lt.s32.totalorder %v14209_v32, 0  ;;  %v6509_v36 = vmul.u32 %v6505_v60, %v6481_v5 }
 0x9d1   :  { %vm7329_vm13 = vcmp.lt.s32.totalorder %v7328_v45, 0  ;;  %vm6492_vm2 = vc.u32 %v6484_v12, %v6488_v51  ;;  %v6494_v30 = vadd.s32 %v6488_v51, %v6484_v12  ;;  %v6510_v2 = vshll.u32 %v6507_v21, 16 }
 0x9d2   :  { %v6695_v50 = vsel %vm7329_vm13, 0, %v7328_v45  ;;  %v6493_v49 = vsel %vm6492_vm2, 1, %v15516_v33  ;;  %v6512_v61 = vshll.u32 %v6508_v41, 16  ;;  %v2173_v20 = vsel %vm2141_vm15, %v15584_v34, %v2108_v4 }
 0x9d3   :  { %v6696_v1 = vsub.s32 32, %v6695_v50  ;;  %v6700_v10 = vsub.s32 4294967266, %v6695_v50  ;;  %v6495_v43 = vadd.s32 %v6493_v49, %v6487_v39  ;;  %v6697_v17 = vshll.u32 %v6688_v18, %v6695_v50 }
 0x9d4   :  { %vm6496_vm9 = vc.u32 %v6494_v30, %v6490_v58  ;;  %vm6514_vm7 = vc.u32 %v6506_v63, %v6510_v2  ;;  %v6516_v14 = vadd.s32 %v6510_v2, %v6506_v63  ;;  %v6468_v18 = vsel %vm6466_vm8, %v14377_v3, 2102212464 }
 0x9d5   :  { %v6698_v28 = vshrl.u32 %v6680_v13, %v6696_v1  ;;  %v6701_v23 = vadd.s32 127, %v6700_v10  ;;  %v6497_v24 = vsel %vm6496_vm9, 1, %v15516_v33  ;;  %v6515_v40 = vsel %vm6514_vm7, 1, %v15516_v33 }
 0x9d6   :  { %v6499_v42 = vadd.s32 %v6497_v24, %v6495_v43  ;;  %v6517_v37 = vadd.s32 %v6515_v40, %v6509_v36  ;;  %v6710_v5 = vsub.s32 4, %v14381_v22  ;;  %vm6518_vm5 = vc.u32 %v6516_v14, %v6512_v61 }
 0x9d7   :  { %v6699_v6 = vor.u32 %v6698_v28, %v6697_v17  ;;  %v6702_v48 = vshll.u32 %v6701_v23, 23  ;;  %v2209_v52 = vmul.f32 %v14199_v35, %v2173_v20  ;;  %v6491_v31 = vshrl.u32 %v6486_v38, 16 }
 0x9d8   :  { %v6500_v27 = vadd.s32 %v6499_v42, %v6489_v9  ;;  %v6519_v60 = vsel %vm6518_vm5, 1, %v15516_v33  ;;  %v2172_v16 = vsel %vm2141_vm15, %v15585_v56, %v2106_v55  ;;  %v6467_v3 = vsel %vm6463_vm10, %v6447_v54, %v14367_v11 }
 0x9d9   :  { %v6703_v62 = vor.u32 4788187, %v6702_v48  ;;  %v6511_v8 = vshrl.u32 %v6507_v21, 16  ;;  %v6521_v45 = vadd.s32 %v6519_v60, %v6517_v37  ;;  %v14445_v12 = vadd.f32 %v14206_v15, %v2209_v52 }
 0x9da   :  { %v6706_v13 = vcvt.s32.f32 %v6699_v6  ;;  %v6469_v38 = vsel %vm6465_vm12, %v14375_v26, %v6468_v18  ;;  %v6501_v39 = vadd.s32 %v6500_v27, %v6491_v31  ;;  %v6513_v58 = vshrl.u32 %v6508_v41, 16 }
 0x9db   :  { %v6704_v51 = vand.u32 2147483647, %v6703_v62  ;;  %v6522_v30 = vadd.s32 %v6521_v45, %v6511_v8  ;;  %v7051_v63 = vand.u32 2147483647, %v14445_v12  ;;  %v2208_v50 = vmul.f32 %v14199_v35, %v2172_v16 }
 0x9dc   :  { %v6711_v11 = vsel %vm6588_vm4, %v6710_v5, %v14381_v22  ;;  %v6520_v54 = vadd.s32 %v6516_v14, %v6512_v61  ;;  %v7054_v21 = vand.u32 2139095040, %v14445_v12  ;;  %v6470_v2 = vsel %vm6464_vm3, %v6467_v3, %v6469_v38 }
 0x9dd   :  { %v6707_v49 = vmul.f32 %v6706_v13, %v6704_v51  ;;  %v6523_v1 = vadd.s32 %v6522_v30, %v6513_v58  ;;  %vm6587_vm15 = vcmp.le.f32.partialorder %v6586_v44, 0.7853982  ;;  %v7058_v9 = vand.u32 8388607, %v7051_v63 }
 0x9de   :  { %vm6526_vm8 = vc.u32 %v6501_v39, %v6520_v54  ;;  %v7055_v41 = vshrl.u32 %v7054_v21, 23  ;;  %v6713_v10 = vsel %vm6587_vm15, 0, %v6711_v11  ;;  %v14463_v22 = vadd.f32 %v14206_v15, %v2208_v50 }
 0x9df   :  { %v6708_v26 = vxor.u32 2147483648, %v6707_v49  ;;  %v6527_v35 = vadd.s32 1, %v6523_v1  ;;  %v6524_v7 = vmul.u32 %v14385_v25, %v6470_v2  ;;  %v6730_v28 = vadd.s32 3, %v6713_v10 }
 0x9e0   :  { %v7336_v17 = vadd.s32 4294967169, %v7055_v41  ;;  %v7059_v40 = vor.u32 8388608, %v7058_v9  ;;  %v6899_v42 = vand.u32 2139095040, %v14463_v22  ;;  %v6896_v20 = vand.u32 2147483647, %v14463_v22 }
 0x9e1   :  { %v6709_v43 = vsel %vm6588_vm4, %v6708_v26, %v6707_v49  ;;  %v6528_v44 = vsel %vm6526_vm8, %v6527_v35, %v6523_v1  ;;  %v14470_v48 = vand.u32 3, %v6730_v28  ;;  %vm14477_vm12 = vcmp.le.f32.partialorder %v6431_v19, 0.7853982 }
 0x9e2   :  { %v6712_v36 = vsel %vm6587_vm15, %v14209_v32, %v6709_v43  ;;  %v6529_v23 = vadd.s32 %v6528_v44, %v6524_v7  ;;  %v7061_v24 = vadd.s32 1, %v7336_v17  ;;  %v14472_v34 = vshll.u32 %v7059_v40, 8 }
 0x9e3   :  { %v6714_v4 = vmul.f32 %v6712_v36, %v6712_v36  ;;  %v6900_v5 = vshrl.u32 %v6899_v42, 23  ;;  %vm6433_vm11 = vcmp.lt.s32.totalorder %v14230_v57, 0  ;;  %vm6736_vm0 = vcmp.eq.s32.totalorder %v14470_v48, 2 }
 0x9e4   :  { %v6530_v15 = vadd.s32 536870912, %v6529_v23  ;;  %vm7062_vm10 = vcmp.gt.s32.totalorder %v7061_v24, 0  ;;  %v6525_v8 = vadd.s32 %v6520_v54, %v6501_v39  ;;  %vm6733_vm3 = vcmp.eq.s32.totalorder %v14470_v48, 0 }
 0x9e5   :  { %v6715_v61 = vmul.f32 -0.001358992, %v6714_v4  ;;  %v6722_v14 = vmul.f32 -0.00019511016, %v6714_v4  ;;  %v7063_v37 = vsel %vm7062_vm10, %v7061_v24, 0  ;;  %v14487_v51 = vand.u32 65535, %v14472_v34 }
 0x9e6   :  { %v6531_v25 = vshrl.u32 %v6530_v15, 30  ;;  %v7065_v18 = vand.u32 31, %v7063_v37  ;;  %v14490_v19 = vshrl.u32 %v14472_v34, 16  ;;  %v14492_v13 = vadd.s32 4294967169, %v6900_v5 }
 0x9e7   :  { %v6716_v55 = vadd.f32 0.041655596, %v6715_v61  ;;  %v6723_v6 = vadd.f32 0.008332121, %v6722_v14  ;;  %v14496_v38 = vand.u32 8388607, %v6896_v20  ;;  %vm6729_vm13 = vweird.f32 %v14209_v32 }
 0x9e8   :  { %v6532_v62 = vshll.u32 %v6531_v25, 30  ;;  %v6555_v60 = vsub.s32 4, %v6531_v25  ;;  %v14482_v56 = vsub.s32 32, %v7065_v18  ;;  %vm6732_vm1 = vcmp.lt.s32.totalorder %v14470_v48, 2 }
 0x9e9   :  { %v6717_v27 = vmul.f32 %v6716_v55, %v6714_v4  ;;  %v6724_v52 = vmul.f32 %v6723_v6, %v6714_v4  ;;  %v14502_v49 = vshrl.u32 %v7063_v37, 5  ;;  %v7068_v11 = vshll.u32 %v15517_v46, %v7065_v18 }
 0x9ea   :  { %v6533_v45 = vsub.s32 %v6529_v23, %v6532_v62  ;;  %v6556_v50 = vsel %vm6433_vm11, %v6555_v60, %v6531_v25  ;;  %v7069_v54 = vshrl.u32 %v15511_v59, %v14482_v56  ;;  %v7072_v26 = vshrl.u32 %v15512_v53, %v14482_v56 }
 0x9eb   :  { %v6718_v16 = vadd.f32 -0.4999988, %v6717_v27  ;;  %v6725_v3 = vadd.f32 -0.16666654, %v6724_v52  ;;  %v7071_v10 = vshll.u32 %v15511_v59, %v7065_v18  ;;  %v7075_v35 = vshrl.u32 %v15513_v0, %v14482_v56 }
 0x9ec   :  { %vm6534_vm14 = vcmp.lt.s32.totalorder %v6533_v45, 0  ;;  %v6535_v39 = vsub.s32 0, %v6533_v45  ;;  %v7078_v9 = vshrl.u32 %v15514_v29, %v14482_v56  ;;  %v7077_v17 = vshll.u32 %v15513_v0, %v7065_v18 }
 0x9ed   :  { %v6719_v58 = vmul.f32 %v6718_v16, %v6714_v4  ;;  %v6726_v30 = vmul.f32 %v6725_v3, %v6714_v4  ;;  %v7081_v44 = vshrl.u32 %v15515_v47, %v14482_v56  ;;  %v6558_v28 = vsel %vm14477_vm12, 0, %v6556_v50 }
 0x9ee   :  { %v6536_v1 = vsel %vm6534_vm14, %v6535_v39, %v6533_v45  ;;  %v7074_v23 = vshll.u32 %v15512_v53, %v7065_v18  ;;  %v7080_v24 = vshll.u32 %v15514_v29, %v7065_v18  ;;  %v7070_v42 = vor.u32 %v7069_v54, %v7068_v11 }
 0x9ef   :  { %v6720_v21 = vadd.f32 1.0, %v6719_v58  ;;  %v6727_v2 = vadd.f32 1.0, %v6726_v30  ;;  %v6537_v41 = vclz %v6536_v1  ;;  %v7073_v61 = vor.u32 %v7072_v26, %v7071_v10 }
 0x9f0   :  { %v7079_v14 = vor.u32 %v7078_v9, %v7077_v17  ;;  %v7076_v15 = vor.u32 %v7075_v35, %v7074_v23  ;;  %v7082_v37 = vor.u32 %v7081_v44, %v7080_v24  ;;  %vm7083_vm4 = vcmp.lt.s32.totalorder %v14502_v49, 1 }
 0x9f1   :  { %v6728_v43 = vmul.f32 %v6727_v2, %v6712_v36  ;;  %v6737_v7 = vxor.u32 2147483648, %v6720_v21  ;;  %v7325_v4 = vadd.s32 4294967294, %v6537_v41  ;;  %vm7084_vm9 = vcmp.lt.s32.totalorder %v14502_v49, 2 }
 0x9f2   :  { %vm7086_vm7 = vcmp.lt.s32.totalorder %v14502_v49, 4  ;;  %vm7085_vm5 = vcmp.lt.s32.totalorder %v14502_v49, 3  ;;  %v7091_v52 = vsel %vm7083_vm4, %v7070_v42, %v7073_v61  ;;  %v7095_v30 = vsel %vm7083_vm4, %v7073_v61, %v7076_v15 }
 0x9f3   :  { %v6734_v40 = vxor.u32 2147483648, %v6728_v43  ;;  %v6738_v36 = vsel %vm6736_vm0, %v6737_v7, %v6728_v43  ;;  %vm7326_vm2 = vcmp.lt.s32.totalorder %v7325_v4, 0  ;;  %v7092_v62 = vsel %vm7086_vm7, %v7079_v14, 920167782 }
 0x9f4   :  { %v6540_v6 = vsel %vm7326_vm2, 0, %v7325_v4  ;;  %v7093_v3 = vsel %vm7085_vm5, %v7076_v15, %v7092_v62  ;;  %v7088_v58 = vsel %vm7086_vm7, %v7076_v15, 2102212464  ;;  %v7096_v39 = vsel %vm7086_vm7, %v7082_v37, 1326507024 }
 0x9f5   :  { %v6735_v55 = vsel %vm6733_vm3, %v6720_v21, %v6734_v40  ;;  %v6541_v18 = vsub.s32 32, %v6540_v6  ;;  %v6545_v5 = vsub.s32 4294967266, %v6540_v6  ;;  %v6542_v48 = vshll.u32 %v6533_v45, %v6540_v6 }
 0x9f6   :  { %v6739_v25 = vsel %vm6732_vm1, %v6735_v55, %v6738_v36  ;;  %v7094_v32 = vsel %vm7084_vm9, %v7091_v52, %v7093_v3  ;;  %v7097_v54 = vsel %vm7085_vm5, %v7079_v14, %v7096_v39  ;;  %v6906_v1 = vadd.s32 1, %v14492_v13 }
 0x9f7   :  { %v6740_v27 = vsel %vm6729_vm13, nan, %v6739_v25  ;;  %v6543_v60 = vshrl.u32 %v6525_v8, %v6541_v18  ;;  %v6546_v16 = vadd.s32 127, %v6545_v5  ;;  %v7124_v21 = vand.u32 65535, %v7094_v32 }
 0x9f8   :  { %7235 = vst.msk [vmem:[%s14704_s3 + $0xe0] sm:$0xff] %vm7206_vm6, %v6740_v27  ;;  %v7067_v8 = vshrl.u32 %v15517_v46, %v14482_v56  ;;  %v7098_v45 = vsel %vm7084_vm9, %v7095_v30, %v7097_v54  ;;  %v7125_v2 = vshrl.u32 %v7094_v32, 16  ;;  %v6575_v41 = vadd.s32 3, %v6558_v28 }
 0x9f9   :  { %v6544_v50 = vor.u32 %v6543_v60, %v6542_v48  ;;  %v6547_v11 = vshll.u32 %v6546_v16, 23  ;;  %v7102_v10 = vand.u32 65535, %v7098_v45  ;;  %v7103_v35 = vshrl.u32 %v7098_v45, 16 }
 0x9fa   :  { %v7087_v9 = vsel %vm7083_vm4, %v7067_v8, %v7070_v42  ;;  %v7089_v43 = vsel %vm7085_vm5, %v7073_v61, %v7088_v58  ;;  %v7127_v7 = vmul.u32 %v7125_v2, %v14487_v51  ;;  %v7128_v56 = vmul.u32 %v7124_v21, %v14490_v19 }
 0x9fb   :  { %v6548_v26 = vor.u32 4788187, %v6547_v11  ;;  %v6551_v44 = vcvt.s32.f32 %v6544_v50  ;;  %v7105_v4 = vmul.u32 %v7103_v35, %v14487_v51  ;;  %v7106_v13 = vmul.u32 %v7102_v10, %v14490_v19 }
 0x9fc   :  { %v7126_v28 = vmul.u32 %v7124_v21, %v14487_v51  ;;  %v7129_v23 = vmul.u32 %v7125_v2, %v14490_v19  ;;  %v7130_v24 = vshll.u32 %v7127_v7, 16  ;;  %vm6907_vm15 = vcmp.gt.s32.totalorder %v6906_v1, 0 }
 0x9fd   :  { %v6549_v17 = vand.u32 2147483647, %v6548_v26  ;;  %v7104_v42 = vmul.u32 %v7102_v10, %v14487_v51  ;;  %v7107_v61 = vmul.u32 %v7103_v35, %v14490_v19  ;;  %v7108_v14 = vshll.u32 %v7105_v4, 16 }
 0x9fe   :  { %v7110_v36 = vshll.u32 %v7106_v13, 16  ;;  %v7132_v15 = vshll.u32 %v7128_v56, 16  ;;  %vm7134_vm8 = vc.u32 %v7126_v28, %v7130_v24  ;;  %v7136_v37 = vadd.s32 %v7130_v24, %v7126_v28 }
 0x9ff   :  { %v6552_v40 = vmul.f32 %v6551_v44, %v6549_v17  ;;  %vm7112_vm10 = vc.u32 %v7104_v42, %v7108_v14  ;;  %v7114_v6 = vadd.s32 %v7108_v14, %v7104_v42  ;;  %v7135_v25 = vsel %vm7134_vm8, 1, %v15516_v33 }
 0xa00   :  { %v7113_v18 = vsel %vm7112_vm10, 1, %v15516_v33  ;;  %v7131_v5 = vshrl.u32 %v7127_v7, 16  ;;  %v7137_v27 = vadd.s32 %v7135_v25, %v7129_v23  ;;  %vm7138_vm0 = vc.u32 %v7136_v37, %v7132_v15 }
 0xa01   :  { %v6553_v55 = vxor.u32 2147483648, %v6552_v40  ;;  %v7115_v52 = vadd.s32 %v7113_v18, %v7107_v61  ;;  %vm7116_vm3 = vc.u32 %v7114_v6, %v7110_v36  ;;  %v7139_v19 = vsel %vm7138_vm0, 1, %v15516_v33 }
 0xa02   :  { %v7117_v48 = vsel %vm7116_vm3, 1, %v15516_v33  ;;  %v7141_v60 = vadd.s32 %v7139_v19, %v7137_v27  ;;  %v6908_v16 = vsel %vm6907_vm15, %v6906_v1, 0  ;;  %v7109_v58 = vshrl.u32 %v7105_v4, 16 }
 0xa03   :  { %v6554_v51 = vsel %vm6433_vm11, %v6553_v55, %v6552_v40  ;;  %v7119_v32 = vadd.s32 %v7117_v48, %v7115_v52  ;;  %v6910_v30 = vand.u32 31, %v6908_v16  ;;  %v7090_v39 = vsel %vm7084_vm9, %v7087_v9, %v7089_v43 }
 0xa04   :  { %v6557_v62 = vsel %vm14477_vm12, %v14230_v57, %v6554_v51  ;;  %v7111_v50 = vshrl.u32 %v7106_v13, 16  ;;  %v7133_v11 = vshrl.u32 %v7128_v56, 16  ;;  %v7142_v54 = vadd.s32 %v7141_v60, %v7131_v5 }
 0xa05   :  { %v6559_v3 = vmul.f32 %v6557_v62, %v6557_v62  ;;  %v7120_v45 = vadd.s32 %v7119_v32, %v7109_v58  ;;  %v14576_v31 = vsub.s32 32, %v6910_v30  ;;  %v14578_v2 = vand.u32 3, %v6575_v41 }
 0xa06   :  { %v7143_v26 = vadd.s32 %v7142_v54, %v7133_v11  ;;  %v6904_v1 = vor.u32 8388608, %v14496_v38  ;;  %v14583_v17 = vadd.s32 %v7136_v37, %v7132_v15  ;;  %v7144_v49 = vmul.u32 %v14472_v34, %v7090_v39 }
 0xa07   :  { %v6560_v21 = vmul.f32 -0.001358992, %v6559_v3  ;;  %v6567_v8 = vmul.f32 -0.00019511016, %v6559_v3  ;;  %v14581_v7 = vadd.s32 %v7120_v45, %v7111_v50  ;;  %v14586_v43 = vshrl.u32 %v6908_v16, 5 }
 0xa08   :  { %v7147_v9 = vadd.s32 1, %v7143_v26  ;;  %v6913_v56 = vshll.u32 %v15517_v46, %v6910_v30  ;;  %v6914_v38 = vshrl.u32 %v15511_v59, %v14576_v31  ;;  %v6916_v13 = vshll.u32 %v15511_v59, %v6910_v30 }
 0xa09   :  { %v6561_v10 = vadd.f32 0.041655596, %v6560_v21  ;;  %v6568_v35 = vadd.f32 0.008332121, %v6567_v8  ;;  %vm7146_vm12 = vc.u32 %v14581_v7, %v14583_v17  ;;  %v6917_v28 = vshrl.u32 %v15512_v53, %v14576_v31 }
 0xa0a   :  { %v7148_v41 = vsel %vm7146_vm12, %v7147_v9, %v7143_v26  ;;  %v6920_v34 = vshrl.u32 %v15513_v0, %v14576_v31  ;;  %v6919_v42 = vshll.u32 %v15512_v53, %v6910_v30  ;;  %v6922_v61 = vshll.u32 %v15513_v0, %v6910_v30 }
 0xa0b   :  { %v6562_v44 = vmul.f32 %v6561_v10, %v6559_v3  ;;  %v6569_v4 = vmul.f32 %v6568_v35, %v6559_v3  ;;  %v7149_v40 = vadd.s32 %v7148_v41, %v7144_v49  ;;  %v6923_v14 = vshrl.u32 %v15514_v29, %v14576_v31 }
 0xa0c   :  { %v6925_v36 = vshll.u32 %v15514_v29, %v6910_v30  ;;  %v6926_v59 = vshrl.u32 %v15515_v47, %v14576_v31  ;;  %v14605_v6 = vor.u32 %v6914_v38, %v6913_v56  ;;  %v14607_v25 = vor.u32 %v6917_v28, %v6916_v13 }
 0xa0d   :  { %v6563_v23 = vadd.f32 -0.4999988, %v6562_v44  ;;  %v6570_v24 = vadd.f32 -0.16666654, %v6569_v4  ;;  %v7150_v55 = vadd.s32 536870912, %v7149_v40  ;;  %v14609_v18 = vor.u32 %v6920_v34, %v6919_v42 }
 0xa0e   :  { %v6924_v53 = vor.u32 %v6923_v14, %v6922_v61  ;;  %v6927_v5 = vor.u32 %v6926_v59, %v6925_v36  ;;  %vm6931_vm11 = vcmp.lt.s32.totalorder %v14586_v43, 4  ;;  %vm6577_vm1 = vcmp.lt.s32.totalorder %v14578_v2, 2 }
 0xa0f   :  { %v6564_v15 = vmul.f32 %v6563_v23, %v6559_v3  ;;  %v6571_v37 = vmul.f32 %v6570_v24, %v6559_v3  ;;  %v14611_v51 = vshrl.u32 %v7150_v55, 30  ;;  %vm6928_vm14 = vcmp.lt.s32.totalorder %v14586_v43, 1 }
 0xa10   :  { %v6937_v29 = vsel %vm6931_vm11, %v6924_v53, 920167782  ;;  %vm6930_vm13 = vcmp.lt.s32.totalorder %v14586_v43, 3  ;;  %vm6581_vm2 = vcmp.eq.s32.totalorder %v14578_v2, 2  ;;  %v6936_v48 = vsel %vm6928_vm14, %v14605_v6, %v14607_v25 }
 0xa11   :  { %v6565_v0 = vadd.f32 1.0, %v6564_v15  ;;  %v6572_v27 = vadd.f32 1.0, %v6571_v37  ;;  %v7152_v19 = vshll.u32 %v14611_v51, 30  ;;  %v6938_v60 = vsel %vm6930_vm13, %v14609_v18, %v6937_v29 }
 0xa12   :  { %v6941_v16 = vsel %vm6931_vm11, %v6927_v5, 1326507024  ;;  %v6940_v58 = vsel %vm6928_vm14, %v14607_v25, %v14609_v18  ;;  %v14634_v32 = vshll.u32 %v6904_v1, 8  ;;  %vm6578_vm4 = vcmp.eq.s32.totalorder %v14578_v2, 0 }
 0xa13   :  { %v6573_v47 = vmul.f32 %v6572_v27, %v6557_v62  ;;  %v6582_v52 = vxor.u32 2147483648, %v6565_v0  ;;  %v7153_v3 = vsub.s32 %v7149_v40, %v7152_v19  ;;  %vm6929_vm9 = vcmp.lt.s32.totalorder %v14586_v43, 2 }
 0xa14   :  { %v6942_v39 = vsel %vm6930_vm13, %v6924_v53, %v6941_v16  ;;  %v6939_v54 = vsel %vm6929_vm9, %v6936_v48, %v6938_v60  ;;  %vm6574_vm5 = vweird.f32 %v14230_v57  ;;  %v6945_v1 = vand.u32 65535, %v14634_v32 }
 0xa15   :  { %v6579_v62 = vxor.u32 2147483648, %v6573_v47  ;;  %v6583_v30 = vsel %vm6581_vm2, %v6582_v52, %v6573_v47  ;;  %vm7154_vm7 = vcmp.lt.s32.totalorder %v7153_v3, 0  ;;  %v7155_v11 = vsub.s32 0, %v7153_v3 }
 0xa16   :  { %v6943_v8 = vsel %vm6929_vm9, %v6940_v58, %v6942_v39  ;;  %v6969_v9 = vand.u32 65535, %v6939_v54  ;;  %v6970_v57 = vshrl.u32 %v6939_v54, 16  ;;  %v6946_v2 = vshrl.u32 %v14634_v32, 16 }
 0xa17   :  { %v6580_v50 = vsel %vm6578_vm4, %v6565_v0, %v6579_v62  ;;  %v7156_v26 = vsel %vm7154_vm7, %v7155_v11, %v7153_v3  ;;  %v6947_v10 = vand.u32 65535, %v6943_v8  ;;  %v6948_v49 = vshrl.u32 %v6943_v8, 16 }
 0xa18   :  { %v6584_v21 = vsel %vm6577_vm1, %v6580_v50, %v6583_v30  ;;  %v7157_v35 = vclz %v7156_v26  ;;  %v7145_v4 = vadd.s32 %v14583_v17, %v14581_v7  ;;  %v6972_v41 = vmul.u32 %v6970_v57, %v6945_v1 }
 0xa19   :  { %v6585_v45 = vsel %vm6574_vm5, nan, %v6584_v21  ;;  %v6950_v44 = vmul.u32 %v6948_v49, %v6945_v1  ;;  %v6951_v38 = vmul.u32 %v6947_v10, %v6946_v2  ;;  %v6949_v13 = vmul.u32 %v6947_v10, %v6945_v1 }
 0xa1a   :  { %7234 = vst.msk [vmem:[%s14704_s3 + $0xd8] sm:$0xff] %vm7206_vm6, %v6585_v45  ;;  %v7337_v56 = vadd.s32 4294967294, %v7157_v35  ;;  %v6971_v34 = vmul.u32 %v6969_v9, %v6945_v1  ;;  %v6952_v24 = vmul.u32 %v6948_v49, %v6946_v2  ;;  %v6973_v40 = vmul.u32 %v6969_v9, %v6946_v2 }
 0xa1b   :  { %v6953_v28 = vshll.u32 %v6950_v44, 16  ;;  %v6975_v42 = vshll.u32 %v6972_v41, 16  ;;  %v6974_v36 = vmul.u32 %v6970_v57, %v6946_v2  ;;  %v6955_v15 = vshll.u32 %v6951_v38, 16 }
 0xa1c   :  { %vm7338_vm15 = vcmp.lt.s32.totalorder %v7337_v56, 0  ;;  %v6977_v5 = vshll.u32 %v6973_v40, 16  ;;  %v6933_v48 = vsel %vm6931_vm11, %v14609_v18, 2102212464  ;;  %v6954_v60 = vshrl.u32 %v6950_v44, 16 }
 0xa1d   :  { %v7160_v23 = vsel %vm7338_vm15, 0, %v7337_v56  ;;  %vm6957_vm8 = vc.u32 %v6949_v13, %v6953_v28  ;;  %v6959_v55 = vadd.s32 %v6953_v28, %v6949_v13  ;;  %vm6979_vm10 = vc.u32 %v6971_v34, %v6975_v42 }
 0xa1e   :  { %v7161_v61 = vsub.s32 32, %v7160_v23  ;;  %v7165_v14 = vsub.s32 4294967266, %v7160_v23  ;;  %v7162_v59 = vshll.u32 %v7153_v3, %v7160_v23  ;;  %v6958_v37 = vsel %vm6957_vm8, 1, %v15516_v33 }
 0xa1f   :  { %v6960_v53 = vadd.s32 %v6958_v37, %v6952_v24  ;;  %vm6961_vm0 = vc.u32 %v6959_v55, %v6955_v15  ;;  %v6980_v0 = vsel %vm6979_vm10, 1, %v15516_v33  ;;  %v6981_v27 = vadd.s32 %v6975_v42, %v6971_v34 }
 0xa20   :  { %v7163_v7 = vshrl.u32 %v7145_v4, %v7161_v61  ;;  %v7166_v17 = vadd.s32 127, %v7165_v14  ;;  %v6962_v52 = vsel %vm6961_vm0, 1, %v15516_v33  ;;  %v6982_v19 = vadd.s32 %v6980_v0, %v6974_v36 }
 0xa21   :  { %v6964_v16 = vadd.s32 %v6962_v52, %v6960_v53  ;;  %vm6983_vm3 = vc.u32 %v6981_v27, %v6977_v5  ;;  %v6912_v3 = vshrl.u32 %v15517_v46, %v14576_v31  ;;  %v6956_v30 = vshrl.u32 %v6951_v38, 16 }
 0xa22   :  { %v7164_v29 = vor.u32 %v7163_v7, %v7162_v59  ;;  %v7167_v47 = vshll.u32 %v7166_v17, 23  ;;  %v6984_v58 = vsel %vm6983_vm3, 1, %v15516_v33  ;;  %v6976_v50 = vshrl.u32 %v6972_v41, 16 }
 0xa23   :  { %v6965_v39 = vadd.s32 %v6964_v16, %v6954_v60  ;;  %v6986_v11 = vadd.s32 %v6984_v58, %v6982_v19  ;;  %v6932_v8 = vsel %vm6928_vm14, %v6912_v3, %v14605_v6  ;;  %v6934_v18 = vsel %vm6930_vm13, %v14607_v25, %v6933_v48 }
 0xa24   :  { %v7168_v62 = vor.u32 4788187, %v7167_v47  ;;  %v7171_v21 = vcvt.s32.f32 %v7164_v29  ;;  %v6978_v26 = vshrl.u32 %v6973_v40, 16  ;;  %v6985_v31 = vadd.s32 %v6981_v27, %v6977_v5 }
 0xa25   :  { %v6966_v45 = vadd.s32 %v6965_v39, %v6956_v30  ;;  %v6987_v1 = vadd.s32 %v6986_v11, %v6976_v50  ;;  %v6935_v33 = vsel %vm6929_vm9, %v6932_v8, %v6934_v18  ;;  %vm7053_vm11 = vcmp.lt.s32.totalorder %v14445_v12, 0 }
 0xa26   :  { %v7169_v54 = vand.u32 2147483647, %v7168_v62  ;;  %vm14675_vm1 = vcmp.le.f32.partialorder %v7051_v63, 0.7853982  ;;  %v6989_v9 = vmul.u32 %v14634_v32, %v6935_v33  ;;  %v7175_v57 = vsub.s32 4, %v14611_v51 }
 0xa27   :  { %v6988_v10 = vadd.s32 %v6987_v1, %v6978_v26  ;;  %vm6991_vm12 = vc.u32 %v6966_v45, %v6985_v31  ;;  %vm7194_vm13 = vweird.f32 %v14445_v12  ;;  %v6990_v60 = vadd.s32 %v6985_v31, %v6966_v45 }
 0xa28   :  { %v7172_v46 = vmul.f32 %v7171_v21, %v7169_v54  ;;  %v7176_v63 = vsel %vm7053_vm11, %v7175_v57, %v14611_v51  ;;  %vm6898_vm5 = vcmp.lt.s32.totalorder %v14463_v22, 0  ;;  %vm6897_vm15 = vcmp.le.f32.partialorder %v6896_v20, 0.7853982 }
 0xa29   :  { %v6992_v49 = vadd.s32 1, %v6988_v10  ;;  %v7178_v32 = vsel %vm14675_vm1, 0, %v7176_v63  ;;  %vm7039_vm3 = vweird.f32 %v14463_v22 }
 0xa2a   :  { %v7173_v35 = vxor.u32 2147483648, %v7172_v46  ;;  %v7195_v36 = vadd.s32 3, %v7178_v32 }
 0xa2b   :  { %v6993_v2 = vsel %vm6991_vm12, %v6992_v49, %v6988_v10 }
 0xa2c   :  { %v7174_v25 = vsel %vm7053_vm11, %v7173_v35, %v7172_v46  ;;  %v6994_v44 = vadd.s32 %v6993_v2, %v6989_v9  ;;  %v7196_v17 = vand.u32 3, %v7195_v36 }
 0xa2d   :  { %v7177_v43 = vsel %vm14675_vm1, %v14445_v12, %v7174_v25 }
 0xa2e   :  { %v7179_v56 = vmul.f32 %v7177_v43, %v7177_v43  ;;  %v6995_v41 = vadd.s32 536870912, %v6994_v44  ;;  %vm7198_vm2 = vcmp.eq.s32.totalorder %v7196_v17, 0  ;;  %vm7201_vm4 = vcmp.eq.s32.totalorder %v7196_v17, 2 }
 0xa2f   :  { %vm7197_vm7 = vcmp.lt.s32.totalorder %v7196_v17, 2 }
 0xa30   :  { %v7180_v4 = vmul.f32 -0.001358992, %v7179_v56  ;;  %v7187_v38 = vmul.f32 -0.00019511016, %v7179_v56  ;;  %v6996_v34 = vshrl.u32 %v6995_v41, 30 }
 0xa32   :  { %v7181_v13 = vadd.f32 0.041655596, %v7180_v4  ;;  %v7188_v28 = vadd.f32 0.008332121, %v7187_v38  ;;  %v6997_v40 = vshll.u32 %v6996_v34, 30  ;;  %v7020_v26 = vsub.s32 4, %v6996_v34 }
 0xa34   :  { %v7182_v23 = vmul.f32 %v7181_v13, %v7179_v56  ;;  %v7189_v24 = vmul.f32 %v7188_v28, %v7179_v56  ;;  %v6998_v14 = vsub.s32 %v6994_v44, %v6997_v40  ;;  %v7021_v10 = vsel %vm6898_vm5, %v7020_v26, %v6996_v34 }
 0xa35   :  { %v7023_v6 = vsel %vm6897_vm15, 0, %v7021_v10 }
 0xa36   :  { %v7183_v42 = vadd.f32 -0.4999988, %v7182_v23  ;;  %v7190_v61 = vadd.f32 -0.16666654, %v7189_v24  ;;  %vm6999_vm14 = vcmp.lt.s32.totalorder %v6998_v14, 0  ;;  %v7000_v37 = vsub.s32 0, %v6998_v14 }
 0xa37   :  { %v7040_v2 = vadd.s32 3, %v7023_v6 }
 0xa38   :  { %v7184_v59 = vmul.f32 %v7183_v42, %v7179_v56  ;;  %v7191_v15 = vmul.f32 %v7190_v61, %v7179_v56  ;;  %v7001_v51 = vsel %vm6999_vm14, %v7000_v37, %v6998_v14 }
 0xa39   :  { %v7002_v53 = vclz %v7001_v51  ;;  %v7041_v38 = vand.u32 3, %v7040_v2 }
 0xa3a   :  { %v7185_v55 = vadd.f32 1.0, %v7184_v59  ;;  %v7192_v7 = vadd.f32 1.0, %v7191_v15 }
 0xa3b   :  { %v7334_v27 = vadd.s32 4294967294, %v7002_v53  ;;  %vm7043_vm8 = vcmp.eq.s32.totalorder %v7041_v38, 0  ;;  %vm7046_vm10 = vcmp.eq.s32.totalorder %v7041_v38, 2  ;;  %vm7042_vm0 = vcmp.lt.s32.totalorder %v7041_v38, 2 }
 0xa3c   :  { %v7193_v5 = vmul.f32 %v7192_v7, %v7177_v43  ;;  %v7202_v0 = vxor.u32 2147483648, %v7185_v55 }
 0xa3d   :  { %vm7335_vm9 = vcmp.lt.s32.totalorder %v7334_v27, 0 }
 0xa3e   :  { %v7199_v29 = vxor.u32 2147483648, %v7193_v5  ;;  %v7203_v52 = vsel %vm7201_vm4, %v7202_v0, %v7193_v5  ;;  %v7005_v19 = vsel %vm7335_vm9, 0, %v7334_v27 }
 0xa3f   :  { %v7006_v16 = vsub.s32 32, %v7005_v19  ;;  %v7010_v62 = vsub.s32 4294967266, %v7005_v19  ;;  %v7007_v58 = vshll.u32 %v6998_v14, %v7005_v19 }
 0xa40   :  { %v7200_v47 = vsel %vm7198_vm2, %v7185_v55, %v7199_v29 }
 0xa41   :  { %v7204_v48 = vsel %vm7197_vm7, %v7200_v47, %v7203_v52  ;;  %v7008_v30 = vshrl.u32 %v6990_v60, %v7006_v16  ;;  %v7011_v12 = vadd.s32 127, %v7010_v62 }
 0xa42   :  { %v7205_v3 = vsel %vm7194_vm13, nan, %v7204_v48 }
 0xa43   :  { %7238 = vst.msk [vmem:[%s14704_s3 + $0xf8] sm:$0xff] %vm7206_vm6, %v7205_v3  ;;  %v7009_v39 = vor.u32 %v7008_v30, %v7007_v58  ;;  %v7012_v50 = vshll.u32 %v7011_v12, 23 }
 0xa45   :  { %v7013_v11 = vor.u32 4788187, %v7012_v50  ;;  %v7016_v21 = vcvt.s32.f32 %v7009_v39 }
 0xa47   :  { %v7014_v54 = vand.u32 2147483647, %v7013_v11 }
 0xa49   :  { %v7017_v8 = vmul.f32 %v7016_v21, %v7014_v54 }
 0xa4b   :  { %v7018_v18 = vxor.u32 2147483648, %v7017_v8 }
 0xa4d   :  { %v7019_v45 = vsel %vm6898_vm5, %v7018_v18, %v7017_v8 }
 0xa4e   :  { %v7022_v1 = vsel %vm6897_vm15, %v14463_v22, %v7019_v45 }
 0xa4f   :  { %v7024_v46 = vmul.f32 %v7022_v1, %v7022_v1 }
 0xa51   :  { %v7025_v31 = vmul.f32 -0.001358992, %v7024_v46  ;;  %v7032_v33 = vmul.f32 -0.00019511016, %v7024_v46 }
 0xa53   :  { %v7026_v35 = vadd.f32 0.041655596, %v7025_v31  ;;  %v7033_v49 = vadd.f32 0.008332121, %v7032_v33 }
 0xa55   :  { %v7027_v25 = vmul.f32 %v7026_v35, %v7024_v46  ;;  %v7034_v9 = vmul.f32 %v7033_v49, %v7024_v46 }
 0xa57   :  { %v7028_v57 = vadd.f32 -0.4999988, %v7027_v25  ;;  %v7035_v43 = vadd.f32 -0.16666654, %v7034_v9 }
 0xa59   :  { %v7029_v56 = vmul.f32 %v7028_v57, %v7024_v46  ;;  %v7036_v44 = vmul.f32 %v7035_v43, %v7024_v46 }
 0xa5b   :  { %v7030_v4 = vadd.f32 1.0, %v7029_v56  ;;  %v7037_v20 = vadd.f32 1.0, %v7036_v44 }
 0xa5d   :  { %v7038_v41 = vmul.f32 %v7037_v20, %v7022_v1  ;;  %v7047_v63 = vxor.u32 2147483648, %v7030_v4 }
 0xa5f   :  { %v7044_v13 = vxor.u32 2147483648, %v7038_v41  ;;  %v7048_v34 = vsel %vm7046_vm10, %v7047_v63, %v7038_v41 }
 0xa61   :  { %v7045_v28 = vsel %vm7043_vm8, %v7030_v4, %v7044_v13 }
 0xa62   :  { %v7049_v32 = vsel %vm7042_vm0, %v7045_v28, %v7048_v34 }
 0xa63   :  { %v7050_v23 = vsel %vm7039_vm3, nan, %v7049_v32 }
 0xa64   :  { %7237 = vst.msk [vmem:[%s14704_s3 + $0xf0] sm:$0xff] %vm7206_vm6, %v7050_v23 }

</bundles_post_ra>
